<compile_context>
chip_gen: v7x
topology: tpu7x:2x2x1
jax: 0.10.0
libtpu: 0.0.40
codegen_flags: <defaults>
</compile_context>

<pallas_src>
import functools

import jax
import jax.numpy as jnp
from jax.experimental import pallas as pl
from jax.experimental.pallas import tpu as pltpu


# ------------------------------ stage 1 kernel ------------------------------

def _stage1_kernel(p1_ref, w1_ref, b1_ref, w2_ref, z2_ref, stats_ref,
                   *, bt, b_valid):
    # p1_ref    : (2, 2, 7, 7, bt, P)  conv1 im2col patches, phase-split rows
    # w1_ref    : (P, 64)              conv1 weight (kh, kw, cin) x cout
    # b1_ref    : (1, 64)              conv1 bias
    # w2_ref    : (16, 64, 128)        conv2 weight [ki*4+kj, cin, cout]
    # z2_ref    : (49, bt, 128)        pre-BN conv2 output (h*w, b, c)
    # stats_ref : (1, 2, 128)          per-tile [sum, sum_sq] over valid rows
    P = p1_ref.shape[-1]

    # conv1 + LeakyReLU(0.2) for all 14x14 output positions of this tile.
    p1 = p1_ref[...].reshape(196 * bt, P)
    y1 = jnp.dot(p1, w1_ref[...], preferred_element_type=jnp.float32)
    y1 = y1 + b1_ref[...]
    y1 = jnp.where(y1 > 0, y1, 0.2 * y1)
    y1 = y1.reshape(2, 2, 7, 7, bt, 64)          # (ph, pw, oh, ow, b, c)

    # Zero-padded stride-2 phase planes of y1, kept entirely in VMEM.
    zrow = jnp.zeros((1, 7, bt, 64), jnp.float32)
    zcol = jnp.zeros((8, 1, bt, 64), jnp.float32)
    planes = {}
    for ph in range(2):
        for pw in range(2):
            pv = y1[ph, pw]                                       # (7,7,bt,64)
            pv = (jnp.concatenate([zrow, pv], axis=0) if ph == 1
                  else jnp.concatenate([pv, zrow], axis=0))       # (8,7,bt,64)
            pv = (jnp.concatenate([zcol, pv], axis=1) if pw == 1
                  else jnp.concatenate([pv, zcol], axis=1))       # (8,8,bt,64)
            planes[(ph, pw)] = pv

    # conv2 (k=4, s=2, p=1) as 16 accumulated matmuls; bias b2 dropped
    # (exactly cancelled by the BatchNorm mean subtraction).
    acc = None
    for ki in range(4):
        ph, ro = (ki + 1) % 2, ki // 2
        for kj in range(4):
            pw, co = (kj + 1) % 2, kj // 2
            tap = planes[(ph, pw)][ro:ro + 7, co:co + 7]          # (7,7,bt,64)
            part = jnp.dot(tap.reshape(49 * bt, 64), w2_ref[ki * 4 + kj],
                           preferred_element_type=jnp.float32)
            acc = part if acc is None else acc + part             # (49*bt,128)

    # Per-tile BatchNorm partial statistics; mask rows of padded samples.
    row_b = jax.lax.broadcasted_iota(jnp.int32, (49 * bt, 1), 0) % bt
    valid = (pl.program_id(0) * bt + row_b) < b_valid
    accm = jnp.where(valid, acc, 0.0)
    stats_ref[0, 0:1, :] = jnp.sum(accm, axis=0, keepdims=True)
    stats_ref[0, 1:2, :] = jnp.sum(accm * accm, axis=0, keepdims=True)

    z2_ref[...] = acc.reshape(49, bt, 128)


# ------------------------------ stage 2 kernel ------------------------------

def _stage2_kernel(z2_ref, scale_ref, shift_ref, wfc_ref, bfc_ref, out_ref):
    # z2_ref    : (49, bt, 128)   pre-BN conv2 output
    # scale_ref : (1, 1, 128)     fused BN scale  (gamma * rsqrt(var+eps))
    # shift_ref : (1, 1, 128)     fused BN shift  (beta - mean * scale)
    # wfc_ref   : (49, 1, 128)    fc weight re-ordered to (h*w, 1, c)
    # bfc_ref   : (1, 1)
    # out_ref   : (bt, 1)
    y = z2_ref[...] * scale_ref[...] + shift_ref[...]
    y = jnp.where(y > 0, y, 0.2 * y)
    contrib = jnp.sum(y * wfc_ref[...], axis=0)              # (bt, 128)
    out_ref[...] = jnp.sum(contrib, axis=1, keepdims=True) + bfc_ref[...]


# ----------------------------- pallas_call glue -----------------------------

def _stage1(p1, w1m, b1, w2m, *, bt, b_valid):
    _, _, _, _, bp, P = p1.shape
    nbt = bp // bt
    kern = functools.partial(_stage1_kernel, bt=bt, b_valid=b_valid)
    return pl.pallas_call(
        kern,
        grid=(nbt,),
        in_specs=[
            pl.BlockSpec((2, 2, 7, 7, bt, P), lambda i: (0, 0, 0, 0, i, 0)),
            pl.BlockSpec((P, 64), lambda i: (0, 0)),
            pl.BlockSpec((1, 64), lambda i: (0, 0)),
            pl.BlockSpec((16, 64, 128), lambda i: (0, 0, 0)),
        ],
        out_specs=(
            pl.BlockSpec((49, bt, 128), lambda i: (0, i, 0)),
            pl.BlockSpec((1, 2, 128), lambda i: (i, 0, 0)),
        ),
        out_shape=(
            jax.ShapeDtypeStruct((49, bp, 128), jnp.float32),
            jax.ShapeDtypeStruct((nbt, 2, 128), jnp.float32),
        ),
        compiler_params=pltpu.CompilerParams(
            dimension_semantics=("parallel",)),
    )(p1, w1m, b1, w2m)


def _stage2(z2, scale, shift, wfc_hwc, bfc, *, bt):
    _, bp, _ = z2.shape
    nbt = bp // bt
    return pl.pallas_call(
        _stage2_kernel,
        grid=(nbt,),
        in_specs=[
            pl.BlockSpec((49, bt, 128), lambda i: (0, i, 0)),
            pl.BlockSpec((1, 1, 128), lambda i: (0, 0, 0)),
            pl.BlockSpec((1, 1, 128), lambda i: (0, 0, 0)),
            pl.BlockSpec((49, 1, 128), lambda i: (0, 0, 0)),
            pl.BlockSpec((1, 1), lambda i: (0, 0)),
        ],
        out_specs=pl.BlockSpec((bt, 1), lambda i: (i, 0)),
        out_shape=jax.ShapeDtypeStruct((bp, 1), jnp.float32),
        compiler_params=pltpu.CompilerParams(
            dimension_semantics=("parallel",)),
    )(z2, scale, shift, wfc_hwc, bfc)


# ------------------------------- host helpers -------------------------------

def _conv1_patches_phase_split(x_nhwc, k, stride, pad):
    """im2col for conv1 with rows ordered (row%2, col%2, oh, ow, batch).

    Phase-splitting the 14x14 conv1 output grid lets the fused kernel build
    all 16 stride-2 conv2 taps with unit-stride slices only.
    """
    B, H, W, C = x_nhwc.shape
    xp = jnp.pad(x_nhwc, ((0, 0), (pad, pad), (pad, pad), (0, 0)))
    Ho = (H + 2 * pad - k) // stride + 1                    # 14
    Wo = (W + 2 * pad - k) // stride + 1                    # 14
    taps = []
    for i in range(k):
        for j in range(k):
            taps.append(
                xp[:, i:i + stride * Ho:stride, j:j + stride * Wo:stride, :])
    p = jnp.stack(taps, axis=3)                             # (B,14,14,k*k,C)
    p = p.reshape(B, Ho, Wo, k * k * C)
    p = p.reshape(B, Ho // 2, 2, Wo // 2, 2, k * k * C)
    p = jnp.transpose(p, (2, 4, 1, 3, 0, 5))                # (2,2,7,7,B,P)
    return p


def init_params(key, channel_size=1):
    ks = jax.random.split(key, 6)
    return {
        "w1": jax.random.normal(ks[0], (64, channel_size, 4, 4), jnp.float32) * 0.05,
        "b1": jax.random.normal(ks[1], (64,), jnp.float32) * 0.05,
        "w2": jax.random.normal(ks[2], (128, 64, 4, 4), jnp.float32) * 0.05,
        "b2": jax.random.normal(ks[3], (128,), jnp.float32) * 0.05,
        "gamma": jnp.ones((128,), jnp.float32),
        "beta": jnp.zeros((128,), jnp.float32),
        "wfc": jax.random.normal(ks[4], (1, 128 * 7 * 7), jnp.float32) * 0.02,
        "bfc": jax.random.normal(ks[5], (1,), jnp.float32) * 0.02,
    }


def pack_params(params):
    """One-time weight re-layouts, done outside the per-forward hot path."""
    w1 = params["w1"]                                       # (64, C, 4, 4)
    C = w1.shape[1]
    w1m = jnp.transpose(w1, (2, 3, 1, 0)).reshape(16 * C, 64)
    w2m = jnp.transpose(params["w2"], (2, 3, 1, 0)).reshape(16, 64, 128)
    # fc weight: PyTorch flatten order is (c, h, w); re-order rows to (h*w, c)
    # so stage 2 consumes the NHWC activations without any transpose.
    wfc_hwc = jnp.transpose(params["wfc"].reshape(128, 7, 7),
                            (1, 2, 0)).reshape(49, 1, 128)
    return {
        "w1m": w1m,
        "b1": params["b1"].reshape(1, 64),
        # conv2 bias b2 is intentionally dropped: BN mean-subtraction
        # cancels a per-channel constant exactly.
        "w2m": w2m,
        "gamma": params["gamma"],
        "beta": params["beta"],
        "wfc_hwc": wfc_hwc,
        "bfc": params["bfc"].reshape(1, 1),
    }


@jax.jit
def critic_forward(packed, x_nchw):
    """Forward pass of the Critic.  x_nchw: (B, C, 28, 28) float32 -> (B, 1)."""
    B = x_nchw.shape[0]
    BT = 8                                                  # batch tile (rows)
    Bp = -(-B // BT) * BT                                   # pad to tile size

    x = jnp.transpose(x_nchw, (0, 2, 3, 1))                 # NHWC
    if Bp != B:
        x = jnp.pad(x, ((0, Bp - B), (0, 0), (0, 0), (0, 0)))

    # conv1 im2col (small: B*196*16C floats), phase-split row order.
    p1 = _conv1_patches_phase_split(x, 4, 2, 1)             # (2,2,7,7,Bp,16C)

    # Stage 1: conv1+LReLU -> in-VMEM im2col -> conv2 matmul + BN partials.
    z2, stats = _stage1(p1, packed["w1m"], packed["b1"], packed["w2m"],
                        bt=BT, b_valid=B)

    # Tiny host-side reduction: fold batch statistics and gamma/beta into a
    # per-channel scale/shift (BatchNorm2d training-mode biased statistics).
    tot = jnp.sum(stats, axis=0)                            # (2, 128)
    cnt = jnp.float32(B * 49)
    mean = tot[0] / cnt
    var = tot[1] / cnt - mean * mean
    inv = jax.lax.rsqrt(var + 1e-5)
    scale = (packed["gamma"] * inv).reshape(1, 1, 128)
    shift = (packed["beta"] - mean * packed["gamma"] * inv).reshape(1, 1, 128)

    # Stage 2: BN + LeakyReLU + Linear(6272 -> 1) epilogue.
    out = _stage2(z2, scale, shift, packed["wfc_hwc"], packed["bfc"], bt=BT)
    return out[:B]


def reference_forward(params, x_nchw):
    """Pure-JAX reference (mirrors the PyTorch module) for verification."""
    dn = ("NCHW", "OIHW", "NCHW")
    hp = jax.lax.Precision.HIGHEST
    y = jax.lax.conv_general_dilated(
        x_nchw, params["w1"], (2, 2), ((1, 1), (1, 1)),
        dimension_numbers=dn, precision=hp) + params["b1"][None, :, None, None]
    y = jnp.where(y > 0, y, 0.2 * y)
    y = jax.lax.conv_general_dilated(
        y, params["w2"], (2, 2), ((1, 1), (1, 1)),
        dimension_numbers=dn, precision=hp) + params["b2"][None, :, None, None]
    mean = jnp.mean(y, axis=(0, 2, 3), keepdims=True)
    var = jnp.mean((y - mean) ** 2, axis=(0, 2, 3), keepdims=True)
    y = (y - mean) * jax.lax.rsqrt(var + 1e-5)
    y = y * params["gamma"][None, :, None, None] + params["beta"][None, :, None, None]
    y = jnp.where(y > 0, y, 0.2 * y)
    y = y.reshape(y.shape[0], -1)
    return jnp.dot(y, params["wfc"].T, precision=hp) + params["bfc"][None, :]


if __name__ == "__main__":
    key = jax.random.PRNGKey(0)
    k_param, k_x = jax.random.split(key)

    channel_size = 1
    params = init_params(k_param, channel_size)
    packed = pack_params(params)

    # MNIST-sized input is required by the fc layer (128 * 7 * 7).
    x = jax.random.normal(k_x, (2, channel_size, 28, 28), jnp.float32)

    out = jax.block_until_ready(critic_forward(packed, x))
    assert out.shape == (2, 1), out.shape

    ref = jax.block_until_ready(reference_forward(params, x))
    assert jnp.allclose(out, ref, atol=5e-3, rtol=5e-3), (out, ref)

    print("KERNEL_OK")
</pallas_src>

<mosaic_0001>
module attributes {stable_mosaic.version = 11 : i64} {
  func.func @_stage2_kernel(%arg0: i32, %arg1: memref<49x8x128xf32, #tpu.memory_space<vmem>>, %arg2: memref<1x1x128xf32, #tpu.memory_space<vmem>>, %arg3: memref<1x1x128xf32, #tpu.memory_space<vmem>>, %arg4: memref<49x1x128xf32, #tpu.memory_space<vmem>>, %arg5: memref<1x1xf32, #tpu.memory_space<vmem>>, %arg6: memref<8x1xf32, #tpu.memory_space<vmem>>) attributes {dimension_semantics = [#tpu.dimension_semantics<parallel>], iteration_bounds = array<i64: 1>, scalar_prefetch = 0 : i64, scratch_operands = 0 : i64, tpu.core_type = #tpu.core_type<tc>, window_params = [{transform_indices = @transform_0, window_bounds = array<i64: 49, 8, 128>}, {pipeline_mode = #tpu.pipeline_mode<synchronous>, transform_indices = @transform_1, window_bounds = array<i64: 1, 1, 128>}, {pipeline_mode = #tpu.pipeline_mode<synchronous>, transform_indices = @transform_2, window_bounds = array<i64: 1, 1, 128>}, {pipeline_mode = #tpu.pipeline_mode<synchronous>, transform_indices = @transform_3, window_bounds = array<i64: 49, 1, 128>}, {pipeline_mode = #tpu.pipeline_mode<synchronous>, transform_indices = @transform_4, window_bounds = array<i64: 1, 1>}, {transform_indices = @transform_5, window_bounds = array<i64: 8, 1>}]} {
    %c0 = arith.constant 0 : index
    %c0_0 = arith.constant 0 : index
    %c0_1 = arith.constant 0 : index
    %0 = vector.load %arg1[%c0, %c0_0, %c0_1] : memref<49x8x128xf32, #tpu.memory_space<vmem>>, vector<49x8x128xf32>
    %c0_2 = arith.constant 0 : index
    %c0_3 = arith.constant 0 : index
    %c0_4 = arith.constant 0 : index
    %1 = vector.load %arg2[%c0_2, %c0_3, %c0_4] : memref<1x1x128xf32, #tpu.memory_space<vmem>>, vector<1x1x128xf32>
    %2 = vector.broadcast %1 : vector<1x1x128xf32> to vector<49x8x128xf32>
    %3 = arith.mulf %0, %2 : vector<49x8x128xf32>
    %c0_5 = arith.constant 0 : index
    %c0_6 = arith.constant 0 : index
    %c0_7 = arith.constant 0 : index
    %4 = vector.load %arg3[%c0_5, %c0_6, %c0_7] : memref<1x1x128xf32, #tpu.memory_space<vmem>>, vector<1x1x128xf32>
    %5 = vector.broadcast %4 : vector<1x1x128xf32> to vector<49x8x128xf32>
    %6 = arith.addf %3, %5 : vector<49x8x128xf32>
    %cst = arith.constant 0.000000e+00 : f32
    %7 = vector.broadcast %cst : f32 to vector<49x8x128xf32>
    %8 = arith.cmpf ogt, %6, %7 : vector<49x8x128xf32>
    %cst_8 = arith.constant 2.000000e-01 : f32
    %9 = vector.broadcast %cst_8 : f32 to vector<49x8x128xf32>
    %10 = arith.mulf %9, %6 : vector<49x8x128xf32>
    %11 = arith.select %8, %6, %10 : vector<49x8x128xi1>, vector<49x8x128xf32>
    %c0_9 = arith.constant 0 : index
    %c0_10 = arith.constant 0 : index
    %c0_11 = arith.constant 0 : index
    %12 = vector.load %arg4[%c0_9, %c0_10, %c0_11] : memref<49x1x128xf32, #tpu.memory_space<vmem>>, vector<49x1x128xf32>
    %13 = vector.broadcast %12 : vector<49x1x128xf32> to vector<49x8x128xf32>
    %14 = arith.mulf %11, %13 : vector<49x8x128xf32>
    %cst_12 = arith.constant dense<0.000000e+00> : vector<8x128xf32>
    %15 = vector.multi_reduction <add>, %14, %cst_12 [0] : vector<49x8x128xf32> to vector<8x128xf32>
    %cst_13 = arith.constant dense<0.000000e+00> : vector<8xf32>
    %16 = vector.multi_reduction <add>, %15, %cst_13 [1] : vector<8x128xf32> to vector<8xf32>
    %17 = vector.shape_cast %16 : vector<8xf32> to vector<8x1xf32>
    %c0_14 = arith.constant 0 : index
    %c0_15 = arith.constant 0 : index
    %18 = vector.load %arg5[%c0_14, %c0_15] : memref<1x1xf32, #tpu.memory_space<vmem>>, vector<1x1xf32>
    %19 = vector.broadcast %18 : vector<1x1xf32> to vector<8x1xf32>
    %20 = arith.addf %17, %19 : vector<8x1xf32>
    %c0_16 = arith.constant 0 : index
    %c0_17 = arith.constant 0 : index
    %21 = vector.load %arg6[%c0_16, %c0_17] : memref<8x1xf32, #tpu.memory_space<vmem>>, vector<8x1xf32>
    tpu.vector_store %arg6[%c0_16, %c0_17], %20 {strides = array<i32>} : memref<8x1xf32, #tpu.memory_space<vmem>>, vector<8x1xf32>,
    return
  }
  func.func @transform_0(%arg0: i32) -> (i32, i32, i32) {
    %c0_i32 = arith.constant 0 : i32
    %c0_i32_0 = arith.constant 0 : i32
    %c0_i32_1 = arith.constant 0 : i32
    return %c0_i32, %arg0, %c0_i32_0 : i32, i32, i32
  }
  func.func @transform_1(%arg0: i32) -> (i32, i32, i32) {
    %c0_i32 = arith.constant 0 : i32
    %c0_i32_0 = arith.constant 0 : i32
    %c0_i32_1 = arith.constant 0 : i32
    %c0_i32_2 = arith.constant 0 : i32
    return %c0_i32, %c0_i32_0, %c0_i32_1 : i32, i32, i32
  }
  func.func @transform_2(%arg0: i32) -> (i32, i32, i32) {
    %c0_i32 = arith.constant 0 : i32
    %c0_i32_0 = arith.constant 0 : i32
    %c0_i32_1 = arith.constant 0 : i32
    %c0_i32_2 = arith.constant 0 : i32
    return %c0_i32, %c0_i32_0, %c0_i32_1 : i32, i32, i32
  }
  func.func @transform_3(%arg0: i32) -> (i32, i32, i32) {
    %c0_i32 = arith.constant 0 : i32
    %c0_i32_0 = arith.constant 0 : i32
    %c0_i32_1 = arith.constant 0 : i32
    %c0_i32_2 = arith.constant 0 : i32
    return %c0_i32, %c0_i32_0, %c0_i32_1 : i32, i32, i32
  }
  func.func @transform_4(%arg0: i32) -> (i32, i32) {
    %c0_i32 = arith.constant 0 : i32
    %c0_i32_0 = arith.constant 0 : i32
    %c0_i32_1 = arith.constant 0 : i32
    return %c0_i32, %c0_i32_0 : i32, i32
  }
  func.func @transform_5(%arg0: i32) -> (i32, i32) {
    %c0_i32 = arith.constant 0 : i32
    %c0_i32_0 = arith.constant 0 : i32
    return %arg0, %c0_i32 : i32, i32
  }
}

module attributes {stable_mosaic.version = 11 : i64} {
  func.func @_stage1_kernel(%arg0: i32, %arg1: memref<2x2x7x7x8x16xf32, #tpu.memory_space<vmem>>, %arg2: memref<16x64xf32, #tpu.memory_space<vmem>>, %arg3: memref<1x64xf32, #tpu.memory_space<vmem>>, %arg4: memref<16x64x128xf32, #tpu.memory_space<vmem>>, %arg5: memref<49x8x128xf32, #tpu.memory_space<vmem>>, %arg6: memref<1x2x128xf32, #tpu.memory_space<vmem>>) attributes {dimension_semantics = [#tpu.dimension_semantics<parallel>], iteration_bounds = array<i64: 1>, scalar_prefetch = 0 : i64, scratch_operands = 0 : i64, tpu.core_type = #tpu.core_type<tc>, window_params = [{transform_indices = @transform_0, window_bounds = array<i64: 2, 2, 7, 7, 8, 16>}, {pipeline_mode = #tpu.pipeline_mode<synchronous>, transform_indices = @transform_1, window_bounds = array<i64: 16, 64>}, {pipeline_mode = #tpu.pipeline_mode<synchronous>, transform_indices = @transform_2, window_bounds = array<i64: 1, 64>}, {pipeline_mode = #tpu.pipeline_mode<synchronous>, transform_indices = @transform_3, window_bounds = array<i64: 16, 64, 128>}, {transform_indices = @transform_4, window_bounds = array<i64: 49, 8, 128>}, {transform_indices = @transform_5, window_bounds = array<i64: 1, 2, 128>}]} {
    %c0 = arith.constant 0 : index
    %c0_0 = arith.constant 0 : index
    %c0_1 = arith.constant 0 : index
    %c0_2 = arith.constant 0 : index
    %c0_3 = arith.constant 0 : index
    %c0_4 = arith.constant 0 : index
    %0 = vector.load %arg1[%c0, %c0_0, %c0_1, %c0_2, %c0_3, %c0_4] : memref<2x2x7x7x8x16xf32, #tpu.memory_space<vmem>>, vector<2x2x7x7x8x16xf32>
    %1 = vector.shape_cast %0 : vector<2x2x7x7x8x16xf32> to vector<1568x16xf32>
    %c0_5 = arith.constant 0 : index
    %c0_6 = arith.constant 0 : index
    %2 = vector.load %arg2[%c0_5, %c0_6] : memref<16x64xf32, #tpu.memory_space<vmem>>, vector<16x64xf32>
    %cst = arith.constant dense<0.000000e+00> : vector<1568x64xf32>
    %3 = tpu.matmul %1, %2, %cst {dimension_numbers = #tpu.dot_dimension_numbers<[1], [0], [0], [1], [0, 0, 1, 1], [], []>} : vector<1568x16xf32>, vector<16x64xf32>, vector<1568x64xf32> -> vector<1568x64xf32>
    %c0_7 = arith.constant 0 : index
    %c0_8 = arith.constant 0 : index
    %4 = vector.load %arg3[%c0_7, %c0_8] : memref<1x64xf32, #tpu.memory_space<vmem>>, vector<1x64xf32>
    %5 = vector.broadcast %4 : vector<1x64xf32> to vector<1568x64xf32>
    %6 = arith.addf %3, %5 : vector<1568x64xf32>
    %cst_9 = arith.constant 0.000000e+00 : f32
    %7 = vector.broadcast %cst_9 : f32 to vector<1568x64xf32>
    %8 = arith.cmpf ogt, %6, %7 : vector<1568x64xf32>
    %cst_10 = arith.constant 2.000000e-01 : f32
    %9 = vector.broadcast %cst_10 : f32 to vector<1568x64xf32>
    %10 = arith.mulf %9, %6 : vector<1568x64xf32>
    %11 = arith.select %8, %6, %10 : vector<1568x64xi1>, vector<1568x64xf32>
    %12 = vector.shape_cast %11 : vector<1568x64xf32> to vector<2x2x7x7x8x64xf32>
    %cst_11 = arith.constant 0.000000e+00 : f32
    %13 = vector.broadcast %cst_11 : f32 to vector<1x7x8x64xf32>
    %cst_12 = arith.constant 0.000000e+00 : f32
    %14 = vector.broadcast %cst_12 : f32 to vector<8x1x8x64xf32>
    %15 = vector.extract_strided_slice %12 {offsets = [0, 0, 0, 0, 0, 0], sizes = [1, 1, 7, 7, 8, 64], strides = [1, 1, 1, 1, 1, 1]} : vector<2x2x7x7x8x64xf32> to vector<1x1x7x7x8x64xf32>
    %16 = vector.shape_cast %15 : vector<1x1x7x7x8x64xf32> to vector<7x7x8x64xf32>
    %17 = tpu.concatenate %16, %13 in 0 : vector<7x7x8x64xf32>, vector<1x7x8x64xf32> -> vector<8x7x8x64xf32>
    %18 = tpu.concatenate %17, %14 in 1 : vector<8x7x8x64xf32>, vector<8x1x8x64xf32> -> vector<8x8x8x64xf32>
    %19 = vector.extract_strided_slice %12 {offsets = [0, 1, 0, 0, 0, 0], sizes = [1, 1, 7, 7, 8, 64], strides = [1, 1, 1, 1, 1, 1]} : vector<2x2x7x7x8x64xf32> to vector<1x1x7x7x8x64xf32>
    %20 = vector.shape_cast %19 : vector<1x1x7x7x8x64xf32> to vector<7x7x8x64xf32>
    %21 = tpu.concatenate %20, %13 in 0 : vector<7x7x8x64xf32>, vector<1x7x8x64xf32> -> vector<8x7x8x64xf32>
    %22 = tpu.concatenate %14, %21 in 1 : vector<8x1x8x64xf32>, vector<8x7x8x64xf32> -> vector<8x8x8x64xf32>
    %23 = vector.extract_strided_slice %12 {offsets = [1, 0, 0, 0, 0, 0], sizes = [1, 1, 7, 7, 8, 64], strides = [1, 1, 1, 1, 1, 1]} : vector<2x2x7x7x8x64xf32> to vector<1x1x7x7x8x64xf32>
    %24 = vector.shape_cast %23 : vector<1x1x7x7x8x64xf32> to vector<7x7x8x64xf32>
    %25 = tpu.concatenate %13, %24 in 0 : vector<1x7x8x64xf32>, vector<7x7x8x64xf32> -> vector<8x7x8x64xf32>
    %26 = tpu.concatenate %25, %14 in 1 : vector<8x7x8x64xf32>, vector<8x1x8x64xf32> -> vector<8x8x8x64xf32>
    %27 = vector.extract_strided_slice %12 {offsets = [1, 1, 0, 0, 0, 0], sizes = [1, 1, 7, 7, 8, 64], strides = [1, 1, 1, 1, 1, 1]} : vector<2x2x7x7x8x64xf32> to vector<1x1x7x7x8x64xf32>
    %28 = vector.shape_cast %27 : vector<1x1x7x7x8x64xf32> to vector<7x7x8x64xf32>
    %29 = tpu.concatenate %13, %28 in 0 : vector<1x7x8x64xf32>, vector<7x7x8x64xf32> -> vector<8x7x8x64xf32>
    %30 = tpu.concatenate %14, %29 in 1 : vector<8x1x8x64xf32>, vector<8x7x8x64xf32> -> vector<8x8x8x64xf32>
    %31 = vector.extract_strided_slice %30 {offsets = [0, 0, 0, 0], sizes = [7, 7, 8, 64], strides = [1, 1, 1, 1]} : vector<8x8x8x64xf32> to vector<7x7x8x64xf32>
    %32 = vector.shape_cast %31 : vector<7x7x8x64xf32> to vector<392x64xf32>
    %c0_13 = arith.constant 0 : index
    %c0_14 = arith.constant 0 : index
    %c0_15 = arith.constant 0 : index
    %33 = vector.load %arg4[%c0_13, %c0_14, %c0_15] : memref<16x64x128xf32, #tpu.memory_space<vmem>>, vector<1x64x128xf32>
    %34 = vector.shape_cast %33 : vector<1x64x128xf32> to vector<64x128xf32>
    %cst_16 = arith.constant dense<0.000000e+00> : vector<392x128xf32>
    %35 = tpu.matmul %32, %34, %cst_16 {dimension_numbers = #tpu.dot_dimension_numbers<[1], [0], [0], [1], [0, 0, 1, 1], [], []>} : vector<392x64xf32>, vector<64x128xf32>, vector<392x128xf32> -> vector<392x128xf32>
    %36 = vector.extract_strided_slice %26 {offsets = [0, 0, 0, 0], sizes = [7, 7, 8, 64], strides = [1, 1, 1, 1]} : vector<8x8x8x64xf32> to vector<7x7x8x64xf32>
    %37 = vector.shape_cast %36 : vector<7x7x8x64xf32> to vector<392x64xf32>
    %c1 = arith.constant 1 : index
    %c0_17 = arith.constant 0 : index
    %c0_18 = arith.constant 0 : index
    %38 = vector.load %arg4[%c1, %c0_17, %c0_18] : memref<16x64x128xf32, #tpu.memory_space<vmem>>, vector<1x64x128xf32>
    %39 = vector.shape_cast %38 : vector<1x64x128xf32> to vector<64x128xf32>
    %cst_19 = arith.constant dense<0.000000e+00> : vector<392x128xf32>
    %40 = tpu.matmul %37, %39, %cst_19 {dimension_numbers = #tpu.dot_dimension_numbers<[1], [0], [0], [1], [0, 0, 1, 1], [], []>} : vector<392x64xf32>, vector<64x128xf32>, vector<392x128xf32> -> vector<392x128xf32>
    %41 = arith.addf %35, %40 : vector<392x128xf32>
    %42 = vector.extract_strided_slice %30 {offsets = [0, 1, 0, 0], sizes = [7, 7, 8, 64], strides = [1, 1, 1, 1]} : vector<8x8x8x64xf32> to vector<7x7x8x64xf32>
    %43 = vector.shape_cast %42 : vector<7x7x8x64xf32> to vector<392x64xf32>
    %c2 = arith.constant 2 : index
    %c0_20 = arith.constant 0 : index
    %c0_21 = arith.constant 0 : index
    %44 = vector.load %arg4[%c2, %c0_20, %c0_21] : memref<16x64x128xf32, #tpu.memory_space<vmem>>, vector<1x64x128xf32>
    %45 = vector.shape_cast %44 : vector<1x64x128xf32> to vector<64x128xf32>
    %cst_22 = arith.constant dense<0.000000e+00> : vector<392x128xf32>
    %46 = tpu.matmul %43, %45, %cst_22 {dimension_numbers = #tpu.dot_dimension_numbers<[1], [0], [0], [1], [0, 0, 1, 1], [], []>} : vector<392x64xf32>, vector<64x128xf32>, vector<392x128xf32> -> vector<392x128xf32>
    %47 = arith.addf %41, %46 : vector<392x128xf32>
    %48 = vector.extract_strided_slice %26 {offsets = [0, 1, 0, 0], sizes = [7, 7, 8, 64], strides = [1, 1, 1, 1]} : vector<8x8x8x64xf32> to vector<7x7x8x64xf32>
    %49 = vector.shape_cast %48 : vector<7x7x8x64xf32> to vector<392x64xf32>
    %c3 = arith.constant 3 : index
    %c0_23 = arith.constant 0 : index
    %c0_24 = arith.constant 0 : index
    %50 = vector.load %arg4[%c3, %c0_23, %c0_24] : memref<16x64x128xf32, #tpu.memory_space<vmem>>, vector<1x64x128xf32>
    %51 = vector.shape_cast %50 : vector<1x64x128xf32> to vector<64x128xf32>
    %cst_25 = arith.constant dense<0.000000e+00> : vector<392x128xf32>
    %52 = tpu.matmul %49, %51, %cst_25 {dimension_numbers = #tpu.dot_dimension_numbers<[1], [0], [0], [1], [0, 0, 1, 1], [], []>} : vector<392x64xf32>, vector<64x128xf32>, vector<392x128xf32> -> vector<392x128xf32>
    %53 = arith.addf %47, %52 : vector<392x128xf32>
    %54 = vector.extract_strided_slice %22 {offsets = [0, 0, 0, 0], sizes = [7, 7, 8, 64], strides = [1, 1, 1, 1]} : vector<8x8x8x64xf32> to vector<7x7x8x64xf32>
    %55 = vector.shape_cast %54 : vector<7x7x8x64xf32> to vector<392x64xf32>
    %c4 = arith.constant 4 : index
    %c0_26 = arith.constant 0 : index
    %c0_27 = arith.constant 0 : index
    %56 = vector.load %arg4[%c4, %c0_26, %c0_27] : memref<16x64x128xf32, #tpu.memory_space<vmem>>, vector<1x64x128xf32>
    %57 = vector.shape_cast %56 : vector<1x64x128xf32> to vector<64x128xf32>
    %cst_28 = arith.constant dense<0.000000e+00> : vector<392x128xf32>
    %58 = tpu.matmul %55, %57, %cst_28 {dimension_numbers = #tpu.dot_dimension_numbers<[1], [0], [0], [1], [0, 0, 1, 1], [], []>} : vector<392x64xf32>, vector<64x128xf32>, vector<392x128xf32> -> vector<392x128xf32>
    %59 = arith.addf %53, %58 : vector<392x128xf32>
    %60 = vector.extract_strided_slice %18 {offsets = [0, 0, 0, 0], sizes = [7, 7, 8, 64], strides = [1, 1, 1, 1]} : vector<8x8x8x64xf32> to vector<7x7x8x64xf32>
    %61 = vector.shape_cast %60 : vector<7x7x8x64xf32> to vector<392x64xf32>
    %c5 = arith.constant 5 : index
    %c0_29 = arith.constant 0 : index
    %c0_30 = arith.constant 0 : index
    %62 = vector.load %arg4[%c5, %c0_29, %c0_30] : memref<16x64x128xf32, #tpu.memory_space<vmem>>, vector<1x64x128xf32>
    %63 = vector.shape_cast %62 : vector<1x64x128xf32> to vector<64x128xf32>
    %cst_31 = arith.constant dense<0.000000e+00> : vector<392x128xf32>
    %64 = tpu.matmul %61, %63, %cst_31 {dimension_numbers = #tpu.dot_dimension_numbers<[1], [0], [0], [1], [0, 0, 1, 1], [], []>} : vector<392x64xf32>, vector<64x128xf32>, vector<392x128xf32> -> vector<392x128xf32>
    %65 = arith.addf %59, %64 : vector<392x128xf32>
    %66 = vector.extract_strided_slice %22 {offsets = [0, 1, 0, 0], sizes = [7, 7, 8, 64], strides = [1, 1, 1, 1]} : vector<8x8x8x64xf32> to vector<7x7x8x64xf32>
    %67 = vector.shape_cast %66 : vector<7x7x8x64xf32> to vector<392x64xf32>
    %c6 = arith.constant 6 : index
    %c0_32 = arith.constant 0 : index
    %c0_33 = arith.constant 0 : index
    %68 = vector.load %arg4[%c6, %c0_32, %c0_33] : memref<16x64x128xf32, #tpu.memory_space<vmem>>, vector<1x64x128xf32>
    %69 = vector.shape_cast %68 : vector<1x64x128xf32> to vector<64x128xf32>
    %cst_34 = arith.constant dense<0.000000e+00> : vector<392x128xf32>
    %70 = tpu.matmul %67, %69, %cst_34 {dimension_numbers = #tpu.dot_dimension_numbers<[1], [0], [0], [1], [0, 0, 1, 1], [], []>} : vector<392x64xf32>, vector<64x128xf32>, vector<392x128xf32> -> vector<392x128xf32>
    %71 = arith.addf %65, %70 : vector<392x128xf32>
    %72 = vector.extract_strided_slice %18 {offsets = [0, 1, 0, 0], sizes = [7, 7, 8, 64], strides = [1, 1, 1, 1]} : vector<8x8x8x64xf32> to vector<7x7x8x64xf32>
    %73 = vector.shape_cast %72 : vector<7x7x8x64xf32> to vector<392x64xf32>
    %c7 = arith.constant 7 : index
    %c0_35 = arith.constant 0 : index
    %c0_36 = arith.constant 0 : index
    %74 = vector.load %arg4[%c7, %c0_35, %c0_36] : memref<16x64x128xf32, #tpu.memory_space<vmem>>, vector<1x64x128xf32>
    %75 = vector.shape_cast %74 : vector<1x64x128xf32> to vector<64x128xf32>
    %cst_37 = arith.constant dense<0.000000e+00> : vector<392x128xf32>
    %76 = tpu.matmul %73, %75, %cst_37 {dimension_numbers = #tpu.dot_dimension_numbers<[1], [0], [0], [1], [0, 0, 1, 1], [], []>} : vector<392x64xf32>, vector<64x128xf32>, vector<392x128xf32> -> vector<392x128xf32>
    %77 = arith.addf %71, %76 : vector<392x128xf32>
    %78 = vector.extract_strided_slice %30 {offsets = [1, 0, 0, 0], sizes = [7, 7, 8, 64], strides = [1, 1, 1, 1]} : vector<8x8x8x64xf32> to vector<7x7x8x64xf32>
    %79 = vector.shape_cast %78 : vector<7x7x8x64xf32> to vector<392x64xf32>
    %c8 = arith.constant 8 : index
    %c0_38 = arith.constant 0 : index
    %c0_39 = arith.constant 0 : index
    %80 = vector.load %arg4[%c8, %c0_38, %c0_39] : memref<16x64x128xf32, #tpu.memory_space<vmem>>, vector<1x64x128xf32>
    %81 = vector.shape_cast %80 : vector<1x64x128xf32> to vector<64x128xf32>
    %cst_40 = arith.constant dense<0.000000e+00> : vector<392x128xf32>
    %82 = tpu.matmul %79, %81, %cst_40 {dimension_numbers = #tpu.dot_dimension_numbers<[1], [0], [0], [1], [0, 0, 1, 1], [], []>} : vector<392x64xf32>, vector<64x128xf32>, vector<392x128xf32> -> vector<392x128xf32>
    %83 = arith.addf %77, %82 : vector<392x128xf32>
    %84 = vector.extract_strided_slice %26 {offsets = [1, 0, 0, 0], sizes = [7, 7, 8, 64], strides = [1, 1, 1, 1]} : vector<8x8x8x64xf32> to vector<7x7x8x64xf32>
    %85 = vector.shape_cast %84 : vector<7x7x8x64xf32> to vector<392x64xf32>
    %c9 = arith.constant 9 : index
    %c0_41 = arith.constant 0 : index
    %c0_42 = arith.constant 0 : index
    %86 = vector.load %arg4[%c9, %c0_41, %c0_42] : memref<16x64x128xf32, #tpu.memory_space<vmem>>, vector<1x64x128xf32>
    %87 = vector.shape_cast %86 : vector<1x64x128xf32> to vector<64x128xf32>
    %cst_43 = arith.constant dense<0.000000e+00> : vector<392x128xf32>
    %88 = tpu.matmul %85, %87, %cst_43 {dimension_numbers = #tpu.dot_dimension_numbers<[1], [0], [0], [1], [0, 0, 1, 1], [], []>} : vector<392x64xf32>, vector<64x128xf32>, vector<392x128xf32> -> vector<392x128xf32>
    %89 = arith.addf %83, %88 : vector<392x128xf32>
    %90 = vector.extract_strided_slice %30 {offsets = [1, 1, 0, 0], sizes = [7, 7, 8, 64], strides = [1, 1, 1, 1]} : vector<8x8x8x64xf32> to vector<7x7x8x64xf32>
    %91 = vector.shape_cast %90 : vector<7x7x8x64xf32> to vector<392x64xf32>
    %c10 = arith.constant 10 : index
    %c0_44 = arith.constant 0 : index
    %c0_45 = arith.constant 0 : index
    %92 = vector.load %arg4[%c10, %c0_44, %c0_45] : memref<16x64x128xf32, #tpu.memory_space<vmem>>, vector<1x64x128xf32>
    %93 = vector.shape_cast %92 : vector<1x64x128xf32> to vector<64x128xf32>
    %cst_46 = arith.constant dense<0.000000e+00> : vector<392x128xf32>
    %94 = tpu.matmul %91, %93, %cst_46 {dimension_numbers = #tpu.dot_dimension_numbers<[1], [0], [0], [1], [0, 0, 1, 1], [], []>} : vector<392x64xf32>, vector<64x128xf32>, vector<392x128xf32> -> vector<392x128xf32>
    %95 = arith.addf %89, %94 : vector<392x128xf32>
    %96 = vector.extract_strided_slice %26 {offsets = [1, 1, 0, 0], sizes = [7, 7, 8, 64], strides = [1, 1, 1, 1]} : vector<8x8x8x64xf32> to vector<7x7x8x64xf32>
    %97 = vector.shape_cast %96 : vector<7x7x8x64xf32> to vector<392x64xf32>
    %c11 = arith.constant 11 : index
    %c0_47 = arith.constant 0 : index
    %c0_48 = arith.constant 0 : index
    %98 = vector.load %arg4[%c11, %c0_47, %c0_48] : memref<16x64x128xf32, #tpu.memory_space<vmem>>, vector<1x64x128xf32>
    %99 = vector.shape_cast %98 : vector<1x64x128xf32> to vector<64x128xf32>
    %cst_49 = arith.constant dense<0.000000e+00> : vector<392x128xf32>
    %100 = tpu.matmul %97, %99, %cst_49 {dimension_numbers = #tpu.dot_dimension_numbers<[1], [0], [0], [1], [0, 0, 1, 1], [], []>} : vector<392x64xf32>, vector<64x128xf32>, vector<392x128xf32> -> vector<392x128xf32>
    %101 = arith.addf %95, %100 : vector<392x128xf32>
    %102 = vector.extract_strided_slice %22 {offsets = [1, 0, 0, 0], sizes = [7, 7, 8, 64], strides = [1, 1, 1, 1]} : vector<8x8x8x64xf32> to vector<7x7x8x64xf32>
    %103 = vector.shape_cast %102 : vector<7x7x8x64xf32> to vector<392x64xf32>
    %c12 = arith.constant 12 : index
    %c0_50 = arith.constant 0 : index
    %c0_51 = arith.constant 0 : index
    %104 = vector.load %arg4[%c12, %c0_50, %c0_51] : memref<16x64x128xf32, #tpu.memory_space<vmem>>, vector<1x64x128xf32>
    %105 = vector.shape_cast %104 : vector<1x64x128xf32> to vector<64x128xf32>
    %cst_52 = arith.constant dense<0.000000e+00> : vector<392x128xf32>
    %106 = tpu.matmul %103, %105, %cst_52 {dimension_numbers = #tpu.dot_dimension_numbers<[1], [0], [0], [1], [0, 0, 1, 1], [], []>} : vector<392x64xf32>, vector<64x128xf32>, vector<392x128xf32> -> vector<392x128xf32>
    %107 = arith.addf %101, %106 : vector<392x128xf32>
    %108 = vector.extract_strided_slice %18 {offsets = [1, 0, 0, 0], sizes = [7, 7, 8, 64], strides = [1, 1, 1, 1]} : vector<8x8x8x64xf32> to vector<7x7x8x64xf32>
    %109 = vector.shape_cast %108 : vector<7x7x8x64xf32> to vector<392x64xf32>
    %c13 = arith.constant 13 : index
    %c0_53 = arith.constant 0 : index
    %c0_54 = arith.constant 0 : index
    %110 = vector.load %arg4[%c13, %c0_53, %c0_54] : memref<16x64x128xf32, #tpu.memory_space<vmem>>, vector<1x64x128xf32>
    %111 = vector.shape_cast %110 : vector<1x64x128xf32> to vector<64x128xf32>
    %cst_55 = arith.constant dense<0.000000e+00> : vector<392x128xf32>
    %112 = tpu.matmul %109, %111, %cst_55 {dimension_numbers = #tpu.dot_dimension_numbers<[1], [0], [0], [1], [0, 0, 1, 1], [], []>} : vector<392x64xf32>, vector<64x128xf32>, vector<392x128xf32> -> vector<392x128xf32>
    %113 = arith.addf %107, %112 : vector<392x128xf32>
    %114 = vector.extract_strided_slice %22 {offsets = [1, 1, 0, 0], sizes = [7, 7, 8, 64], strides = [1, 1, 1, 1]} : vector<8x8x8x64xf32> to vector<7x7x8x64xf32>
    %115 = vector.shape_cast %114 : vector<7x7x8x64xf32> to vector<392x64xf32>
    %c14 = arith.constant 14 : index
    %c0_56 = arith.constant 0 : index
    %c0_57 = arith.constant 0 : index
    %116 = vector.load %arg4[%c14, %c0_56, %c0_57] : memref<16x64x128xf32, #tpu.memory_space<vmem>>, vector<1x64x128xf32>
    %117 = vector.shape_cast %116 : vector<1x64x128xf32> to vector<64x128xf32>
    %cst_58 = arith.constant dense<0.000000e+00> : vector<392x128xf32>
    %118 = tpu.matmul %115, %117, %cst_58 {dimension_numbers = #tpu.dot_dimension_numbers<[1], [0], [0], [1], [0, 0, 1, 1], [], []>} : vector<392x64xf32>, vector<64x128xf32>, vector<392x128xf32> -> vector<392x128xf32>
    %119 = arith.addf %113, %118 : vector<392x128xf32>
    %120 = vector.extract_strided_slice %18 {offsets = [1, 1, 0, 0], sizes = [7, 7, 8, 64], strides = [1, 1, 1, 1]} : vector<8x8x8x64xf32> to vector<7x7x8x64xf32>
    %121 = vector.shape_cast %120 : vector<7x7x8x64xf32> to vector<392x64xf32>
    %c15 = arith.constant 15 : index
    %c0_59 = arith.constant 0 : index
    %c0_60 = arith.constant 0 : index
    %122 = vector.load %arg4[%c15, %c0_59, %c0_60] : memref<16x64x128xf32, #tpu.memory_space<vmem>>, vector<1x64x128xf32>
    %123 = vector.shape_cast %122 : vector<1x64x128xf32> to vector<64x128xf32>
    %cst_61 = arith.constant dense<0.000000e+00> : vector<392x128xf32>
    %124 = tpu.matmul %121, %123, %cst_61 {dimension_numbers = #tpu.dot_dimension_numbers<[1], [0], [0], [1], [0, 0, 1, 1], [], []>} : vector<392x64xf32>, vector<64x128xf32>, vector<392x128xf32> -> vector<392x128xf32>
    %125 = arith.addf %119, %124 : vector<392x128xf32>
    %126 = tpu.iota {dimensions = array<i32: 0>} : vector<392x1xi32>
    %c8_i32 = arith.constant 8 : i32
    %c0_i32 = arith.constant 0 : i32
    %127 = arith.cmpi eq, %c8_i32, %c0_i32 : i32
    %c1_i32 = arith.constant 1 : i32
    %128 = arith.select %127, %c1_i32, %c8_i32 : i32
    %129 = vector.broadcast %128 : i32 to vector<392x1xi32>
    %130 = arith.remsi %126, %129 : vector<392x1xi32>
    %c0_i32_62 = arith.constant 0 : i32
    %131 = vector.broadcast %c0_i32_62 : i32 to vector<392x1xi32>
    %132 = arith.cmpi ne, %130, %131 : vector<392x1xi32>
    %c0_i32_63 = arith.constant 0 : i32
    %133 = vector.broadcast %c0_i32_63 : i32 to vector<392x1xi32>
    %134 = arith.cmpi slt, %130, %133 : vector<392x1xi32>
    %c0_i32_64 = arith.constant 0 : i32
    %135 = arith.cmpi slt, %128, %c0_i32_64 : i32
    %136 = vector.broadcast %135 : i1 to vector<392x1xi1>
    %137 = vector.broadcast %136 : vector<392x1xi1> to vector<392x1xi1>
    %138 = arith.xori %134, %137 : vector<392x1xi1>
    %139 = arith.andi %138, %132 : vector<392x1xi1>
    %140 = vector.broadcast %128 : i32 to vector<392x1xi32>
    %141 = arith.addi %130, %140 : vector<392x1xi32>
    %142 = arith.select %139, %141, %130 : vector<392x1xi1>, vector<392x1xi32>
    %c8_i32_65 = arith.constant 8 : i32
    %143 = arith.muli %arg0, %c8_i32_65 : i32
    %144 = vector.broadcast %143 : i32 to vector<392x1xi32>
    %145 = arith.addi %144, %142 : vector<392x1xi32>
    %c2_i32 = arith.constant 2 : i32
    %146 = vector.broadcast %c2_i32 : i32 to vector<392x1xi32>
    %147 = arith.cmpi slt, %145, %146 : vector<392x1xi32>
    %cst_66 = arith.constant 0.000000e+00 : f32
    %148 = vector.shape_cast %147 : vector<392x1xi1> to vector<392x1xi1>
    %149 = vector.broadcast %148 : vector<392x1xi1> to vector<392x128xi1>
    %150 = vector.broadcast %cst_66 : f32 to vector<392x128xf32>
    %151 = arith.select %149, %125, %150 : vector<392x128xi1>, vector<392x128xf32>
    %cst_67 = arith.constant dense<0.000000e+00> : vector<128xf32>
    %152 = vector.multi_reduction <add>, %151, %cst_67 [0] : vector<392x128xf32> to vector<128xf32>
    %153 = vector.shape_cast %152 : vector<128xf32> to vector<1x128xf32>
    %c0_68 = arith.constant 0 : index
    %c0_69 = arith.constant 0 : index
    %c0_70 = arith.constant 0 : index
    %154 = vector.load %arg6[%c0_68, %c0_69, %c0_70] : memref<1x2x128xf32, #tpu.memory_space<vmem>>, vector<1x1x128xf32>
    %155 = vector.shape_cast %154 : vector<1x1x128xf32> to vector<1x128xf32>
    %156 = vector.shape_cast %153 : vector<1x128xf32> to vector<1x1x128xf32>
    tpu.vector_store %arg6[%c0_68, %c0_69, %c0_70], %156 {strides = array<i32>} : memref<1x2x128xf32, #tpu.memory_space<vmem>>, vector<1x1x128xf32>,
    %157 = arith.mulf %151, %151 : vector<392x128xf32>
    %cst_71 = arith.constant dense<0.000000e+00> : vector<128xf32>
    %158 = vector.multi_reduction <add>, %157, %cst_71 [0] : vector<392x128xf32> to vector<128xf32>
    %159 = vector.shape_cast %158 : vector<128xf32> to vector<1x128xf32>
    %c0_72 = arith.constant 0 : index
    %c1_73 = arith.constant 1 : index
    %c0_74 = arith.constant 0 : index
    %160 = vector.load %arg6[%c0_72, %c1_73, %c0_74] : memref<1x2x128xf32, #tpu.memory_space<vmem>>, vector<1x1x128xf32>
    %161 = vector.shape_cast %160 : vector<1x1x128xf32> to vector<1x128xf32>
    %162 = vector.shape_cast %159 : vector<1x128xf32> to vector<1x1x128xf32>
    tpu.vector_store %arg6[%c0_72, %c1_73, %c0_74], %162 {strides = array<i32>} : memref<1x2x128xf32, #tpu.memory_space<vmem>>, vector<1x1x128xf32>,
    %163 = vector.shape_cast %125 : vector<392x128xf32> to vector<49x8x128xf32>
    %c0_75 = arith.constant 0 : index
    %c0_76 = arith.constant 0 : index
    %c0_77 = arith.constant 0 : index
    %164 = vector.load %arg5[%c0_75, %c0_76, %c0_77] : memref<49x8x128xf32, #tpu.memory_space<vmem>>, vector<49x8x128xf32>
    tpu.vector_store %arg5[%c0_75, %c0_76, %c0_77], %163 {strides = array<i32>} : memref<49x8x128xf32, #tpu.memory_space<vmem>>, vector<49x8x128xf32>,
    return
  }
  func.func @transform_0(%arg0: i32) -> (i32, i32, i32, i32, i32, i32) {
    %c0_i32 = arith.constant 0 : i32
    %c0_i32_0 = arith.constant 0 : i32
    %c0_i32_1 = arith.constant 0 : i32
    %c0_i32_2 = arith.constant 0 : i32
    %c0_i32_3 = arith.constant 0 : i32
    %c0_i32_4 = arith.constant 0 : i32
    return %c0_i32, %c0_i32_0, %c0_i32_1, %c0_i32_2, %arg0, %c0_i32_3 : i32, i32, i32, i32, i32, i32
  }
  func.func @transform_1(%arg0: i32) -> (i32, i32) {
    %c0_i32 = arith.constant 0 : i32
    %c0_i32_0 = arith.constant 0 : i32
    %c0_i32_1 = arith.constant 0 : i32
    return %c0_i32, %c0_i32_0 : i32, i32
  }
  func.func @transform_2(%arg0: i32) -> (i32, i32) {
    %c0_i32 = arith.constant 0 : i32
    %c0_i32_0 = arith.constant 0 : i32
    %c0_i32_1 = arith.constant 0 : i32
    return %c0_i32, %c0_i32_0 : i32, i32
  }
  func.func @transform_3(%arg0: i32) -> (i32, i32, i32) {
    %c0_i32 = arith.constant 0 : i32
    %c0_i32_0 = arith.constant 0 : i32
    %c0_i32_1 = arith.constant 0 : i32
    %c0_i32_2 = arith.constant 0 : i32
    return %c0_i32, %c0_i32_0, %c0_i32_1 : i32, i32, i32
  }
  func.func @transform_4(%arg0: i32) -> (i32, i32, i32) {
    %c0_i32 = arith.constant 0 : i32
    %c0_i32_0 = arith.constant 0 : i32
    %c0_i32_1 = arith.constant 0 : i32
    return %c0_i32, %arg0, %c0_i32_0 : i32, i32, i32
  }
  func.func @transform_5(%arg0: i32) -> (i32, i32, i32) {
    %c0_i32 = arith.constant 0 : i32
    %c0_i32_0 = arith.constant 0 : i32
    %c0_i32_1 = arith.constant 0 : i32
    return %arg0, %c0_i32, %c0_i32_0 : i32, i32, i32
  }
}

</mosaic_0001>

<bundles_post_ra>
// kernel: critic_forward.3
= control target key start
LH: loop header
LB: loop body
LE: loop exit
PB: predicated region body
PF: predicated region fallthrough
CT: control target
= control target key end

     0   :  { %s1480_s4 = inlined_call_operand.<no memory space> [shape: f32[1,1], index: 4, kind: input, shape index: {}]   ;;  %s1481_s0 = inlined_call_operand.vmem [shape: f32[49,8,128], index: 0, kind: input, shape index: {}]   ;;  %s1482_s1 = inlined_call_operand.vmem [shape: f32[1,1,128], index: 1, kind: input, shape index: {}]   ;;  %s1483_s2 = inlined_call_operand.vmem [shape: f32[1,1,128], index: 2, kind: input, shape index: {}]   ;;  %s1484_s3 = inlined_call_operand.vmem [shape: f32[49,1,128], index: 3, kind: input, shape index: {}]   ;;  %s1485_s5 = inlined_call_operand.vmem [shape: f32[8,1], index: 5, kind: output, shape index: {}]  }
   0x1   :  { %v10_v0 = vstv %s1480_s4  ;;  %v55_v1 = vld [vmem:[%s1481_s0 + $0x108] sm:$0xff]  ;;  %v56_v2 = vld [vmem:[%s1481_s0 + $0x110] sm:$0xff]  ;;  %v57_v3 = vld [vmem:[%s1481_s0 + $0x118] sm:$0xff] }
   0x2   :  { %11 = vst [vmem:[#allocation2] sm:$0x1] %v10_v0  ;;  %v58_v4 = vld [vmem:[%s1481_s0 + $0x120] sm:$0xff]  ;;  %v59_v5 = vld [vmem:[%s1481_s0 + $0x128] sm:$0xff]  ;;  %v60_v6 = vld [vmem:[%s1481_s0 + $0x130] sm:$0xff] }
   0x3   :  { %v61_v7 = vld [vmem:[%s1481_s0 + $0x138] sm:$0xff]  ;;  %v62_v8 = vld [vmem:[%s1481_s0 + $0x140] sm:$0xff]  ;;  %v63_v9 = vld [vmem:[%s1481_s0 + $0x148] sm:$0xff] }
   0x4   :  { %v64_v10 = vld [vmem:[%s1481_s0 + $0x150] sm:$0xff]  ;;  %v65_v11 = vld [vmem:[%s1481_s0 + $0x158] sm:$0xff]  ;;  %v66_v12 = vld [vmem:[%s1481_s0 + $0x160] sm:$0xff] }
   0x5   :  { %v910_v13 = vld [vmem:[%s1482_s1] ss:$0 sm:$0xff]  ;;  %v67_v14 = vld [vmem:[%s1481_s0 + $0x168] sm:$0xff]  ;;  %v68_v15 = vld [vmem:[%s1481_s0 + $0x170] sm:$0xff] }
   0x6   :  { %v69_v16 = vld [vmem:[%s1481_s0 + $0x178] sm:$0xff]  ;;  %v111_v17 = vmul.f32 %v910_v13, %v55_v1  ;;  %v112_v18 = vmul.f32 %v910_v13, %v56_v2  ;;  %v113_v19 = vmul.f32 %v910_v13, %v57_v3  ;;  %v70_v20 = vld [vmem:[%s1481_s0 + $0x180] sm:$0xff]  ;;  %v114_v21 = vmul.f32 %v910_v13, %v58_v4  ;;  %v23_v52 = vld [vmem:[%s1481_s0 + $0x8] sm:$0xff] }
   0x7   :  { %v115_v22 = vmul.f32 %v910_v13, %v59_v5  ;;  %v116_v23 = vmul.f32 %v910_v13, %v60_v6  ;;  %v117_v24 = vmul.f32 %v910_v13, %v61_v7  ;;  %v118_v25 = vmul.f32 %v910_v13, %v62_v8  ;;  %v943_v34 = vld [vmem:[%s1483_s2] ss:$0 sm:$0xff]  ;;  %v24_v53 = vld [vmem:[%s1481_s0 + $0x10] sm:$0xff]  ;;  %v25_v54 = vld [vmem:[%s1481_s0 + $0x18] sm:$0xff] }
   0x8   :  { %v119_v26 = vmul.f32 %v910_v13, %v63_v9  ;;  %v120_v27 = vmul.f32 %v910_v13, %v64_v10  ;;  %v121_v28 = vmul.f32 %v910_v13, %v65_v11  ;;  %v122_v29 = vmul.f32 %v910_v13, %v66_v12  ;;  %v22_v51 = vld [vmem:[%s1481_s0] sm:$0xff]  ;;  %v27_v56 = vld [vmem:[%s1481_s0 + $0x28] sm:$0xff]  ;;  %v28_v57 = vld [vmem:[%s1481_s0 + $0x30] sm:$0xff] }
   0x9   :  { %v123_v30 = vmul.f32 %v910_v13, %v67_v14  ;;  %v124_v31 = vmul.f32 %v910_v13, %v68_v15  ;;  %v125_v32 = vmul.f32 %v910_v13, %v69_v16  ;;  %v126_v33 = vmul.f32 %v910_v13, %v70_v20  ;;  %v26_v55 = vld [vmem:[%s1481_s0 + $0x20] sm:$0xff]  ;;  %v29_v60 = vld [vmem:[%s1481_s0 + $0x38] sm:$0xff]  ;;  %v31_v3 = vld [vmem:[%s1481_s0 + $0x48] sm:$0xff] }
   0xa   :  { %v946_v35 = vadd.f32 %v943_v34, %v111_v17  ;;  %v949_v36 = vadd.f32 %v943_v34, %v112_v18  ;;  %v952_v37 = vadd.f32 %v943_v34, %v113_v19  ;;  %v955_v38 = vadd.f32 %v943_v34, %v114_v21  ;;  %v30_v61 = vld [vmem:[%s1481_s0 + $0x40] sm:$0xff]  ;;  %v32_v4 = vld [vmem:[%s1481_s0 + $0x50] sm:$0xff] }
   0xb   :  { %v958_v39 = vadd.f32 %v943_v34, %v115_v22  ;;  %v961_v40 = vadd.f32 %v943_v34, %v116_v23  ;;  %v964_v41 = vadd.f32 %v943_v34, %v117_v24  ;;  %v967_v42 = vadd.f32 %v943_v34, %v118_v25 }
   0xc   :  { %v970_v43 = vadd.f32 %v943_v34, %v119_v26  ;;  %v973_v44 = vadd.f32 %v943_v34, %v120_v27  ;;  %v976_v45 = vadd.f32 %v943_v34, %v121_v28  ;;  %v979_v46 = vadd.f32 %v943_v34, %v122_v29 }
   0xd   :  { %v982_v47 = vadd.f32 %v943_v34, %v123_v30  ;;  %v985_v48 = vadd.f32 %v943_v34, %v124_v31  ;;  %v988_v49 = vadd.f32 %v943_v34, %v125_v32  ;;  %v991_v50 = vadd.f32 %v943_v34, %v126_v33 }
   0xe   :  { %v78_v58 = vmul.f32 %v910_v13, %v22_v51  ;;  %v79_v59 = vmul.f32 %v910_v13, %v23_v52  ;;  %v80_v62 = vmul.f32 %v910_v13, %v24_v53  ;;  %v81_v63 = vmul.f32 %v910_v13, %v25_v54 }
   0xf   :  { %v82_v0 = vmul.f32 %v910_v13, %v26_v55  ;;  %v83_v1 = vmul.f32 %v910_v13, %v27_v56  ;;  %v84_v2 = vmul.f32 %v910_v13, %v28_v57  ;;  %v85_v5 = vmul.f32 %v910_v13, %v29_v60 }
  0x10   :  { %v86_v6 = vmul.f32 %v910_v13, %v30_v61  ;;  %v134_v7 = vadd.f32 %v943_v34, %v78_v58  ;;  %v135_v8 = vadd.f32 %v943_v34, %v79_v59  ;;  %v136_v9 = vadd.f32 %v943_v34, %v80_v62  ;;  %v788_v61 = vld [vmem:[%s1484_s3] ss:$0 sm:$0xff] }
  0x11   :  { %v137_v10 = vadd.f32 %v943_v34, %v81_v63  ;;  %v138_v11 = vadd.f32 %v943_v34, %v82_v0  ;;  %v1041_v12 = vmul.f32 %v910_v13, %v31_v3  ;;  %v1044_v14 = vmul.f32 %v910_v13, %v32_v4 }
  0x12   :  { %v1047_v15 = vadd.f32 %v943_v34, %v83_v1  ;;  %v1050_v16 = vadd.f32 %v943_v34, %v84_v2  ;;  %v1053_v17 = vadd.f32 %v943_v34, %v85_v5  ;;  %v1056_v18 = vadd.f32 %v943_v34, %v86_v6  ;;  %v789_v2 = vld [vmem:[%s1484_s3 + $0x1] ss:$0 sm:$0xff]  ;;  %v790_v6 = vld [vmem:[%s1484_s3 + $0x2] ss:$0 sm:$0xff] }
  0x13   :  { %vm183_vm0 = vcmp.gt.f32.partialorder %v134_v7, 0.0  ;;  %vm184_vm1 = vcmp.gt.f32.partialorder %v135_v8, 0.0  ;;  %vm185_vm2 = vcmp.gt.f32.partialorder %v136_v9, 0.0  ;;  %vm186_vm3 = vcmp.gt.f32.partialorder %v137_v10, 0.0 }
  0x14   :  { %vm187_vm4 = vcmp.gt.f32.partialorder %v138_v11, 0.0  ;;  %vm216_vm5 = vcmp.gt.f32.partialorder %v946_v35, 0.0  ;;  %vm217_vm6 = vcmp.gt.f32.partialorder %v949_v36, 0.0  ;;  %vm223_vm12 = vcmp.gt.f32.partialorder %v967_v42, 0.0 }
  0x15   :  { %v232_v19 = vmul.f32 0.2, %v134_v7  ;;  %vm224_vm13 = vcmp.gt.f32.partialorder %v970_v43, 0.0  ;;  %vm225_vm14 = vcmp.gt.f32.partialorder %v973_v44, 0.0  ;;  %vm226_vm15 = vcmp.gt.f32.partialorder %v976_v45, 0.0 }
  0x16   :  { %v233_v20 = vmul.f32 0.2, %v135_v8  ;;  %vm227_vm7 = vcmp.gt.f32.partialorder %v979_v46, 0.0  ;;  %vm228_vm8 = vcmp.gt.f32.partialorder %v982_v47, 0.0  ;;  %vm229_vm9 = vcmp.gt.f32.partialorder %v985_v48, 0.0 }
  0x17   :  { %v234_v21 = vmul.f32 0.2, %v136_v9  ;;  %vm230_vm10 = vcmp.gt.f32.partialorder %v988_v49, 0.0  ;;  %vm231_vm11 = vcmp.gt.f32.partialorder %v991_v50, 0.0  ;;  %v235_v22 = vmul.f32 0.2, %v137_v10 }
  0x18   :  { %v236_v23 = vmul.f32 0.2, %v138_v11  ;;  %v1075_v24 = vmul.f32 0.2, %v1047_v15  ;;  %v1078_v25 = vmul.f32 0.2, %v1050_v16  ;;  %v281_v27 = vsel %vm183_vm0, %v134_v7, %v232_v19 }
  0x19   :  { %v265_v26 = vmul.f32 0.2, %v946_v35  ;;  %v266_v28 = vmul.f32 0.2, %v949_v36  ;;  %v267_v29 = vmul.f32 0.2, %v952_v37  ;;  %v282_v31 = vsel %vm184_vm1, %v135_v8, %v233_v20 }
  0x1a   :  { %v268_v30 = vmul.f32 0.2, %v955_v38  ;;  %v269_v32 = vmul.f32 0.2, %v958_v39  ;;  %v270_v33 = vmul.f32 0.2, %v961_v40  ;;  %v283_v52 = vsel %vm185_vm2, %v136_v9, %v234_v21 }
  0x1b   :  { %v271_v51 = vmul.f32 0.2, %v964_v41  ;;  %v272_v53 = vmul.f32 0.2, %v967_v42  ;;  %v273_v54 = vmul.f32 0.2, %v970_v43  ;;  %v284_v56 = vsel %vm186_vm3, %v137_v10, %v235_v22 }
  0x1c   :  { %v274_v55 = vmul.f32 0.2, %v973_v44  ;;  %vm188_vm0 = vcmp.gt.f32.partialorder %v1047_v15, 0.0  ;;  %v275_v57 = vmul.f32 0.2, %v976_v45  ;;  %v1099_v60 = vsel %vm187_vm4, %v138_v11, %v236_v23 }
  0x1d   :  { %v276_v58 = vmul.f32 0.2, %v979_v46  ;;  %v277_v59 = vmul.f32 0.2, %v982_v47  ;;  %v278_v62 = vmul.f32 0.2, %v985_v48  ;;  %v314_v1 = vsel %vm216_vm5, %v946_v35, %v265_v26 }
  0x1e   :  { %v279_v63 = vmul.f32 0.2, %v988_v49  ;;  %v280_v0 = vmul.f32 0.2, %v991_v50  ;;  %vm189_vm1 = vcmp.gt.f32.partialorder %v1050_v16, 0.0  ;;  %v315_v3 = vsel %vm217_vm6, %v949_v36, %v266_v28 }
  0x1f   :  { %vm1486_vm2 = vcmp.gt.f32.partialorder %v952_v37, 0.0  ;;  %vm1487_vm3 = vcmp.gt.f32.partialorder %v955_v38, 0.0  ;;  %vm1488_vm4 = vcmp.gt.f32.partialorder %v958_v39, 0.0  ;;  %v791_v36 = vld [vmem:[%s1484_s3 + $0x3] ss:$0 sm:$0xff]  ;;  %vm1489_vm5 = vcmp.gt.f32.partialorder %v961_v40, 0.0 }
  0x20   :  { %v316_v4 = vsel %vm1486_vm2, %v952_v37, %v267_v29  ;;  %v317_v5 = vsel %vm1487_vm3, %v955_v38, %v268_v30  ;;  %v318_v35 = vsel %vm1488_vm4, %v958_v39, %v269_v32  ;;  %v821_v37 = vld [vmem:[%s1484_s3 + $0x21] ss:$0 sm:$0xff]  ;;  %v319_v38 = vsel %vm1489_vm5, %v961_v40, %v270_v33  ;;  %v822_v9 = vld [vmem:[%s1484_s3 + $0x22] ss:$0 sm:$0xff]  ;;  %v823_v40 = vld [vmem:[%s1484_s3 + $0x23] ss:$0 sm:$0xff] }
  0x21   :  { %vm1490_vm6 = vcmp.gt.f32.partialorder %v964_v41, 0.0  ;;  %v321_v7 = vsel %vm223_vm12, %v967_v42, %v272_v53  ;;  %v322_v8 = vsel %vm224_vm13, %v970_v43, %v273_v54  ;;  %v323_v42 = vsel %vm225_vm14, %v973_v44, %v274_v55  ;;  %v825_v19 = vld [vmem:[%s1484_s3 + $0x25] ss:$0 sm:$0xff]  ;;  %v826_v44 = vld [vmem:[%s1484_s3 + $0x26] ss:$0 sm:$0xff]  ;;  %v33_v55 = vld [vmem:[%s1481_s0 + $0x58] sm:$0xff] }
  0x22   :  { %v320_v39 = vsel %vm1490_vm6, %v964_v41, %v271_v51  ;;  %v824_v41 = vld [vmem:[%s1484_s3 + $0x24] ss:$0 sm:$0xff]  ;;  %v324_v43 = vsel %vm226_vm15, %v976_v45, %v275_v57  ;;  %v325_v10 = vsel %vm227_vm7, %v979_v46, %v276_v58  ;;  %v326_v11 = vsel %vm228_vm8, %v982_v47, %v277_v59  ;;  %v827_v45 = vld [vmem:[%s1484_s3 + $0x27] ss:$0 sm:$0xff]  ;;  %v828_v21 = vld [vmem:[%s1484_s3 + $0x28] ss:$0 sm:$0xff] }
  0x23   :  { %v327_v46 = vsel %vm229_vm9, %v985_v48, %v278_v62  ;;  %v328_v47 = vsel %vm230_vm10, %v988_v49, %v279_v63  ;;  %v329_v20 = vsel %vm231_vm11, %v991_v50, %v280_v0  ;;  %v829_v22 = vld [vmem:[%s1484_s3 + $0x29] ss:$0 sm:$0xff]  ;;  %v830_v48 = vld [vmem:[%s1484_s3 + $0x2a] ss:$0 sm:$0xff]  ;;  %v673_v23 = vmul.f32 %v788_v61, %v281_v27  ;;  %v831_v49 = vld [vmem:[%s1484_s3 + $0x2b] ss:$0 sm:$0xff] }
  0x24   :  { %v832_v50 = vld [vmem:[%s1484_s3 + $0x2c] ss:$0 sm:$0xff]  ;;  %v833_v26 = vld [vmem:[%s1484_s3 + $0x2d] ss:$0 sm:$0xff]  ;;  %v674_v28 = vmul.f32 %v789_v2, %v282_v31  ;;  %v675_v29 = vmul.f32 %v790_v6, %v283_v52  ;;  %v676_v30 = vmul.f32 %v791_v36, %v284_v56  ;;  %v1204_v32 = vmul.f32 %v821_v37, %v314_v1  ;;  %v834_v27 = vld [vmem:[%s1484_s3 + $0x2e] ss:$0 sm:$0xff] }
  0x25   :  { %v835_v33 = vld [vmem:[%s1484_s3 + $0x2f] ss:$0 sm:$0xff]  ;;  %v836_v51 = vld [vmem:[%s1484_s3 + $0x30] ss:$0 sm:$0xff]  ;;  %v1215_v53 = vmul.f32 %v822_v9, %v315_v3  ;;  %v1217_v54 = vmul.f32 %v823_v40, %v316_v4  ;;  %v1219_v31 = vmul.f32 %v824_v41, %v317_v5  ;;  %v1221_v52 = vmul.f32 %v825_v19, %v318_v35  ;;  %v792_v61 = vld [vmem:[%s1484_s3 + $0x4] ss:$0 sm:$0xff] }
  0x26   :  { %v1226_v56 = vmul.f32 %v826_v44, %v319_v38  ;;  %v1228_v57 = vmul.f32 %v827_v45, %v320_v39  ;;  %v1230_v58 = vmul.f32 %v828_v21, %v321_v7  ;;  %v1232_v59 = vmul.f32 %v829_v22, %v322_v8  ;;  %v34_v2 = vld [vmem:[%s1481_s0 + $0x60] sm:$0xff]  ;;  %v35_v7 = vld [vmem:[%s1481_s0 + $0x68] sm:$0xff] }
  0x27   :  { %v1237_v62 = vmul.f32 %v830_v48, %v323_v42  ;;  %v1239_v63 = vmul.f32 %v831_v49, %v324_v43  ;;  %v1241_v0 = vmul.f32 %v832_v50, %v325_v10  ;;  %v1243_v1 = vmul.f32 %v833_v26, %v326_v11  ;;  %v793_v39 = vld [vmem:[%s1484_s3 + $0x5] ss:$0 sm:$0xff]  ;;  %v794_v41 = vld [vmem:[%s1484_s3 + $0x6] ss:$0 sm:$0xff] }
  0x28   :  { %v1248_v3 = vmul.f32 %v834_v27, %v327_v46  ;;  %v1250_v4 = vmul.f32 %v835_v33, %v328_v47  ;;  %v1252_v5 = vmul.f32 %v836_v51, %v329_v20  ;;  %v722_v35 = vadd.f32 %v674_v28, %v673_v23  ;;  %v38_v22 = vld [vmem:[%s1481_s0 + $0x80] sm:$0xff] }
  0x29   :  { %v89_v6 = vmul.f32 %v910_v13, %v33_v55  ;;  %v143_v36 = vadd.f32 %v943_v34, %v1041_v12  ;;  %v239_v37 = vmul.f32 0.2, %v1053_v17  ;;  %v286_v38 = vsel %vm188_vm0, %v1047_v15, %v1075_v24 }
  0x2a   :  { %vm190_vm7 = vcmp.gt.f32.partialorder %v1053_v17, 0.0  ;;  %v677_v8 = vmul.f32 %v792_v61, %v1099_v60  ;;  %v723_v12 = vadd.f32 %v722_v35, %v675_v29  ;;  %v90_v9 = vmul.f32 %v910_v13, %v34_v2  ;;  %v36_v60 = vld [vmem:[%s1481_s0 + $0x70] sm:$0xff]  ;;  %v39_v29 = vld [vmem:[%s1481_s0 + $0x88] sm:$0xff] }
  0x2b   :  { %v144_v40 = vadd.f32 %v943_v34, %v1044_v14  ;;  %v240_v15 = vmul.f32 0.2, %v1056_v18  ;;  %v287_v24 = vsel %vm189_vm1, %v1050_v16, %v1078_v25  ;;  %vm191_vm8 = vcmp.gt.f32.partialorder %v1056_v18, 0.0  ;;  %v795_v16 = vld [vmem:[%s1484_s3 + $0x7] ss:$0 sm:$0xff]  ;;  %v37_v25 = vld [vmem:[%s1481_s0 + $0x78] sm:$0xff] }
  0x2c   :  { %v678_v42 = vmul.f32 %v793_v39, %v286_v38  ;;  %v724_v43 = vadd.f32 %v723_v12, %v676_v30  ;;  %v91_v14 = vmul.f32 %v910_v13, %v35_v7  ;;  %v145_v10 = vadd.f32 %v943_v34, %v89_v6  ;;  %v798_v2 = vld [vmem:[%s1484_s3 + $0xa] ss:$0 sm:$0xff]  ;;  %v40_v35 = vld [vmem:[%s1481_s0 + $0x90] sm:$0xff]  ;;  %v41_v12 = vld [vmem:[%s1481_s0 + $0x98] sm:$0xff] }
  0x2d   :  { %v241_v11 = vmul.f32 0.2, %v143_v36  ;;  %v288_v19 = vsel %vm190_vm7, %v1053_v17, %v239_v37  ;;  %vm192_vm9 = vcmp.gt.f32.partialorder %v143_v36, 0.0  ;;  %v679_v44 = vmul.f32 %v794_v41, %v287_v24  ;;  %v796_v17 = vld [vmem:[%s1484_s3 + $0x8] ss:$0 sm:$0xff] }
  0x2e   :  { %v725_v45 = vadd.f32 %v724_v43, %v677_v8  ;;  %v92_v46 = vmul.f32 %v910_v13, %v36_v60  ;;  %v146_v47 = vadd.f32 %v943_v34, %v90_v9  ;;  %v242_v20 = vmul.f32 0.2, %v144_v40  ;;  %v799_v8 = vld [vmem:[%s1484_s3 + $0xb] ss:$0 sm:$0xff]  ;;  %v42_v43 = vld [vmem:[%s1481_s0 + $0xa0] sm:$0xff] }
  0x2f   :  { %v289_v21 = vsel %vm191_vm8, %v1056_v18, %v240_v15  ;;  %vm193_vm10 = vcmp.gt.f32.partialorder %v144_v40, 0.0  ;;  %v680_v48 = vmul.f32 %v795_v16, %v288_v19  ;;  %v93_v49 = vmul.f32 %v910_v13, %v37_v25  ;;  %v797_v18 = vld [vmem:[%s1484_s3 + $0x9] ss:$0 sm:$0xff] }
  0x30   :  { %v726_v23 = vadd.f32 %v725_v45, %v678_v42  ;;  %v147_v50 = vadd.f32 %v943_v34, %v91_v14  ;;  %v243_v26 = vmul.f32 0.2, %v145_v10  ;;  %v290_v28 = vsel %vm192_vm9, %v143_v36, %v241_v11  ;;  %v800_v42 = vld [vmem:[%s1484_s3 + $0xc] ss:$0 sm:$0xff] }
  0x31   :  { %vm194_vm11 = vcmp.gt.f32.partialorder %v145_v10, 0.0  ;;  %v681_v30 = vmul.f32 %v796_v17, %v289_v21  ;;  %v94_v33 = vmul.f32 %v910_v13, %v38_v22  ;;  %v148_v51 = vadd.f32 %v943_v34, %v92_v46  ;;  %v43_v45 = vld [vmem:[%s1481_s0 + $0xa8] sm:$0xff] }
  0x32   :  { %v727_v27 = vadd.f32 %v726_v23, %v679_v44  ;;  %v244_v55 = vmul.f32 0.2, %v146_v47  ;;  %v291_v61 = vsel %vm193_vm10, %v144_v40, %v242_v20  ;;  %vm195_vm12 = vcmp.gt.f32.partialorder %v146_v47, 0.0  ;;  %v801_v44 = vld [vmem:[%s1484_s3 + $0xd] ss:$0 sm:$0xff]  ;;  %v44_v23 = vld [vmem:[%s1481_s0 + $0xb0] sm:$0xff] }
  0x33   :  { %v682_v6 = vmul.f32 %v797_v18, %v290_v28  ;;  %v95_v37 = vmul.f32 %v910_v13, %v39_v29  ;;  %v149_v38 = vadd.f32 %v943_v34, %v93_v49  ;;  %v245_v39 = vmul.f32 0.2, %v147_v50 }
  0x34   :  { %v728_v36 = vadd.f32 %v727_v27, %v680_v48  ;;  %v292_v7 = vsel %vm194_vm11, %v145_v10, %v243_v26  ;;  %vm196_vm13 = vcmp.gt.f32.partialorder %v147_v50, 0.0  ;;  %v683_v9 = vmul.f32 %v798_v2, %v291_v61  ;;  %v802_v48 = vld [vmem:[%s1484_s3 + $0xe] ss:$0 sm:$0xff]  ;;  %v45_v27 = vld [vmem:[%s1481_s0 + $0xb8] sm:$0xff] }
  0x35   :  { %v96_v15 = vmul.f32 %v910_v13, %v40_v35  ;;  %v150_v24 = vadd.f32 %v943_v34, %v94_v33  ;;  %v246_v41 = vmul.f32 0.2, %v148_v51  ;;  %v293_v60 = vsel %vm195_vm12, %v146_v47, %v244_v55 }
  0x36   :  { %v729_v40 = vadd.f32 %v728_v36, %v681_v30  ;;  %vm197_vm14 = vcmp.gt.f32.partialorder %v148_v51, 0.0  ;;  %v684_v14 = vmul.f32 %v799_v8, %v292_v7  ;;  %v97_v11 = vmul.f32 %v910_v13, %v41_v12  ;;  %v803_v30 = vld [vmem:[%s1484_s3 + $0xf] ss:$0 sm:$0xff]  ;;  %v46_v36 = vld [vmem:[%s1481_s0 + $0xc0] sm:$0xff] }
  0x37   :  { %v151_v19 = vadd.f32 %v943_v34, %v95_v37  ;;  %v247_v16 = vmul.f32 0.2, %v149_v38  ;;  %v294_v25 = vsel %vm196_vm13, %v147_v50, %v245_v39  ;;  %vm198_vm15 = vcmp.gt.f32.partialorder %v149_v38, 0.0 }
  0x38   :  { %v730_v10 = vadd.f32 %v729_v40, %v682_v6  ;;  %v685_v46 = vmul.f32 %v800_v42, %v293_v60  ;;  %v98_v20 = vmul.f32 %v910_v13, %v42_v43  ;;  %v152_v21 = vadd.f32 %v943_v34, %v96_v15  ;;  %v804_v6 = vld [vmem:[%s1484_s3 + $0x10] ss:$0 sm:$0xff]  ;;  %v47_v40 = vld [vmem:[%s1481_s0 + $0xc8] sm:$0xff] }
  0x39   :  { %v248_v17 = vmul.f32 0.2, %v150_v24  ;;  %v295_v22 = vsel %vm197_vm14, %v148_v51, %v246_v41  ;;  %vm199_vm0 = vcmp.gt.f32.partialorder %v150_v24, 0.0  ;;  %v686_v49 = vmul.f32 %v801_v44, %v294_v25 }
  0x3a   :  { %v731_v47 = vadd.f32 %v730_v10, %v683_v9  ;;  %v99_v26 = vmul.f32 %v910_v13, %v43_v45  ;;  %v153_v28 = vadd.f32 %v943_v34, %v97_v11  ;;  %v249_v18 = vmul.f32 0.2, %v151_v19  ;;  %v805_v9 = vld [vmem:[%s1484_s3 + $0x11] ss:$0 sm:$0xff] }
  0x3b   :  { %v296_v29 = vsel %vm198_vm15, %v149_v38, %v247_v16  ;;  %vm200_vm1 = vcmp.gt.f32.partialorder %v151_v19, 0.0  ;;  %v687_v33 = vmul.f32 %v802_v48, %v295_v22  ;;  %v100_v55 = vmul.f32 %v910_v13, %v44_v23  ;;  %v48_v10 = vld [vmem:[%s1481_s0 + $0xd0] sm:$0xff] }
  0x3c   :  { %v732_v50 = vadd.f32 %v731_v47, %v684_v14  ;;  %v154_v61 = vadd.f32 %v943_v34, %v98_v20  ;;  %v250_v2 = vmul.f32 0.2, %v152_v21  ;;  %v297_v35 = vsel %vm199_vm0, %v150_v24, %v248_v17  ;;  %v806_v14 = vld [vmem:[%s1484_s3 + $0x12] ss:$0 sm:$0xff]  ;;  %v49_v47 = vld [vmem:[%s1481_s0 + $0xd8] sm:$0xff] }
  0x3d   :  { %vm201_vm2 = vcmp.gt.f32.partialorder %v152_v21, 0.0  ;;  %v688_v37 = vmul.f32 %v803_v30, %v296_v29  ;;  %v101_v39 = vmul.f32 %v910_v13, %v45_v27  ;;  %v155_v7 = vadd.f32 %v943_v34, %v99_v26 }
  0x3e   :  { %v733_v51 = vadd.f32 %v732_v50, %v685_v46  ;;  %v251_v8 = vmul.f32 0.2, %v153_v28  ;;  %v298_v12 = vsel %vm200_vm1, %v151_v19, %v249_v18  ;;  %vm202_vm3 = vcmp.gt.f32.partialorder %v153_v28, 0.0  ;;  %v807_v46 = vld [vmem:[%s1484_s3 + $0x13] ss:$0 sm:$0xff]  ;;  %v50_v50 = vld [vmem:[%s1481_s0 + $0xe0] sm:$0xff] }
  0x3f   :  { %v689_v15 = vmul.f32 %v804_v6, %v297_v35  ;;  %v102_v41 = vmul.f32 %v910_v13, %v46_v36  ;;  %v156_v60 = vadd.f32 %v943_v34, %v100_v55  ;;  %v252_v42 = vmul.f32 0.2, %v154_v61 }
  0x40   :  { %v734_v38 = vadd.f32 %v733_v51, %v686_v49  ;;  %v299_v43 = vsel %vm201_vm2, %v152_v21, %v250_v2  ;;  %vm203_vm4 = vcmp.gt.f32.partialorder %v154_v61, 0.0  ;;  %v690_v11 = vmul.f32 %v805_v9, %v298_v12  ;;  %v808_v49 = vld [vmem:[%s1484_s3 + $0x14] ss:$0 sm:$0xff]  ;;  %v51_v51 = vld [vmem:[%s1481_s0 + $0xe8] sm:$0xff] }
  0x41   :  { %v103_v16 = vmul.f32 %v910_v13, %v47_v40  ;;  %v157_v25 = vadd.f32 %v943_v34, %v101_v39  ;;  %v253_v44 = vmul.f32 0.2, %v155_v7  ;;  %v300_v45 = vsel %vm202_vm3, %v153_v28, %v251_v8 }
  0x42   :  { %v735_v24 = vadd.f32 %v734_v38, %v687_v33  ;;  %vm204_vm5 = vcmp.gt.f32.partialorder %v155_v7, 0.0  ;;  %v691_v20 = vmul.f32 %v806_v14, %v299_v43  ;;  %v104_v17 = vmul.f32 %v910_v13, %v48_v10  ;;  %v809_v33 = vld [vmem:[%s1484_s3 + $0x15] ss:$0 sm:$0xff] }
  0x43   :  { %v158_v22 = vadd.f32 %v943_v34, %v102_v41  ;;  %v254_v48 = vmul.f32 0.2, %v156_v60  ;;  %v301_v23 = vsel %vm203_vm4, %v154_v61, %v252_v42  ;;  %vm205_vm6 = vcmp.gt.f32.partialorder %v156_v60, 0.0  ;;  %v52_v38 = vld [vmem:[%s1481_s0 + $0xf0] sm:$0xff] }
  0x44   :  { %v736_v19 = vadd.f32 %v735_v24, %v688_v37  ;;  %v692_v26 = vmul.f32 %v807_v46, %v300_v45  ;;  %v105_v18 = vmul.f32 %v910_v13, %v49_v47  ;;  %v159_v29 = vadd.f32 %v943_v34, %v103_v16  ;;  %v810_v37 = vld [vmem:[%s1484_s3 + $0x16] ss:$0 sm:$0xff]  ;;  %v53_v24 = vld [vmem:[%s1481_s0 + $0xf8] sm:$0xff] }
  0x45   :  { %v255_v30 = vmul.f32 0.2, %v157_v25  ;;  %v302_v27 = vsel %vm204_vm5, %v155_v7, %v253_v44  ;;  %vm206_vm7 = vcmp.gt.f32.partialorder %v157_v25, 0.0  ;;  %v693_v55 = vmul.f32 %v808_v49, %v301_v23 }
  0x46   :  { %v737_v21 = vadd.f32 %v736_v19, %v689_v15  ;;  %v106_v2 = vmul.f32 %v910_v13, %v50_v50  ;;  %v160_v35 = vadd.f32 %v943_v34, %v104_v17  ;;  %v256_v6 = vmul.f32 0.2, %v158_v22  ;;  %v811_v15 = vld [vmem:[%s1484_s3 + $0x17] ss:$0 sm:$0xff]  ;;  %v54_v19 = vld [vmem:[%s1481_s0 + $0x100] sm:$0xff] }
  0x47   :  { %v303_v36 = vsel %vm205_vm6, %v156_v60, %v254_v48  ;;  %vm207_vm8 = vcmp.gt.f32.partialorder %v158_v22, 0.0  ;;  %v694_v39 = vmul.f32 %v809_v33, %v302_v27  ;;  %v107_v8 = vmul.f32 %v910_v13, %v51_v51  ;;  %v814_v50 = vld [vmem:[%s1484_s3 + $0x1a] ss:$0 sm:$0xff]  ;;  %v815_v27 = vld [vmem:[%s1484_s3 + $0x1b] ss:$0 sm:$0xff] }
  0x48   :  { %v738_v28 = vadd.f32 %v737_v21, %v690_v11  ;;  %v161_v12 = vadd.f32 %v943_v34, %v105_v18  ;;  %v257_v9 = vmul.f32 0.2, %v159_v29  ;;  %v304_v40 = vsel %vm206_vm7, %v157_v25, %v255_v30  ;;  %v812_v11 = vld [vmem:[%s1484_s3 + $0x18] ss:$0 sm:$0xff] }
  0x49   :  { %vm208_vm9 = vcmp.gt.f32.partialorder %v159_v29, 0.0  ;;  %v695_v41 = vmul.f32 %v810_v37, %v303_v36  ;;  %v108_v42 = vmul.f32 %v910_v13, %v52_v38  ;;  %v162_v43 = vadd.f32 %v943_v34, %v106_v2  ;;  %v816_v2 = vld [vmem:[%s1484_s3 + $0x1c] ss:$0 sm:$0xff]  ;;  %v817_v38 = vld [vmem:[%s1484_s3 + $0x1d] ss:$0 sm:$0xff] }
  0x4a   :  { %v739_v61 = vadd.f32 %v738_v28, %v691_v20  ;;  %v258_v14 = vmul.f32 0.2, %v160_v35  ;;  %v305_v10 = vsel %vm207_vm8, %v158_v22, %v256_v6  ;;  %vm209_vm10 = vcmp.gt.f32.partialorder %v160_v35, 0.0  ;;  %v813_v20 = vld [vmem:[%s1484_s3 + $0x19] ss:$0 sm:$0xff] }
  0x4b   :  { %v696_v16 = vmul.f32 %v811_v15, %v304_v40  ;;  %v109_v44 = vmul.f32 %v910_v13, %v53_v24  ;;  %v163_v45 = vadd.f32 %v943_v34, %v107_v8  ;;  %v259_v46 = vmul.f32 0.2, %v161_v12  ;;  %v819_v24 = vld [vmem:[%s1484_s3 + $0x1f] ss:$0 sm:$0xff] }
  0x4c   :  { %v740_v7 = vadd.f32 %v739_v61, %v692_v26  ;;  %v306_v47 = vsel %vm208_vm9, %v159_v29, %v257_v9  ;;  %vm210_vm11 = vcmp.gt.f32.partialorder %v161_v12, 0.0  ;;  %v697_v21 = vmul.f32 %v812_v11, %v305_v10 }
  0x4d   :  { %v110_v22 = vmul.f32 %v910_v13, %v54_v19  ;;  %v164_v48 = vadd.f32 %v943_v34, %v108_v42  ;;  %v260_v23 = vmul.f32 0.2, %v162_v43  ;;  %v307_v49 = vsel %vm209_vm10, %v160_v35, %v258_v14 }
  0x4e   :  { %v741_v60 = vadd.f32 %v740_v7, %v693_v55  ;;  %vm211_vm12 = vcmp.gt.f32.partialorder %v162_v43, 0.0  ;;  %v698_v26 = vmul.f32 %v813_v20, %v306_v47  ;;  %v165_v18 = vadd.f32 %v943_v34, %v109_v44 }
  0x4f   :  { %v261_v29 = vmul.f32 0.2, %v163_v45  ;;  %v308_v30 = vsel %vm210_vm11, %v161_v12, %v259_v46  ;;  %vm212_vm13 = vcmp.gt.f32.partialorder %v163_v45, 0.0  ;;  %v699_v13 = vmul.f32 %v814_v50, %v307_v49  ;;  %v818_v12 = vld [vmem:[%s1484_s3 + $0x1e] ss:$0 sm:$0xff] }
  0x50   :  { %v742_v25 = vadd.f32 %v741_v60, %v694_v39  ;;  %v166_v51 = vadd.f32 %v943_v34, %v110_v22  ;;  %v262_v55 = vmul.f32 0.2, %v164_v48  ;;  %v309_v61 = vsel %vm211_vm12, %v162_v43, %v260_v23  ;;  %v820_v43 = vld [vmem:[%s1484_s3 + $0x20] ss:$0 sm:$0xff] }
  0x51   :  { %vm213_vm14 = vcmp.gt.f32.partialorder %v164_v48, 0.0  ;;  %v700_v35 = vmul.f32 %v815_v27, %v308_v30  ;;  %v263_v36 = vmul.f32 0.2, %v165_v18  ;;  %v310_v37 = vsel %vm212_vm13, %v163_v45, %v261_v29 }
  0x52   :  { %v743_v17 = vadd.f32 %v742_v25, %v695_v41  ;;  %vm214_vm15 = vcmp.gt.f32.partialorder %v165_v18, 0.0  ;;  %v701_v39 = vmul.f32 %v816_v2, %v309_v61  ;;  %v264_v8 = vmul.f32 0.2, %v166_v51 }
  0x53   :  { %v311_v34 = vsel %vm213_vm14, %v164_v48, %v262_v55  ;;  %vm215_vm0 = vcmp.gt.f32.partialorder %v166_v51, 0.0  ;;  %v702_v9 = vmul.f32 %v817_v38, %v310_v37  ;;  %v312_v15 = vsel %vm214_vm15, %v165_v18, %v263_v36 }
  0x54   :  { %v744_v28 = vadd.f32 %v743_v17, %v696_v16  ;;  %v703_v41 = vmul.f32 %v818_v12, %v311_v34  ;;  %v313_v42 = vsel %vm215_vm0, %v166_v51, %v264_v8  ;;  %v704_v14 = vmul.f32 %v819_v24, %v312_v15 }
  0x55   :  { %v705_v11 = vmul.f32 %v820_v43, %v313_v42  ;;  %vm780_vm1 = vcmask 7168  }
  0x56   :  { %v745_v33 = vadd.f32 %v744_v28, %v697_v21 }
  0x58   :  { %v746_v6 = vadd.f32 %v745_v33, %v698_v26 }
  0x5a   :  { %v747_v7 = vadd.f32 %v746_v6, %v699_v13 }
  0x5c   :  { %v748_v40 = vadd.f32 %v747_v7, %v700_v35 }
  0x5e   :  { %v749_v60 = vadd.f32 %v748_v40, %v701_v39 }
  0x60   :  { %v750_v10 = vadd.f32 %v749_v60, %v702_v9 }
  0x62   :  { %v751_v19 = vadd.f32 %v750_v10, %v703_v41 }
  0x64   :  { %v752_v16 = vadd.f32 %v751_v19, %v704_v14 }
  0x66   :  { %v753_v25 = vadd.f32 %v752_v16, %v705_v11 }
  0x68   :  { %v754_v44 = vadd.f32 %v753_v25, %v1204_v32 }
  0x6a   :  { %v755_v45 = vadd.f32 %v754_v44, %v1215_v53 }
  0x6c   :  { %v756_v46 = vadd.f32 %v755_v45, %v1217_v54 }
  0x6e   :  { %v757_v47 = vadd.f32 %v756_v46, %v1219_v31 }
  0x70   :  { %v758_v20 = vadd.f32 %v757_v47, %v1221_v52 }
  0x72   :  { %v759_v21 = vadd.f32 %v758_v20, %v1226_v56 }
  0x74   :  { %v760_v17 = vadd.f32 %v759_v21, %v1228_v57  ;;  %v837_v57 = vld [vmem:[#allocation2] ss:$0 sm:$0xff] }
  0x76   :  { %v761_v22 = vadd.f32 %v760_v17, %v1230_v58 }
  0x78   :  { %v762_v48 = vadd.f32 %v761_v22, %v1232_v59 }
  0x7a   :  { %v763_v23 = vadd.f32 %v762_v48, %v1237_v62 }
  0x7c   :  { %v764_v32 = vadd.f32 %v763_v23, %v1239_v63 }
  0x7e   :  { %v765_v53 = vadd.f32 %v764_v32, %v1241_v0 }
  0x80   :  { %v766_v54 = vadd.f32 %v765_v53, %v1243_v1 }
  0x82   :  { %v767_v31 = vadd.f32 %v766_v54, %v1248_v3 }
  0x84   :  { %v768_v52 = vadd.f32 %v767_v31, %v1250_v4 }
  0x86   :  { %v769_v56 = vadd.f32 %v768_v52, %v1252_v5 }
  0x88   :  { %770 = vadd.xlane.f32.xlu0 %v769_v56 }
 0x115   :  { %v771_v49 = vpop.xlane.xlu0 %770 }
 0x116   :  { %v779_v58 = vadd.f32 %v837_v57, %v771_v49 }
 0x118   :  { %781 = vst.msk [vmem:[%s1485_s5] sm:$0xff] %vm780_vm1, %v779_v58 }

// kernel: critic_forward.2
= control target key start
LH: loop header
LB: loop body
LE: loop exit
PB: predicated region body
PF: predicated region fallthrough
CT: control target
= control target key end

     0   :  { %vm224_vm0 = vcmask 130048   ;;  %v22341_v47 = vmov 0.0|0.0   ;;  %vm16571_vm1 = vmmov 0   ;;  %vm2463_vm3 = vcmask 523264   ;;  %s22335_s1 = inlined_call_operand.vmem [shape: f32[16,64], index: 1, kind: input, shape index: {}]   ;;  %s22336_s0 = inlined_call_operand.vmem [shape: f32[2,2,7,7,8,16], index: 0, kind: input, shape index: {}]   ;;  %s22337_s3 = inlined_call_operand.vmem [shape: f32[16,64,128], index: 3, kind: input, shape index: {}]   ;;  %s22338_s2 = inlined_call_operand.vmem [shape: f32[1,64], index: 2, kind: input, shape index: {}]   ;;  %s22339_s4 = inlined_call_operand.vmem [shape: f32[49,8,128], index: 4, kind: output, shape index: {0}]   ;;  %s22340_s5 = inlined_call_operand.vmem [shape: f32[1,2,128], index: 5, kind: output, shape index: {1}]  }
   0x1   :  { %v215_v0 = vld [vmem:[%s22335_s1] sm:$0xff]  ;;  %v216_v1 = vld [vmem:[%s22335_s1 + $0x8] sm:$0xff]  ;;  %v21_v5 = vld [vmem:[%s22336_s0 + $0x10] sm:$0xff]  ;;  %15133 = vmatprep.subr.bf16.mxu1 %v22341_v47 }
   0x2   :  { %v19_v2 = vld [vmem:[%s22336_s0] sm:$0xff]  ;;  %v14937_v3 = vpack.c.bf16 %v216_v1, %v215_v0  ;;  %v20_v4 = vld [vmem:[%s22336_s0 + $0x8] sm:$0xff]  ;;  %v22_v6 = vld [vmem:[%s22336_s0 + $0x18] sm:$0xff] }
   0x3   :  { %12035 = vmatprep.mubr.msk.f32.mxu0 %vm224_vm0, %v19_v2  ;;  %v23_v7 = vld [vmem:[%s22336_s0 + $0x20] sm:$0xff]  ;;  %v24_v8 = vld [vmem:[%s22336_s0 + $0x28] sm:$0xff]  ;;  %v25_v9 = vld [vmem:[%s22336_s0 + $0x30] sm:$0xff] }
   0x4   :  { %14938 = vmatprep.subr.bf16.mxu0 %v14937_v3  ;;  %v26_v10 = vld [vmem:[%s22336_s0 + $0x38] sm:$0xff]  ;;  %v27_v11 = vld [vmem:[%s22336_s0 + $0x40] sm:$0xff]  ;;  %v28_v12 = vld [vmem:[%s22336_s0 + $0x48] sm:$0xff] }
   0x5   :  { %14940 = vmatpush3.bf16.msra.mxu0 %v14937_v3  ;;  %v29_v13 = vld [vmem:[%s22336_s0 + $0x50] sm:$0xff]  ;;  %v30_v14 = vld [vmem:[%s22336_s0 + $0x58] sm:$0xff]  ;;  %v31_v15 = vld [vmem:[%s22336_s0 + $0x60] sm:$0xff] }
   0x6   :  { %v32_v16 = vld [vmem:[%s22336_s0 + $0x68] sm:$0xff]  ;;  %v33_v17 = vld [vmem:[%s22336_s0 + $0x70] sm:$0xff]  ;;  %v34_v18 = vld [vmem:[%s22336_s0 + $0x78] sm:$0xff]  ;;  %14941 = vmatprep.subr.bf16.mxu0 %v22341_v47 }
   0x7   :  { %v35_v19 = vld [vmem:[%s22336_s0 + $0x80] sm:$0xff]  ;;  %v36_v20 = vld [vmem:[%s22336_s0 + $0x88] sm:$0xff]  ;;  %v37_v21 = vld [vmem:[%s22336_s0 + $0x90] sm:$0xff] }
   0x8   :  { %12036 = vmatmul.mubr.msk.f32.vlgmr.msra.gmra.mrb[0].mxu0 %vm224_vm0, %v20_v4  ;;  %v38_v22 = vld [vmem:[%s22336_s0 + $0x98] sm:$0xff]  ;;  %v39_v23 = vld [vmem:[%s22336_s0 + $0xa0] sm:$0xff]  ;;  %v40_v24 = vld [vmem:[%s22336_s0 + $0xa8] sm:$0xff] }
   0x9   :  { %12038 = vmatprep.mubr.msk.f32.mxu0 %vm224_vm0, %v21_v5  ;;  %v41_v25 = vld [vmem:[%s22336_s0 + $0xb0] sm:$0xff]  ;;  %v42_v26 = vld [vmem:[%s22336_s0 + $0xb8] sm:$0xff]  ;;  %v43_v27 = vld [vmem:[%s22336_s0 + $0xc0] sm:$0xff]  ;;  %v22345_v5 = vmov 0.0  }
   0xa   :  { %v44_v28 = vld [vmem:[%s22336_s0 + $0xc8] sm:$0xff]  ;;  %v45_v29 = vld [vmem:[%s22336_s0 + $0xd0] sm:$0xff]  ;;  %v46_v30 = vld [vmem:[%s22336_s0 + $0xd8] sm:$0xff]  ;;  %13489 = vmatprep.mubr.msk.f32.mxu1 %vm16571_vm1, %v22345_v5 }
   0xb   :  { %v47_v31 = vld [vmem:[%s22336_s0 + $0xe0] sm:$0xff]  ;;  %v48_v32 = vld [vmem:[%s22336_s0 + $0xe8] sm:$0xff]  ;;  %v49_v33 = vld [vmem:[%s22336_s0 + $0xf0] sm:$0xff] }
   0xc   :  { %12039 = vmatmul.mubr.msk.f32.gmra.mrb[2].mxu0 %vm224_vm0, %v22_v6  ;;  %v50_v34 = vld [vmem:[%s22336_s0 + $0xf8] sm:$0xff]  ;;  %v51_v35 = vld [vmem:[%s22336_s0 + $0x100] sm:$0xff]  ;;  %v52_v36 = vld [vmem:[%s22336_s0 + $0x108] sm:$0xff] }
   0xd   :  { %12041 = vmatprep.mubr.msk.f32.mxu0 %vm224_vm0, %v23_v7  ;;  %v53_v37 = vld [vmem:[%s22336_s0 + $0x110] sm:$0xff]  ;;  %v54_v38 = vld [vmem:[%s22336_s0 + $0x118] sm:$0xff]  ;;  %v55_v39 = vld [vmem:[%s22336_s0 + $0x120] sm:$0xff] }
   0xe   :  { %v56_v40 = vld [vmem:[%s22336_s0 + $0x128] sm:$0xff]  ;;  %v57_v41 = vld [vmem:[%s22336_s0 + $0x130] sm:$0xff]  ;;  %v58_v42 = vld [vmem:[%s22336_s0 + $0x138] sm:$0xff] }
   0xf   :  { %v59_v43 = vld [vmem:[%s22336_s0 + $0x140] sm:$0xff]  ;;  %v10470_v45 = vld [vmem:[%s22337_s3 + $0x1c8] sm:$0xff]  ;;  %v61_v49 = vld [vmem:[%s22336_s0 + $0x150] sm:$0xff] }
  0x10   :  { %12042 = vmatmul.mubr.msk.f32.gmra.mrb[4].mxu0 %vm224_vm0, %v24_v8  ;;  %v10469_v44 = vld [vmem:[%s22337_s3 + $0x1c0] sm:$0xff]  ;;  %v60_v46 = vld [vmem:[%s22336_s0 + $0x148] sm:$0xff]  ;;  %v10471_v50 = vld [vmem:[%s22337_s3 + $0x1d0] sm:$0xff] }
  0x11   :  { %12044 = vmatprep.mubr.msk.f32.mxu0 %vm224_vm0, %v25_v9  ;;  %v16783_v48 = vpack.c.bf16 %v10470_v45, %v10469_v44  ;;  %v10472_v51 = vld [vmem:[%s22337_s3 + $0x1d8] sm:$0xff]  ;;  %v63_v54 = vld [vmem:[%s22336_s0 + $0x160] sm:$0xff]  ;;  %v10126_v56 = vld [vmem:[%s22337_s3 + $0x48] sm:$0xff] }
  0x12   :  { %v62_v52 = vld [vmem:[%s22336_s0 + $0x158] sm:$0xff]  ;;  %v16802_v53 = vpack.c.bf16 %v10472_v51, %v10471_v50  ;;  %v10125_v55 = vld [vmem:[%s22337_s3 + $0x40] sm:$0xff]  ;;  %v64_v58 = vld [vmem:[%s22336_s0 + $0x168] sm:$0xff] }
  0x13   :  { %22522 = vst [vmem:[#allocation2_spill] sm:$0xff] %v16783_v48  ;;  %15137 = vmatpush3.bf16.msra.mxu1 %v16783_v48  ;;  %v10473_v57 = vld [vmem:[%s22337_s3 + $0x1e0] sm:$0xff]  ;;  %v14942_v59 = vpack.c.bf16 %v10126_v56, %v10125_v55  ;;  %v10474_v60 = vld [vmem:[%s22337_s3 + $0x1e8] sm:$0xff]  ;;  %v65_v61 = vld [vmem:[%s22336_s0 + $0x170] sm:$0xff] }
  0x14   :  { %12045 = vmatmul.mubr.msk.f32.gmra.mrb[6].mxu0 %vm224_vm0, %v26_v10  ;;  %15134 = vmatprep.subr.bf16.mxu1 %v22341_v47  ;;  %22523 = vst [vmem:[#allocation3_spill] sm:$0xff] %v16802_v53  ;;  %v16829_v62 = vpack.c.bf16 %v10474_v60, %v10473_v57  ;;  %v10475_v63 = vld [vmem:[%s22337_s3 + $0x1f0] sm:$0xff]  ;;  %v10476_v0 = vld [vmem:[%s22337_s3 + $0x1f8] sm:$0xff]  ;;  %v67_v3 = vld [vmem:[%s22336_s0 + $0x180] sm:$0xff] }
  0x15   :  { %12047 = vmatprep.mubr.msk.f32.mxu0 %vm224_vm0, %v27_v11  ;;  %14943 = vmatpush3.bf16.msra.mxu0 %v14942_v59  ;;  %v66_v1 = vld [vmem:[%s22336_s0 + $0x178] sm:$0xff]  ;;  %v16844_v2 = vpack.c.bf16 %v10476_v0, %v10475_v63  ;;  %v68_v4 = vld [vmem:[%s22336_s0 + $0x188] sm:$0xff]  ;;  %v69_v6 = vld [vmem:[%s22336_s0 + $0x190] sm:$0xff] }
  0x16   :  { %22524 = vst [vmem:[#allocation4_spill] sm:$0xff] %v16829_v62  ;;  %14944 = vmatprep.subr.bf16.mxu0 %v22341_v47  ;;  %v70_v7 = vld [vmem:[%s22336_s0 + $0x198] sm:$0xff]  ;;  %v71_v8 = vld [vmem:[%s22336_s0 + $0x1a0] sm:$0xff]  ;;  %v72_v9 = vld [vmem:[%s22336_s0 + $0x1a8] sm:$0xff] }
  0x17   :  { %15138 = vmatpush3.bf16.msra.mxu1 %v16802_v53  ;;  %22525 = vst [vmem:[#allocation5_spill] sm:$0xff] %v16844_v2  ;;  %v73_v10 = vld [vmem:[%s22336_s0 + $0x1b0] sm:$0xff]  ;;  %v74_v11 = vld [vmem:[%s22336_s0 + $0x1b8] sm:$0xff]  ;;  %v107_v44 = vld [vmem:[%s22336_s0 + $0x2c0] sm:$0xff] }
  0x18   :  { %12048 = vmatmul.mubr.msk.f32.gmra.mrb[8].mxu0 %vm224_vm0, %v28_v12  ;;  %15135 = vmatprep.subr.bf16.mxu1 %v22341_v47  ;;  %v75_v12 = vld [vmem:[%s22336_s0 + $0x1c0] sm:$0xff]  ;;  %v108_v45 = vld [vmem:[%s22336_s0 + $0x2c8] sm:$0xff]  ;;  %v10128_v55 = vld [vmem:[%s22337_s3 + $0x58] sm:$0xff] }
  0x19   :  { %12050 = vmatprep.mubr.msk.f32.mxu0 %vm224_vm0, %v29_v13  ;;  %v76_v13 = vld [vmem:[%s22336_s0 + $0x1c8] sm:$0xff]  ;;  %v111_v50 = vld [vmem:[%s22336_s0 + $0x2e0] sm:$0xff]  ;;  %v114_v57 = vld [vmem:[%s22336_s0 + $0x2f8] sm:$0xff] }
  0x1a   :  { %v112_v51 = vld [vmem:[%s22336_s0 + $0x2e8] sm:$0xff]  ;;  %v117_v60 = vld [vmem:[%s22336_s0 + $0x310] sm:$0xff]  ;;  %v119_v63 = vld [vmem:[%s22336_s0 + $0x320] sm:$0xff] }
  0x1b   :  { %15139 = vmatpush3.bf16.msra.mxu1 %v16829_v62  ;;  %v116_v59 = vld [vmem:[%s22336_s0 + $0x308] sm:$0xff] }
  0x1c   :  { %12051 = vmatmul.mubr.msk.f32.gmra.mrb[10].mxu0 %vm224_vm0, %v30_v14  ;;  %15136 = vmatprep.subr.bf16.mxu1 %v22341_v47  ;;  %v77_v14 = vld [vmem:[%s22336_s0 + $0x1d0] sm:$0xff]  ;;  %v120_v0 = vld [vmem:[%s22336_s0 + $0x328] sm:$0xff] }
  0x1d   :  { %12053 = vmatprep.mubr.msk.f32.mxu0 %vm224_vm0, %v31_v15  ;;  %v78_v15 = vld [vmem:[%s22336_s0 + $0x1d8] sm:$0xff] }
  0x1f   :  { %15140 = vmatpush3.bf16.msra.mxu1 %v16844_v2 }
  0x20   :  { %12054 = vmatmul.mubr.msk.f32.gmra.mrb[12].mxu0 %vm224_vm0, %v32_v16  ;;  %15037 = vmatprep.subr.bf16.mxu1 %v22341_v47  ;;  %v79_v16 = vld [vmem:[%s22336_s0 + $0x1e0] sm:$0xff] }
  0x21   :  { %12056 = vmatprep.mubr.msk.f32.mxu0 %vm224_vm0, %v33_v17  ;;  %v80_v17 = vld [vmem:[%s22336_s0 + $0x1e8] sm:$0xff] }
  0x24   :  { %12057 = vmatmul.mubr.msk.f32.gmra.mrb[14].mxu0 %vm224_vm0, %v34_v18  ;;  %v81_v18 = vld [vmem:[%s22336_s0 + $0x1f0] sm:$0xff] }
  0x25   :  { %12059 = vmatprep.mubr.msk.f32.mxu0 %vm224_vm0, %v35_v19  ;;  %v82_v19 = vld [vmem:[%s22336_s0 + $0x1f8] sm:$0xff] }
  0x28   :  { %12060 = vmatmul.mubr.msk.f32.gmra.mrb[16].mxu0 %vm224_vm0, %v36_v20  ;;  %v83_v20 = vld [vmem:[%s22336_s0 + $0x200] sm:$0xff] }
  0x29   :  { %12062 = vmatprep.mubr.msk.f32.mxu0 %vm224_vm0, %v37_v21  ;;  %v84_v21 = vld [vmem:[%s22336_s0 + $0x208] sm:$0xff] }
  0x2c   :  { %12063 = vmatmul.mubr.msk.f32.gmra.mrb[18].mxu0 %vm224_vm0, %v38_v22  ;;  %v85_v22 = vld [vmem:[%s22336_s0 + $0x210] sm:$0xff] }
  0x2d   :  { %12065 = vmatprep.mubr.msk.f32.mxu0 %vm224_vm0, %v39_v23  ;;  %v86_v23 = vld [vmem:[%s22336_s0 + $0x218] sm:$0xff] }
  0x30   :  { %12066 = vmatmul.mubr.msk.f32.gmra.mrb[20].mxu0 %vm224_vm0, %v40_v24  ;;  %v87_v24 = vld [vmem:[%s22336_s0 + $0x220] sm:$0xff] }
  0x31   :  { %12068 = vmatprep.mubr.msk.f32.mxu0 %vm224_vm0, %v41_v25  ;;  %v88_v25 = vld [vmem:[%s22336_s0 + $0x228] sm:$0xff] }
  0x34   :  { %12069 = vmatmul.mubr.msk.f32.gmra.mrb[22].mxu0 %vm224_vm0, %v42_v26  ;;  %v89_v26 = vld [vmem:[%s22336_s0 + $0x230] sm:$0xff] }
  0x35   :  { %12071 = vmatprep.mubr.msk.f32.mxu0 %vm224_vm0, %v43_v27  ;;  %v90_v27 = vld [vmem:[%s22336_s0 + $0x238] sm:$0xff] }
  0x38   :  { %12072 = vmatmul.mubr.msk.f32.gmra.mrb[24].mxu0 %vm224_vm0, %v44_v28  ;;  %v91_v28 = vld [vmem:[%s22336_s0 + $0x240] sm:$0xff] }
  0x39   :  { %12074 = vmatprep.mubr.msk.f32.mxu0 %vm224_vm0, %v45_v29  ;;  %v92_v29 = vld [vmem:[%s22336_s0 + $0x248] sm:$0xff] }
  0x3c   :  { %12075 = vmatmul.mubr.msk.f32.gmra.mrb[26].mxu0 %vm224_vm0, %v46_v30  ;;  %v93_v30 = vld [vmem:[%s22336_s0 + $0x250] sm:$0xff] }
  0x3d   :  { %12077 = vmatprep.mubr.msk.f32.mxu0 %vm224_vm0, %v47_v31  ;;  %v94_v31 = vld [vmem:[%s22336_s0 + $0x258] sm:$0xff] }
  0x40   :  { %12078 = vmatmul.mubr.msk.f32.gmra.mrb[28].mxu0 %vm224_vm0, %v48_v32  ;;  %v95_v32 = vld [vmem:[%s22336_s0 + $0x260] sm:$0xff] }
  0x41   :  { %12080 = vmatprep.mubr.msk.f32.mxu0 %vm224_vm0, %v49_v33  ;;  %v96_v33 = vld [vmem:[%s22336_s0 + $0x268] sm:$0xff] }
  0x44   :  { %12081 = vmatmul.mubr.msk.f32.gmra.mrb[30].mxu0 %vm224_vm0, %v50_v34  ;;  %v97_v34 = vld [vmem:[%s22336_s0 + $0x270] sm:$0xff] }
  0x45   :  { %12083 = vmatprep.mubr.msk.f32.mxu0 %vm224_vm0, %v51_v35  ;;  %v98_v35 = vld [vmem:[%s22336_s0 + $0x278] sm:$0xff] }
  0x48   :  { %12084 = vmatmul.mubr.msk.f32.gmra.mrb[32].mxu0 %vm224_vm0, %v52_v36  ;;  %v99_v36 = vld [vmem:[%s22336_s0 + $0x280] sm:$0xff] }
  0x49   :  { %12086 = vmatprep.mubr.msk.f32.mxu0 %vm224_vm0, %v53_v37  ;;  %v100_v37 = vld [vmem:[%s22336_s0 + $0x288] sm:$0xff] }
  0x4c   :  { %12087 = vmatmul.mubr.msk.f32.gmra.mrb[34].mxu0 %vm224_vm0, %v54_v38  ;;  %v101_v38 = vld [vmem:[%s22336_s0 + $0x290] sm:$0xff] }
  0x4d   :  { %12089 = vmatprep.mubr.msk.f32.mxu0 %vm224_vm0, %v55_v39  ;;  %v102_v39 = vld [vmem:[%s22336_s0 + $0x298] sm:$0xff] }
  0x50   :  { %12090 = vmatmul.mubr.msk.f32.gmra.mrb[36].mxu0 %vm224_vm0, %v56_v40  ;;  %v103_v40 = vld [vmem:[%s22336_s0 + $0x2a0] sm:$0xff] }
  0x51   :  { %12092 = vmatprep.mubr.msk.f32.mxu0 %vm224_vm0, %v57_v41  ;;  %v104_v41 = vld [vmem:[%s22336_s0 + $0x2a8] sm:$0xff] }
  0x54   :  { %12093 = vmatmul.mubr.msk.f32.gmra.mrb[38].mxu0 %vm224_vm0, %v58_v42  ;;  %v105_v42 = vld [vmem:[%s22336_s0 + $0x2b0] sm:$0xff] }
  0x55   :  { %12095 = vmatprep.mubr.msk.f32.mxu0 %vm224_vm0, %v59_v43  ;;  %v106_v43 = vld [vmem:[%s22336_s0 + $0x2b8] sm:$0xff] }
  0x58   :  { %12096 = vmatmul.mubr.msk.f32.gmra.mrb[40].mxu0 %vm224_vm0, %v60_v46  ;;  %v109_v46 = vld [vmem:[%s22336_s0 + $0x2d0] sm:$0xff] }
  0x59   :  { %12098 = vmatprep.mubr.msk.f32.mxu0 %vm224_vm0, %v61_v49  ;;  %v110_v49 = vld [vmem:[%s22336_s0 + $0x2d8] sm:$0xff] }
  0x5c   :  { %12099 = vmatmul.mubr.msk.f32.gmra.mrb[42].mxu0 %vm224_vm0, %v62_v52  ;;  %v113_v52 = vld [vmem:[%s22336_s0 + $0x2f0] sm:$0xff] }
  0x5d   :  { %12101 = vmatprep.mubr.msk.f32.mxu0 %vm224_vm0, %v63_v54  ;;  %v10127_v54 = vld [vmem:[%s22337_s3 + $0x50] sm:$0xff] }
  0x5e   :  { %v14945_v56 = vpack.c.bf16 %v10128_v55, %v10127_v54  ;;  %v139_v54 = vld [vmem:[%s22336_s0 + $0x3c0] sm:$0xff] }
  0x60   :  { %12102 = vmatmul.mubr.msk.f32.gmra.mrb[44].mxu0 %vm224_vm0, %v64_v58  ;;  %v115_v58 = vld [vmem:[%s22336_s0 + $0x300] sm:$0xff] }
  0x61   :  { %12104 = vmatprep.mubr.msk.f32.mxu0 %vm224_vm0, %v65_v61  ;;  %14946 = vmatpush3.bf16.msra.mxu0 %v14945_v56  ;;  %v118_v61 = vld [vmem:[%s22336_s0 + $0x318] sm:$0xff]  ;;  %v10521_v56 = vld [vmem:[%s22337_s3 + $0x210] sm:$0xff] }
  0x62   :  { %14947 = vmatprep.subr.bf16.mxu0 %v22341_v47 }
  0x64   :  { %12105 = vmatmul.mubr.msk.f32.gmra.mrb[46].mxu0 %vm224_vm0, %v66_v1  ;;  %v121_v1 = vld [vmem:[%s22336_s0 + $0x330] sm:$0xff] }
  0x65   :  { %12107 = vmatprep.mubr.msk.f32.mxu0 %vm224_vm0, %v67_v3  ;;  %v122_v3 = vld [vmem:[%s22336_s0 + $0x338] sm:$0xff] }
  0x68   :  { %12108 = vmatmul.mubr.msk.f32.gmra.mrb[48].mxu0 %vm224_vm0, %v68_v4  ;;  %v123_v4 = vld [vmem:[%s22336_s0 + $0x340] sm:$0xff] }
  0x69   :  { %12110 = vmatprep.mubr.msk.f32.mxu0 %vm224_vm0, %v69_v6  ;;  %v124_v6 = vld [vmem:[%s22336_s0 + $0x348] sm:$0xff] }
  0x6c   :  { %12111 = vmatmul.mubr.msk.f32.gmra.mrb[50].mxu0 %vm224_vm0, %v70_v7  ;;  %v125_v7 = vld [vmem:[%s22336_s0 + $0x350] sm:$0xff] }
  0x6d   :  { %12113 = vmatprep.mubr.msk.f32.mxu0 %vm224_vm0, %v71_v8  ;;  %v126_v8 = vld [vmem:[%s22336_s0 + $0x358] sm:$0xff] }
  0x70   :  { %12114 = vmatmul.mubr.msk.f32.gmra.mrb[52].mxu0 %vm224_vm0, %v72_v9  ;;  %v127_v9 = vld [vmem:[%s22336_s0 + $0x360] sm:$0xff] }
  0x71   :  { %12116 = vmatprep.mubr.msk.f32.mxu0 %vm224_vm0, %v73_v10 }
  0x74   :  { %12117 = vmatmul.mubr.msk.f32.gmra.mrb[54].mxu0 %vm224_vm0, %v74_v11 }
  0x75   :  { %12119 = vmatprep.mubr.msk.f32.mxu0 %vm224_vm0, %v75_v12  ;;  %v128_v12 = vld [vmem:[%s22336_s0 + $0x368] sm:$0xff] }
  0x78   :  { %12120 = vmatmul.mubr.msk.f32.gmra.mrb[56].mxu0 %vm224_vm0, %v76_v13  ;;  %v129_v13 = vld [vmem:[%s22336_s0 + $0x370] sm:$0xff] }
  0x79   :  { %12122 = vmatprep.mubr.msk.f32.mxu0 %vm224_vm0, %v77_v14 }
  0x7c   :  { %12123 = vmatmul.mubr.msk.f32.gmra.mrb[58].mxu0 %vm224_vm0, %v78_v15 }
  0x7d   :  { %12125 = vmatprep.mubr.msk.f32.mxu0 %vm224_vm0, %v79_v16  ;;  %v17117_v16 = vld [vmem:[%s22338_s2] ss:$0 sm:$0xff] }
  0x80   :  { %12126 = vmatmul.mubr.msk.f32.gmra.mrb[60].mxu0 %vm224_vm0, %v80_v17  ;;  %v10519_v17 = vld [vmem:[%s22337_s3 + $0x200] sm:$0xff] }
  0x81   :  { %12128 = vmatprep.mubr.msk.f32.mxu0 %vm224_vm0, %v81_v18  ;;  %v10520_v18 = vld [vmem:[%s22337_s3 + $0x208] sm:$0xff] }
  0x84   :  { %12129 = vmatmul.mubr.msk.f32.gmra.mrb[62].mxu0 %vm224_vm0, %v82_v19  ;;  %v130_v19 = vld [vmem:[%s22336_s0 + $0x378] sm:$0xff] }
  0x85   :  { %12131 = vmatprep.mubr.msk.f32.mxu0 %vm224_vm0, %v83_v20 }
  0x88   :  { %12132 = vmatmul.mubr.msk.f32.gmra.mrb[64].mxu0 %vm224_vm0, %v84_v21 }
  0x89   :  { %12134 = vmatprep.mubr.msk.f32.mxu0 %vm224_vm0, %v85_v22  ;;  %v131_v22 = vld [vmem:[%s22336_s0 + $0x380] sm:$0xff] }
  0x8c   :  { %12135 = vmatmul.mubr.msk.f32.gmra.mrb[66].mxu0 %vm224_vm0, %v86_v23 }
  0x8d   :  { %12137 = vmatprep.mubr.msk.f32.mxu0 %vm224_vm0, %v87_v24 }
  0x90   :  { %12138 = vmatmul.mubr.msk.f32.gmra.mrb[68].mxu0 %vm224_vm0, %v88_v25  ;;  %v15038_v25 = vpack.c.bf16 %v10520_v18, %v10519_v17  ;;  %v145_v18 = vld [vmem:[%s22336_s0 + $0x3f0] sm:$0xff] }
  0x91   :  { %12140 = vmatprep.mubr.msk.f32.mxu0 %vm224_vm0, %v89_v26 }
  0x94   :  { %12141 = vmatmul.mubr.msk.f32.gmra.mrb[70].mxu0 %vm224_vm0, %v90_v27 }
  0x95   :  { %12143 = vmatprep.mubr.msk.f32.mxu0 %vm224_vm0, %v91_v28  ;;  %v132_v28 = vld [vmem:[%s22336_s0 + $0x388] sm:$0xff] }
  0x98   :  { %12144 = vmatmul.mubr.msk.f32.gmra.mrb[72].mxu0 %vm224_vm0, %v92_v29 }
  0x99   :  { %12146 = vmatprep.mubr.msk.f32.mxu0 %vm224_vm0, %v93_v30 }
  0x9c   :  { %12147 = vmatmul.mubr.msk.f32.gmra.mrb[74].mxu0 %vm224_vm0, %v94_v31  ;;  %v133_v31 = vld [vmem:[%s22336_s0 + $0x390] sm:$0xff] }
  0x9d   :  { %12149 = vmatprep.mubr.msk.f32.mxu0 %vm224_vm0, %v95_v32 }
  0xa0   :  { %12150 = vmatmul.mubr.msk.f32.gmra.mrb[76].mxu0 %vm224_vm0, %v96_v33 }
  0xa1   :  { %12152 = vmatprep.mubr.msk.f32.mxu0 %vm224_vm0, %v97_v34 }
  0xa4   :  { %12153 = vmatmul.mubr.msk.f32.gmra.mrb[78].mxu0 %vm224_vm0, %v98_v35  ;;  %v134_v35 = vld [vmem:[%s22336_s0 + $0x398] sm:$0xff] }
  0xa5   :  { %12155 = vmatprep.mubr.msk.f32.mxu0 %vm224_vm0, %v99_v36 }
  0xa8   :  { %12156 = vmatmul.mubr.msk.f32.gmra.mrb[80].mxu0 %vm224_vm0, %v100_v37 }
  0xa9   :  { %12158 = vmatprep.mubr.msk.f32.mxu0 %vm224_vm0, %v101_v38  ;;  %v135_v38 = vld [vmem:[%s22336_s0 + $0x3a0] sm:$0xff] }
  0xac   :  { %12159 = vmatmul.mubr.msk.f32.gmra.mrb[82].mxu0 %vm224_vm0, %v102_v39 }
  0xad   :  { %12161 = vmatprep.mubr.msk.f32.mxu0 %vm224_vm0, %v103_v40 }
  0xb0   :  { %12162 = vmatmul.mubr.msk.f32.gmra.mrb[84].mxu0 %vm224_vm0, %v104_v41 }
  0xb1   :  { %12164 = vmatprep.mubr.msk.f32.mxu0 %vm224_vm0, %v105_v42  ;;  %v136_v42 = vld [vmem:[%s22336_s0 + $0x3a8] sm:$0xff] }
  0xb4   :  { %12165 = vmatmul.mubr.msk.f32.gmra.mrb[86].mxu0 %vm224_vm0, %v106_v43 }
  0xb5   :  { %12167 = vmatprep.mubr.msk.f32.mxu0 %vm224_vm0, %v107_v44 }
  0xb8   :  { %12168 = vmatmul.mubr.msk.f32.gmra.mrb[88].mxu0 %vm224_vm0, %v108_v45  ;;  %v137_v45 = vld [vmem:[%s22336_s0 + $0x3b0] sm:$0xff] }
  0xb9   :  { %12170 = vmatprep.mubr.msk.f32.mxu0 %vm224_vm0, %v109_v46 }
  0xbc   :  { %12171 = vmatmul.mubr.msk.f32.gmra.mrb[90].mxu0 %vm224_vm0, %v110_v49 }
  0xbd   :  { %12173 = vmatprep.mubr.msk.f32.mxu0 %vm224_vm0, %v111_v50 }
  0xc0   :  { %12174 = vmatmul.mubr.msk.f32.gmra.mrb[92].mxu0 %vm224_vm0, %v112_v51  ;;  %v138_v51 = vld [vmem:[%s22336_s0 + $0x3b8] sm:$0xff] }
  0xc1   :  { %12176 = vmatprep.mubr.msk.f32.mxu0 %vm224_vm0, %v113_v52 }
  0xc4   :  { %12177 = vmatmul.mubr.msk.f32.gmra.mrb[94].mxu0 %vm224_vm0, %v114_v57  ;;  %v10522_v57 = vld [vmem:[%s22337_s3 + $0x218] sm:$0xff] }
  0xc5   :  { %12179 = vmatprep.mubr.msk.f32.mxu0 %vm224_vm0, %v115_v58 }
  0xc8   :  { %12180 = vmatmul.mubr.msk.f32.gmra.mrb[96].mxu0 %vm224_vm0, %v116_v59  ;;  %v15041_v59 = vpack.c.bf16 %v10522_v57, %v10521_v56  ;;  %v152_v57 = vld [vmem:[%s22336_s0 + $0x428] sm:$0xff] }
  0xc9   :  { %12182 = vmatprep.mubr.msk.f32.mxu0 %vm224_vm0, %v117_v60 }
  0xcc   :  { %12183 = vmatmul.mubr.msk.f32.gmra.mrb[98].mxu0 %vm224_vm0, %v118_v61  ;;  %v140_v61 = vld [vmem:[%s22336_s0 + $0x3c8] sm:$0xff] }
  0xcd   :  { %12185 = vmatprep.mubr.msk.f32.mxu0 %vm224_vm0, %v119_v63 }
  0xd0   :  { %12186 = vmatmul.mubr.msk.f32.gmra.mrb[100].mxu0 %vm224_vm0, %v120_v0  ;;  %v141_v0 = vld [vmem:[%s22336_s0 + $0x3d0] sm:$0xff] }
  0xd1   :  { %12188 = vmatprep.mubr.msk.f32.mxu0 %vm224_vm0, %v121_v1 }
  0xd4   :  { %12189 = vmatmul.mubr.msk.f32.gmra.mrb[102].mxu0 %vm224_vm0, %v122_v3 }
  0xd5   :  { %12191 = vmatprep.mubr.msk.f32.mxu0 %vm224_vm0, %v123_v4  ;;  %v142_v4 = vld [vmem:[%s22336_s0 + $0x3d8] sm:$0xff] }
  0xd8   :  { %12192 = vmatmul.mubr.msk.f32.gmra.mrb[104].mxu0 %vm224_vm0, %v124_v6 }
  0xd9   :  { %12194 = vmatprep.mubr.msk.f32.mxu0 %vm224_vm0, %v125_v7 }
  0xdb   :  { %v17101_v10 = vpop.f32.mrb[0].mxu0 }
  0xdc   :  { %22526 = vst [vmem:[#allocation6_spill] sm:$0xff] %v17101_v10  ;;  %v17103_v11 = vpop.f32.mrb[1].mxu0  ;;  %12195 = vmatmul.mubr.msk.f32.gmra.mrb[106].mxu0 %vm224_vm0, %v126_v8  ;;  %v143_v8 = vld [vmem:[%s22336_s0 + $0x3e0] sm:$0xff] }
  0xdd   :  { %22527 = vst [vmem:[#allocation7_spill] sm:$0xff] %v17103_v11  ;;  %12197 = vmatprep.mubr.msk.f32.mxu0 %vm224_vm0, %v127_v9 }
  0xdf   :  { %v12040_v14 = vpop.f32.mrb[2].mxu0 }
  0xe0   :  { %v889_v15 = vpop.f32.mrb[3].mxu0  ;;  %12198 = vmatmul.mubr.msk.f32.gmra.mrb[108].mxu0 %vm224_vm0, %v128_v12  ;;  %v895_v21 = vadd.f32 %v12040_v14, %v17117_v16  ;;  %v144_v14 = vld [vmem:[%s22336_s0 + $0x3e8] sm:$0xff] }
  0xe1   :  { %12200 = vmatprep.mubr.msk.f32.mxu0 %vm224_vm0, %v129_v13  ;;  %v890_v20 = vadd.f32 %v17117_v16, %v889_v15 }
  0xe2   :  { %v2057_v29 = vmul.f32 0.2, %v895_v21  ;;  %vm1861_vm4 = vcmp.gt.f32.partialorder %v895_v21, 0.0 }
  0xe3   :  { %v12043_v23 = vpop.f32.mrb[4].mxu0  ;;  %vm1860_vm2 = vcmp.gt.f32.partialorder %v890_v20, 0.0  ;;  %v2056_v24 = vmul.f32 0.2, %v890_v20 }
  0xe4   :  { %v899_v26 = vpop.f32.mrb[5].mxu0  ;;  %12201 = vmatmul.mubr.msk.f32.gmra.mrb[110].mxu0 %vm224_vm0, %v130_v19  ;;  %v17153_v34 = vsel %vm1861_vm4, %v895_v21, %v2057_v29  ;;  %v905_v37 = vadd.f32 %v12043_v23, %v17117_v16 }
  0xe5   :  { %v17135_v27 = vsel %vm1860_vm2, %v890_v20, %v2056_v24  ;;  %12203 = vmatprep.mubr.msk.f32.mxu0 %vm224_vm0, %v131_v22  ;;  %v900_v30 = vadd.f32 %v17117_v16, %v899_v26  ;;  %22530 = vst [vmem:[#allocation10_spill] sm:$0xff] %v17153_v34  ;;  %v146_v22 = vld [vmem:[%s22336_s0 + $0x3f8] sm:$0xff] }
  0xe6   :  { %22528 = vst [vmem:[#allocation8_spill] sm:$0xff] %v17135_v27  ;;  %13490 = vmatmul.mubr.msk.f32.vlgmr.msra.gmra.mrb[0].mxu1 %vm2463_vm3, %v17135_v27  ;;  %v2059_v43 = vmul.f32 0.2, %v905_v37  ;;  %vm1863_vm6 = vcmp.gt.f32.partialorder %v905_v37, 0.0 }
  0xe7   :  { %v17147_v32 = vpop.f32.mrb[6].mxu0  ;;  %13492 = vmatprep.mubr.msk.f32.mxu1 %vm16571_vm1, %v22345_v5  ;;  %15039 = vmatpush3.bf16.msra.mxu1 %v15038_v25  ;;  %v2058_v36 = vmul.f32 0.2, %v900_v30  ;;  %vm1862_vm5 = vcmp.gt.f32.partialorder %v900_v30, 0.0  ;;  %v147_v25 = vld [vmem:[%s22336_s0 + $0x400] sm:$0xff] }
  0xe8   :  { %22529 = vst [vmem:[#allocation9_spill] sm:$0xff] %v17147_v32  ;;  %v909_v33 = vpop.f32.mrb[7].mxu0  ;;  %12204 = vmatmul.mubr.msk.f32.gmra.mrb[112].mxu0 %vm224_vm0, %v132_v28  ;;  %15040 = vmatprep.subr.bf16.mxu1 %v22341_v47  ;;  %v17183_v50 = vsel %vm1863_vm6, %v905_v37, %v2059_v43  ;;  %v10130_v37 = vld [vmem:[%s22337_s3 + $0x68] sm:$0xff]  ;;  %v150_v43 = vld [vmem:[%s22336_s0 + $0x418] sm:$0xff] }
  0xe9   :  { %12206 = vmatprep.mubr.msk.f32.mxu0 %vm224_vm0, %v133_v31  ;;  %v17168_v41 = vsel %vm1862_vm5, %v900_v30, %v2058_v36  ;;  %v910_v44 = vadd.f32 %v17117_v16, %v909_v33  ;;  %22532 = vst [vmem:[#allocation12_spill] sm:$0xff] %v17183_v50  ;;  %v148_v30 = vld [vmem:[%s22336_s0 + $0x408] sm:$0xff]  ;;  %v10129_v36 = vld [vmem:[%s22337_s3 + $0x60] sm:$0xff] }
  0xea   :  { %13493 = vmatmul.mubr.msk.f32.gmra.mrb[2].mxu1 %vm2463_vm3, %v17153_v34  ;;  %22531 = vst [vmem:[#allocation11_spill] sm:$0xff] %v17168_v41 }
  0xeb   :  { %v12049_v39 = vpop.f32.mrb[8].mxu0  ;;  %13495 = vmatprep.mubr.msk.f32.mxu1 %vm16571_vm1, %v22345_v5  ;;  %v2060_v52 = vmul.f32 0.2, %v910_v44  ;;  %vm1864_vm7 = vcmp.gt.f32.partialorder %v910_v44, 0.0  ;;  %15042 = vmatpush3.bf16.msra.mxu1 %v15041_v59  ;;  %v153_v59 = vld [vmem:[%s22336_s0 + $0x430] sm:$0xff] }
  0xec   :  { %v919_v40 = vpop.f32.mrb[9].mxu0  ;;  %12207 = vmatmul.mubr.msk.f32.gmra.mrb[114].mxu0 %vm224_vm0, %v134_v35  ;;  %15043 = vmatprep.subr.bf16.mxu1 %v22341_v47  ;;  %v925_v7 = vadd.f32 %v12049_v39, %v17117_v16  ;;  %v149_v35 = vld [vmem:[%s22336_s0 + $0x410] sm:$0xff]  ;;  %v14948_v39 = vpack.c.bf16 %v10130_v37, %v10129_v36 }
  0xed   :  { %12209 = vmatprep.mubr.msk.f32.mxu0 %vm224_vm0, %v135_v38  ;;  %v17205_v60 = vsel %vm1864_vm7, %v910_v44, %v2060_v52  ;;  %v920_v63 = vadd.f32 %v17117_v16, %v919_v40 }
  0xee   :  { %13496 = vmatmul.mubr.msk.f32.gmra.mrb[4].mxu1 %vm2463_vm3, %v17168_v41  ;;  %22533 = vst [vmem:[#allocation13_spill] sm:$0xff] %v17205_v60  ;;  %v2063_v15 = vmul.f32 0.2, %v925_v7  ;;  %vm1867_vm9 = vcmp.gt.f32.partialorder %v925_v7, 0.0  ;;  %14949 = vmatpush3.bf16.msra.mxu0 %v14948_v39 }
  0xef   :  { %v12052_v46 = vpop.f32.mrb[10].mxu0  ;;  %13498 = vmatprep.mubr.msk.f32.mxu1 %vm16571_vm1, %v22345_v5  ;;  %v2062_v6 = vmul.f32 0.2, %v920_v63  ;;  %vm1866_vm8 = vcmp.gt.f32.partialorder %v920_v63, 0.0  ;;  %14950 = vmatprep.subr.bf16.mxu0 %v22341_v47 }
  0xf0   :  { %v929_v49 = vpop.f32.mrb[11].mxu0  ;;  %12210 = vmatmul.mubr.msk.f32.gmra.mrb[116].mxu0 %vm224_vm0, %v136_v42  ;;  %v17260_v21 = vsel %vm1867_vm9, %v925_v7, %v2063_v15  ;;  %v935_v24 = vadd.f32 %v12052_v46, %v17117_v16  ;;  %v151_v46 = vld [vmem:[%s22336_s0 + $0x420] sm:$0xff] }
  0xf1   :  { %12212 = vmatprep.mubr.msk.f32.mxu0 %vm224_vm0, %v137_v45  ;;  %v17241_v13 = vsel %vm1866_vm8, %v920_v63, %v2062_v6  ;;  %v930_v17 = vadd.f32 %v17117_v16, %v929_v49  ;;  %22536 = vst [vmem:[#allocation16_spill] sm:$0xff] %v17260_v21  ;;  %v10131_v49 = vld [vmem:[%s22337_s3 + $0x70] sm:$0xff]  ;;  %v155_v7 = vld [vmem:[%s22336_s0 + $0x440] sm:$0xff] }
  0xf2   :  { %13499 = vmatmul.mubr.msk.f32.gmra.mrb[6].mxu1 %vm2463_vm3, %v17183_v50  ;;  %22535 = vst [vmem:[#allocation15_spill] sm:$0xff] %v17241_v13  ;;  %v2065_v31 = vmul.f32 0.2, %v935_v24  ;;  %vm1869_vm11 = vcmp.gt.f32.partialorder %v935_v24, 0.0 }
  0xf3   :  { %v17194_v55 = vpop.f32.mrb[12].mxu0  ;;  %13501 = vmatprep.mubr.msk.f32.mxu1 %vm16571_vm1, %v22345_v5  ;;  %v2064_v23 = vmul.f32 0.2, %v930_v17  ;;  %vm1868_vm10 = vcmp.gt.f32.partialorder %v930_v17, 0.0 }
  0xf4   :  { %v939_v58 = vpop.f32.mrb[13].mxu0  ;;  %12213 = vmatmul.mubr.msk.f32.gmra.mrb[118].mxu0 %vm224_vm0, %v138_v51  ;;  %v17304_v42 = vsel %vm1869_vm11, %v935_v24, %v2065_v31  ;;  %v945_v45 = vadd.f32 %v17194_v55, %v17117_v16  ;;  %v10132_v51 = vld [vmem:[%s22337_s3 + $0x78] sm:$0xff]  ;;  %v159_v31 = vld [vmem:[%s22336_s0 + $0x460] sm:$0xff] }
  0xf5   :  { %12215 = vmatprep.mubr.msk.f32.mxu0 %vm224_vm0, %v139_v54  ;;  %v17279_v29 = vsel %vm1868_vm10, %v930_v17, %v2064_v23  ;;  %v940_v33 = vadd.f32 %v17117_v16, %v939_v58  ;;  %22539 = vst [vmem:[#allocation19_spill] sm:$0xff] %v17304_v42  ;;  %v14951_v54 = vpack.c.bf16 %v10132_v51, %v10131_v49 }
  0xf6   :  { %13502 = vmatmul.mubr.msk.f32.gmra.mrb[8].mxu1 %vm2463_vm3, %v17205_v60  ;;  %22538 = vst [vmem:[#allocation18_spill] sm:$0xff] %v17279_v29  ;;  %v2067_v58 = vmul.f32 0.2, %v945_v45  ;;  %vm1871_vm13 = vcmp.gt.f32.partialorder %v945_v45, 0.0 }
  0xf7   :  { %v17217_v1 = vpop.f32.mrb[14].mxu0  ;;  %13504 = vmatprep.mubr.msk.f32.mxu1 %vm16571_vm1, %v22345_v5  ;;  %v2066_v44 = vmul.f32 0.2, %v940_v33  ;;  %vm1870_vm12 = vcmp.gt.f32.partialorder %v940_v33, 0.0  ;;  %14952 = vmatpush3.bf16.msra.mxu0 %v14951_v54  ;;  %v163_v54 = vld [vmem:[%s22336_s0 + $0x480] sm:$0xff] }
  0xf8   :  { %v17221_v3 = vpop.f32.mrb[15].mxu0  ;;  %12216 = vmatmul.mubr.msk.f32.gmra.mrb[120].mxu0 %vm224_vm0, %v140_v61  ;;  %14953 = vmatprep.subr.bf16.mxu0 %v22341_v47  ;;  %v955_v6 = vadd.f32 %v17217_v1, %v17117_v16  ;;  %v156_v1 = vld [vmem:[%s22336_s0 + $0x448] sm:$0xff] }
  0xf9   :  { %22534 = vst [vmem:[#allocation14_spill] sm:$0xff] %v17221_v3  ;;  %12218 = vmatprep.mubr.msk.f32.mxu0 %vm224_vm0, %v141_v0  ;;  %v17331_v56 = vsel %vm1870_vm12, %v940_v33, %v2066_v44  ;;  %v17350_v0 = vsel %vm1871_vm13, %v945_v45, %v2067_v58  ;;  %v10523_v58 = vld [vmem:[%s22337_s3 + $0x220] sm:$0xff] }
  0xfa   :  { %13505 = vmatmul.mubr.f32.gmra.mrb[10].mxu1 %v22345_v5  ;;  %22540 = vst [vmem:[#allocation20_spill] sm:$0xff] %v17331_v56  ;;  %22541 = vst [vmem:[#allocation21_spill] sm:$0xff] %v17350_v0  ;;  %v2069_v15 = vmul.f32 0.2, %v955_v6  ;;  %vm1873_vm14 = vcmp.gt.f32.partialorder %v955_v6, 0.0 }
  0xfb   :  { %v17234_v9 = vpop.f32.mrb[16].mxu0  ;;  %13507 = vmatprep.mubr.msk.f32.mxu1 %vm16571_vm1, %v22345_v5 }
  0xfc   :  { %v17238_v12 = vpop.f32.mrb[17].mxu0  ;;  %12219 = vmatmul.mubr.msk.f32.gmra.mrb[122].mxu0 %vm224_vm0, %v142_v4  ;;  %v154_v4 = vld [vmem:[%s22336_s0 + $0x438] sm:$0xff]  ;;  %v17387_v24 = vsel %vm1873_vm14, %v955_v6, %v2069_v15 }
  0xfd   :  { %12221 = vmatprep.mubr.msk.f32.mxu0 %vm224_vm0, %v143_v8  ;;  %v960_v17 = vadd.f32 %v17117_v16, %v17238_v12  ;;  %22543 = vst [vmem:[#allocation23_spill] sm:$0xff] %v17387_v24  ;;  %v158_v12 = vld [vmem:[%s22336_s0 + $0x458] sm:$0xff] }
  0xfe   :  { %13508 = vmatmul.mubr.msk.f32.gmra.mrb[12].mxu1 %vm2463_vm3, %v17241_v13 }
  0xff   :  { %v17253_v19 = vpop.f32.mrb[18].mxu0  ;;  %13510 = vmatprep.mubr.msk.f32.mxu1 %vm16571_vm1, %v22345_v5  ;;  %vm1874_vm15 = vcmp.gt.f32.partialorder %v960_v17, 0.0 }
 0x100   :  { %v17257_v20 = vpop.f32.mrb[19].mxu0  ;;  %12222 = vmatmul.mubr.msk.f32.gmra.mrb[124].mxu0 %vm224_vm0, %v144_v14  ;;  %v975_v51 = vadd.f32 %v17253_v19, %v17117_v16  ;;  %v10524_v19 = vld [vmem:[%s22337_s3 + $0x228] sm:$0xff] }
 0x101   :  { %12224 = vmatprep.mubr.msk.f32.mxu0 %vm224_vm0, %v145_v18  ;;  %v157_v18 = vld [vmem:[%s22336_s0 + $0x450] sm:$0xff]  ;;  %v970_v39 = vadd.f32 %v17117_v16, %v17257_v20  ;;  %v162_v20 = vld [vmem:[%s22336_s0 + $0x478] sm:$0xff] }
 0x102   :  { %13511 = vmatmul.mubr.msk.f32.gmra.mrb[14].mxu1 %vm2463_vm3, %v17260_v21  ;;  %vm1877_vm5 = vcmp.gt.f32.partialorder %v975_v51, 0.0 }
 0x103   :  { %v17272_v26 = vpop.f32.mrb[20].mxu0  ;;  %13513 = vmatprep.mubr.msk.f32.mxu1 %vm16571_vm1, %v22345_v5  ;;  %v2072_v49 = vmul.f32 0.2, %v970_v39  ;;  %vm1876_vm4 = vcmp.gt.f32.partialorder %v970_v39, 0.0 }
 0x104   :  { %22537 = vst [vmem:[#allocation17_spill] sm:$0xff] %v17272_v26  ;;  %v17276_v28 = vpop.f32.mrb[21].mxu0  ;;  %12225 = vmatmul.mubr.msk.f32.gmra.mrb[126].mxu0 %vm224_vm0, %v146_v22 }
 0x105   :  { %12227 = vmatprep.mubr.msk.f32.mxu0 %vm224_vm0, %v147_v25  ;;  %v2070_v25 = vmul.f32 0.2, %v960_v17  ;;  %v17453_v6 = vsel %vm1876_vm4, %v970_v39, %v2072_v49  ;;  %v980_v15 = vadd.f32 %v17117_v16, %v17276_v28  ;;  %v169_v49 = vld [vmem:[%s22336_s0 + $0x4b0] sm:$0xff] }
 0x106   :  { %13514 = vmatmul.mubr.msk.f32.gmra.mrb[16].mxu1 %vm2463_vm3, %v17279_v29  ;;  %22547 = vst [vmem:[#allocation27_spill] sm:$0xff] %v17453_v6 }
 0x107   :  { %v17297_v38 = vpop.f32.mrb[22].mxu0  ;;  %13516 = vmatprep.mubr.msk.f32.mxu1 %vm16571_vm1, %v22345_v5  ;;  %v17407_v36 = vsel %vm1874_vm15, %v960_v17, %v2070_v25  ;;  %v165_v17 = vld [vmem:[%s22336_s0 + $0x490] sm:$0xff]  ;;  %v166_v25 = vld [vmem:[%s22336_s0 + $0x498] sm:$0xff]  ;;  %vm1878_vm6 = vcmp.gt.f32.partialorder %v980_v15, 0.0 }
 0x108   :  { %v17301_v40 = vpop.f32.mrb[23].mxu0  ;;  %12228 = vmatmul.mubr.msk.f32.gmra.mrb[128].mxu0 %vm224_vm0, %v148_v30  ;;  %v965_v30 = vadd.f32 %v17234_v9, %v17117_v16  ;;  %22544 = vst [vmem:[#allocation24_spill] sm:$0xff] %v17407_v36  ;;  %v160_v9 = vld [vmem:[%s22336_s0 + $0x468] sm:$0xff] }
 0x109   :  { %12230 = vmatprep.mubr.msk.f32.mxu0 %vm224_vm0, %v149_v35 }
 0x10a   :  { %13517 = vmatmul.mubr.msk.f32.gmra.mrb[18].mxu1 %vm2463_vm3, %v17304_v42  ;;  %v2071_v37 = vmul.f32 0.2, %v965_v30  ;;  %vm1875_vm2 = vcmp.gt.f32.partialorder %v965_v30, 0.0 }
 0x10b   :  { %v17324_v52 = vpop.f32.mrb[24].mxu0  ;;  %13519 = vmatprep.mubr.msk.f32.mxu1 %vm16571_vm1, %v22345_v5 }
 0x10c   :  { %v17328_v55 = vpop.f32.mrb[25].mxu0  ;;  %12231 = vmatmul.mubr.msk.f32.gmra.mrb[130].mxu0 %vm224_vm0, %v150_v43  ;;  %v161_v43 = vld [vmem:[%s22336_s0 + $0x470] sm:$0xff] }
 0x10d   :  { %12233 = vmatprep.mubr.msk.f32.mxu0 %vm224_vm0, %v151_v46  ;;  %v17427_v46 = vsel %vm1875_vm2, %v965_v30, %v2071_v37  ;;  %v2074_v30 = vmul.f32 0.2, %v980_v15 }
 0x10e   :  { %13520 = vmatmul.mubr.msk.f32.gmra.mrb[20].mxu1 %vm2463_vm3, %v17331_v56  ;;  %22546 = vst [vmem:[#allocation26_spill] sm:$0xff] %v17427_v46 }
 0x10f   :  { %v17343_v61 = vpop.f32.mrb[26].mxu0  ;;  %13522 = vmatprep.mubr.msk.f32.mxu1 %vm16571_vm1, %v22345_v5  ;;  %v17492_v39 = vsel %vm1878_vm6, %v980_v15, %v2074_v30  ;;  %v173_v30 = vld [vmem:[%s22336_s0 + $0x4d0] sm:$0xff] }
 0x110   :  { %v17347_v63 = vpop.f32.mrb[27].mxu0  ;;  %12234 = vmatmul.mubr.msk.f32.gmra.mrb[132].mxu0 %vm224_vm0, %v152_v57  ;;  %22549 = vst [vmem:[#allocation29_spill] sm:$0xff] %v17492_v39  ;;  %v1015_v2 = vadd.f32 %v17343_v61, %v17117_v16  ;;  %v180_v61 = vld [vmem:[%s22336_s0 + $0x508] sm:$0xff] }
 0x111   :  { %12236 = vmatprep.mubr.msk.f32.mxu0 %vm224_vm0, %v153_v59 }
 0x112   :  { %13523 = vmatmul.mubr.msk.f32.gmra.mrb[22].mxu1 %vm2463_vm3, %v17350_v0  ;;  %v2081_v62 = vmul.f32 0.2, %v1015_v2  ;;  %vm1885_vm12 = vcmp.gt.f32.partialorder %v1015_v2, 0.0  ;;  %v214_v0 = vld [vmem:[%s22336_s0 + $0x618] sm:$0xff] }
 0x113   :  { %v17363_v8 = vpop.f32.mrb[28].mxu0  ;;  %13525 = vmatprep.mubr.msk.f32.mxu1 %vm16571_vm1, %v22345_v5 }
 0x114   :  { %v17367_v14 = vpop.f32.mrb[29].mxu0  ;;  %12237 = vmatmul.mubr.msk.f32.gmra.mrb[134].mxu0 %vm224_vm0, %v154_v4  ;;  %v15044_v4 = vpack.c.bf16 %v10524_v19, %v10523_v58  ;;  %v995_v19 = vadd.f32 %v17297_v38, %v17117_v16  ;;  %v172_v38 = vld [vmem:[%s22336_s0 + $0x4c8] sm:$0xff]  ;;  %v1025_v48 = vadd.f32 %v17363_v8, %v17117_v16 }
 0x115   :  { %22542 = vst [vmem:[#allocation22_spill] sm:$0xff] %v17367_v14  ;;  %12239 = vmatprep.mubr.msk.f32.mxu0 %vm224_vm0, %v155_v7  ;;  %v164_v7 = vld [vmem:[%s22336_s0 + $0x488] sm:$0xff] }
 0x116   :  { %13526 = vmatmul.mubr.f32.gmra.mrb[24].mxu1 %v22345_v5  ;;  %vm1881_vm8 = vcmp.gt.f32.partialorder %v995_v19, 0.0  ;;  %vm1887_vm13 = vcmp.gt.f32.partialorder %v1025_v48, 0.0 }
 0x117   :  { %v17380_v22 = vpop.f32.mrb[30].mxu0  ;;  %13528 = vmatprep.mubr.msk.f32.mxu1 %vm16571_vm1, %v22345_v5  ;;  %15045 = vmatpush3.bf16.msra.mxu1 %v15044_v4  ;;  %v171_v4 = vld [vmem:[%s22336_s0 + $0x4c0] sm:$0xff] }
 0x118   :  { %v17384_v23 = vpop.f32.mrb[31].mxu0  ;;  %12240 = vmatmul.mubr.msk.f32.gmra.mrb[136].mxu0 %vm224_vm0, %v156_v1  ;;  %v2073_v1 = vmul.f32 0.2, %v975_v51  ;;  %15046 = vmatprep.subr.bf16.mxu1 %v22341_v47 }
 0x119   :  { %12242 = vmatprep.mubr.msk.f32.mxu0 %vm224_vm0, %v157_v18  ;;  %v1030_v8 = vadd.f32 %v17117_v16, %v17384_v23  ;;  %v186_v23 = vld [vmem:[%s22336_s0 + $0x538] sm:$0xff] }
 0x11a   :  { %13529 = vmatmul.mubr.msk.f32.gmra.mrb[26].mxu1 %vm2463_vm3, %v17387_v24  ;;  %v17474_v28 = vsel %vm1877_vm5, %v975_v51, %v2073_v1 }
 0x11b   :  { %v17400_v33 = vpop.f32.mrb[32].mxu0  ;;  %13531 = vmatprep.mubr.msk.f32.mxu1 %vm16571_vm1, %v22345_v5  ;;  %22548 = vst [vmem:[#allocation28_spill] sm:$0xff] %v17474_v28  ;;  %vm1888_vm14 = vcmp.gt.f32.partialorder %v1030_v8, 0.0 }
 0x11c   :  { %v17404_v35 = vpop.f32.mrb[33].mxu0  ;;  %12243 = vmatmul.mubr.msk.f32.gmra.mrb[138].mxu0 %vm224_vm0, %v158_v12 }
 0x11d   :  { %12245 = vmatprep.mubr.msk.f32.mxu0 %vm224_vm0, %v159_v31  ;;  %v167_v31 = vld [vmem:[%s22336_s0 + $0x4a0] sm:$0xff]  ;;  %v1040_v14 = vadd.f32 %v17117_v16, %v17404_v35 }
 0x11e   :  { %13532 = vmatmul.mubr.msk.f32.gmra.mrb[28].mxu1 %vm2463_vm3, %v17407_v36 }
 0x11f   :  { %v17420_v44 = vpop.f32.mrb[34].mxu0  ;;  %13534 = vmatprep.mubr.msk.f32.mxu1 %vm16571_vm1, %v22345_v5  ;;  %vm1890_vm2 = vcmp.gt.f32.partialorder %v1040_v14, 0.0 }
 0x120   :  { %22545 = vst [vmem:[#allocation25_spill] sm:$0xff] %v17420_v44  ;;  %v17424_v45 = vpop.f32.mrb[35].mxu0  ;;  %12246 = vmatmul.mubr.msk.f32.gmra.mrb[140].mxu0 %vm224_vm0, %v160_v9 }
 0x121   :  { %12248 = vmatprep.mubr.msk.f32.mxu0 %vm224_vm0, %v161_v43  ;;  %v168_v43 = vld [vmem:[%s22336_s0 + $0x4a8] sm:$0xff] }
 0x122   :  { %13535 = vmatmul.mubr.msk.f32.gmra.mrb[30].mxu1 %vm2463_vm3, %v17427_v46 }
 0x123   :  { %v17440_v57 = vpop.f32.mrb[36].mxu0  ;;  %13537 = vmatprep.mubr.msk.f32.mxu1 %vm16571_vm1, %v22345_v5 }
 0x124   :  { %v17450_v59 = vpop.f32.mrb[37].mxu0  ;;  %12249 = vmatmul.mubr.msk.f32.gmra.mrb[142].mxu0 %vm224_vm0, %v162_v20  ;;  %v990_v20 = vadd.f32 %v17117_v16, %v17301_v40  ;;  %v170_v40 = vld [vmem:[%s22336_s0 + $0x4b8] sm:$0xff] }
 0x125   :  { %12251 = vmatprep.mubr.msk.f32.mxu0 %vm224_vm0, %v163_v54 }
 0x126   :  { %13538 = vmatmul.mubr.msk.f32.gmra.mrb[32].mxu1 %vm2463_vm3, %v17453_v6  ;;  %v2076_v58 = vmul.f32 0.2, %v990_v20  ;;  %vm1880_vm7 = vcmp.gt.f32.partialorder %v990_v20, 0.0 }
 0x127   :  { %v17466_v18 = vpop.f32.mrb[38].mxu0  ;;  %13540 = vmatprep.mubr.msk.f32.mxu1 %vm16571_vm1, %v22345_v5 }
 0x128   :  { %v17470_v12 = vpop.f32.mrb[39].mxu0  ;;  %12252 = vmatmul.mubr.msk.f32.gmra.mrb[144].mxu0 %vm224_vm0, %v164_v7  ;;  %v17529_v15 = vsel %vm1880_vm7, %v990_v20, %v2076_v58  ;;  %v175_v58 = vld [vmem:[%s22336_s0 + $0x4e0] sm:$0xff] }
 0x129   :  { %12254 = vmatprep.mubr.msk.f32.mxu0 %vm224_vm0, %v165_v17  ;;  %22551 = vst [vmem:[#allocation31_spill] sm:$0xff] %v17529_v15  ;;  %v2077_v17 = vmul.f32 0.2, %v995_v19 }
 0x12a   :  { %13541 = vmatmul.mubr.msk.f32.gmra.mrb[34].mxu1 %vm2463_vm3, %v17474_v28 }
 0x12b   :  { %v17485_v9 = vpop.f32.mrb[40].mxu0  ;;  %13543 = vmatprep.mubr.msk.f32.mxu1 %vm16571_vm1, %v22345_v5  ;;  %v17549_v20 = vsel %vm1881_vm8, %v995_v19, %v2077_v17 }
 0x12c   :  { %v17489_v37 = vpop.f32.mrb[41].mxu0  ;;  %12255 = vmatmul.mubr.msk.f32.gmra.mrb[146].mxu0 %vm224_vm0, %v166_v25  ;;  %v1000_v25 = vadd.f32 %v17117_v16, %v17328_v55  ;;  %22552 = vst [vmem:[#allocation32_spill] sm:$0xff] %v17549_v20  ;;  %v174_v55 = vld [vmem:[%s22336_s0 + $0x4d8] sm:$0xff] }
 0x12d   :  { %12257 = vmatprep.mubr.msk.f32.mxu0 %vm224_vm0, %v167_v31 }
 0x12e   :  { %13544 = vmatmul.mubr.msk.f32.gmra.mrb[36].mxu1 %vm2463_vm3, %v17492_v39  ;;  %vm1882_vm9 = vcmp.gt.f32.partialorder %v1000_v25, 0.0  ;;  %v200_v39 = vld [vmem:[%s22336_s0 + $0x5a8] sm:$0xff] }
 0x12f   :  { %v17505_v51 = vpop.f32.mrb[42].mxu0  ;;  %13546 = vmatprep.mubr.msk.f32.mxu1 %vm16571_vm1, %v22345_v5 }
 0x130   :  { %v17509_v54 = vpop.f32.mrb[43].mxu0  ;;  %12258 = vmatmul.mubr.msk.f32.gmra.mrb[148].mxu0 %vm224_vm0, %v168_v43 }
 0x131   :  { %22550 = vst [vmem:[#allocation30_spill] sm:$0xff] %v17509_v54  ;;  %12260 = vmatprep.mubr.msk.f32.mxu0 %vm224_vm0, %v169_v49  ;;  %v2078_v49 = vmul.f32 0.2, %v1000_v25 }
 0x132   :  { %13547 = vmatmul.mubr.f32.gmra.mrb[38].mxu1 %v22345_v5 }
 0x133   :  { %v17522_v7 = vpop.f32.mrb[44].mxu0  ;;  %13549 = vmatprep.mubr.msk.f32.mxu1 %vm16571_vm1, %v22345_v5 }
 0x134   :  { %v17526_v1 = vpop.f32.mrb[45].mxu0  ;;  %12261 = vmatmul.mubr.msk.f32.gmra.mrb[150].mxu0 %vm224_vm0, %v170_v40  ;;  %v1005_v40 = vadd.f32 %v17324_v52, %v17117_v16  ;;  %v176_v52 = vld [vmem:[%s22336_s0 + $0x4e8] sm:$0xff] }
 0x135   :  { %12263 = vmatprep.mubr.msk.f32.mxu0 %vm224_vm0, %v171_v4 }
 0x136   :  { %13550 = vmatmul.mubr.msk.f32.gmra.mrb[40].mxu1 %vm2463_vm3, %v17529_v15  ;;  %v2079_v17 = vmul.f32 0.2, %v1005_v40  ;;  %vm1883_vm10 = vcmp.gt.f32.partialorder %v1005_v40, 0.0 }
 0x137   :  { %v17542_v31 = vpop.f32.mrb[46].mxu0  ;;  %13552 = vmatprep.mubr.msk.f32.mxu1 %vm16571_vm1, %v22345_v5 }
 0x138   :  { %v17546_v43 = vpop.f32.mrb[47].mxu0  ;;  %12264 = vmatmul.mubr.msk.f32.gmra.mrb[152].mxu0 %vm224_vm0, %v172_v38  ;;  %v17569_v38 = vsel %vm1882_vm9, %v1000_v25, %v2078_v49 }
 0x139   :  { %12266 = vmatprep.mubr.msk.f32.mxu0 %vm224_vm0, %v173_v30  ;;  %22554 = vst [vmem:[#allocation34_spill] sm:$0xff] %v17569_v38  ;;  %v1010_v30 = vadd.f32 %v17117_v16, %v17347_v63  ;;  %v178_v63 = vld [vmem:[%s22336_s0 + $0x4f8] sm:$0xff] }
 0x13a   :  { %13553 = vmatmul.mubr.msk.f32.gmra.mrb[42].mxu1 %vm2463_vm3, %v17549_v20  ;;  %v2086_v20 = vmul.f32 0.2, %v1040_v14 }
 0x13b   :  { %v17562_v19 = vpop.f32.mrb[48].mxu0  ;;  %13555 = vmatprep.mubr.msk.f32.mxu1 %vm16571_vm1, %v22345_v5  ;;  %v2080_v47 = vmul.f32 0.2, %v1010_v30  ;;  %vm1884_vm11 = vcmp.gt.f32.partialorder %v1010_v30, 0.0 }
 0x13c   :  { %22553 = vst [vmem:[#allocation33_spill] sm:$0xff] %v17562_v19  ;;  %v17566_v4 = vpop.f32.mrb[49].mxu0  ;;  %12267 = vmatmul.mubr.msk.f32.gmra.mrb[154].mxu0 %vm224_vm0, %v174_v55  ;;  %v177_v55 = vld [vmem:[%s22336_s0 + $0x4f0] sm:$0xff] }
 0x13d   :  { %12269 = vmatprep.mubr.msk.f32.mxu0 %vm224_vm0, %v175_v58  ;;  %v17589_v58 = vsel %vm1883_vm10, %v1005_v40, %v2079_v17 }
 0x13e   :  { %13556 = vmatmul.mubr.msk.f32.gmra.mrb[44].mxu1 %vm2463_vm3, %v17569_v38  ;;  %22557 = vst [vmem:[#allocation37_spill] sm:$0xff] %v17589_v58 }
 0x13f   :  { %v17582_v25 = vpop.f32.mrb[50].mxu0  ;;  %13558 = vmatprep.mubr.msk.f32.mxu1 %vm16571_vm1, %v22345_v5 }
 0x140   :  { %22555 = vst [vmem:[#allocation35_spill] sm:$0xff] %v17582_v25  ;;  %v17586_v49 = vpop.f32.mrb[51].mxu0  ;;  %12270 = vmatmul.mubr.msk.f32.gmra.mrb[156].mxu0 %vm224_vm0, %v176_v52  ;;  %v179_v52 = vld [vmem:[%s22336_s0 + $0x500] sm:$0xff] }
 0x141   :  { %22556 = vst [vmem:[#allocation36_spill] sm:$0xff] %v17586_v49  ;;  %12272 = vmatprep.mubr.msk.f32.mxu0 %vm224_vm0, %v177_v55  ;;  %v17609_v55 = vsel %vm1884_vm11, %v1010_v30, %v2080_v47  ;;  %v17627_v30 = vsel %vm1885_vm12, %v1015_v2, %v2081_v62  ;;  %v184_v2 = vld [vmem:[%s22336_s0 + $0x528] sm:$0xff] }
 0x142   :  { %13559 = vmatmul.mubr.msk.f32.gmra.mrb[46].mxu1 %vm2463_vm3, %v17589_v58  ;;  %22560 = vst [vmem:[#allocation40_spill] sm:$0xff] %v17609_v55  ;;  %22564 = vst [vmem:[#allocation43_spill] sm:$0xff] %v17627_v30  ;;  %v10525_v58 = vld [vmem:[%s22337_s3 + $0x230] sm:$0xff] }
 0x143   :  { %v17602_v40 = vpop.f32.mrb[52].mxu0  ;;  %13561 = vmatprep.mubr.msk.f32.mxu1 %vm16571_vm1, %v22345_v5  ;;  %v181_v5 = vld [vmem:[%s22336_s0 + $0x510] sm:$0xff] }
 0x144   :  { %22558 = vst [vmem:[#allocation38_spill] sm:$0xff] %v17602_v40  ;;  %v17606_v17 = vpop.f32.mrb[53].mxu0  ;;  %12273 = vmatmul.mubr.msk.f32.gmra.mrb[158].mxu0 %vm224_vm0, %v178_v63  ;;  %v22562_v63 = vmov 0.0  }
 0x145   :  { %22559 = vst [vmem:[#allocation39_spill] sm:$0xff] %v17606_v17  ;;  %12275 = vmatprep.mubr.msk.f32.mxu0 %vm224_vm0, %v179_v52  ;;  %v182_v52 = vld [vmem:[%s22336_s0 + $0x518] sm:$0xff] }
 0x146   :  { %13562 = vmatmul.mubr.msk.f32.gmra.mrb[48].mxu1 %vm2463_vm3, %v17609_v55  ;;  %v1035_v55 = vadd.f32 %v17380_v22, %v17117_v16  ;;  %v188_v22 = vld [vmem:[%s22336_s0 + $0x548] sm:$0xff] }
 0x147   :  { %v17620_v53 = vpop.f32.mrb[54].mxu0  ;;  %13564 = vmatprep.mubr.msk.f32.mxu1 %vm16571_vm1, %v22562_v63 }
 0x148   :  { %22561 = vst [vmem:[#allocation41_spill] sm:$0xff] %v17620_v53  ;;  %v17624_v47 = vpop.f32.mrb[55].mxu0  ;;  %12276 = vmatmul.mubr.msk.f32.gmra.mrb[160].mxu0 %vm224_vm0, %v180_v61  ;;  %v183_v53 = vld [vmem:[%s22336_s0 + $0x520] sm:$0xff]  ;;  %v185_v61 = vld [vmem:[%s22336_s0 + $0x530] sm:$0xff]  ;;  %vm1889_vm15 = vcmp.gt.f32.partialorder %v1035_v55, 0.0 }
 0x149   :  { %22563 = vst [vmem:[#allocation42_spill] sm:$0xff] %v17624_v47  ;;  %12278 = vmatprep.mubr.msk.f32.mxu0 %vm224_vm0, %v181_v5  ;;  %v2083_v5 = vmul.f32 0.2, %v1025_v48 }
 0x14a   :  { %13565 = vmatmul.mubr.msk.f32.gmra.mrb[50].mxu1 %vm2463_vm3, %v17627_v30  ;;  %v2084_v30 = vmul.f32 0.2, %v1030_v8 }
 0x14b   :  { %v17640_v54 = vpop.f32.mrb[56].mxu0  ;;  %13567 = vmatprep.mubr.msk.f32.mxu1 %vm16571_vm1, %v22562_v63 }
 0x14c   :  { %22565 = vst [vmem:[#allocation44_spill] sm:$0xff] %v17640_v54  ;;  %v17644_v62 = vpop.f32.mrb[57].mxu0  ;;  %12279 = vmatmul.mubr.msk.f32.gmra.mrb[162].mxu0 %vm224_vm0, %v182_v52  ;;  %v17664_v52 = vsel %vm1887_vm13, %v1025_v48, %v2083_v5 }
 0x14d   :  { %22566 = vst [vmem:[#allocation45_spill] sm:$0xff] %v17644_v62  ;;  %12281 = vmatprep.mubr.msk.f32.mxu0 %vm224_vm0, %v183_v53  ;;  %22569 = vst [vmem:[#allocation48_spill] sm:$0xff] %v17664_v52 }
 0x14e   :  { %13568 = vmatmul.mubr.f32.gmra.mrb[52].mxu1 %v22562_v63 }
 0x14f   :  { %v17657_v44 = vpop.f32.mrb[58].mxu0  ;;  %13570 = vmatprep.mubr.msk.f32.mxu1 %vm16571_vm1, %v22562_v63 }
 0x150   :  { %22567 = vst [vmem:[#allocation46_spill] sm:$0xff] %v17657_v44  ;;  %v17661_v53 = vpop.f32.mrb[59].mxu0  ;;  %12282 = vmatmul.mubr.msk.f32.gmra.mrb[164].mxu0 %vm224_vm0, %v184_v2  ;;  %v187_v2 = vld [vmem:[%s22336_s0 + $0x540] sm:$0xff] }
 0x151   :  { %22568 = vst [vmem:[#allocation47_spill] sm:$0xff] %v17661_v53  ;;  %12284 = vmatprep.mubr.msk.f32.mxu0 %vm224_vm0, %v185_v61  ;;  %v17684_v61 = vsel %vm1888_vm14, %v1030_v8, %v2084_v30  ;;  %v189_v30 = vld [vmem:[%s22336_s0 + $0x550] sm:$0xff] }
 0x152   :  { %13571 = vmatmul.mubr.msk.f32.gmra.mrb[54].mxu1 %vm2463_vm3, %v17664_v52  ;;  %22572 = vst [vmem:[#allocation51_spill] sm:$0xff] %v17684_v61  ;;  %v2085_v52 = vmul.f32 0.2, %v1035_v55 }
 0x153   :  { %v17677_v48 = vpop.f32.mrb[60].mxu0  ;;  %13573 = vmatprep.mubr.msk.f32.mxu1 %vm16571_vm1, %v22562_v63 }
 0x154   :  { %22570 = vst [vmem:[#allocation49_spill] sm:$0xff] %v17677_v48  ;;  %v17681_v5 = vpop.f32.mrb[61].mxu0  ;;  %12285 = vmatmul.mubr.msk.f32.gmra.mrb[166].mxu0 %vm224_vm0, %v186_v23  ;;  %v10526_v23 = vld [vmem:[%s22337_s3 + $0x238] sm:$0xff]  ;;  %v17710_v38 = vsel %vm1889_vm15, %v1035_v55, %v2085_v52  ;;  %v191_v55 = vld [vmem:[%s22336_s0 + $0x560] sm:$0xff] }
 0x155   :  { %22571 = vst [vmem:[#allocation50_spill] sm:$0xff] %v17681_v5  ;;  %12287 = vmatprep.mubr.msk.f32.mxu0 %vm224_vm0, %v187_v2  ;;  %v15047_v8 = vpack.c.bf16 %v10526_v23, %v10525_v58  ;;  %22575 = vst [vmem:[#allocation54_spill] sm:$0xff] %v17710_v38  ;;  %v1045_v58 = vadd.f32 %v17400_v33, %v17117_v16  ;;  %v22576_v23 = vmov 0.0|0.0   ;;  %v17731_v33 = vsel %vm1890_vm2, %v1040_v14, %v2086_v20 }
 0x156   :  { %13574 = vmatmul.mubr.msk.f32.gmra.mrb[56].mxu1 %vm2463_vm3, %v17684_v61  ;;  %v190_v61 = vld [vmem:[%s22336_s0 + $0x558] sm:$0xff]  ;;  %22579 = vst [vmem:[#allocation57_spill] sm:$0xff] %v17731_v33 }
 0x157   :  { %v17703_v2 = vpop.f32.mrb[62].mxu0  ;;  %13576 = vmatprep.mubr.msk.f32.mxu1 %vm16571_vm1, %v22562_v63  ;;  %15048 = vmatpush3.bf16.msra.mxu1 %v15047_v8  ;;  %v2087_v8 = vmul.f32 0.2, %v1045_v58  ;;  %vm1891_vm4 = vcmp.gt.f32.partialorder %v1045_v58, 0.0 }
 0x158   :  { %22573 = vst [vmem:[#allocation52_spill] sm:$0xff] %v17703_v2  ;;  %v17707_v35 = vpop.f32.mrb[63].mxu0  ;;  %12288 = vmatmul.mubr.msk.f32.gmra.mrb[168].mxu0 %vm224_vm0, %v188_v22  ;;  %15049 = vmatprep.subr.bf16.mxu1 %v22576_v23 }
 0x159   :  { %22574 = vst [vmem:[#allocation53_spill] sm:$0xff] %v17707_v35  ;;  %12290 = vmatprep.mubr.msk.f32.mxu0 %vm224_vm0, %v189_v30  ;;  %v192_v30 = vld [vmem:[%s22336_s0 + $0x568] sm:$0xff]  ;;  %v1050_v35 = vadd.f32 %v17117_v16, %v17424_v45  ;;  %v194_v45 = vld [vmem:[%s22336_s0 + $0x578] sm:$0xff] }
 0x15a   :  { %13577 = vmatmul.mubr.msk.f32.gmra.mrb[58].mxu1 %vm2463_vm3, %v17710_v38  ;;  %v195_v38 = vld [vmem:[%s22336_s0 + $0x580] sm:$0xff] }
 0x15b   :  { %v17724_v52 = vpop.f32.mrb[64].mxu0  ;;  %13579 = vmatprep.mubr.msk.f32.mxu1 %vm16571_vm1, %v22562_v63  ;;  %vm1892_vm5 = vcmp.gt.f32.partialorder %v1050_v35, 0.0 }
 0x15c   :  { %22577 = vst [vmem:[#allocation55_spill] sm:$0xff] %v17724_v52  ;;  %v17728_v22 = vpop.f32.mrb[65].mxu0  ;;  %12291 = vmatmul.mubr.msk.f32.gmra.mrb[170].mxu0 %vm224_vm0, %v190_v61  ;;  %v193_v61 = vld [vmem:[%s22336_s0 + $0x570] sm:$0xff] }
 0x15d   :  { %22578 = vst [vmem:[#allocation56_spill] sm:$0xff] %v17728_v22  ;;  %12293 = vmatprep.mubr.msk.f32.mxu0 %vm224_vm0, %v191_v55  ;;  %v17751_v55 = vsel %vm1891_vm4, %v1045_v58, %v2087_v8  ;;  %v196_v8 = vld [vmem:[%s22336_s0 + $0x588] sm:$0xff] }
 0x15e   :  { %13580 = vmatmul.mubr.msk.f32.gmra.mrb[60].mxu1 %vm2463_vm3, %v17731_v33  ;;  %22582 = vst [vmem:[#allocation60_spill] sm:$0xff] %v17751_v55  ;;  %v2088_v33 = vmul.f32 0.2, %v1050_v35 }
 0x15f   :  { %v17744_v14 = vpop.f32.mrb[66].mxu0  ;;  %13582 = vmatprep.mubr.msk.f32.mxu1 %vm16571_vm1, %v22562_v63 }
 0x160   :  { %22580 = vst [vmem:[#allocation58_spill] sm:$0xff] %v17744_v14  ;;  %v17748_v20 = vpop.f32.mrb[67].mxu0  ;;  %12294 = vmatmul.mubr.msk.f32.gmra.mrb[172].mxu0 %vm224_vm0, %v192_v30  ;;  %v17769_v30 = vsel %vm1892_vm5, %v1050_v35, %v2088_v33  ;;  %v1065_v33 = vadd.f32 %v17440_v57, %v17117_v16 }
 0x161   :  { %22581 = vst [vmem:[#allocation59_spill] sm:$0xff] %v17748_v20  ;;  %12296 = vmatprep.mubr.msk.f32.mxu0 %vm224_vm0, %v193_v61  ;;  %22585 = vst [vmem:[#allocation63_spill] sm:$0xff] %v17769_v30  ;;  %v1060_v61 = vadd.f32 %v17117_v16, %v17450_v59  ;;  %v198_v59 = vld [vmem:[%s22336_s0 + $0x598] sm:$0xff] }
 0x162   :  { %13583 = vmatmul.mubr.msk.f32.gmra.mrb[62].mxu1 %vm2463_vm3, %v17751_v55  ;;  %v2091_v28 = vmul.f32 0.2, %v1065_v33  ;;  %vm1895_vm7 = vcmp.gt.f32.partialorder %v1065_v33, 0.0 }
 0x163   :  { %v17762_v15 = vpop.f32.mrb[68].mxu0  ;;  %13585 = vmatprep.mubr.msk.f32.mxu1 %vm16571_vm1, %v22562_v63  ;;  %v2090_v35 = vmul.f32 0.2, %v1060_v61  ;;  %vm1894_vm6 = vcmp.gt.f32.partialorder %v1060_v61, 0.0 }
 0x164   :  { %22583 = vst [vmem:[#allocation61_spill] sm:$0xff] %v17762_v15  ;;  %v17766_v58 = vpop.f32.mrb[69].mxu0  ;;  %12297 = vmatmul.mubr.msk.f32.gmra.mrb[174].mxu0 %vm224_vm0, %v194_v45  ;;  %v197_v15 = vld [vmem:[%s22336_s0 + $0x590] sm:$0xff]  ;;  %v199_v45 = vld [vmem:[%s22336_s0 + $0x5a0] sm:$0xff] }
 0x165   :  { %22584 = vst [vmem:[#allocation62_spill] sm:$0xff] %v17766_v58  ;;  %12299 = vmatprep.mubr.msk.f32.mxu0 %vm224_vm0, %v195_v38  ;;  %v17808_v57 = vsel %vm1894_vm6, %v1060_v61, %v2090_v35  ;;  %v1075_v61 = vadd.f32 %v17466_v18, %v17117_v16 }
 0x166   :  { %13586 = vmatmul.mubr.msk.f32.gmra.mrb[64].mxu1 %vm2463_vm3, %v17769_v30  ;;  %22590 = vst [vmem:[#allocation68_spill] sm:$0xff] %v17808_v57 }
 0x167   :  { %v17782_v55 = vpop.f32.mrb[70].mxu0  ;;  %13588 = vmatprep.mubr.msk.f32.mxu1 %vm16571_vm1, %v22562_v63  ;;  %vm1897_vm9 = vcmp.gt.f32.partialorder %v1075_v61, 0.0 }
 0x168   :  { %22586 = vst [vmem:[#allocation64_spill] sm:$0xff] %v17782_v55  ;;  %v17786_v38 = vpop.f32.mrb[71].mxu0  ;;  %12300 = vmatmul.mubr.msk.f32.gmra.mrb[176].mxu0 %vm224_vm0, %v196_v8  ;;  %v1070_v8 = vadd.f32 %v17117_v16, %v17470_v12  ;;  %v10574_v55 = vld [vmem:[%s22337_s3 + $0x268] sm:$0xff] }
 0x169   :  { %22587 = vst [vmem:[#allocation65_spill] sm:$0xff] %v17786_v38  ;;  %12302 = vmatprep.mubr.msk.f32.mxu0 %vm224_vm0, %v197_v15 }
 0x16a   :  { %13589 = vmatmul.mubr.f32.gmra.mrb[66].mxu1 %v22562_v63  ;;  %v2092_v35 = vmul.f32 0.2, %v1070_v8  ;;  %vm1896_vm8 = vcmp.gt.f32.partialorder %v1070_v8, 0.0 }
 0x16b   :  { %v17799_v30 = vpop.f32.mrb[72].mxu0  ;;  %13591 = vmatprep.mubr.msk.f32.mxu1 %vm16571_vm1, %v22562_v63 }
 0x16c   :  { %22588 = vst [vmem:[#allocation66_spill] sm:$0xff] %v17799_v30  ;;  %v17803_v15 = vpop.f32.mrb[73].mxu0  ;;  %12303 = vmatmul.mubr.msk.f32.gmra.mrb[178].mxu0 %vm224_vm0, %v198_v59  ;;  %v201_v59 = vld [vmem:[%s22336_s0 + $0x5b0] sm:$0xff] }
 0x16d   :  { %22589 = vst [vmem:[#allocation67_spill] sm:$0xff] %v17803_v15  ;;  %12305 = vmatprep.mubr.msk.f32.mxu0 %vm224_vm0, %v199_v45  ;;  %v17828_v45 = vsel %vm1895_vm7, %v1065_v33, %v2091_v28  ;;  %v2093_v28 = vmul.f32 0.2, %v1075_v61  ;;  %v1080_v33 = vadd.f32 %v17117_v16, %v17489_v37 }
 0x16e   :  { %13592 = vmatmul.mubr.msk.f32.gmra.mrb[68].mxu1 %vm2463_vm3, %v17808_v57  ;;  %22593 = vst [vmem:[#allocation71_spill] sm:$0xff] %v17828_v45  ;;  %v202_v57 = vld [vmem:[%s22336_s0 + $0x5b8] sm:$0xff] }
 0x16f   :  { %v17819_v26 = vpop.f32.mrb[74].mxu0  ;;  %13594 = vmatprep.mubr.msk.f32.mxu1 %vm16571_vm1, %v22562_v63  ;;  %vm1898_vm10 = vcmp.gt.f32.partialorder %v1080_v33, 0.0 }
 0x170   :  { %22591 = vst [vmem:[#allocation69_spill] sm:$0xff] %v17819_v26  ;;  %v17823_v12 = vpop.f32.mrb[75].mxu0  ;;  %12306 = vmatmul.mubr.msk.f32.gmra.mrb[180].mxu0 %vm224_vm0, %v200_v39  ;;  %v203_v39 = vld [vmem:[%s22336_s0 + $0x5c0] sm:$0xff] }
 0x171   :  { %22592 = vst [vmem:[#allocation70_spill] sm:$0xff] %v17823_v12  ;;  %12308 = vmatprep.mubr.msk.f32.mxu0 %vm224_vm0, %v201_v59  ;;  %v17848_v59 = vsel %vm1896_vm8, %v1070_v8, %v2092_v35  ;;  %v1085_v8 = vadd.f32 %v17485_v9, %v17117_v16  ;;  %v2094_v35 = vmul.f32 0.2, %v1080_v33 }
 0x172   :  { %13595 = vmatmul.mubr.msk.f32.gmra.mrb[70].mxu1 %vm2463_vm3, %v17828_v45  ;;  %22596 = vst [vmem:[#allocation74_spill] sm:$0xff] %v17848_v59  ;;  %v204_v45 = vld [vmem:[%s22336_s0 + $0x5c8] sm:$0xff] }
 0x173   :  { %v17839_v6 = vpop.f32.mrb[76].mxu0  ;;  %13597 = vmatprep.mubr.msk.f32.mxu1 %vm16571_vm1, %v22562_v63  ;;  %vm1899_vm11 = vcmp.gt.f32.partialorder %v1085_v8, 0.0 }
 0x174   :  { %22594 = vst [vmem:[#allocation72_spill] sm:$0xff] %v17839_v6  ;;  %v17843_v18 = vpop.f32.mrb[77].mxu0  ;;  %12309 = vmatmul.mubr.msk.f32.gmra.mrb[182].mxu0 %vm224_vm0, %v202_v57  ;;  %v205_v57 = vld [vmem:[%s22336_s0 + $0x5d0] sm:$0xff] }
 0x175   :  { %22595 = vst [vmem:[#allocation73_spill] sm:$0xff] %v17843_v18  ;;  %12311 = vmatprep.mubr.msk.f32.mxu0 %vm224_vm0, %v203_v39  ;;  %v17868_v39 = vsel %vm1897_vm9, %v1075_v61, %v2093_v28  ;;  %v2095_v61 = vmul.f32 0.2, %v1085_v8  ;;  %v17886_v28 = vsel %vm1898_vm10, %v1080_v33, %v2094_v35 }
 0x176   :  { %13598 = vmatmul.mubr.msk.f32.gmra.mrb[72].mxu1 %vm2463_vm3, %v17848_v59  ;;  %22599 = vst [vmem:[#allocation77_spill] sm:$0xff] %v17868_v39  ;;  %v206_v59 = vld [vmem:[%s22336_s0 + $0x5d8] sm:$0xff]  ;;  %22602 = vst [vmem:[#allocation80_spill] sm:$0xff] %v17886_v28 }
 0x177   :  { %v17859_v18 = vpop.f32.mrb[78].mxu0  ;;  %13600 = vmatprep.mubr.msk.f32.mxu1 %vm16571_vm1, %v22562_v63  ;;  %v17906_v35 = vsel %vm1899_vm11, %v1085_v8, %v2095_v61  ;;  %v212_v61 = vld [vmem:[%s22336_s0 + $0x608] sm:$0xff] }
 0x178   :  { %22597 = vst [vmem:[#allocation75_spill] sm:$0xff] %v17859_v18  ;;  %v17863_v37 = vpop.f32.mrb[79].mxu0  ;;  %12312 = vmatmul.mubr.msk.f32.gmra.mrb[184].mxu0 %vm224_vm0, %v204_v45  ;;  %v207_v45 = vld [vmem:[%s22336_s0 + $0x5e0] sm:$0xff]  ;;  %22605 = vst [vmem:[#allocation83_spill] sm:$0xff] %v17906_v35 }
 0x179   :  { %22598 = vst [vmem:[#allocation76_spill] sm:$0xff] %v17863_v37  ;;  %12314 = vmatprep.mubr.msk.f32.mxu0 %vm224_vm0, %v205_v57  ;;  %v208_v57 = vld [vmem:[%s22336_s0 + $0x5e8] sm:$0xff] }
 0x17a   :  { %13601 = vmatmul.mubr.msk.f32.gmra.mrb[74].mxu1 %vm2463_vm3, %v17868_v39  ;;  %v209_v39 = vld [vmem:[%s22336_s0 + $0x5f0] sm:$0xff] }
 0x17b   :  { %v17879_v46 = vpop.f32.mrb[80].mxu0  ;;  %13603 = vmatprep.mubr.msk.f32.mxu1 %vm16571_vm1, %v22562_v63 }
 0x17c   :  { %22600 = vst [vmem:[#allocation78_spill] sm:$0xff] %v17879_v46  ;;  %v17883_v9 = vpop.f32.mrb[81].mxu0  ;;  %12315 = vmatmul.mubr.msk.f32.gmra.mrb[186].mxu0 %vm224_vm0, %v206_v59  ;;  %v1095_v59 = vadd.f32 %v17505_v51, %v17117_v16 }
 0x17d   :  { %22601 = vst [vmem:[#allocation79_spill] sm:$0xff] %v17883_v9  ;;  %12317 = vmatprep.mubr.msk.f32.mxu0 %vm224_vm0, %v207_v45  ;;  %v210_v45 = vld [vmem:[%s22336_s0 + $0x5f8] sm:$0xff] }
 0x17e   :  { %13604 = vmatmul.mubr.msk.f32.gmra.mrb[76].mxu1 %vm2463_vm3, %v17886_v28  ;;  %v2097_v8 = vmul.f32 0.2, %v1095_v59  ;;  %vm1901_vm12 = vcmp.gt.f32.partialorder %v1095_v59, 0.0 }
 0x17f   :  { %v17897_v36 = vpop.f32.mrb[82].mxu0  ;;  %13606 = vmatprep.mubr.msk.f32.mxu1 %vm16571_vm1, %v22562_v63 }
 0x180   :  { %22603 = vst [vmem:[#allocation81_spill] sm:$0xff] %v17897_v36  ;;  %v17901_v33 = vpop.f32.mrb[83].mxu0  ;;  %12318 = vmatmul.mubr.msk.f32.gmra.mrb[188].mxu0 %vm224_vm0, %v208_v57  ;;  %v211_v36 = vld [vmem:[%s22336_s0 + $0x600] sm:$0xff]  ;;  %v213_v57 = vld [vmem:[%s22336_s0 + $0x610] sm:$0xff]  ;;  %v17943_v24 = vsel %vm1901_vm12, %v1095_v59, %v2097_v8 }
 0x181   :  { %22604 = vst [vmem:[#allocation82_spill] sm:$0xff] %v17901_v33  ;;  %12320 = vmatprep.mubr.msk.f32.mxu0 %vm224_vm0, %v209_v39  ;;  %v1100_v39 = vadd.f32 %v17117_v16, %v17526_v1  ;;  %22610 = vst [vmem:[#allocation88_spill] sm:$0xff] %v17943_v24 }
 0x182   :  { %13607 = vmatmul.mubr.msk.f32.gmra.mrb[78].mxu1 %vm2463_vm3, %v17906_v35 }
 0x183   :  { %v17917_v28 = vpop.f32.mrb[84].mxu0  ;;  %13609 = vmatprep.mubr.msk.f32.mxu1 %vm16571_vm1, %v22562_v63  ;;  %v2098_v1 = vmul.f32 0.2, %v1100_v39  ;;  %vm1902_vm13 = vcmp.gt.f32.partialorder %v1100_v39, 0.0 }
 0x184   :  { %22606 = vst [vmem:[#allocation84_spill] sm:$0xff] %v17917_v28  ;;  %v17921_v51 = vpop.f32.mrb[85].mxu0  ;;  %12321 = vmatmul.mubr.msk.f32.gmra.mrb[190].mxu0 %vm224_vm0, %v210_v45 }
 0x185   :  { %22607 = vst [vmem:[#allocation85_spill] sm:$0xff] %v17921_v51  ;;  %12323 = vmatprep.mubr.msk.f32.mxu0 %vm224_vm0, %v211_v36  ;;  %v1105_v36 = vadd.f32 %v17522_v7, %v17117_v16  ;;  %v17961_v7 = vld [vmem:[%s22338_s2] ss:$0 sm:$0xff]  ;;  %v17965_v8 = vsel %vm1902_vm13, %v1100_v39, %v2098_v1 }
 0x186   :  { %13610 = vmatmul.mubr.f32.gmra.mrb[80].mxu1 %v22562_v63  ;;  %v1110_v59 = vadd.f32 %v17961_v7, %v17546_v43  ;;  %22613 = vst [vmem:[#allocation91_spill] sm:$0xff] %v17965_v8  ;;  %v1115_v43 = vadd.f32 %v17961_v7, %v17542_v31 }
 0x187   :  { %v17934_v35 = vpop.f32.mrb[86].mxu0  ;;  %13612 = vmatprep.mubr.msk.f32.mxu1 %vm16571_vm1, %v22562_v63  ;;  %v2099_v16 = vmul.f32 0.2, %v1105_v36  ;;  %vm1903_vm14 = vcmp.gt.f32.partialorder %v1105_v36, 0.0 }
 0x188   :  { %22608 = vst [vmem:[#allocation86_spill] sm:$0xff] %v17934_v35  ;;  %v17938_v45 = vpop.f32.mrb[87].mxu0  ;;  %12324 = vmatmul.mubr.msk.f32.gmra.mrb[192].mxu0 %vm224_vm0, %v212_v61  ;;  %v2100_v39 = vmul.f32 0.2, %v1110_v59  ;;  %v2101_v31 = vmul.f32 0.2, %v1115_v43 }
 0x189   :  { %22609 = vst [vmem:[#allocation87_spill] sm:$0xff] %v17938_v45  ;;  %12326 = vmatprep.mubr.msk.f32.mxu0 %vm224_vm0, %v213_v57  ;;  %v17980_v1 = vsel %vm1903_vm14, %v1105_v36, %v2099_v16  ;;  %v1120_v36 = vadd.f32 %v17961_v7, %v17566_v4  ;;  %vm1905_vm15 = vcmp.gt.f32.partialorder %v1115_v43, 0.0 }
 0x18a   :  { %13613 = vmatmul.mubr.msk.f32.gmra.mrb[82].mxu1 %vm2463_vm3, %v17943_v24  ;;  %22616 = vst [vmem:[#allocation94_spill] sm:$0xff] %v17980_v1  ;;  %v18008_v4 = vsel %vm1905_vm15, %v1115_v43, %v2101_v31 }
 0x18b   :  { %v17951_v56 = vpop.f32.mrb[88].mxu0  ;;  %13615 = vmatprep.mubr.msk.f32.mxu1 %vm16571_vm1, %v22562_v63  ;;  %v2102_v3 = vmul.f32 0.2, %v1120_v36  ;;  %22622 = vst [vmem:[#allocation100_spill] sm:$0xff] %v18008_v4  ;;  %vm1906_vm2 = vcmp.gt.f32.partialorder %v1120_v36, 0.0 }
 0x18c   :  { %22611 = vst [vmem:[#allocation89_spill] sm:$0xff] %v17951_v56  ;;  %v17955_v61 = vpop.f32.mrb[89].mxu0  ;;  %12327 = vmatmul.mubr.msk.f32.gmra.mrb[194].mxu0 %vm224_vm0, %v214_v0  ;;  %vm1904_vm0 = vcmp.gt.f32.partialorder %v1110_v59, 0.0 }
 0x18d   :  { %22612 = vst [vmem:[#allocation90_spill] sm:$0xff] %v17955_v61  ;;  %12345 = vmatprep.mubr.msk.f32.mxu0 %vm16571_vm1, %v22562_v63  ;;  %v17995_v16 = vsel %vm1904_vm0, %v1110_v59, %v2100_v39 }
 0x18e   :  { %13616 = vmatmul.mubr.msk.f32.gmra.mrb[84].mxu1 %vm2463_vm3, %v17965_v8  ;;  %22619 = vst [vmem:[#allocation97_spill] sm:$0xff] %v17995_v16 }
 0x18f   :  { %v17971_v57 = vpop.f32.mrb[90].mxu0  ;;  %13618 = vmatprep.mubr.msk.f32.mxu1 %vm16571_vm1, %v22562_v63 }
 0x190   :  { %22614 = vst [vmem:[#allocation92_spill] sm:$0xff] %v17971_v57  ;;  %v17975_v0 = vpop.f32.mrb[91].mxu0  ;;  %12346 = vmatmul.mubr.f32.vlgmr.msra.gmra.mrb[196].mxu0 %v22562_v63 }
 0x191   :  { %22615 = vst [vmem:[#allocation93_spill] sm:$0xff] %v17975_v0  ;;  %12348 = vmatprep.mubr.msk.f32.mxu0 %vm16571_vm1, %v22562_v63 }
 0x192   :  { %13619 = vmatmul.mubr.msk.f32.gmra.mrb[86].mxu1 %vm2463_vm3, %v17980_v1 }
 0x193   :  { %v17986_v8 = vpop.f32.mrb[92].mxu0  ;;  %13621 = vmatprep.mubr.msk.f32.mxu1 %vm16571_vm1, %v22562_v63 }
 0x194   :  { %22617 = vst [vmem:[#allocation95_spill] sm:$0xff] %v17986_v8  ;;  %v17990_v0 = vpop.f32.mrb[93].mxu0  ;;  %12349 = vmatmul.mubr.f32.gmra.mrb[198].mxu0 %v22562_v63 }
 0x195   :  { %22618 = vst [vmem:[#allocation96_spill] sm:$0xff] %v17990_v0  ;;  %12351 = vmatprep.mubr.msk.f32.mxu0 %vm16571_vm1, %v22562_v63 }
 0x196   :  { %13622 = vmatmul.mubr.msk.f32.gmra.mrb[88].mxu1 %vm2463_vm3, %v17995_v16  ;;  %v18021_v16 = vsel %vm1906_vm2, %v1120_v36, %v2102_v3  ;;  %v10570_v3 = vld [vmem:[%s22337_s3 + $0x248] sm:$0xff] }
 0x197   :  { %v18001_v1 = vpop.f32.mrb[94].mxu0  ;;  %13624 = vmatprep.mubr.msk.f32.mxu1 %vm16571_vm1, %v22562_v63  ;;  %22625 = vst [vmem:[#allocation103_spill] sm:$0xff] %v18021_v16 }
 0x198   :  { %22620 = vst [vmem:[#allocation98_spill] sm:$0xff] %v18001_v1  ;;  %v18005_v24 = vpop.f32.mrb[95].mxu0  ;;  %12352 = vmatmul.mubr.f32.gmra.mrb[200].mxu0 %v22562_v63 }
 0x199   :  { %22621 = vst [vmem:[#allocation99_spill] sm:$0xff] %v18005_v24  ;;  %12354 = vmatprep.mubr.msk.f32.mxu0 %vm16571_vm1, %v22562_v63 }
 0x19a   :  { %13625 = vmatmul.mubr.msk.f32.gmra.mrb[90].mxu1 %vm2463_vm3, %v18008_v4 }
 0x19b   :  { %v18014_v59 = vpop.f32.mrb[96].mxu0  ;;  %13627 = vmatprep.mubr.msk.f32.mxu1 %vm16571_vm1, %v22562_v63 }
 0x19c   :  { %22623 = vst [vmem:[#allocation101_spill] sm:$0xff] %v18014_v59  ;;  %v18018_v39 = vpop.f32.mrb[97].mxu0  ;;  %12355 = vmatmul.mubr.f32.gmra.mrb[202].mxu0 %v22562_v63  ;;  %v10569_v59 = vld [vmem:[%s22337_s3 + $0x240] sm:$0xff] }
 0x19d   :  { %22624 = vst [vmem:[#allocation102_spill] sm:$0xff] %v18018_v39  ;;  %12357 = vmatprep.mubr.msk.f32.mxu0 %vm16571_vm1, %v22562_v63  ;;  %v15050_v4 = vpack.c.bf16 %v10570_v3, %v10569_v59 }
 0x19e   :  { %13628 = vmatmul.mubr.msk.f32.gmra.mrb[92].mxu1 %vm2463_vm3, %v18021_v16 }
 0x19f   :  { %v12184_v43 = vpop.f32.mrb[98].mxu0  ;;  %13630 = vmatprep.mubr.msk.f32.mxu1 %vm16571_vm1, %v22562_v63 }
 0x1a0   :  { %v1369_v31 = vpop.f32.mrb[99].mxu0  ;;  %12358 = vmatmul.mubr.f32.gmra.mrb[204].mxu0 %v22562_v63  ;;  %v1375_v29 = vadd.f32 %v17961_v7, %v12184_v43 }
 0x1a1   :  { %12360 = vmatprep.mubr.msk.f32.mxu0 %vm16571_vm1, %v22562_v63  ;;  %v1370_v36 = vadd.f32 %v17961_v7, %v1369_v31 }
 0x1a2   :  { %13631 = vmatmul.mubr.f32.gmra.mrb[94].mxu1 %v22562_v63  ;;  %v2153_v59 = vmul.f32 0.2, %v1375_v29  ;;  %vm1957_vm5 = vcmp.gt.f32.partialorder %v1375_v29, 0.0 }
 0x1a3   :  { %v12187_v16 = vpop.f32.mrb[100].mxu0  ;;  %13649 = vmatprep.mubr.msk.f32.mxu1 %vm16571_vm1, %v22562_v63  ;;  %v2152_v21 = vmul.f32 0.2, %v1370_v36  ;;  %vm1956_vm4 = vcmp.gt.f32.partialorder %v1370_v36, 0.0 }
 0x1a4   :  { %v1379_v42 = vpop.f32.mrb[101].mxu0  ;;  %12361 = vmatmul.mubr.f32.gmra.mrb[206].mxu0 %v22562_v63  ;;  %v1385_v50 = vadd.f32 %v17961_v7, %v12187_v16  ;;  %v18061_v34 = vsel %vm1957_vm5, %v1375_v29, %v2153_v59 }
 0x1a5   :  { %12363 = vmatprep.mubr.msk.f32.mxu0 %vm16571_vm1, %v22562_v63  ;;  %v1380_v3 = vadd.f32 %v17961_v7, %v1379_v42  ;;  %v18054_v43 = vsel %vm1956_vm4, %v1370_v36, %v2152_v21  ;;  %v10571_v21 = vld [vmem:[%s22337_s3 + $0x250] sm:$0xff]  ;;  %v10572_v42 = vld [vmem:[%s22337_s3 + $0x258] sm:$0xff] }
 0x1a6   :  { %13650 = vmatmul.mubr.f32.vlgmr.msra.gmra.mrb[96].mxu1 %v22562_v63  ;;  %v2155_v16 = vmul.f32 0.2, %v1385_v50  ;;  %v15053_v10 = vpack.c.bf16 %v10572_v42, %v10571_v21  ;;  %vm1959_vm7 = vcmp.gt.f32.partialorder %v1385_v50, 0.0 }
 0x1a7   :  { %v12190_v13 = vpop.f32.mrb[102].mxu0  ;;  %15051 = vmatpush3.bf16.msra.mxu1 %v15050_v4  ;;  %13652 = vmatprep.mubr.msk.f32.mxu1 %vm16571_vm1, %v22562_v63  ;;  %v2154_v32 = vmul.f32 0.2, %v1380_v3  ;;  %vm1958_vm6 = vcmp.gt.f32.partialorder %v1380_v3, 0.0 }
 0x1a8   :  { %v1389_v31 = vpop.f32.mrb[103].mxu0  ;;  %12364 = vmatmul.mubr.f32.gmra.mrb[208].mxu0 %v22562_v63  ;;  %15052 = vmatprep.subr.bf16.mxu1 %v22576_v23  ;;  %v1395_v39 = vadd.f32 %v17961_v7, %v12190_v13  ;;  %v18086_v24 = vsel %vm1959_vm7, %v1385_v50, %v2155_v16 }
 0x1a9   :  { %12366 = vmatprep.mubr.msk.f32.mxu0 %vm16571_vm1, %v22562_v63  ;;  %v1390_v29 = vadd.f32 %v17961_v7, %v1389_v31  ;;  %v18076_v59 = vsel %vm1958_vm6, %v1380_v3, %v2154_v32 }
 0x1aa   :  { %v2157_v3 = vmul.f32 0.2, %v1395_v39  ;;  %vm1961_vm9 = vcmp.gt.f32.partialorder %v1395_v39, 0.0 }
 0x1ab   :  { %v12193_v60 = vpop.f32.mrb[104].mxu0  ;;  %15054 = vmatpush3.bf16.msra.mxu1 %v15053_v10  ;;  %v2156_v1 = vmul.f32 0.2, %v1390_v29  ;;  %vm1960_vm8 = vcmp.gt.f32.partialorder %v1390_v29, 0.0 }
 0x1ac   :  { %v1399_v4 = vpop.f32.mrb[105].mxu0  ;;  %12367 = vmatmul.mubr.msk.f32.gmra.mrb[210].mxu0 %vm2463_vm3, %v18054_v43  ;;  %15055 = vmatprep.subr.bf16.mxu1 %v22576_v23  ;;  %v1405_v50 = vadd.f32 %v17961_v7, %v12193_v60  ;;  %v18108_v0 = vsel %vm1961_vm9, %v1395_v39, %v2157_v3  ;;  %v2447_v60 = vld [vmem:[%s22337_s3 + $0x8] sm:$0xff] }
 0x1ad   :  { %12369 = vmatprep.mubr.msk.f32.mxu0 %vm16571_vm1, %v22562_v63  ;;  %v1400_v10 = vadd.f32 %v17961_v7, %v1399_v4  ;;  %v18097_v13 = vsel %vm1960_vm8, %v1390_v29, %v2156_v1  ;;  %v2446_v1 = vld [vmem:[%s22337_s3] sm:$0xff] }
 0x1ae   :  { %v2159_v29 = vmul.f32 0.2, %v1405_v50  ;;  %v14954_v56 = vpack.c.bf16 %v2447_v60, %v2446_v1  ;;  %vm1963_vm11 = vcmp.gt.f32.partialorder %v1405_v50, 0.0 }
 0x1af   :  { %v12196_v41 = vpop.f32.mrb[106].mxu0  ;;  %v2158_v16 = vmul.f32 0.2, %v1400_v10  ;;  %vm1962_vm10 = vcmp.gt.f32.partialorder %v1400_v10, 0.0 }
 0x1b0   :  { %v1409_v27 = vpop.f32.mrb[107].mxu0  ;;  %12370 = vmatmul.mubr.msk.f32.gmra.mrb[212].mxu0 %vm2463_vm3, %v18061_v34  ;;  %v18143_v35 = vsel %vm1963_vm11, %v1405_v50, %v2159_v29  ;;  %v2451_v50 = vld [vmem:[%s22337_s3 + $0x28] sm:$0xff] }
 0x1b1   :  { %12372 = vmatprep.mubr.msk.f32.mxu0 %vm16571_vm1, %v22562_v63  ;;  %v1410_v39 = vadd.f32 %v17961_v7, %v1409_v27  ;;  %v18125_v57 = vsel %vm1962_vm10, %v1400_v10, %v2158_v16  ;;  %14955 = vmatpush3.bf16.msra.mxu0 %v14954_v56  ;;  %v2448_v27 = vld [vmem:[%s22337_s3 + $0x10] sm:$0xff]  ;;  %v2449_v10 = vld [vmem:[%s22337_s3 + $0x18] sm:$0xff]  ;;  %v1415_v16 = vadd.f32 %v17961_v7, %v12196_v41  ;;  %v2450_v41 = vld [vmem:[%s22337_s3 + $0x20] sm:$0xff] }
 0x1b2   :  { %14956 = vmatprep.subr.bf16.mxu0 %v22576_v23  ;;  %v14957_v45 = vpack.c.bf16 %v2449_v10, %v2448_v27  ;;  %v14960_v51 = vpack.c.bf16 %v2451_v50, %v2450_v41 }
 0x1b3   :  { %v18074_v36 = vpop.f32.mrb[108].mxu0  ;;  %v2160_v1 = vmul.f32 0.2, %v1410_v39  ;;  %vm1964_vm12 = vcmp.gt.f32.partialorder %v1410_v39, 0.0  ;;  %v2161_v29 = vmul.f32 0.2, %v1415_v16 }
 0x1b4   :  { %v1419_v11 = vpop.f32.mrb[109].mxu0  ;;  %12373 = vmatmul.mubr.msk.f32.gmra.mrb[214].mxu0 %vm2463_vm3, %v18076_v59  ;;  %vm1965_vm13 = vcmp.gt.f32.partialorder %v1415_v16, 0.0 }
 0x1b5   :  { %12375 = vmatprep.mubr.msk.f32.mxu0 %vm16571_vm1, %v22562_v63  ;;  %14958 = vmatpush3.bf16.msra.mxu0 %v14957_v45  ;;  %v1420_v27 = vadd.f32 %v17961_v7, %v1419_v11  ;;  %v18161_v28 = vsel %vm1964_vm12, %v1410_v39, %v2160_v1  ;;  %v2452_v11 = vld [vmem:[%s22337_s3 + $0x30] sm:$0xff]  ;;  %v2453_v39 = vld [vmem:[%s22337_s3 + $0x38] sm:$0xff]  ;;  %v1425_v1 = vadd.f32 %v17961_v7, %v18074_v36 }
 0x1b6   :  { %14959 = vmatprep.subr.bf16.mxu0 %v22576_v23  ;;  %v18180_v33 = vsel %vm1965_vm13, %v1415_v16, %v2161_v29  ;;  %v14963_v46 = vpack.c.bf16 %v2453_v39, %v2452_v11 }
 0x1b7   :  { %v18084_v31 = vpop.f32.mrb[110].mxu0  ;;  %v2162_v41 = vmul.f32 0.2, %v1420_v27  ;;  %vm1966_vm14 = vcmp.gt.f32.partialorder %v1420_v27, 0.0  ;;  %v2163_v9 = vmul.f32 0.2, %v1425_v1 }
 0x1b8   :  { %v18088_v32 = vpop.f32.mrb[111].mxu0  ;;  %12376 = vmatmul.mubr.msk.f32.gmra.mrb[216].mxu0 %vm2463_vm3, %v18086_v24  ;;  %vm1967_vm0 = vcmp.gt.f32.partialorder %v1425_v1, 0.0 }
 0x1b9   :  { %12378 = vmatprep.mubr.msk.f32.mxu0 %vm16571_vm1, %v22562_v63  ;;  %14961 = vmatpush3.bf16.msra.mxu0 %v14960_v51  ;;  %v1430_v36 = vadd.f32 %v17961_v7, %v18088_v32  ;;  %v18193_v16 = vsel %vm1966_vm14, %v1420_v27, %v2162_v41  ;;  %v18205_v32 = vsel %vm1967_vm0, %v1425_v1, %v2163_v9 }
 0x1ba   :  { %14962 = vmatprep.subr.bf16.mxu0 %v22576_v23 }
 0x1bb   :  { %v18095_v21 = vpop.f32.mrb[112].mxu0  ;;  %v2164_v11 = vmul.f32 0.2, %v1430_v36  ;;  %vm1968_vm15 = vcmp.gt.f32.partialorder %v1430_v36, 0.0 }
 0x1bc   :  { %v18099_v42 = vpop.f32.mrb[113].mxu0  ;;  %12379 = vmatmul.mubr.msk.f32.gmra.mrb[218].mxu0 %vm2463_vm3, %v18097_v13  ;;  %v1445_v1 = vadd.f32 %v17961_v7, %v18095_v21 }
 0x1bd   :  { %12381 = vmatprep.mubr.msk.f32.mxu0 %vm16571_vm1, %v22562_v63  ;;  %14964 = vmatpush3.bf16.msra.mxu0 %v14963_v46  ;;  %v1435_v46 = vadd.f32 %v17961_v7, %v18084_v31  ;;  %v1440_v37 = vadd.f32 %v17961_v7, %v18099_v42  ;;  %v18217_v31 = vsel %vm1968_vm15, %v1430_v36, %v2164_v11 }
 0x1be   :  { %14965 = vmatprep.subr.bf16.mxu0 %v22576_v23  ;;  %22626 = vst [vmem:[#allocation104_spill] sm:$0xff] %v18217_v31  ;;  %v2167_v11 = vmul.f32 0.2, %v1445_v1  ;;  %vm1971_vm5 = vcmp.gt.f32.partialorder %v1445_v1, 0.0 }
 0x1bf   :  { %v18106_v8 = vpop.f32.mrb[114].mxu0  ;;  %v2165_v41 = vmul.f32 0.2, %v1435_v46  ;;  %vm1969_vm2 = vcmp.gt.f32.partialorder %v1435_v46, 0.0  ;;  %v2166_v26 = vmul.f32 0.2, %v1440_v37 }
 0x1c0   :  { %v18110_v4 = vpop.f32.mrb[115].mxu0  ;;  %12382 = vmatmul.mubr.msk.f32.gmra.mrb[220].mxu0 %vm2463_vm3, %v18108_v0  ;;  %vm1970_vm4 = vcmp.gt.f32.partialorder %v1440_v37, 0.0  ;;  %v18259_v58 = vsel %vm1971_vm5, %v1445_v1, %v2167_v11 }
 0x1c1   :  { %12384 = vmatprep.mubr.msk.f32.mxu0 %vm16571_vm1, %v22562_v63  ;;  %v18229_v42 = vsel %vm1969_vm2, %v1435_v46, %v2165_v41  ;;  %v1450_v30 = vadd.f32 %v17961_v7, %v18110_v4  ;;  %v18241_v21 = vsel %vm1970_vm4, %v1440_v37, %v2166_v26  ;;  %v10573_v41 = vld [vmem:[%s22337_s3 + $0x260] sm:$0xff]  ;;  %v1455_v26 = vadd.f32 %v17961_v7, %v18106_v8 }
 0x1c2   :  { %22627 = vst [vmem:[#allocation105_spill] sm:$0xff] %v18229_v42  ;;  %22628 = vst [vmem:[#allocation106_spill] sm:$0xff] %v18241_v21  ;;  %v15056_v4 = vpack.c.bf16 %v10574_v55, %v10573_v41 }
 0x1c3   :  { %v18123_v3 = vpop.f32.mrb[116].mxu0  ;;  %v2168_v37 = vmul.f32 0.2, %v1450_v30  ;;  %22629 = vst [vmem:[#allocation107_spill] sm:$0xff] %v18259_v58  ;;  %vm1972_vm6 = vcmp.gt.f32.partialorder %v1450_v30, 0.0  ;;  %vm1973_vm7 = vcmp.gt.f32.partialorder %v1455_v26, 0.0 }
 0x1c4   :  { %v18127_v61 = vpop.f32.mrb[117].mxu0  ;;  %12385 = vmatmul.mubr.msk.f32.gmra.mrb[222].mxu0 %vm2463_vm3, %v18125_v57  ;;  %15057 = vmatpush3.bf16.msra.mxu1 %v15056_v4  ;;  %v2169_v55 = vmul.f32 0.2, %v1455_v26  ;;  %v1465_v4 = vadd.f32 %v17961_v7, %v18123_v3 }
 0x1c5   :  { %12387 = vmatprep.mubr.msk.f32.mxu0 %vm16571_vm1, %v22562_v63  ;;  %15058 = vmatprep.subr.bf16.mxu1 %v22576_v23  ;;  %v1460_v8 = vadd.f32 %v17961_v7, %v18127_v61  ;;  %v18272_v1 = vsel %vm1972_vm6, %v1450_v30, %v2168_v37 }
 0x1c6   :  { %22630 = vst [vmem:[#allocation108_spill] sm:$0xff] %v18272_v1  ;;  %v18284_v61 = vsel %vm1973_vm7, %v1455_v26, %v2169_v55  ;;  %v2171_v37 = vmul.f32 0.2, %v1465_v4  ;;  %vm1975_vm9 = vcmp.gt.f32.partialorder %v1465_v4, 0.0 }
 0x1c7   :  { %v18141_v60 = vpop.f32.mrb[118].mxu0  ;;  %v2170_v20 = vmul.f32 0.2, %v1460_v8  ;;  %22631 = vst [vmem:[#allocation109_spill] sm:$0xff] %v18284_v61  ;;  %vm1974_vm8 = vcmp.gt.f32.partialorder %v1460_v8, 0.0 }
 0x1c8   :  { %v18145_v56 = vpop.f32.mrb[119].mxu0  ;;  %12388 = vmatmul.mubr.msk.f32.gmra.mrb[224].mxu0 %vm2463_vm3, %v18143_v35  ;;  %v1475_v55 = vadd.f32 %v17961_v7, %v18141_v60 }
 0x1c9   :  { %12390 = vmatprep.mubr.msk.f32.mxu0 %vm16571_vm1, %v22562_v63  ;;  %v1470_v22 = vadd.f32 %v17961_v7, %v18145_v56  ;;  %v18296_v3 = vsel %vm1974_vm8, %v1460_v8, %v2170_v20  ;;  %v18308_v56 = vsel %vm1975_vm9, %v1465_v4, %v2171_v37 }
 0x1ca   :  { %22633 = vst [vmem:[#allocation111_spill] sm:$0xff] %v18296_v3  ;;  %22636 = vst [vmem:[#allocation114_spill] sm:$0xff] %v18308_v56  ;;  %v2173_v8 = vmul.f32 0.2, %v1475_v55  ;;  %vm1977_vm11 = vcmp.gt.f32.partialorder %v1475_v55, 0.0 }
 0x1cb   :  { %v18159_v10 = vpop.f32.mrb[120].mxu0  ;;  %v2172_v48 = vmul.f32 0.2, %v1470_v22  ;;  %vm1976_vm10 = vcmp.gt.f32.partialorder %v1470_v22, 0.0 }
 0x1cc   :  { %v18163_v45 = vpop.f32.mrb[121].mxu0  ;;  %12391 = vmatmul.mubr.msk.f32.gmra.mrb[226].mxu0 %vm2463_vm3, %v18161_v28  ;;  %v1485_v37 = vadd.f32 %v17961_v7, %v18159_v10  ;;  %v18330_v47 = vsel %vm1977_vm11, %v1475_v55, %v2173_v8 }
 0x1cd   :  { %12393 = vmatprep.mubr.msk.f32.mxu0 %vm16571_vm1, %v22562_v63  ;;  %v1480_v44 = vadd.f32 %v17961_v7, %v18163_v45  ;;  %v18320_v60 = vsel %vm1976_vm10, %v1470_v22, %v2172_v48  ;;  %22641 = vst [vmem:[#allocation119_spill] sm:$0xff] %v18330_v47 }
 0x1ce   :  { %22639 = vst [vmem:[#allocation117_spill] sm:$0xff] %v18320_v60  ;;  %v2175_v45 = vmul.f32 0.2, %v1485_v37  ;;  %vm1979_vm14 = vcmp.gt.f32.partialorder %v1485_v37, 0.0 }
 0x1cf   :  { %v18178_v50 = vpop.f32.mrb[122].mxu0  ;;  %v2174_v54 = vmul.f32 0.2, %v1480_v44  ;;  %vm1978_vm12 = vcmp.gt.f32.partialorder %v1480_v44, 0.0 }
 0x1d0   :  { %v18182_v51 = vpop.f32.mrb[123].mxu0  ;;  %12394 = vmatmul.mubr.msk.f32.gmra.mrb[228].mxu0 %vm2463_vm3, %v18180_v33 }
 0x1d1   :  { %12396 = vmatprep.mubr.msk.f32.mxu0 %vm16571_vm1, %v22562_v63  ;;  %v1490_v10 = vadd.f32 %v17961_v7, %v18182_v51  ;;  %v18341_v8 = vsel %vm1978_vm12, %v1480_v44, %v2174_v54  ;;  %v18353_v51 = vsel %vm1979_vm14, %v1485_v37, %v2175_v45  ;;  %v1495_v44 = vadd.f32 %v17961_v7, %v18178_v50 }
 0x1d2   :  { %22643 = vst [vmem:[#allocation121_spill] sm:$0xff] %v18341_v8  ;;  %22644 = vst [vmem:[#allocation122_spill] sm:$0xff] %v18353_v51 }
 0x1d3   :  { %v18191_v18 = vpop.f32.mrb[124].mxu0  ;;  %v2176_v54 = vmul.f32 0.2, %v1490_v10  ;;  %vm1980_vm15 = vcmp.gt.f32.partialorder %v1490_v10, 0.0  ;;  %v2177_v50 = vmul.f32 0.2, %v1495_v44 }
 0x1d4   :  { %v18195_v29 = vpop.f32.mrb[125].mxu0  ;;  %12397 = vmatmul.mubr.msk.f32.gmra.mrb[230].mxu0 %vm2463_vm3, %v18193_v16  ;;  %vm1981_vm4 = vcmp.gt.f32.partialorder %v1495_v44, 0.0 }
 0x1d5   :  { %12399 = vmatprep.mubr.msk.f32.mxu0 %vm16571_vm1, %v22562_v63  ;;  %v18368_v45 = vsel %vm1980_vm15, %v1490_v10, %v2176_v54  ;;  %v1505_v10 = vadd.f32 %v17961_v7, %v18191_v18 }
 0x1d6   :  { %22645 = vst [vmem:[#allocation123_spill] sm:$0xff] %v18368_v45 }
 0x1d7   :  { %v18203_v39 = vpop.f32.mrb[126].mxu0  ;;  %v2179_v18 = vmul.f32 0.2, %v1505_v10  ;;  %vm1983_vm8 = vcmp.gt.f32.partialorder %v1505_v10, 0.0 }
 0x1d8   :  { %v18207_v27 = vpop.f32.mrb[127].mxu0  ;;  %12400 = vmatmul.mubr.msk.f32.gmra.mrb[232].mxu0 %vm2463_vm3, %v18205_v32 }
 0x1d9   :  { %12402 = vmatprep.mubr.msk.f32.mxu0 %vm16571_vm1, %v22562_v63 }
 0x1db   :  { %v18215_v6 = vpop.f32.mrb[128].mxu0 }
 0x1dc   :  { %v18219_v9 = vpop.f32.mrb[129].mxu0  ;;  %12403 = vmatmul.mubr.msk.f32.gmra.mrb[234].mxu0 %vm2463_vm3, %v18217_v31 }
 0x1dd   :  { %12405 = vmatprep.mubr.msk.f32.mxu0 %vm16571_vm1, %v22562_v63 }
 0x1df   :  { %v18227_v12 = vpop.f32.mrb[130].mxu0 }
 0x1e0   :  { %v18231_v36 = vpop.f32.mrb[131].mxu0  ;;  %12406 = vmatmul.mubr.msk.f32.gmra.mrb[236].mxu0 %vm2463_vm3, %v18229_v42 }
 0x1e1   :  { %12408 = vmatprep.mubr.msk.f32.mxu0 %vm16571_vm1, %v22562_v63 }
 0x1e3   :  { %v18239_v15 = vpop.f32.mrb[132].mxu0 }
 0x1e4   :  { %v18243_v46 = vpop.f32.mrb[133].mxu0  ;;  %12409 = vmatmul.mubr.msk.f32.gmra.mrb[238].mxu0 %vm2463_vm3, %v18241_v21 }
 0x1e5   :  { %12411 = vmatprep.mubr.msk.f32.mxu0 %vm16571_vm1, %v22562_v63 }
 0x1e7   :  { %v18257_v38 = vpop.f32.mrb[134].mxu0 }
 0x1e8   :  { %v18261_v14 = vpop.f32.mrb[135].mxu0  ;;  %12412 = vmatmul.mubr.msk.f32.gmra.mrb[240].mxu0 %vm2463_vm3, %v18259_v58 }
 0x1e9   :  { %12414 = vmatprep.mubr.msk.f32.mxu0 %vm16571_vm1, %v22562_v63 }
 0x1eb   :  { %v18270_v41 = vpop.f32.mrb[136].mxu0 }
 0x1ec   :  { %v18274_v11 = vpop.f32.mrb[137].mxu0  ;;  %12415 = vmatmul.mubr.msk.f32.gmra.mrb[242].mxu0 %vm2463_vm3, %v18272_v1 }
 0x1ed   :  { %12417 = vmatprep.mubr.msk.f32.mxu0 %vm16571_vm1, %v22562_v63 }
 0x1ef   :  { %v18282_v52 = vpop.f32.mrb[138].mxu0 }
 0x1f0   :  { %v18286_v30 = vpop.f32.mrb[139].mxu0  ;;  %12418 = vmatmul.mubr.msk.f32.gmra.mrb[244].mxu0 %vm2463_vm3, %v18284_v61 }
 0x1f1   :  { %12420 = vmatprep.mubr.msk.f32.mxu0 %vm16571_vm1, %v22562_v63 }
 0x1f3   :  { %v18294_v2 = vpop.f32.mrb[140].mxu0 }
 0x1f4   :  { %22632 = vst [vmem:[#allocation110_spill] sm:$0xff] %v18294_v2  ;;  %v18298_v26 = vpop.f32.mrb[141].mxu0  ;;  %12421 = vmatmul.mubr.msk.f32.gmra.mrb[246].mxu0 %vm2463_vm3, %v18296_v3 }
 0x1f5   :  { %22634 = vst [vmem:[#allocation112_spill] sm:$0xff] %v18298_v26  ;;  %12423 = vmatprep.mubr.msk.f32.mxu0 %vm16571_vm1, %v22562_v63  ;;  %v18420_v26 = vsel %vm1983_vm8, %v1505_v10, %v2179_v18 }
 0x1f6   :  { %22649 = vst [vmem:[#allocation127_spill] sm:$0xff] %v18420_v26 }
 0x1f7   :  { %v18306_v5 = vpop.f32.mrb[142].mxu0 }
 0x1f8   :  { %22635 = vst [vmem:[#allocation113_spill] sm:$0xff] %v18306_v5  ;;  %v18310_v20 = vpop.f32.mrb[143].mxu0  ;;  %12424 = vmatmul.mubr.msk.f32.gmra.mrb[248].mxu0 %vm2463_vm3, %v18308_v56 }
 0x1f9   :  { %22637 = vst [vmem:[#allocation115_spill] sm:$0xff] %v18310_v20  ;;  %12426 = vmatprep.mubr.msk.f32.mxu0 %vm16571_vm1, %v22562_v63 }
 0x1fb   :  { %v18318_v53 = vpop.f32.mrb[144].mxu0 }
 0x1fc   :  { %22638 = vst [vmem:[#allocation116_spill] sm:$0xff] %v18318_v53  ;;  %v18322_v4 = vpop.f32.mrb[145].mxu0  ;;  %12427 = vmatmul.mubr.msk.f32.gmra.mrb[250].mxu0 %vm2463_vm3, %v18320_v60 }
 0x1fd   :  { %22640 = vst [vmem:[#allocation118_spill] sm:$0xff] %v18322_v4  ;;  %12429 = vmatprep.mubr.msk.f32.mxu0 %vm16571_vm1, %v22562_v63 }
 0x1ff   :  { %v12256_v62 = vpop.f32.mrb[146].mxu0 }
 0x200   :  { %v1615_v48 = vadd.f32 %v17961_v7, %v12256_v62  ;;  %v18333_v22 = vpop.f32.mrb[147].mxu0  ;;  %12430 = vmatmul.mubr.msk.f32.gmra.mrb[252].mxu0 %vm2463_vm3, %v18330_v47 }
 0x201   :  { %22642 = vst [vmem:[#allocation120_spill] sm:$0xff] %v18333_v22  ;;  %12432 = vmatprep.mubr.msk.f32.mxu0 %vm16571_vm1, %v22562_v63  ;;  %v1500_v22 = vadd.f32 %v17961_v7, %v18195_v29  ;;  %v18385_v29 = vsel %vm1981_vm4, %v1495_v44, %v2177_v50  ;;  %v1510_v50 = vadd.f32 %v17961_v7, %v18207_v27 }
 0x202   :  { %vm2005_vm13 = vcmp.gt.f32.partialorder %v1615_v48, 0.0  ;;  %v2201_v40 = vmul.f32 0.2, %v1615_v48  ;;  %22647 = vst [vmem:[#allocation125_spill] sm:$0xff] %v18385_v29 }
 0x203   :  { %v12259_v55 = vpop.f32.mrb[148].mxu0  ;;  %v2178_v54 = vmul.f32 0.2, %v1500_v22  ;;  %vm1982_vm6 = vcmp.gt.f32.partialorder %v1500_v22, 0.0  ;;  %vm1984_vm10 = vcmp.gt.f32.partialorder %v1510_v50, 0.0 }
 0x204   :  { %v1619_v17 = vpop.f32.mrb[149].mxu0  ;;  %12433 = vmatmul.mubr.msk.f32.gmra.mrb[254].mxu0 %vm2463_vm3, %v18341_v8  ;;  %v18345_v62 = vsel %vm2005_vm13, %v1615_v48, %v2201_v40  ;;  %v1625_v25 = vadd.f32 %v17961_v7, %v12259_v55 }
 0x205   :  { %v1620_v49 = vadd.f32 %v17961_v7, %v1619_v17  ;;  %13653 = vmatmul.mubr.msk.f32.gmra.mrb[0].mxu1 %vm2463_vm3, %v18345_v62  ;;  %12435 = vmatprep.mubr.msk.f32.mxu0 %vm16571_vm1, %v22562_v63  ;;  %v18400_v44 = vsel %vm1982_vm6, %v1500_v22, %v2178_v54  ;;  %v10576_v22 = vld [vmem:[%s22337_s3 + $0x278] sm:$0xff] }
 0x206   :  { %13655 = vmatprep.mubr.msk.f32.mxu1 %vm16571_vm1, %v22562_v63  ;;  %v2203_v55 = vmul.f32 0.2, %v1625_v25  ;;  %vm2007_vm2 = vcmp.gt.f32.partialorder %v1625_v25, 0.0  ;;  %22648 = vst [vmem:[#allocation126_spill] sm:$0xff] %v18400_v44 }
 0x207   :  { %vm2006_vm0 = vcmp.gt.f32.partialorder %v1620_v49, 0.0  ;;  %v2202_v40 = vmul.f32 0.2, %v1620_v49  ;;  %v12262_v48 = vpop.f32.mrb[150].mxu0 }
 0x208   :  { %12436 = vmatmul.mubr.msk.f32.gmra.mrb[0].mxu0 %vm2463_vm3, %v18353_v51  ;;  %v1629_v17 = vpop.f32.mrb[151].mxu0  ;;  %v18379_v4 = vsel %vm2007_vm2, %v1625_v25, %v2203_v55 }
 0x209   :  { %v1630_v19 = vadd.f32 %v17961_v7, %v1629_v17  ;;  %v18362_v37 = vsel %vm2006_vm0, %v1620_v49, %v2202_v40  ;;  %12438 = vmatprep.mubr.msk.f32.mxu0 %vm16571_vm1, %v22562_v63  ;;  %v1635_v40 = vadd.f32 %v17961_v7, %v12262_v48 }
 0x20a   :  { %13656 = vmatmul.mubr.msk.f32.gmra.mrb[2].mxu1 %vm2463_vm3, %v18362_v37 }
 0x20b   :  { %13658 = vmatprep.mubr.msk.f32.mxu1 %vm16571_vm1, %v22562_v63  ;;  %v18374_v53 = vpop.f32.mrb[152].mxu0  ;;  %v2204_v17 = vmul.f32 0.2, %v1630_v19  ;;  %vm2008_vm5 = vcmp.gt.f32.partialorder %v1630_v19, 0.0  ;;  %v2205_v55 = vmul.f32 0.2, %v1635_v40 }
 0x20c   :  { %22646 = vst [vmem:[#allocation124_spill] sm:$0xff] %v18374_v53  ;;  %12439 = vmatmul.mubr.msk.f32.gmra.mrb[2].mxu0 %vm2463_vm3, %v18368_v45  ;;  %v1639_v49 = vpop.f32.mrb[153].mxu0  ;;  %vm2009_vm7 = vcmp.gt.f32.partialorder %v1635_v40, 0.0  ;;  %v1515_v53 = vadd.f32 %v17961_v7, %v18203_v39 }
 0x20d   :  { %12441 = vmatprep.mubr.msk.f32.mxu0 %vm16571_vm1, %v22562_v63  ;;  %v1640_v5 = vadd.f32 %v17961_v7, %v1639_v49  ;;  %v18394_v20 = vsel %vm2008_vm5, %v1630_v19, %v2204_v17  ;;  %v10575_v49 = vld [vmem:[%s22337_s3 + $0x270] sm:$0xff]  ;;  %v18414_v54 = vsel %vm2009_vm7, %v1635_v40, %v2205_v55 }
 0x20e   :  { %13659 = vmatmul.mubr.msk.f32.gmra.mrb[4].mxu1 %vm2463_vm3, %v18379_v4  ;;  %v15059_v27 = vpack.c.bf16 %v10576_v22, %v10575_v49  ;;  %v2181_v39 = vmul.f32 0.2, %v1515_v53  ;;  %v1520_v49 = vadd.f32 %v17961_v7, %v18219_v9  ;;  %vm1985_vm11 = vcmp.gt.f32.partialorder %v1515_v53, 0.0 }
 0x20f   :  { %13661 = vmatprep.mubr.msk.f32.mxu1 %vm16571_vm1, %v22562_v63  ;;  %v12268_v48 = vpop.f32.mrb[154].mxu0  ;;  %v2206_v17 = vmul.f32 0.2, %v1640_v5  ;;  %vm2010_vm9 = vcmp.gt.f32.partialorder %v1640_v5, 0.0 }
 0x210   :  { %12442 = vmatmul.mubr.msk.f32.gmra.mrb[4].mxu0 %vm2463_vm3, %v18385_v29  ;;  %v1649_v25 = vpop.f32.mrb[155].mxu0  ;;  %15060 = vmatpush3.bf16.msra.mxu1 %v15059_v27  ;;  %v18454_v9 = vsel %vm1985_vm11, %v1515_v53, %v2181_v39  ;;  %vm1986_vm13 = vcmp.gt.f32.partialorder %v1520_v49, 0.0 }
 0x211   :  { %12444 = vmatprep.mubr.msk.f32.mxu0 %vm16571_vm1, %v22562_v63  ;;  %15061 = vmatprep.subr.bf16.mxu1 %v22576_v23  ;;  %v1650_v10 = vadd.f32 %v17961_v7, %v1649_v25  ;;  %v18432_v55 = vsel %vm2010_vm9, %v1640_v5, %v2206_v17  ;;  %v1655_v25 = vadd.f32 %v17961_v7, %v12268_v48 }
 0x212   :  { %13662 = vmatmul.mubr.msk.f32.gmra.mrb[6].mxu1 %vm2463_vm3, %v18394_v20  ;;  %22652 = vst [vmem:[#allocation130_spill] sm:$0xff] %v18454_v9 }
 0x213   :  { %13664 = vmatprep.mubr.msk.f32.mxu1 %vm16571_vm1, %v22562_v63  ;;  %v12271_v2 = vpop.f32.mrb[156].mxu0  ;;  %v2208_v17 = vmul.f32 0.2, %v1650_v10  ;;  %vm2012_vm12 = vcmp.gt.f32.partialorder %v1650_v10, 0.0  ;;  %vm2013_vm14 = vcmp.gt.f32.partialorder %v1655_v25, 0.0 }
 0x214   :  { %12445 = vmatmul.mubr.msk.f32.gmra.mrb[6].mxu0 %vm2463_vm3, %v18400_v44  ;;  %v1659_v19 = vpop.f32.mrb[157].mxu0  ;;  %v2180_v44 = vmul.f32 0.2, %v1510_v50 }
 0x215   :  { %12447 = vmatprep.mubr.msk.f32.mxu0 %vm16571_vm1, %v22562_v63  ;;  %v18467_v53 = vsel %vm2012_vm12, %v1650_v10, %v2208_v17  ;;  %v1665_v10 = vadd.f32 %v17961_v7, %v12271_v2 }
 0x216   :  { %13665 = vmatmul.mubr.msk.f32.gmra.mrb[8].mxu1 %vm2463_vm3, %v18414_v54  ;;  %v18438_v18 = vsel %vm1984_vm10, %v1510_v50, %v2180_v44  ;;  %v1525_v44 = vadd.f32 %v17961_v7, %v18215_v6  ;;  %v2182_v50 = vmul.f32 0.2, %v1520_v49 }
 0x217   :  { %13667 = vmatprep.mubr.msk.f32.mxu1 %vm16571_vm1, %v22562_v63  ;;  %v18426_v29 = vpop.f32.mrb[158].mxu0  ;;  %22650 = vst [vmem:[#allocation128_spill] sm:$0xff] %v18438_v18  ;;  %vm2015_vm4 = vcmp.gt.f32.partialorder %v1665_v10, 0.0 }
 0x218   :  { %12448 = vmatmul.mubr.msk.f32.gmra.mrb[8].mxu0 %vm2463_vm3, %v18420_v26  ;;  %v1669_v40 = vpop.f32.mrb[159].mxu0  ;;  %v2183_v6 = vmul.f32 0.2, %v1525_v44  ;;  %v18473_v39 = vsel %vm1986_vm13, %v1520_v49, %v2182_v50  ;;  %vm1987_vm0 = vcmp.gt.f32.partialorder %v1525_v44, 0.0  ;;  %v1535_v49 = vadd.f32 %v17961_v7, %v18227_v12 }
 0x219   :  { %12450 = vmatprep.mubr.msk.f32.mxu0 %vm16571_vm1, %v22562_v63  ;;  %22653 = vst [vmem:[#allocation131_spill] sm:$0xff] %v18473_v39 }
 0x21a   :  { %13668 = vmatmul.mubr.msk.f32.gmra.mrb[10].mxu1 %vm2463_vm3, %v18432_v55  ;;  %v2185_v12 = vmul.f32 0.2, %v1535_v49  ;;  %vm1989_vm5 = vcmp.gt.f32.partialorder %v1535_v49, 0.0 }
 0x21b   :  { %13670 = vmatprep.mubr.msk.f32.mxu1 %vm16571_vm1, %v22562_v63  ;;  %v18444_v22 = vpop.f32.mrb[160].mxu0 }
 0x21c   :  { %12451 = vmatmul.mubr.msk.f32.gmra.mrb[10].mxu0 %vm2463_vm3, %v18438_v18  ;;  %v18448_v5 = vpop.f32.mrb[161].mxu0  ;;  %v1660_v18 = vadd.f32 %v17961_v7, %v1659_v19 }
 0x21d   :  { %22651 = vst [vmem:[#allocation129_spill] sm:$0xff] %v18448_v5  ;;  %12453 = vmatprep.mubr.msk.f32.mxu0 %vm16571_vm1, %v22562_v63  ;;  %v2209_v5 = vmul.f32 0.2, %v1655_v25 }
 0x21e   :  { %13671 = vmatmul.mubr.f32.gmra.mrb[12].mxu1 %v22562_v63  ;;  %v2210_v17 = vmul.f32 0.2, %v1660_v18  ;;  %vm2014_vm15 = vcmp.gt.f32.partialorder %v1660_v18, 0.0 }
 0x21f   :  { %13673 = vmatprep.mubr.msk.f32.mxu1 %vm16571_vm1, %v22562_v63  ;;  %v18460_v27 = vpop.f32.mrb[162].mxu0  ;;  %v18486_v45 = vsel %vm2013_vm14, %v1655_v25, %v2209_v5  ;;  %v2211_v25 = vmul.f32 0.2, %v1665_v10 }
 0x220   :  { %12454 = vmatmul.mubr.msk.f32.gmra.mrb[12].mxu0 %vm2463_vm3, %v18454_v9  ;;  %v18464_v48 = vpop.f32.mrb[163].mxu0  ;;  %v1530_v9 = vadd.f32 %v17961_v7, %v18231_v36  ;;  %v18492_v36 = vsel %vm1987_vm0, %v1525_v44, %v2183_v6  ;;  %v18505_v44 = vsel %vm2014_vm15, %v1660_v18, %v2210_v17  ;;  %v1675_v18 = vadd.f32 %v17961_v7, %v18426_v29 }
 0x221   :  { %12456 = vmatprep.mubr.msk.f32.mxu0 %vm16571_vm1, %v22562_v63  ;;  %22654 = vst [vmem:[#allocation132_spill] sm:$0xff] %v18492_v36 }
 0x222   :  { %13674 = vmatmul.mubr.msk.f32.gmra.mrb[14].mxu1 %vm2463_vm3, %v18467_v53  ;;  %v2184_v50 = vmul.f32 0.2, %v1530_v9  ;;  %vm1988_vm2 = vcmp.gt.f32.partialorder %v1530_v9, 0.0  ;;  %vm2017_vm8 = vcmp.gt.f32.partialorder %v1675_v18, 0.0 }
 0x223   :  { %13676 = vmatprep.mubr.msk.f32.mxu1 %vm16571_vm1, %v22562_v63  ;;  %v18479_v26 = vpop.f32.mrb[164].mxu0 }
 0x224   :  { %12457 = vmatmul.mubr.msk.f32.gmra.mrb[14].mxu0 %vm2463_vm3, %v18473_v39  ;;  %v18483_v19 = vpop.f32.mrb[165].mxu0  ;;  %v1670_v39 = vadd.f32 %v17961_v7, %v1669_v40  ;;  %v18511_v6 = vsel %vm1988_vm2, %v1530_v9, %v2184_v50  ;;  %v18525_v9 = vsel %vm2015_vm4, %v1665_v10, %v2211_v25  ;;  %v1545_v50 = vadd.f32 %v17961_v7, %v18239_v15 }
 0x225   :  { %12459 = vmatprep.mubr.msk.f32.mxu0 %vm16571_vm1, %v22562_v63  ;;  %22656 = vst [vmem:[#allocation134_spill] sm:$0xff] %v18511_v6  ;;  %v2213_v25 = vmul.f32 0.2, %v1675_v18 }
 0x226   :  { %13677 = vmatmul.mubr.msk.f32.gmra.mrb[16].mxu1 %vm2463_vm3, %v18486_v45  ;;  %v2212_v17 = vmul.f32 0.2, %v1670_v39  ;;  %vm2016_vm6 = vcmp.gt.f32.partialorder %v1670_v39, 0.0  ;;  %v2187_v15 = vmul.f32 0.2, %v1545_v50  ;;  %vm1991_vm9 = vcmp.gt.f32.partialorder %v1545_v50, 0.0 }
 0x227   :  { %13679 = vmatprep.mubr.msk.f32.mxu1 %vm16571_vm1, %v22562_v63  ;;  %v18498_v2 = vpop.f32.mrb[166].mxu0  ;;  %v18563_v8 = vsel %vm2017_vm8, %v1675_v18, %v2213_v25 }
 0x228   :  { %22655 = vst [vmem:[#allocation133_spill] sm:$0xff] %v18498_v2  ;;  %12460 = vmatmul.mubr.msk.f32.gmra.mrb[16].mxu0 %vm2463_vm3, %v18492_v36  ;;  %v18502_v5 = vpop.f32.mrb[167].mxu0  ;;  %v1540_v2 = vadd.f32 %v17961_v7, %v18243_v46  ;;  %v18531_v46 = vsel %vm1989_vm5, %v1535_v49, %v2185_v12  ;;  %v18543_v51 = vsel %vm2016_vm6, %v1670_v39, %v2212_v17 }
 0x229   :  { %12462 = vmatprep.mubr.msk.f32.mxu0 %vm16571_vm1, %v22562_v63  ;;  %22657 = vst [vmem:[#allocation135_spill] sm:$0xff] %v18531_v46  ;;  %v1550_v12 = vadd.f32 %v17961_v7, %v18261_v14  ;;  %v1685_v17 = vadd.f32 %v17961_v7, %v18444_v22  ;;  %v18569_v14 = vsel %vm1991_vm9, %v1545_v50, %v2187_v15 }
 0x22a   :  { %13680 = vmatmul.mubr.msk.f32.gmra.mrb[18].mxu1 %vm2463_vm3, %v18505_v44  ;;  %vm1990_vm7 = vcmp.gt.f32.partialorder %v1540_v2, 0.0  ;;  %22659 = vst [vmem:[#allocation137_spill] sm:$0xff] %v18569_v14  ;;  %v1690_v50 = vadd.f32 %v17961_v7, %v18464_v48  ;;  %v1560_v15 = vadd.f32 %v17961_v7, %v18274_v11 }
 0x22b   :  { %13682 = vmatprep.mubr.msk.f32.mxu1 %vm16571_vm1, %v22562_v63  ;;  %v18517_v36 = vpop.f32.mrb[168].mxu0  ;;  %vm1992_vm10 = vcmp.gt.f32.partialorder %v1550_v12, 0.0  ;;  %v2215_v18 = vmul.f32 0.2, %v1685_v17  ;;  %vm2019_vm11 = vcmp.gt.f32.partialorder %v1685_v17, 0.0 }
 0x22c   :  { %12463 = vmatmul.mubr.msk.f32.gmra.mrb[18].mxu0 %vm2463_vm3, %v18511_v6  ;;  %v18521_v40 = vpop.f32.mrb[169].mxu0  ;;  %v2186_v6 = vmul.f32 0.2, %v1540_v2  ;;  %v2216_v47 = vmul.f32 0.2, %v1690_v50  ;;  %vm2020_vm13 = vcmp.gt.f32.partialorder %v1690_v50, 0.0 }
 0x22d   :  { %12465 = vmatprep.mubr.msk.f32.mxu0 %vm16571_vm1, %v22562_v63  ;;  %vm1994_vm14 = vcmp.gt.f32.partialorder %v1560_v15, 0.0 }
 0x22e   :  { %13683 = vmatmul.mubr.msk.f32.gmra.mrb[20].mxu1 %vm2463_vm3, %v18525_v9  ;;  %v18549_v49 = vsel %vm1990_vm7, %v1540_v2, %v2186_v6  ;;  %v1555_v2 = vadd.f32 %v17961_v7, %v18257_v38  ;;  %v2188_v6 = vmul.f32 0.2, %v1550_v12 }
 0x22f   :  { %13685 = vmatprep.mubr.msk.f32.mxu1 %vm16571_vm1, %v22562_v63  ;;  %v18537_v29 = vpop.f32.mrb[170].mxu0  ;;  %22658 = vst [vmem:[#allocation136_spill] sm:$0xff] %v18549_v49 }
 0x230   :  { %12466 = vmatmul.mubr.msk.f32.gmra.mrb[20].mxu0 %vm2463_vm3, %v18531_v46  ;;  %v18541_v10 = vpop.f32.mrb[171].mxu0  ;;  %v2189_v38 = vmul.f32 0.2, %v1555_v2  ;;  %v18586_v25 = vsel %vm1992_vm10, %v1550_v12, %v2188_v6  ;;  %vm1993_vm12 = vcmp.gt.f32.partialorder %v1555_v2, 0.0  ;;  %v18600_v12 = vsel %vm2019_vm11, %v1685_v17, %v2215_v18 }
 0x231   :  { %12468 = vmatprep.mubr.msk.f32.mxu0 %vm16571_vm1, %v22562_v63  ;;  %22661 = vst [vmem:[#allocation139_spill] sm:$0xff] %v18586_v25  ;;  %v1565_v6 = vadd.f32 %v17961_v7, %v18270_v41 }
 0x232   :  { %13686 = vmatmul.mubr.msk.f32.gmra.mrb[22].mxu1 %vm2463_vm3, %v18543_v51  ;;  %v18606_v11 = vsel %vm1993_vm12, %v1555_v2, %v2189_v38  ;;  %v1700_v2 = vadd.f32 %v17961_v7, %v18483_v19  ;;  %v18620_v38 = vsel %vm2020_vm13, %v1690_v50, %v2216_v47  ;;  %v1705_v19 = vadd.f32 %v17961_v7, %v18479_v26 }
 0x233   :  { %13688 = vmatprep.mubr.msk.f32.mxu1 %vm16571_vm1, %v22562_v63  ;;  %v18555_v46 = vpop.f32.mrb[172].mxu0  ;;  %22662 = vst [vmem:[#allocation140_spill] sm:$0xff] %v18606_v11  ;;  %v2191_v41 = vmul.f32 0.2, %v1565_v6  ;;  %vm1995_vm15 = vcmp.gt.f32.partialorder %v1565_v6, 0.0 }
 0x234   :  { %12469 = vmatmul.mubr.msk.f32.gmra.mrb[22].mxu0 %vm2463_vm3, %v18549_v49  ;;  %v18559_v39 = vpop.f32.mrb[173].mxu0  ;;  %v2218_v50 = vmul.f32 0.2, %v1700_v2  ;;  %vm2022_vm2 = vcmp.gt.f32.partialorder %v1700_v2, 0.0  ;;  %vm2023_vm5 = vcmp.gt.f32.partialorder %v1705_v19, 0.0 }
 0x235   :  { %12471 = vmatprep.mubr.msk.f32.mxu0 %vm16571_vm1, %v22562_v63 }
 0x236   :  { %13689 = vmatmul.mubr.msk.f32.gmra.mrb[24].mxu1 %vm2463_vm3, %v18563_v8 }
 0x237   :  { %13691 = vmatprep.mubr.msk.f32.mxu1 %vm16571_vm1, %v22562_v63  ;;  %v18575_v49 = vpop.f32.mrb[174].mxu0 }
 0x238   :  { %12472 = vmatmul.mubr.msk.f32.gmra.mrb[24].mxu0 %vm2463_vm3, %v18569_v14  ;;  %v18579_v22 = vpop.f32.mrb[175].mxu0  ;;  %v1695_v14 = vadd.f32 %v17961_v7, %v18460_v27 }
 0x239   :  { %22660 = vst [vmem:[#allocation138_spill] sm:$0xff] %v18579_v22  ;;  %12474 = vmatprep.mubr.msk.f32.mxu0 %vm16571_vm1, %v22562_v63 }
 0x23a   :  { %13692 = vmatmul.mubr.f32.gmra.mrb[26].mxu1 %v22562_v63  ;;  %v2217_v18 = vmul.f32 0.2, %v1695_v14  ;;  %vm2021_vm0 = vcmp.gt.f32.partialorder %v1695_v14, 0.0 }
 0x23b   :  { %13694 = vmatprep.mubr.msk.f32.mxu1 %vm16571_vm1, %v22562_v63  ;;  %v18592_v22 = vpop.f32.mrb[176].mxu0 }
 0x23c   :  { %12475 = vmatmul.mubr.msk.f32.gmra.mrb[26].mxu0 %vm2463_vm3, %v18586_v25  ;;  %v18596_v48 = vpop.f32.mrb[177].mxu0  ;;  %v2190_v25 = vmul.f32 0.2, %v1560_v15 }
 0x23d   :  { %12477 = vmatprep.mubr.msk.f32.mxu0 %vm16571_vm1, %v22562_v63 }
 0x23e   :  { %13695 = vmatmul.mubr.msk.f32.gmra.mrb[28].mxu1 %vm2463_vm3, %v18600_v12  ;;  %v18626_v60 = vsel %vm1994_vm14, %v1560_v15, %v2190_v25  ;;  %v18640_v25 = vsel %vm2021_vm0, %v1695_v14, %v2217_v18  ;;  %v18651_v15 = vld [vmem:[%s22338_s2] ss:$0 sm:$0xff]  ;;  %v2219_v18 = vmul.f32 0.2, %v1705_v19 }
 0x23f   :  { %13697 = vmatprep.mubr.msk.f32.mxu1 %vm16571_vm1, %v22562_v63  ;;  %v18612_v27 = vpop.f32.mrb[178].mxu0  ;;  %22663 = vst [vmem:[#allocation141_spill] sm:$0xff] %v18626_v60 }
 0x240   :  { %12478 = vmatmul.mubr.msk.f32.gmra.mrb[28].mxu0 %vm2463_vm3, %v18606_v11  ;;  %v18616_v17 = vpop.f32.mrb[179].mxu0  ;;  %v1570_v11 = vadd.f32 %v17961_v7, %v18286_v30  ;;  %v18646_v30 = vsel %vm1995_vm15, %v1565_v6, %v2191_v41  ;;  %v1575_v7 = vadd.f32 %v18651_v15, %v18282_v52  ;;  %v1710_v41 = vadd.f32 %v18651_v15, %v18502_v5 }
 0x241   :  { %12480 = vmatprep.mubr.msk.f32.mxu0 %vm16571_vm1, %v22562_v63  ;;  %22665 = vst [vmem:[#allocation143_spill] sm:$0xff] %v18646_v30 }
 0x242   :  { %13698 = vmatmul.mubr.msk.f32.gmra.mrb[30].mxu1 %vm2463_vm3, %v18620_v38  ;;  %v2192_v26 = vmul.f32 0.2, %v1570_v11  ;;  %vm1996_vm4 = vcmp.gt.f32.partialorder %v1570_v11, 0.0  ;;  %v2193_v52 = vmul.f32 0.2, %v1575_v7  ;;  %vm1997_vm6 = vcmp.gt.f32.partialorder %v1575_v7, 0.0 }
 0x243   :  { %13700 = vmatprep.mubr.msk.f32.mxu1 %vm16571_vm1, %v22562_v63  ;;  %v18632_v56 = vpop.f32.mrb[180].mxu0  ;;  %vm2024_vm7 = vcmp.gt.f32.partialorder %v1710_v41, 0.0 }
 0x244   :  { %22664 = vst [vmem:[#allocation142_spill] sm:$0xff] %v18632_v56  ;;  %12481 = vmatmul.mubr.msk.f32.gmra.mrb[30].mxu0 %vm2463_vm3, %v18626_v60  ;;  %v18636_v47 = vpop.f32.mrb[181].mxu0  ;;  %v18665_v56 = vsel %vm2022_vm2, %v1700_v2, %v2218_v50  ;;  %v18671_v60 = vsel %vm1996_vm4, %v1570_v11, %v2192_v26  ;;  %v2220_v2 = vmul.f32 0.2, %v1710_v41  ;;  %v18681_v50 = vsel %vm2023_vm5, %v1705_v19, %v2219_v18 }
 0x245   :  { %12483 = vmatprep.mubr.msk.f32.mxu0 %vm16571_vm1, %v22562_v63  ;;  %22666 = vst [vmem:[#allocation144_spill] sm:$0xff] %v18671_v60  ;;  %v18687_v11 = vsel %vm1997_vm6, %v1575_v7, %v2193_v52  ;;  %v1720_v19 = vadd.f32 %v18651_v15, %v18521_v40  ;;  %v1725_v40 = vadd.f32 %v18651_v15, %v18517_v36 }
 0x246   :  { %13701 = vmatmul.mubr.msk.f32.gmra.mrb[32].mxu1 %vm2463_vm3, %v18640_v25  ;;  %22667 = vst [vmem:[#allocation145_spill] sm:$0xff] %v18687_v11  ;;  %v18699_v18 = vsel %vm2024_vm7, %v1710_v41, %v2220_v2  ;;  %v1730_v36 = vadd.f32 %v18651_v15, %v18541_v10  ;;  %v1735_v10 = vadd.f32 %v18651_v15, %v18537_v29 }
 0x247   :  { %13703 = vmatprep.mubr.msk.f32.mxu1 %vm16571_vm1, %v22562_v63  ;;  %v18657_v14 = vpop.f32.mrb[182].mxu0  ;;  %v2222_v41 = vmul.f32 0.2, %v1720_v19  ;;  %vm2026_vm8 = vcmp.gt.f32.partialorder %v1720_v19, 0.0  ;;  %vm2027_vm9 = vcmp.gt.f32.partialorder %v1725_v40, 0.0 }
 0x248   :  { %12484 = vmatmul.mubr.msk.f32.gmra.mrb[32].mxu0 %vm2463_vm3, %v18646_v30  ;;  %v18661_v6 = vpop.f32.mrb[183].mxu0  ;;  %vm2028_vm10 = vcmp.gt.f32.partialorder %v1730_v36, 0.0  ;;  %v2225_v29 = vmul.f32 0.2, %v1735_v10  ;;  %vm2029_vm11 = vcmp.gt.f32.partialorder %v1735_v10, 0.0 }
 0x249   :  { %12486 = vmatprep.mubr.msk.f32.mxu0 %vm16571_vm1, %v22562_v63  ;;  %v18726_v3 = vsel %vm2026_vm8, %v1720_v19, %v2222_v41  ;;  %v2224_v19 = vmul.f32 0.2, %v1730_v36 }
 0x24a   :  { %13704 = vmatmul.mubr.msk.f32.gmra.mrb[34].mxu1 %vm2463_vm3, %v18665_v56  ;;  %v18767_v31 = vsel %vm2029_vm11, %v1735_v10, %v2225_v29 }
 0x24b   :  { %13706 = vmatprep.mubr.msk.f32.mxu1 %vm16571_vm1, %v22562_v63  ;;  %v18675_v30 = vpop.f32.mrb[184].mxu0 }
 0x24c   :  { %12487 = vmatmul.mubr.msk.f32.gmra.mrb[34].mxu0 %vm2463_vm3, %v18671_v60  ;;  %v18679_v5 = vpop.f32.mrb[185].mxu0 }
 0x24d   :  { %12489 = vmatprep.mubr.msk.f32.mxu0 %vm16571_vm1, %v22562_v63 }
 0x24e   :  { %13707 = vmatmul.mubr.msk.f32.gmra.mrb[36].mxu1 %vm2463_vm3, %v18681_v50 }
 0x24f   :  { %13709 = vmatprep.mubr.msk.f32.mxu1 %vm16571_vm1, %v22562_v63  ;;  %v18691_v26 = vpop.f32.mrb[186].mxu0 }
 0x250   :  { %12490 = vmatmul.mubr.msk.f32.gmra.mrb[36].mxu0 %vm2463_vm3, %v18687_v11  ;;  %v18695_v60 = vpop.f32.mrb[187].mxu0 }
 0x251   :  { %12508 = vmatprep.mubr.msk.f32.mxu0 %vm16571_vm1, %v22562_v63 }
 0x252   :  { %13710 = vmatmul.mubr.msk.f32.gmra.mrb[38].mxu1 %vm2463_vm3, %v18699_v18 }
 0x253   :  { %13712 = vmatprep.mubr.msk.f32.mxu1 %vm16571_vm1, %v22562_v63  ;;  %v18707_v7 = vpop.f32.mrb[188].mxu0 }
 0x254   :  { %12509 = vmatmul.mubr.f32.vlgmr.msra.gmra.mrb[196].mxu0 %v22562_v63  ;;  %v18710_v52 = vpop.f32.mrb[189].mxu0 }
 0x255   :  { %22668 = vst [vmem:[#allocation146_spill] sm:$0xff] %v18710_v52  ;;  %12511 = vmatprep.mubr.msk.f32.mxu0 %vm16571_vm1, %v22562_v63  ;;  %v2223_v52 = vmul.f32 0.2, %v1725_v40 }
 0x256   :  { %13713 = vmatmul.mubr.f32.gmra.mrb[40].mxu1 %v22562_v63 }
 0x257   :  { %13715 = vmatprep.mubr.msk.f32.mxu1 %vm16571_vm1, %v22562_v63  ;;  %v18719_v2 = vpop.f32.mrb[190].mxu0  ;;  %v18741_v41 = vsel %vm2027_vm9, %v1725_v40, %v2223_v52  ;;  %v1740_v52 = vadd.f32 %v18651_v15, %v18559_v39  ;;  %v18756_v40 = vsel %vm2028_vm10, %v1730_v36, %v2224_v19  ;;  %v1760_v19 = vadd.f32 %v18651_v15, %v18596_v48 }
 0x258   :  { %12512 = vmatmul.mubr.f32.gmra.mrb[198].mxu0 %v22562_v63  ;;  %v18722_v11 = vpop.f32.mrb[191].mxu0 }
 0x259   :  { %12514 = vmatprep.mubr.msk.f32.mxu0 %vm16571_vm1, %v22562_v63  ;;  %v2226_v42 = vmul.f32 0.2, %v1740_v52  ;;  %vm2030_vm12 = vcmp.gt.f32.partialorder %v1740_v52, 0.0  ;;  %vm2034_vm0 = vcmp.gt.f32.partialorder %v1760_v19, 0.0 }
 0x25a   :  { %13716 = vmatmul.mubr.msk.f32.gmra.mrb[42].mxu1 %vm2463_vm3, %v18726_v3 }
 0x25b   :  { %13718 = vmatprep.mubr.msk.f32.mxu1 %vm16571_vm1, %v22562_v63  ;;  %v18734_v61 = vpop.f32.mrb[192].mxu0  ;;  %v18776_v36 = vsel %vm2030_vm12, %v1740_v52, %v2226_v42 }
 0x25c   :  { %12515 = vmatmul.mubr.f32.gmra.mrb[200].mxu0 %v22562_v63  ;;  %v18737_v1 = vpop.f32.mrb[193].mxu0 }
 0x25d   :  { %12517 = vmatprep.mubr.msk.f32.mxu0 %vm16571_vm1, %v22562_v63 }
 0x25e   :  { %13719 = vmatmul.mubr.msk.f32.gmra.mrb[44].mxu1 %vm2463_vm3, %v18741_v41 }
 0x25f   :  { %13721 = vmatprep.mubr.msk.f32.mxu1 %vm16571_vm1, %v22562_v63  ;;  %v18749_v58 = vpop.f32.mrb[194].mxu0 }
 0x260   :  { %22669 = vst [vmem:[#allocation147_spill] sm:$0xff] %v18749_v58  ;;  %12518 = vmatmul.mubr.f32.gmra.mrb[202].mxu0 %v22562_v63  ;;  %v18752_v21 = vpop.f32.mrb[195].mxu0  ;;  %v1745_v58 = vadd.f32 %v18651_v15, %v18555_v46  ;;  %v1755_v46 = vadd.f32 %v18651_v15, %v18575_v49  ;;  %v2230_v49 = vmul.f32 0.2, %v1760_v19 }
 0x261   :  { %12520 = vmatprep.mubr.msk.f32.mxu0 %vm16571_vm1, %v22562_v63 }
 0x262   :  { %13722 = vmatmul.mubr.msk.f32.gmra.mrb[46].mxu1 %vm2463_vm3, %v18756_v40  ;;  %v2227_v39 = vmul.f32 0.2, %v1745_v58  ;;  %vm2031_vm13 = vcmp.gt.f32.partialorder %v1745_v58, 0.0  ;;  %v2229_v42 = vmul.f32 0.2, %v1755_v46  ;;  %vm2033_vm14 = vcmp.gt.f32.partialorder %v1755_v46, 0.0 }
 0x263   :  { %13724 = vmatprep.mubr.msk.f32.mxu1 %vm16571_vm1, %v22562_v63  ;;  %v18819_v52 = vsel %vm2034_vm0, %v1760_v19, %v2230_v49 }
 0x264   :  { %12521 = vmatmul.mubr.f32.gmra.mrb[204].mxu0 %v22562_v63  ;;  %v18787_v10 = vsel %vm2031_vm13, %v1745_v58, %v2227_v39  ;;  %v1765_v58 = vadd.f32 %v18651_v15, %v18592_v22  ;;  %v18807_v29 = vsel %vm2033_vm14, %v1755_v46, %v2229_v42  ;;  %v1770_v22 = vadd.f32 %v18651_v15, %v18616_v17 }
 0x265   :  { %12523 = vmatprep.mubr.msk.f32.mxu0 %vm16571_vm1, %v22562_v63  ;;  %v1775_v39 = vadd.f32 %v18651_v15, %v18612_v27  ;;  %v1780_v27 = vadd.f32 %v18651_v15, %v18636_v47  ;;  %v10211_v47 = vld [vmem:[%s22337_s3 + $0x80] sm:$0xff] }
 0x266   :  { %13725 = vmatmul.mubr.msk.f32.gmra.mrb[48].mxu1 %vm2463_vm3, %v18767_v31  ;;  %v2231_v48 = vmul.f32 0.2, %v1765_v58  ;;  %vm2035_vm15 = vcmp.gt.f32.partialorder %v1765_v58, 0.0  ;;  %v2232_v46 = vmul.f32 0.2, %v1770_v22  ;;  %vm2036_vm2 = vcmp.gt.f32.partialorder %v1770_v22, 0.0 }
 0x267   :  { %13727 = vmatprep.mubr.msk.f32.mxu1 %vm16571_vm1, %v22562_v63  ;;  %v2233_v42 = vmul.f32 0.2, %v1775_v39  ;;  %vm2037_vm4 = vcmp.gt.f32.partialorder %v1775_v39, 0.0  ;;  %vm2038_vm5 = vcmp.gt.f32.partialorder %v1780_v27, 0.0 }
 0x268   :  { %12524 = vmatmul.mubr.f32.gmra.mrb[206].mxu0 %v22562_v63  ;;  %v18831_v17 = vsel %vm2035_vm15, %v1765_v58, %v2231_v48  ;;  %v18843_v19 = vsel %vm2036_vm2, %v1770_v22, %v2232_v46  ;;  %v2234_v58 = vmul.f32 0.2, %v1780_v27  ;;  %v10212_v48 = vld [vmem:[%s22337_s3 + $0x88] sm:$0xff] }
 0x269   :  { %12526 = vmatprep.mubr.msk.f32.mxu0 %vm16571_vm1, %v22562_v63  ;;  %v18853_v49 = vsel %vm2037_vm4, %v1775_v39, %v2233_v42  ;;  %v14966_v22 = vpack.c.bf16 %v10212_v48, %v10211_v47  ;;  %v1790_v39 = vadd.f32 %v18651_v15, %v18661_v6  ;;  %v10213_v42 = vld [vmem:[%s22337_s3 + $0x90] sm:$0xff]  ;;  %v10214_v47 = vld [vmem:[%s22337_s3 + $0x98] sm:$0xff]  ;;  %v10215_v48 = vld [vmem:[%s22337_s3 + $0xa0] sm:$0xff] }
 0x26a   :  { %13728 = vmatmul.mubr.msk.f32.gmra.mrb[50].mxu1 %vm2463_vm3, %v18776_v36  ;;  %v18871_v46 = vsel %vm2038_vm5, %v1780_v27, %v2234_v58  ;;  %v14969_v6 = vpack.c.bf16 %v10214_v47, %v10213_v42  ;;  %v1795_v27 = vadd.f32 %v18651_v15, %v18657_v14  ;;  %v1800_v47 = vadd.f32 %v18651_v15, %v18679_v5  ;;  %v10218_v5 = vld [vmem:[%s22337_s3 + $0xb8] sm:$0xff] }
 0x26b   :  { %13730 = vmatprep.mubr.msk.f32.mxu1 %vm16571_vm1, %v22562_v63  ;;  %14967 = vmatpush3.bf16.msra.mxu0 %v14966_v22  ;;  %v2236_v58 = vmul.f32 0.2, %v1790_v39  ;;  %vm2040_vm6 = vcmp.gt.f32.partialorder %v1790_v39, 0.0  ;;  %v10216_v22 = vld [vmem:[%s22337_s3 + $0xa8] sm:$0xff] }
 0x26c   :  { %12527 = vmatmul.mubr.f32.gmra.mrb[208].mxu0 %v22562_v63  ;;  %14968 = vmatprep.subr.bf16.mxu0 %v22576_v23  ;;  %v14972_v14 = vpack.c.bf16 %v10216_v22, %v10215_v48  ;;  %v2237_v42 = vmul.f32 0.2, %v1795_v27  ;;  %vm2041_vm7 = vcmp.gt.f32.partialorder %v1795_v27, 0.0  ;;  %v10217_v48 = vld [vmem:[%s22337_s3 + $0xb0] sm:$0xff]  ;;  %v2238_v22 = vmul.f32 0.2, %v1800_v47 }
 0x26d   :  { %12529 = vmatprep.mubr.msk.f32.mxu0 %vm16571_vm1, %v22562_v63  ;;  %vm2042_vm8 = vcmp.gt.f32.partialorder %v1800_v47, 0.0 }
 0x26e   :  { %13731 = vmatmul.mubr.msk.f32.gmra.mrb[52].mxu1 %vm2463_vm3, %v18787_v10 }
 0x26f   :  { %13733 = vmatprep.mubr.msk.f32.mxu1 %vm16571_vm1, %v22562_v63  ;;  %14970 = vmatpush3.bf16.msra.mxu0 %v14969_v6  ;;  %v18905_v6 = vsel %vm2040_vm6, %v1790_v39, %v2236_v58  ;;  %v14975_v39 = vpack.c.bf16 %v10218_v5, %v10217_v48  ;;  %v1805_v58 = vadd.f32 %v18651_v15, %v18675_v30 }
 0x270   :  { %12530 = vmatmul.mubr.f32.gmra.mrb[210].mxu0 %v22562_v63  ;;  %14971 = vmatprep.subr.bf16.mxu0 %v22576_v23  ;;  %v1815_v48 = vadd.f32 %v18651_v15, %v18691_v26  ;;  %v1825_v26 = vadd.f32 %v18651_v15, %v18707_v7  ;;  %v1835_v7 = vadd.f32 %v18651_v15, %v18719_v2 }
 0x271   :  { %12532 = vmatprep.mubr.msk.f32.mxu0 %vm16571_vm1, %v22562_v63  ;;  %v2239_v30 = vmul.f32 0.2, %v1805_v58  ;;  %vm2043_vm9 = vcmp.gt.f32.partialorder %v1805_v58, 0.0  ;;  %v1840_v2 = vadd.f32 %v18651_v15, %v18737_v1 }
 0x272   :  { %13734 = vmatmul.mubr.f32.gmra.mrb[54].mxu1 %v22562_v63  ;;  %vm2045_vm11 = vcmp.gt.f32.partialorder %v1815_v48, 0.0  ;;  %vm2047_vm12 = vcmp.gt.f32.partialorder %v1825_v26, 0.0  ;;  %vm2049_vm14 = vcmp.gt.f32.partialorder %v1835_v7, 0.0 }
 0x273   :  { %13736 = vmatprep.mubr.msk.f32.mxu1 %vm16571_vm1, %v22562_v63  ;;  %14973 = vmatpush3.bf16.msra.mxu0 %v14972_v14  ;;  %v18924_v14 = vsel %vm2041_vm7, %v1795_v27, %v2237_v42  ;;  %v1810_v27 = vadd.f32 %v18651_v15, %v18695_v60  ;;  %v18937_v42 = vsel %vm2042_vm8, %v1800_v47, %v2238_v22  ;;  %v2241_v47 = vmul.f32 0.2, %v1815_v48 }
 0x274   :  { %12533 = vmatmul.mubr.msk.f32.gmra.mrb[212].mxu0 %vm2463_vm3, %v18345_v62  ;;  %14974 = vmatprep.subr.bf16.mxu0 %v22576_v23  ;;  %v18949_v60 = vsel %vm2043_vm9, %v1805_v58, %v2239_v30  ;;  %v2243_v22 = vmul.f32 0.2, %v1825_v26  ;;  %v1830_v30 = vadd.f32 %v18651_v15, %v18722_v11  ;;  %v2245_v11 = vmul.f32 0.2, %v1835_v7 }
 0x275   :  { %12535 = vmatprep.mubr.msk.f32.mxu0 %vm16571_vm1, %v22562_v63  ;;  %v2240_v5 = vmul.f32 0.2, %v1810_v27  ;;  %vm2044_vm10 = vcmp.gt.f32.partialorder %v1810_v27, 0.0  ;;  %v18971_v58 = vsel %vm2045_vm11, %v1815_v48, %v2241_v47  ;;  %v1845_v47 = vadd.f32 %v18651_v15, %v18734_v61 }
 0x276   :  { %13737 = vmatmul.mubr.msk.f32.gmra.mrb[56].mxu1 %vm2463_vm3, %v18807_v29  ;;  %v18991_v48 = vsel %vm2047_vm12, %v1825_v26, %v2243_v22  ;;  %vm2048_vm13 = vcmp.gt.f32.partialorder %v1830_v30, 0.0  ;;  %v2246_v26 = vmul.f32 0.2, %v1840_v2  ;;  %v19015_v1 = vsel %vm2049_vm14, %v1835_v7, %v2245_v11  ;;  %v10627_v11 = vld [vmem:[%s22337_s3 + $0x288] sm:$0xff] }
 0x277   :  { %13739 = vmatprep.mubr.msk.f32.mxu1 %vm16571_vm1, %v22562_v63  ;;  %14976 = vmatpush3.bf16.msra.mxu0 %v14975_v39  ;;  %v18959_v39 = vsel %vm2044_vm10, %v1810_v27, %v2240_v5  ;;  %v2244_v27 = vmul.f32 0.2, %v1830_v30  ;;  %22670 = vst [vmem:[#allocation148_spill] sm:$0xff] %v18991_v48  ;;  %22672 = vst [vmem:[#allocation150_spill] sm:$0xff] %v19015_v1  ;;  %vm2050_vm0 = vcmp.gt.f32.partialorder %v1840_v2, 0.0  ;;  %vm2051_vm15 = vcmp.gt.f32.partialorder %v1845_v47, 0.0 }
 0x278   :  { %12536 = vmatmul.mubr.msk.f32.gmra.mrb[214].mxu0 %vm2463_vm3, %v18362_v37  ;;  %14977 = vmatprep.subr.bf16.mxu0 %v22576_v23  ;;  %v2247_v22 = vmul.f32 0.2, %v1845_v47  ;;  %v1850_v61 = vadd.f32 %v18651_v15, %v18752_v21  ;;  %v10626_v21 = vld [vmem:[%s22337_s3 + $0x280] sm:$0xff] }
 0x279   :  { %12538 = vmatprep.mubr.msk.f32.mxu0 %vm16571_vm1, %v22562_v63  ;;  %v19003_v5 = vsel %vm2048_vm13, %v1830_v30, %v2244_v27  ;;  %v19027_v30 = vsel %vm2050_vm0, %v1840_v2, %v2246_v26  ;;  %v10628_v26 = vld [vmem:[%s22337_s3 + $0x290] sm:$0xff] }
 0x27a   :  { %13740 = vmatmul.mubr.msk.f32.gmra.mrb[58].mxu1 %vm2463_vm3, %v18819_v52  ;;  %22671 = vst [vmem:[#allocation149_spill] sm:$0xff] %v19003_v5  ;;  %22673 = vst [vmem:[#allocation151_spill] sm:$0xff] %v19027_v30  ;;  %v2248_v7 = vmul.f32 0.2, %v1850_v61  ;;  %v19037_v27 = vsel %vm2051_vm15, %v1845_v47, %v2247_v22  ;;  %vm2052_vm2 = vcmp.gt.f32.partialorder %v1850_v61, 0.0  ;;  %v15062_v47 = vpack.c.bf16 %v10627_v11, %v10626_v21  ;;  %v10629_v22 = vld [vmem:[%s22337_s3 + $0x298] sm:$0xff] }
 0x27b   :  { %13742 = vmatprep.mubr.msk.f32.mxu1 %vm16571_vm1, %v22562_v63  ;;  %22674 = vst [vmem:[#allocation152_spill] sm:$0xff] %v19037_v27  ;;  %v10631_v21 = vld [vmem:[%s22337_s3 + $0x2a8] sm:$0xff]  ;;  %v10632_v11 = vld [vmem:[%s22337_s3 + $0x2b0] sm:$0xff] }
 0x27c   :  { %12539 = vmatmul.mubr.msk.f32.gmra.mrb[216].mxu0 %vm2463_vm3, %v18379_v4  ;;  %v19053_v2 = vsel %vm2052_vm2, %v1850_v61, %v2248_v7  ;;  %v15065_v61 = vpack.c.bf16 %v10629_v22, %v10628_v26  ;;  %v10630_v7 = vld [vmem:[%s22337_s3 + $0x2a0] sm:$0xff]  ;;  %v22677_v22 = vld [vmem:[#allocation105_spill] sm:$0xff] }
 0x27d   :  { %12541 = vmatprep.mubr.msk.f32.mxu0 %vm16571_vm1, %v22562_v63  ;;  %22675 = vst [vmem:[#allocation153_spill] sm:$0xff] %v19053_v2 }
 0x27e   :  { %13743 = vmatmul.mubr.msk.f32.gmra.mrb[60].mxu1 %vm2463_vm3, %v18831_v17 }
 0x27f   :  { %13745 = vmatprep.mubr.msk.f32.mxu1 %vm16571_vm1, %v22562_v63 }
 0x280   :  { %12542 = vmatmul.mubr.msk.f32.gmra.mrb[218].mxu0 %vm2463_vm3, %v18394_v20 }
 0x281   :  { %12544 = vmatprep.mubr.msk.f32.mxu0 %vm16571_vm1, %v22562_v63 }
 0x282   :  { %13746 = vmatmul.mubr.msk.f32.gmra.mrb[62].mxu1 %vm2463_vm3, %v18843_v19 }
 0x283   :  { %13748 = vmatprep.mubr.msk.f32.mxu1 %vm16571_vm1, %v22562_v63 }
 0x284   :  { %12545 = vmatmul.mubr.msk.f32.gmra.mrb[220].mxu0 %vm2463_vm3, %v18414_v54 }
 0x285   :  { %12547 = vmatprep.mubr.msk.f32.mxu0 %vm16571_vm1, %v22562_v63 }
 0x286   :  { %13749 = vmatmul.mubr.msk.f32.gmra.mrb[64].mxu1 %vm2463_vm3, %v18853_v49 }
 0x287   :  { %13751 = vmatprep.mubr.msk.f32.mxu1 %vm16571_vm1, %v22562_v63 }
 0x288   :  { %12548 = vmatmul.mubr.msk.f32.gmra.mrb[222].mxu0 %vm2463_vm3, %v18432_v55 }
 0x289   :  { %12550 = vmatprep.mubr.msk.f32.mxu0 %vm16571_vm1, %v22562_v63 }
 0x28a   :  { %13752 = vmatmul.mubr.msk.f32.gmra.mrb[66].mxu1 %vm2463_vm3, %v18871_v46 }
 0x28b   :  { %13754 = vmatprep.mubr.msk.f32.mxu1 %vm16571_vm1, %v22562_v63 }
 0x28c   :  { %12551 = vmatmul.mubr.f32.gmra.mrb[224].mxu0 %v22562_v63 }
 0x28d   :  { %12553 = vmatprep.mubr.msk.f32.mxu0 %vm16571_vm1, %v22562_v63 }
 0x28e   :  { %13755 = vmatmul.mubr.f32.gmra.mrb[68].mxu1 %v22562_v63 }
 0x28f   :  { %13757 = vmatprep.mubr.msk.f32.mxu1 %vm16571_vm1, %v22562_v63 }
 0x290   :  { %12554 = vmatmul.mubr.msk.f32.gmra.mrb[226].mxu0 %vm2463_vm3, %v18467_v53 }
 0x291   :  { %12556 = vmatprep.mubr.msk.f32.mxu0 %vm16571_vm1, %v22562_v63 }
 0x292   :  { %13758 = vmatmul.mubr.msk.f32.gmra.mrb[70].mxu1 %vm2463_vm3, %v18905_v6 }
 0x293   :  { %13760 = vmatprep.mubr.msk.f32.mxu1 %vm16571_vm1, %v22562_v63 }
 0x294   :  { %12557 = vmatmul.mubr.msk.f32.gmra.mrb[228].mxu0 %vm2463_vm3, %v18486_v45 }
 0x295   :  { %12559 = vmatprep.mubr.msk.f32.mxu0 %vm16571_vm1, %v22562_v63 }
 0x296   :  { %13761 = vmatmul.mubr.msk.f32.gmra.mrb[72].mxu1 %vm2463_vm3, %v18924_v14 }
 0x297   :  { %13763 = vmatprep.mubr.msk.f32.mxu1 %vm16571_vm1, %v22562_v63 }
 0x298   :  { %12560 = vmatmul.mubr.msk.f32.gmra.mrb[230].mxu0 %vm2463_vm3, %v18505_v44 }
 0x299   :  { %12562 = vmatprep.mubr.msk.f32.mxu0 %vm16571_vm1, %v22562_v63 }
 0x29a   :  { %13764 = vmatmul.mubr.msk.f32.gmra.mrb[74].mxu1 %vm2463_vm3, %v18937_v42 }
 0x29b   :  { %13766 = vmatprep.mubr.msk.f32.mxu1 %vm16571_vm1, %v22562_v63 }
 0x29c   :  { %12563 = vmatmul.mubr.msk.f32.gmra.mrb[232].mxu0 %vm2463_vm3, %v18525_v9 }
 0x29d   :  { %12565 = vmatprep.mubr.msk.f32.mxu0 %vm16571_vm1, %v22562_v63 }
 0x29e   :  { %13767 = vmatmul.mubr.msk.f32.gmra.mrb[76].mxu1 %vm2463_vm3, %v18949_v60 }
 0x29f   :  { %13769 = vmatprep.mubr.msk.f32.mxu1 %vm16571_vm1, %v22562_v63 }
 0x2a0   :  { %12566 = vmatmul.mubr.msk.f32.gmra.mrb[234].mxu0 %vm2463_vm3, %v18543_v51 }
 0x2a1   :  { %12568 = vmatprep.mubr.msk.f32.mxu0 %vm16571_vm1, %v22562_v63 }
 0x2a2   :  { %13770 = vmatmul.mubr.msk.f32.gmra.mrb[78].mxu1 %vm2463_vm3, %v18959_v39 }
 0x2a3   :  { %13772 = vmatprep.mubr.msk.f32.mxu1 %vm16571_vm1, %v22562_v63 }
 0x2a4   :  { %12569 = vmatmul.mubr.msk.f32.gmra.mrb[236].mxu0 %vm2463_vm3, %v18563_v8 }
 0x2a5   :  { %12571 = vmatprep.mubr.msk.f32.mxu0 %vm16571_vm1, %v22562_v63 }
 0x2a6   :  { %13773 = vmatmul.mubr.msk.f32.gmra.mrb[80].mxu1 %vm2463_vm3, %v18971_v58 }
 0x2a7   :  { %13775 = vmatprep.mubr.msk.f32.mxu1 %vm16571_vm1, %v22562_v63 }
 0x2a8   :  { %12572 = vmatmul.mubr.f32.gmra.mrb[238].mxu0 %v22562_v63 }
 0x2a9   :  { %12574 = vmatprep.mubr.msk.f32.mxu0 %vm16571_vm1, %v22562_v63 }
 0x2aa   :  { %13776 = vmatmul.mubr.f32.gmra.mrb[82].mxu1 %v22562_v63 }
 0x2ab   :  { %13778 = vmatprep.mubr.msk.f32.mxu1 %vm16571_vm1, %v22562_v63 }
 0x2ac   :  { %12575 = vmatmul.mubr.msk.f32.gmra.mrb[240].mxu0 %vm2463_vm3, %v18600_v12 }
 0x2ad   :  { %12577 = vmatprep.mubr.msk.f32.mxu0 %vm16571_vm1, %v22562_v63 }
 0x2ae   :  { %13779 = vmatmul.mubr.msk.f32.gmra.mrb[84].mxu1 %vm2463_vm3, %v18991_v48 }
 0x2af   :  { %13781 = vmatprep.mubr.msk.f32.mxu1 %vm16571_vm1, %v22562_v63 }
 0x2b0   :  { %12578 = vmatmul.mubr.msk.f32.gmra.mrb[242].mxu0 %vm2463_vm3, %v18620_v38 }
 0x2b1   :  { %12580 = vmatprep.mubr.msk.f32.mxu0 %vm16571_vm1, %v22562_v63 }
 0x2b2   :  { %13782 = vmatmul.mubr.msk.f32.gmra.mrb[86].mxu1 %vm2463_vm3, %v19003_v5 }
 0x2b3   :  { %13784 = vmatprep.mubr.msk.f32.mxu1 %vm16571_vm1, %v22562_v63 }
 0x2b4   :  { %12581 = vmatmul.mubr.msk.f32.gmra.mrb[244].mxu0 %vm2463_vm3, %v18640_v25 }
 0x2b5   :  { %12583 = vmatprep.mubr.msk.f32.mxu0 %vm16571_vm1, %v22562_v63 }
 0x2b6   :  { %13785 = vmatmul.mubr.msk.f32.gmra.mrb[88].mxu1 %vm2463_vm3, %v19015_v1 }
 0x2b7   :  { %13787 = vmatprep.mubr.msk.f32.mxu1 %vm16571_vm1, %v22562_v63 }
 0x2b8   :  { %12584 = vmatmul.mubr.msk.f32.gmra.mrb[246].mxu0 %vm2463_vm3, %v18665_v56 }
 0x2b9   :  { %12586 = vmatprep.mubr.msk.f32.mxu0 %vm16571_vm1, %v22562_v63 }
 0x2ba   :  { %13788 = vmatmul.mubr.msk.f32.gmra.mrb[90].mxu1 %vm2463_vm3, %v19027_v30 }
 0x2bb   :  { %13790 = vmatprep.mubr.msk.f32.mxu1 %vm16571_vm1, %v22562_v63 }
 0x2bc   :  { %12587 = vmatmul.mubr.msk.f32.gmra.mrb[248].mxu0 %vm2463_vm3, %v18681_v50 }
 0x2bd   :  { %12589 = vmatprep.mubr.msk.f32.mxu0 %vm16571_vm1, %v22562_v63 }
 0x2be   :  { %13791 = vmatmul.mubr.msk.f32.gmra.mrb[92].mxu1 %vm2463_vm3, %v19037_v27 }
 0x2bf   :  { %13793 = vmatprep.mubr.msk.f32.mxu1 %vm16571_vm1, %v22562_v63 }
 0x2c0   :  { %12590 = vmatmul.mubr.msk.f32.gmra.mrb[250].mxu0 %vm2463_vm3, %v18699_v18 }
 0x2c1   :  { %12592 = vmatprep.mubr.msk.f32.mxu0 %vm16571_vm1, %v22562_v63 }
 0x2c2   :  { %13794 = vmatmul.mubr.msk.f32.gmra.mrb[94].mxu1 %vm2463_vm3, %v19053_v2  ;;  %v22686_v2 = vld [vmem:[#allocation121_spill] sm:$0xff] }
 0x2c3   :  { %13812 = vmatprep.mubr.msk.f32.mxu1 %vm16571_vm1, %v22562_v63 }
 0x2c4   :  { %12593 = vmatmul.mubr.f32.gmra.mrb[252].mxu0 %v22562_v63 }
 0x2c5   :  { %12595 = vmatprep.mubr.msk.f32.mxu0 %vm16571_vm1, %v22562_v63 }
 0x2c6   :  { %13813 = vmatmul.mubr.msk.f32.vlgmr.msra.gmra.mrb[96].mxu1 %vm2463_vm3, %v18054_v43  ;;  %v15068_v43 = vpack.c.bf16 %v10631_v21, %v10630_v7  ;;  %v22679_v7 = vld [vmem:[#allocation107_spill] sm:$0xff]  ;;  %v22680_v21 = vld [vmem:[#allocation108_spill] sm:$0xff] }
 0x2c7   :  { %15063 = vmatpush3.bf16.msra.mxu1 %v15062_v47  ;;  %13815 = vmatprep.mubr.msk.f32.mxu1 %vm16571_vm1, %v22562_v63  ;;  %v10633_v47 = vld [vmem:[%s22337_s3 + $0x2b8] sm:$0xff] }
 0x2c8   :  { %12596 = vmatmul.mubr.msk.f32.gmra.mrb[254].mxu0 %vm2463_vm3, %v18726_v3  ;;  %15064 = vmatprep.subr.bf16.mxu1 %v22576_v23  ;;  %v15071_v26 = vpack.c.bf16 %v10633_v47, %v10632_v11  ;;  %v22682_v11 = vld [vmem:[#allocation111_spill] sm:$0xff]  ;;  %v22683_v47 = vld [vmem:[#allocation114_spill] sm:$0xff] }
 0x2c9   :  { %12598 = vmatprep.mubr.msk.f32.mxu0 %vm16571_vm1, %v22562_v63 }
 0x2ca   :  { %13816 = vmatmul.mubr.msk.f32.gmra.mrb[0].mxu1 %vm2463_vm3, %v18061_v34 }
 0x2cb   :  { %13818 = vmatprep.mubr.msk.f32.mxu1 %vm16571_vm1, %v22562_v63  ;;  %15066 = vmatpush3.bf16.msra.mxu1 %v15065_v61  ;;  %v22678_v61 = vld [vmem:[#allocation106_spill] sm:$0xff] }
 0x2cc   :  { %12599 = vmatmul.mubr.msk.f32.gmra.mrb[0].mxu0 %vm2463_vm3, %v18741_v41  ;;  %15067 = vmatprep.subr.bf16.mxu1 %v22576_v23 }
 0x2cd   :  { %12601 = vmatprep.mubr.msk.f32.mxu0 %vm16571_vm1, %v22562_v63 }
 0x2ce   :  { %13819 = vmatmul.mubr.msk.f32.gmra.mrb[2].mxu1 %vm2463_vm3, %v18076_v59 }
 0x2cf   :  { %13821 = vmatprep.mubr.msk.f32.mxu1 %vm16571_vm1, %v22562_v63  ;;  %15069 = vmatpush3.bf16.msra.mxu1 %v15068_v43  ;;  %v22681_v43 = vld [vmem:[#allocation109_spill] sm:$0xff] }
 0x2d0   :  { %12602 = vmatmul.mubr.msk.f32.gmra.mrb[2].mxu0 %vm2463_vm3, %v18756_v40  ;;  %15070 = vmatprep.subr.bf16.mxu1 %v22576_v23 }
 0x2d1   :  { %12604 = vmatprep.mubr.msk.f32.mxu0 %vm16571_vm1, %v22562_v63 }
 0x2d2   :  { %13822 = vmatmul.mubr.msk.f32.gmra.mrb[4].mxu1 %vm2463_vm3, %v18086_v24 }
 0x2d3   :  { %13824 = vmatprep.mubr.msk.f32.mxu1 %vm16571_vm1, %v22562_v63  ;;  %15072 = vmatpush3.bf16.msra.mxu1 %v15071_v26  ;;  %v22684_v26 = vld [vmem:[#allocation117_spill] sm:$0xff] }
 0x2d4   :  { %12605 = vmatmul.mubr.msk.f32.gmra.mrb[4].mxu0 %vm2463_vm3, %v18767_v31  ;;  %15073 = vmatprep.subr.bf16.mxu1 %v22576_v23 }
 0x2d5   :  { %12607 = vmatprep.mubr.msk.f32.mxu0 %vm16571_vm1, %v22562_v63 }
 0x2d6   :  { %13825 = vmatmul.mubr.msk.f32.gmra.mrb[6].mxu1 %vm2463_vm3, %v18097_v13 }
 0x2d7   :  { %13827 = vmatprep.mubr.msk.f32.mxu1 %vm16571_vm1, %v22562_v63 }
 0x2d8   :  { %12608 = vmatmul.mubr.msk.f32.gmra.mrb[6].mxu0 %vm2463_vm3, %v18776_v36 }
 0x2d9   :  { %12610 = vmatprep.mubr.msk.f32.mxu0 %vm16571_vm1, %v22562_v63 }
 0x2da   :  { %13828 = vmatmul.mubr.msk.f32.gmra.mrb[8].mxu1 %vm2463_vm3, %v18108_v0 }
 0x2db   :  { %13830 = vmatprep.mubr.msk.f32.mxu1 %vm16571_vm1, %v22562_v63 }
 0x2dc   :  { %12611 = vmatmul.mubr.msk.f32.gmra.mrb[8].mxu0 %vm2463_vm3, %v18787_v10 }
 0x2dd   :  { %12613 = vmatprep.mubr.msk.f32.mxu0 %vm16571_vm1, %v22562_v63 }
 0x2de   :  { %13831 = vmatmul.mubr.msk.f32.gmra.mrb[10].mxu1 %vm2463_vm3, %v18125_v57 }
 0x2df   :  { %13833 = vmatprep.mubr.msk.f32.mxu1 %vm16571_vm1, %v22562_v63 }
 0x2e0   :  { %12614 = vmatmul.mubr.f32.gmra.mrb[10].mxu0 %v22562_v63 }
 0x2e1   :  { %12616 = vmatprep.mubr.msk.f32.mxu0 %vm16571_vm1, %v22562_v63 }
 0x2e2   :  { %13834 = vmatmul.mubr.msk.f32.gmra.mrb[12].mxu1 %vm2463_vm3, %v18143_v35  ;;  %v22676_v35 = vld [vmem:[#allocation104_spill] sm:$0xff] }
 0x2e3   :  { %13836 = vmatprep.mubr.msk.f32.mxu1 %vm16571_vm1, %v22562_v63 }
 0x2e4   :  { %12617 = vmatmul.mubr.msk.f32.gmra.mrb[12].mxu0 %vm2463_vm3, %v18807_v29 }
 0x2e5   :  { %12619 = vmatprep.mubr.msk.f32.mxu0 %vm16571_vm1, %v22562_v63 }
 0x2e6   :  { %13837 = vmatmul.mubr.msk.f32.gmra.mrb[14].mxu1 %vm2463_vm3, %v18161_v28 }
 0x2e7   :  { %13839 = vmatprep.mubr.msk.f32.mxu1 %vm16571_vm1, %v22562_v63 }
 0x2e8   :  { %12620 = vmatmul.mubr.msk.f32.gmra.mrb[14].mxu0 %vm2463_vm3, %v18819_v52 }
 0x2e9   :  { %12622 = vmatprep.mubr.msk.f32.mxu0 %vm16571_vm1, %v22562_v63 }
 0x2ea   :  { %13840 = vmatmul.mubr.msk.f32.gmra.mrb[16].mxu1 %vm2463_vm3, %v18180_v33 }
 0x2eb   :  { %13842 = vmatprep.mubr.msk.f32.mxu1 %vm16571_vm1, %v22562_v63 }
 0x2ec   :  { %12623 = vmatmul.mubr.msk.f32.gmra.mrb[16].mxu0 %vm2463_vm3, %v18831_v17 }
 0x2ed   :  { %12625 = vmatprep.mubr.msk.f32.mxu0 %vm16571_vm1, %v22562_v63 }
 0x2ee   :  { %13843 = vmatmul.mubr.msk.f32.gmra.mrb[18].mxu1 %vm2463_vm3, %v18193_v16 }
 0x2ef   :  { %13845 = vmatprep.mubr.msk.f32.mxu1 %vm16571_vm1, %v22562_v63 }
 0x2f0   :  { %12626 = vmatmul.mubr.msk.f32.gmra.mrb[18].mxu0 %vm2463_vm3, %v18843_v19 }
 0x2f1   :  { %12628 = vmatprep.mubr.msk.f32.mxu0 %vm16571_vm1, %v22562_v63 }
 0x2f2   :  { %13846 = vmatmul.mubr.msk.f32.gmra.mrb[20].mxu1 %vm2463_vm3, %v18205_v32 }
 0x2f3   :  { %13848 = vmatprep.mubr.msk.f32.mxu1 %vm16571_vm1, %v22562_v63 }
 0x2f4   :  { %12629 = vmatmul.mubr.msk.f32.gmra.mrb[20].mxu0 %vm2463_vm3, %v18853_v49 }
 0x2f5   :  { %12631 = vmatprep.mubr.msk.f32.mxu0 %vm16571_vm1, %v22562_v63 }
 0x2f6   :  { %13849 = vmatmul.mubr.msk.f32.gmra.mrb[22].mxu1 %vm2463_vm3, %v22676_v35 }
 0x2f7   :  { %13851 = vmatprep.mubr.msk.f32.mxu1 %vm16571_vm1, %v22562_v63 }
 0x2f8   :  { %12632 = vmatmul.mubr.msk.f32.gmra.mrb[22].mxu0 %vm2463_vm3, %v18871_v46 }
 0x2f9   :  { %12634 = vmatprep.mubr.msk.f32.mxu0 %vm16571_vm1, %v22562_v63 }
 0x2fa   :  { %13852 = vmatmul.mubr.msk.f32.gmra.mrb[24].mxu1 %vm2463_vm3, %v22677_v22 }
 0x2fb   :  { %13854 = vmatprep.mubr.msk.f32.mxu1 %vm16571_vm1, %v22562_v63 }
 0x2fc   :  { %12635 = vmatmul.mubr.f32.gmra.mrb[24].mxu0 %v22562_v63 }
 0x2fd   :  { %12637 = vmatprep.mubr.msk.f32.mxu0 %vm16571_vm1, %v22562_v63 }
 0x2fe   :  { %13855 = vmatmul.mubr.msk.f32.gmra.mrb[26].mxu1 %vm2463_vm3, %v22678_v61  ;;  %v22685_v61 = vld [vmem:[#allocation119_spill] sm:$0xff] }
 0x2ff   :  { %13857 = vmatprep.mubr.msk.f32.mxu1 %vm16571_vm1, %v22562_v63 }
 0x300   :  { %12638 = vmatmul.mubr.msk.f32.gmra.mrb[26].mxu0 %vm2463_vm3, %v18905_v6 }
 0x301   :  { %12640 = vmatprep.mubr.msk.f32.mxu0 %vm16571_vm1, %v22562_v63 }
 0x302   :  { %13858 = vmatmul.mubr.msk.f32.gmra.mrb[28].mxu1 %vm2463_vm3, %v22679_v7 }
 0x303   :  { %13860 = vmatprep.mubr.msk.f32.mxu1 %vm16571_vm1, %v22562_v63 }
 0x304   :  { %12641 = vmatmul.mubr.msk.f32.gmra.mrb[28].mxu0 %vm2463_vm3, %v18924_v14 }
 0x305   :  { %12643 = vmatprep.mubr.msk.f32.mxu0 %vm16571_vm1, %v22562_v63 }
 0x306   :  { %13861 = vmatmul.mubr.msk.f32.gmra.mrb[30].mxu1 %vm2463_vm3, %v22680_v21 }
 0x307   :  { %13863 = vmatprep.mubr.msk.f32.mxu1 %vm16571_vm1, %v22562_v63 }
 0x308   :  { %12644 = vmatmul.mubr.msk.f32.gmra.mrb[30].mxu0 %vm2463_vm3, %v18937_v42 }
 0x309   :  { %12646 = vmatprep.mubr.msk.f32.mxu0 %vm16571_vm1, %v22562_v63 }
 0x30a   :  { %13864 = vmatmul.mubr.msk.f32.gmra.mrb[32].mxu1 %vm2463_vm3, %v22681_v43 }
 0x30b   :  { %13866 = vmatprep.mubr.msk.f32.mxu1 %vm16571_vm1, %v22562_v63 }
 0x30c   :  { %12647 = vmatmul.mubr.msk.f32.gmra.mrb[32].mxu0 %vm2463_vm3, %v18949_v60 }
 0x30d   :  { %12649 = vmatprep.mubr.msk.f32.mxu0 %vm16571_vm1, %v22562_v63 }
 0x30e   :  { %13867 = vmatmul.mubr.msk.f32.gmra.mrb[34].mxu1 %vm2463_vm3, %v22682_v11 }
 0x30f   :  { %13869 = vmatprep.mubr.msk.f32.mxu1 %vm16571_vm1, %v22562_v63 }
 0x310   :  { %12650 = vmatmul.mubr.msk.f32.gmra.mrb[34].mxu0 %vm2463_vm3, %v18959_v39 }
 0x311   :  { %12652 = vmatprep.mubr.msk.f32.mxu0 %vm16571_vm1, %v22562_v63 }
 0x312   :  { %13870 = vmatmul.mubr.msk.f32.gmra.mrb[36].mxu1 %vm2463_vm3, %v22683_v47 }
 0x313   :  { %13872 = vmatprep.mubr.msk.f32.mxu1 %vm16571_vm1, %v22562_v63 }
 0x314   :  { %12653 = vmatmul.mubr.msk.f32.gmra.mrb[36].mxu0 %vm2463_vm3, %v18971_v58 }
 0x315   :  { %12671 = vmatprep.mubr.msk.f32.mxu0 %vm16571_vm1, %v22562_v63 }
 0x316   :  { %13873 = vmatmul.mubr.msk.f32.gmra.mrb[38].mxu1 %vm2463_vm3, %v22684_v26  ;;  %v22696_v26 = vld [vmem:[#allocation124_spill] sm:$0xff] }
 0x317   :  { %13875 = vmatprep.mubr.msk.f32.mxu1 %vm16571_vm1, %v22562_v63  ;;  %v1645_v27 = vadd.f32 %v18651_v15, %v22696_v26  ;;  %v22698_v26 = vld [vmem:[#allocation135_spill] sm:$0xff] }
 0x318   :  { %12672 = vmatmul.mubr.f32.vlgmr.msra.gmra.mrb[196].mxu0 %v22562_v63 }
 0x319   :  { %12674 = vmatprep.mubr.msk.f32.mxu0 %vm16571_vm1, %v22562_v63  ;;  %v2207_v47 = vmul.f32 0.2, %v1645_v27  ;;  %vm2011_vm4 = vcmp.gt.f32.partialorder %v1645_v27, 0.0 }
 0x31a   :  { %13876 = vmatmul.mubr.msk.f32.gmra.mrb[40].mxu1 %vm2463_vm3, %v22685_v61  ;;  %v22687_v61 = vld [vmem:[#allocation122_spill] sm:$0xff] }
 0x31b   :  { %13878 = vmatprep.mubr.msk.f32.mxu1 %vm16571_vm1, %v22562_v63  ;;  %v19351_v30 = vsel %vm2011_vm4, %v1645_v27, %v2207_v47  ;;  %v10263_v27 = vld [vmem:[%s22337_s3 + $0xd0] sm:$0xff]  ;;  %v10264_v47 = vld [vmem:[%s22337_s3 + $0xd8] sm:$0xff] }
 0x31c   :  { %12675 = vmatmul.mubr.f32.gmra.mrb[198].mxu0 %v22562_v63 }
 0x31d   :  { %12677 = vmatprep.mubr.msk.f32.mxu0 %vm16571_vm1, %v22562_v63 }
 0x31e   :  { %13879 = vmatmul.mubr.msk.f32.gmra.mrb[42].mxu1 %vm2463_vm3, %v22686_v2  ;;  %v22688_v2 = vld [vmem:[#allocation123_spill] sm:$0xff] }
 0x31f   :  { %13881 = vmatprep.mubr.msk.f32.mxu1 %vm16571_vm1, %v22562_v63 }
 0x320   :  { %12678 = vmatmul.mubr.f32.gmra.mrb[200].mxu0 %v22562_v63 }
 0x321   :  { %12680 = vmatprep.mubr.msk.f32.mxu0 %vm16571_vm1, %v22562_v63 }
 0x322   :  { %13882 = vmatmul.mubr.msk.f32.gmra.mrb[44].mxu1 %vm2463_vm3, %v22687_v61  ;;  %v22689_v61 = vld [vmem:[#allocation125_spill] sm:$0xff] }
 0x323   :  { %13884 = vmatprep.mubr.msk.f32.mxu1 %vm16571_vm1, %v22562_v63 }
 0x324   :  { %12681 = vmatmul.mubr.f32.gmra.mrb[202].mxu0 %v22562_v63 }
 0x325   :  { %12683 = vmatprep.mubr.msk.f32.mxu0 %vm16571_vm1, %v22562_v63 }
 0x326   :  { %13885 = vmatmul.mubr.msk.f32.gmra.mrb[46].mxu1 %vm2463_vm3, %v22688_v2  ;;  %v22690_v2 = vld [vmem:[#allocation126_spill] sm:$0xff] }
 0x327   :  { %13887 = vmatprep.mubr.msk.f32.mxu1 %vm16571_vm1, %v22562_v63 }
 0x328   :  { %12684 = vmatmul.mubr.f32.gmra.mrb[204].mxu0 %v22562_v63 }
 0x329   :  { %12686 = vmatprep.mubr.msk.f32.mxu0 %vm16571_vm1, %v22562_v63 }
 0x32a   :  { %13888 = vmatmul.mubr.msk.f32.gmra.mrb[48].mxu1 %vm2463_vm3, %v22689_v61  ;;  %v22691_v61 = vld [vmem:[#allocation127_spill] sm:$0xff] }
 0x32b   :  { %13890 = vmatprep.mubr.msk.f32.mxu1 %vm16571_vm1, %v22562_v63 }
 0x32c   :  { %12687 = vmatmul.mubr.f32.gmra.mrb[206].mxu0 %v22562_v63 }
 0x32d   :  { %12689 = vmatprep.mubr.msk.f32.mxu0 %vm16571_vm1, %v22562_v63 }
 0x32e   :  { %13891 = vmatmul.mubr.msk.f32.gmra.mrb[50].mxu1 %vm2463_vm3, %v22690_v2  ;;  %v22692_v2 = vld [vmem:[#allocation128_spill] sm:$0xff] }
 0x32f   :  { %13893 = vmatprep.mubr.msk.f32.mxu1 %vm16571_vm1, %v22562_v63 }
 0x330   :  { %12690 = vmatmul.mubr.f32.gmra.mrb[208].mxu0 %v22562_v63 }
 0x331   :  { %12692 = vmatprep.mubr.msk.f32.mxu0 %vm16571_vm1, %v22562_v63 }
 0x332   :  { %13894 = vmatmul.mubr.msk.f32.gmra.mrb[52].mxu1 %vm2463_vm3, %v22691_v61  ;;  %v22693_v61 = vld [vmem:[#allocation130_spill] sm:$0xff] }
 0x333   :  { %13896 = vmatprep.mubr.msk.f32.mxu1 %vm16571_vm1, %v22562_v63 }
 0x334   :  { %12693 = vmatmul.mubr.msk.f32.gmra.mrb[210].mxu0 %vm2463_vm3, %v18345_v62 }
 0x335   :  { %12695 = vmatprep.mubr.msk.f32.mxu0 %vm16571_vm1, %v22562_v63 }
 0x336   :  { %13897 = vmatmul.mubr.msk.f32.gmra.mrb[54].mxu1 %vm2463_vm3, %v22692_v2  ;;  %v22694_v2 = vld [vmem:[#allocation131_spill] sm:$0xff] }
 0x337   :  { %13899 = vmatprep.mubr.msk.f32.mxu1 %vm16571_vm1, %v22562_v63 }
 0x338   :  { %12696 = vmatmul.mubr.msk.f32.gmra.mrb[212].mxu0 %vm2463_vm3, %v18362_v37 }
 0x339   :  { %12698 = vmatprep.mubr.msk.f32.mxu0 %vm16571_vm1, %v22562_v63 }
 0x33a   :  { %13900 = vmatmul.mubr.msk.f32.gmra.mrb[56].mxu1 %vm2463_vm3, %v22693_v61  ;;  %v22695_v61 = vld [vmem:[#allocation132_spill] sm:$0xff] }
 0x33b   :  { %13902 = vmatprep.mubr.msk.f32.mxu1 %vm16571_vm1, %v22562_v63 }
 0x33c   :  { %12699 = vmatmul.mubr.msk.f32.gmra.mrb[214].mxu0 %vm2463_vm3, %v18379_v4 }
 0x33d   :  { %12701 = vmatprep.mubr.msk.f32.mxu0 %vm16571_vm1, %v22562_v63 }
 0x33e   :  { %13903 = vmatmul.mubr.msk.f32.gmra.mrb[58].mxu1 %vm2463_vm3, %v22694_v2  ;;  %v22697_v2 = vld [vmem:[#allocation134_spill] sm:$0xff] }
 0x33f   :  { %13905 = vmatprep.mubr.msk.f32.mxu1 %vm16571_vm1, %v22562_v63 }
 0x340   :  { %12702 = vmatmul.mubr.msk.f32.gmra.mrb[216].mxu0 %vm2463_vm3, %v18394_v20 }
 0x341   :  { %12704 = vmatprep.mubr.msk.f32.mxu0 %vm16571_vm1, %v22562_v63 }
 0x342   :  { %13906 = vmatmul.mubr.msk.f32.gmra.mrb[60].mxu1 %vm2463_vm3, %v22695_v61  ;;  %v10261_v61 = vld [vmem:[%s22337_s3 + $0xc0] sm:$0xff] }
 0x343   :  { %13908 = vmatprep.mubr.msk.f32.mxu1 %vm16571_vm1, %v22562_v63 }
 0x344   :  { %12705 = vmatmul.mubr.msk.f32.gmra.mrb[218].mxu0 %vm2463_vm3, %v18414_v54 }
 0x345   :  { %12707 = vmatprep.mubr.msk.f32.mxu0 %vm16571_vm1, %v22562_v63 }
 0x346   :  { %13909 = vmatmul.mubr.msk.f32.gmra.mrb[62].mxu1 %vm2463_vm3, %v22697_v2  ;;  %v10262_v2 = vld [vmem:[%s22337_s3 + $0xc8] sm:$0xff] }
 0x347   :  { %13911 = vmatprep.mubr.msk.f32.mxu1 %vm16571_vm1, %v22562_v63  ;;  %v14978_v11 = vpack.c.bf16 %v10262_v2, %v10261_v61  ;;  %v14981_v61 = vpack.c.bf16 %v10264_v47, %v10263_v27  ;;  %v10265_v2 = vld [vmem:[%s22337_s3 + $0xe0] sm:$0xff]  ;;  %v10266_v27 = vld [vmem:[%s22337_s3 + $0xe8] sm:$0xff] }
 0x348   :  { %12708 = vmatmul.mubr.msk.f32.gmra.mrb[220].mxu0 %vm2463_vm3, %v18432_v55  ;;  %v14984_v47 = vpack.c.bf16 %v10266_v27, %v10265_v2  ;;  %v10268_v2 = vld [vmem:[%s22337_s3 + $0xf8] sm:$0xff] }
 0x349   :  { %12710 = vmatprep.mubr.msk.f32.mxu0 %vm16571_vm1, %v22562_v63  ;;  %14979 = vmatpush3.bf16.msra.mxu0 %v14978_v11  ;;  %v22700_v11 = vld [vmem:[#allocation137_spill] sm:$0xff] }
 0x34a   :  { %13912 = vmatmul.mubr.msk.f32.gmra.mrb[64].mxu1 %vm2463_vm3, %v22698_v26  ;;  %v22699_v26 = vld [vmem:[#allocation136_spill] sm:$0xff]  ;;  %14980 = vmatprep.subr.bf16.mxu0 %v22576_v23 }
 0x34b   :  { %13914 = vmatprep.mubr.msk.f32.mxu1 %vm16571_vm1, %v22562_v63 }
 0x34c   :  { %12711 = vmatmul.mubr.msk.f32.gmra.mrb[222].mxu0 %vm2463_vm3, %v19351_v30 }
 0x34d   :  { %12713 = vmatprep.mubr.msk.f32.mxu0 %vm16571_vm1, %v22562_v63  ;;  %14982 = vmatpush3.bf16.msra.mxu0 %v14981_v61  ;;  %v22701_v61 = vld [vmem:[#allocation139_spill] sm:$0xff] }
 0x34e   :  { %13915 = vmatmul.mubr.msk.f32.gmra.mrb[66].mxu1 %vm2463_vm3, %v22699_v26  ;;  %14983 = vmatprep.subr.bf16.mxu0 %v22576_v23  ;;  %v22707_v26 = vld [vmem:[#allocation144_spill] sm:$0xff] }
 0x34f   :  { %13917 = vmatprep.mubr.msk.f32.mxu1 %vm16571_vm1, %v22562_v63 }
 0x350   :  { %12714 = vmatmul.mubr.msk.f32.gmra.mrb[224].mxu0 %vm2463_vm3, %v18467_v53 }
 0x351   :  { %12716 = vmatprep.mubr.msk.f32.mxu0 %vm16571_vm1, %v22562_v63  ;;  %14985 = vmatpush3.bf16.msra.mxu0 %v14984_v47  ;;  %v22702_v47 = vld [vmem:[#allocation140_spill] sm:$0xff] }
 0x352   :  { %13918 = vmatmul.mubr.msk.f32.gmra.mrb[68].mxu1 %vm2463_vm3, %v22700_v11  ;;  %14986 = vmatprep.subr.bf16.mxu0 %v22576_v23  ;;  %v10267_v11 = vld [vmem:[%s22337_s3 + $0xf0] sm:$0xff] }
 0x353   :  { %13920 = vmatprep.mubr.msk.f32.mxu1 %vm16571_vm1, %v22562_v63  ;;  %v14987_v27 = vpack.c.bf16 %v10268_v2, %v10267_v11  ;;  %v22703_v11 = vld [vmem:[#allocation141_spill] sm:$0xff] }
 0x354   :  { %12717 = vmatmul.mubr.msk.f32.gmra.mrb[226].mxu0 %vm2463_vm3, %v18486_v45  ;;  %v22704_v2 = vld [vmem:[#allocation129_spill] sm:$0xff] }
 0x355   :  { %12719 = vmatprep.mubr.msk.f32.mxu0 %vm16571_vm1, %v22562_v63  ;;  %14988 = vmatpush3.bf16.msra.mxu0 %v14987_v27  ;;  %v1680_v27 = vadd.f32 %v18651_v15, %v22704_v2  ;;  %v22706_v2 = vld [vmem:[#allocation112_spill] sm:$0xff] }
 0x356   :  { %13921 = vmatmul.mubr.msk.f32.gmra.mrb[70].mxu1 %vm2463_vm3, %v22701_v61  ;;  %14989 = vmatprep.subr.bf16.mxu0 %v22576_v23 }
 0x357   :  { %13923 = vmatprep.mubr.msk.f32.mxu1 %vm16571_vm1, %v22562_v63  ;;  %v2214_v61 = vmul.f32 0.2, %v1680_v27  ;;  %vm2018_vm5 = vcmp.gt.f32.partialorder %v1680_v27, 0.0 }
 0x358   :  { %12720 = vmatmul.mubr.msk.f32.gmra.mrb[228].mxu0 %vm2463_vm3, %v18505_v44 }
 0x359   :  { %12722 = vmatprep.mubr.msk.f32.mxu0 %vm16571_vm1, %v22562_v63  ;;  %v19435_v1 = vsel %vm2018_vm5, %v1680_v27, %v2214_v61  ;;  %v22710_v27 = vld [vmem:[#allocation115_spill] sm:$0xff] }
 0x35a   :  { %13924 = vmatmul.mubr.msk.f32.gmra.mrb[72].mxu1 %vm2463_vm3, %v22702_v47  ;;  %v22705_v47 = vld [vmem:[#allocation143_spill] sm:$0xff] }
 0x35b   :  { %13926 = vmatprep.mubr.msk.f32.mxu1 %vm16571_vm1, %v22562_v63 }
 0x35c   :  { %12723 = vmatmul.mubr.msk.f32.gmra.mrb[230].mxu0 %vm2463_vm3, %v18525_v9 }
 0x35d   :  { %12725 = vmatprep.mubr.msk.f32.mxu0 %vm16571_vm1, %v22562_v63 }
 0x35e   :  { %13927 = vmatmul.mubr.msk.f32.gmra.mrb[74].mxu1 %vm2463_vm3, %v22703_v11  ;;  %v1580_v11 = vadd.f32 %v18651_v15, %v22706_v2  ;;  %v22709_v2 = vld [vmem:[#allocation145_spill] sm:$0xff] }
 0x35f   :  { %13929 = vmatprep.mubr.msk.f32.mxu1 %vm16571_vm1, %v22562_v63 }
 0x360   :  { %12726 = vmatmul.mubr.msk.f32.gmra.mrb[232].mxu0 %vm2463_vm3, %v18543_v51  ;;  %v2194_v5 = vmul.f32 0.2, %v1580_v11  ;;  %vm1998_vm6 = vcmp.gt.f32.partialorder %v1580_v11, 0.0 }
 0x361   :  { %12728 = vmatprep.mubr.msk.f32.mxu0 %vm16571_vm1, %v22562_v63 }
 0x362   :  { %13930 = vmatmul.mubr.msk.f32.gmra.mrb[76].mxu1 %vm2463_vm3, %v22705_v47  ;;  %v22708_v47 = vld [vmem:[#allocation110_spill] sm:$0xff]  ;;  %v2390_v21 = vsel %vm1998_vm6, %v1580_v11, %v2194_v5 }
 0x363   :  { %13932 = vmatprep.mubr.msk.f32.mxu1 %vm16571_vm1, %v22562_v63  ;;  %v1585_v43 = vadd.f32 %v18651_v15, %v22708_v47  ;;  %v22711_v47 = vld [vmem:[#allocation113_spill] sm:$0xff] }
 0x364   :  { %12729 = vmatmul.mubr.msk.f32.gmra.mrb[234].mxu0 %vm2463_vm3, %v18563_v8 }
 0x365   :  { %12731 = vmatprep.mubr.msk.f32.mxu0 %vm16571_vm1, %v22562_v63  ;;  %v2195_v61 = vmul.f32 0.2, %v1585_v43  ;;  %vm1999_vm7 = vcmp.gt.f32.partialorder %v1585_v43, 0.0 }
 0x366   :  { %13933 = vmatmul.mubr.msk.f32.gmra.mrb[78].mxu1 %vm2463_vm3, %v22707_v26  ;;  %v1590_v26 = vadd.f32 %v18651_v15, %v22710_v27 }
 0x367   :  { %13935 = vmatprep.mubr.msk.f32.mxu1 %vm16571_vm1, %v22562_v63  ;;  %v19462_v7 = vsel %vm1999_vm7, %v1585_v43, %v2195_v61  ;;  %v19487_v43 = vld [vmem:[%s22338_s2] ss:$0 sm:$0xff] }
 0x368   :  { %12732 = vmatmul.mubr.msk.f32.gmra.mrb[236].mxu0 %vm2463_vm3, %v19435_v1  ;;  %v2196_v48 = vmul.f32 0.2, %v1590_v26  ;;  %22712 = vst [vmem:[#allocation104_spill] sm:$0xff] %v19462_v7  ;;  %vm2000_vm8 = vcmp.gt.f32.partialorder %v1590_v26, 0.0 }
 0x369   :  { %12734 = vmatprep.mubr.msk.f32.mxu0 %vm16571_vm1, %v22562_v63 }
 0x36a   :  { %13936 = vmatmul.mubr.msk.f32.gmra.mrb[80].mxu1 %vm2463_vm3, %v22709_v2  ;;  %v1595_v2 = vadd.f32 %v18651_v15, %v22711_v47  ;;  %v19474_v27 = vsel %vm2000_vm8, %v1590_v26, %v2196_v48  ;;  %v22717_v47 = vld [vmem:[#allocation133_spill] sm:$0xff] }
 0x36b   :  { %13938 = vmatprep.mubr.msk.f32.mxu1 %vm16571_vm1, %v22562_v63  ;;  %22714 = vst [vmem:[#allocation105_spill] sm:$0xff] %v19474_v27 }
 0x36c   :  { %12735 = vmatmul.mubr.msk.f32.gmra.mrb[238].mxu0 %vm2463_vm3, %v18600_v12  ;;  %v2197_v5 = vmul.f32 0.2, %v1595_v2  ;;  %vm2001_vm9 = vcmp.gt.f32.partialorder %v1595_v2, 0.0 }
 0x36d   :  { %12737 = vmatprep.mubr.msk.f32.mxu0 %vm16571_vm1, %v22562_v63 }
 0x36e   :  { %13939 = vmatmul.mubr.msk.f32.gmra.mrb[82].mxu1 %vm2463_vm3, %v2390_v21  ;;  %v22713_v21 = vld [vmem:[#allocation118_spill] sm:$0xff]  ;;  %v19491_v61 = vsel %vm2001_vm9, %v1595_v2, %v2197_v5 }
 0x36f   :  { %13941 = vmatprep.mubr.msk.f32.mxu1 %vm16571_vm1, %v22562_v63  ;;  %v1600_v11 = vadd.f32 %v18651_v15, %v22713_v21  ;;  %v22715_v15 = vld [vmem:[#allocation116_spill] sm:$0xff]  ;;  %22716 = vst [vmem:[#allocation106_spill] sm:$0xff] %v19491_v61  ;;  %v1715_v21 = vadd.f32 %v19487_v43, %v22717_v47 }
 0x370   :  { %12738 = vmatmul.mubr.msk.f32.gmra.mrb[240].mxu0 %vm2463_vm3, %v18620_v38  ;;  %v1605_v48 = vadd.f32 %v19487_v43, %v22715_v15 }
 0x371   :  { %12740 = vmatprep.mubr.msk.f32.mxu0 %vm16571_vm1, %v22562_v63  ;;  %v2198_v26 = vmul.f32 0.2, %v1600_v11  ;;  %vm2002_vm10 = vcmp.gt.f32.partialorder %v1600_v11, 0.0  ;;  %v2221_v47 = vmul.f32 0.2, %v1715_v21  ;;  %vm2025_vm12 = vcmp.gt.f32.partialorder %v1715_v21, 0.0 }
 0x372   :  { %13942 = vmatmul.mubr.msk.f32.gmra.mrb[84].mxu1 %vm2463_vm3, %v19462_v7  ;;  %v2199_v15 = vmul.f32 0.2, %v1605_v48  ;;  %vm2003_vm11 = vcmp.gt.f32.partialorder %v1605_v48, 0.0 }
 0x373   :  { %13944 = vmatprep.mubr.msk.f32.mxu1 %vm16571_vm1, %v22562_v63  ;;  %v19505_v5 = vsel %vm2002_vm10, %v1600_v11, %v2198_v26  ;;  %v19521_v11 = vsel %vm2025_vm12, %v1715_v21, %v2221_v47  ;;  %v10687_v47 = vld [vmem:[%s22337_s3 + $0x2e0] sm:$0xff] }
 0x374   :  { %12741 = vmatmul.mubr.msk.f32.gmra.mrb[242].mxu0 %vm2463_vm3, %v18640_v25  ;;  %v19515_v7 = vsel %vm2003_vm11, %v1605_v48, %v2199_v15  ;;  %v10684_v48 = vld [vmem:[%s22337_s3 + $0x2c8] sm:$0xff]  ;;  %v10685_v15 = vld [vmem:[%s22337_s3 + $0x2d0] sm:$0xff] }
 0x375   :  { %12743 = vmatprep.mubr.msk.f32.mxu0 %vm16571_vm1, %v22562_v63 }
 0x376   :  { %13945 = vmatmul.mubr.msk.f32.gmra.mrb[86].mxu1 %vm2463_vm3, %v19474_v27  ;;  %v22718_v27 = vld [vmem:[#allocation120_spill] sm:$0xff] }
 0x377   :  { %13947 = vmatprep.mubr.msk.f32.mxu1 %vm16571_vm1, %v22562_v63  ;;  %v1610_v2 = vadd.f32 %v19487_v43, %v22718_v27  ;;  %v10683_v27 = vld [vmem:[%s22337_s3 + $0x2c0] sm:$0xff] }
 0x378   :  { %12744 = vmatmul.mubr.msk.f32.gmra.mrb[244].mxu0 %vm2463_vm3, %v18665_v56  ;;  %v15074_v21 = vpack.c.bf16 %v10684_v48, %v10683_v27  ;;  %v10688_v27 = vld [vmem:[%s22337_s3 + $0x2e8] sm:$0xff] }
 0x379   :  { %12746 = vmatprep.mubr.msk.f32.mxu0 %vm16571_vm1, %v22562_v63  ;;  %vm2004_vm13 = vcmp.gt.f32.partialorder %v1610_v2, 0.0 }
 0x37a   :  { %13948 = vmatmul.mubr.msk.f32.gmra.mrb[88].mxu1 %vm2463_vm3, %v19491_v61  ;;  %v2200_v61 = vmul.f32 0.2, %v1610_v2 }
 0x37b   :  { %13950 = vmatprep.mubr.msk.f32.mxu1 %vm16571_vm1, %v22562_v63 }
 0x37c   :  { %12747 = vmatmul.mubr.msk.f32.gmra.mrb[246].mxu0 %vm2463_vm3, %v18681_v50  ;;  %v19533_v26 = vsel %vm2004_vm13, %v1610_v2, %v2200_v61  ;;  %v10686_v61 = vld [vmem:[%s22337_s3 + $0x2d8] sm:$0xff] }
 0x37d   :  { %12749 = vmatprep.mubr.msk.f32.mxu0 %vm16571_vm1, %v22562_v63  ;;  %v15077_v2 = vpack.c.bf16 %v10686_v61, %v10685_v15  ;;  %v22734_v61 = vld [vmem:[#allocation153_spill] sm:$0xff] }
 0x37e   :  { %13951 = vmatmul.mubr.msk.f32.gmra.mrb[90].mxu1 %vm2463_vm3, %v19505_v5 }
 0x37f   :  { %13953 = vmatprep.mubr.msk.f32.mxu1 %vm16571_vm1, %v22562_v63 }
 0x380   :  { %12750 = vmatmul.mubr.msk.f32.gmra.mrb[248].mxu0 %vm2463_vm3, %v18699_v18 }
 0x381   :  { %12752 = vmatprep.mubr.msk.f32.mxu0 %vm16571_vm1, %v22562_v63 }
 0x382   :  { %13954 = vmatmul.mubr.msk.f32.gmra.mrb[92].mxu1 %vm2463_vm3, %v19515_v7 }
 0x383   :  { %13956 = vmatprep.mubr.msk.f32.mxu1 %vm16571_vm1, %v22562_v63 }
 0x384   :  { %12753 = vmatmul.mubr.msk.f32.gmra.mrb[250].mxu0 %vm2463_vm3, %v19521_v11 }
 0x385   :  { %12755 = vmatprep.mubr.msk.f32.mxu0 %vm16571_vm1, %v22562_v63 }
 0x386   :  { %13957 = vmatmul.mubr.msk.f32.gmra.mrb[94].mxu1 %vm2463_vm3, %v19533_v26 }
 0x387   :  { %13975 = vmatprep.mubr.msk.f32.mxu1 %vm16571_vm1, %v22562_v63 }
 0x388   :  { %12756 = vmatmul.mubr.msk.f32.gmra.mrb[252].mxu0 %vm2463_vm3, %v18726_v3 }
 0x389   :  { %12758 = vmatprep.mubr.msk.f32.mxu0 %vm16571_vm1, %v22562_v63 }
 0x38a   :  { %13976 = vmatmul.mubr.msk.f32.vlgmr.msra.gmra.mrb[96].mxu1 %vm2463_vm3, %v18345_v62  ;;  %v15080_v62 = vpack.c.bf16 %v10688_v27, %v10687_v47  ;;  %v10734_v47 = vld [vmem:[%s22337_s3 + $0x308] sm:$0xff] }
 0x38b   :  { %15075 = vmatpush3.bf16.msra.mxu1 %v15074_v21  ;;  %13978 = vmatprep.mubr.msk.f32.mxu1 %vm16571_vm1, %v22562_v63  ;;  %v10690_v21 = vld [vmem:[%s22337_s3 + $0x2f8] sm:$0xff] }
 0x38c   :  { %12759 = vmatmul.mubr.msk.f32.gmra.mrb[254].mxu0 %vm2463_vm3, %v18741_v41  ;;  %15076 = vmatprep.subr.bf16.mxu1 %v22576_v23 }
 0x38d   :  { %12761 = vmatprep.mubr.msk.f32.mxu0 %vm16571_vm1, %v22562_v63 }
 0x38e   :  { %13979 = vmatmul.mubr.msk.f32.gmra.mrb[0].mxu1 %vm2463_vm3, %v18362_v37  ;;  %v22719_v37 = vld [vmem:[#allocation138_spill] sm:$0xff] }
 0x38f   :  { %13981 = vmatprep.mubr.msk.f32.mxu1 %vm16571_vm1, %v22562_v63  ;;  %15078 = vmatpush3.bf16.msra.mxu1 %v15077_v2  ;;  %v1750_v48 = vadd.f32 %v19487_v43, %v22719_v37  ;;  %v10733_v2 = vld [vmem:[%s22337_s3 + $0x300] sm:$0xff]  ;;  %v22735_v37 = vld [vmem:[#allocation121_spill] sm:$0xff] }
 0x390   :  { %12762 = vmatmul.mubr.msk.f32.gmra.mrb[0].mxu0 %vm2463_vm3, %v18756_v40  ;;  %15079 = vmatprep.subr.bf16.mxu1 %v22576_v23 }
 0x391   :  { %12764 = vmatprep.mubr.msk.f32.mxu0 %vm16571_vm1, %v22562_v63  ;;  %vm2032_vm14 = vcmp.gt.f32.partialorder %v1750_v48, 0.0 }
 0x392   :  { %13982 = vmatmul.mubr.msk.f32.gmra.mrb[2].mxu1 %vm2463_vm3, %v18379_v4  ;;  %v2228_v4 = vmul.f32 0.2, %v1750_v48 }
 0x393   :  { %13984 = vmatprep.mubr.msk.f32.mxu1 %vm16571_vm1, %v22562_v63  ;;  %15081 = vmatpush3.bf16.msra.mxu1 %v15080_v62  ;;  %v15086_v62 = vpack.c.bf16 %v10734_v47, %v10733_v2 }
 0x394   :  { %12765 = vmatmul.mubr.msk.f32.gmra.mrb[2].mxu0 %vm2463_vm3, %v18767_v31  ;;  %15082 = vmatprep.subr.bf16.mxu1 %v22576_v23  ;;  %v19610_v15 = vsel %vm2032_vm14, %v1750_v48, %v2228_v4  ;;  %v10735_v48 = vld [vmem:[%s22337_s3 + $0x310] sm:$0xff]  ;;  %v10736_v4 = vld [vmem:[%s22337_s3 + $0x318] sm:$0xff] }
 0x395   :  { %12767 = vmatprep.mubr.msk.f32.mxu0 %vm16571_vm1, %v22562_v63 }
 0x396   :  { %13985 = vmatmul.mubr.msk.f32.gmra.mrb[4].mxu1 %vm2463_vm3, %v18394_v20  ;;  %v10689_v20 = vld [vmem:[%s22337_s3 + $0x2f0] sm:$0xff] }
 0x397   :  { %13987 = vmatprep.mubr.msk.f32.mxu1 %vm16571_vm1, %v22562_v63 }
 0x398   :  { %12768 = vmatmul.mubr.msk.f32.gmra.mrb[4].mxu0 %vm2463_vm3, %v18776_v36 }
 0x399   :  { %12770 = vmatprep.mubr.msk.f32.mxu0 %vm16571_vm1, %v22562_v63 }
 0x39a   :  { %13988 = vmatmul.mubr.msk.f32.gmra.mrb[6].mxu1 %vm2463_vm3, %v18414_v54  ;;  %v15083_v54 = vpack.c.bf16 %v10690_v21, %v10689_v20  ;;  %v15089_v20 = vpack.c.bf16 %v10736_v4, %v10735_v48  ;;  %v22736_v21 = vld [vmem:[#allocation122_spill] sm:$0xff] }
 0x39b   :  { %13990 = vmatprep.mubr.msk.f32.mxu1 %vm16571_vm1, %v22562_v63  ;;  %v22762_v4 = vld [vmem:[#allocation46_spill] sm:$0xff] }
 0x39c   :  { %12771 = vmatmul.mubr.msk.f32.gmra.mrb[6].mxu0 %vm2463_vm3, %v18787_v10  ;;  %15084 = vmatpush3.bf16.msra.mxu1 %v15083_v54  ;;  %v10737_v54 = vld [vmem:[%s22337_s3 + $0x320] sm:$0xff] }
 0x39d   :  { %12773 = vmatprep.mubr.msk.f32.mxu0 %vm16571_vm1, %v22562_v63  ;;  %15085 = vmatprep.subr.bf16.mxu1 %v22576_v23 }
 0x39e   :  { %13991 = vmatmul.mubr.msk.f32.gmra.mrb[8].mxu1 %vm2463_vm3, %v18432_v55 }
 0x39f   :  { %13993 = vmatprep.mubr.msk.f32.mxu1 %vm16571_vm1, %v22562_v63 }
 0x3a0   :  { %12774 = vmatmul.mubr.msk.f32.gmra.mrb[8].mxu0 %vm2463_vm3, %v19610_v15 }
 0x3a1   :  { %12776 = vmatprep.mubr.msk.f32.mxu0 %vm16571_vm1, %v22562_v63 }
 0x3a2   :  { %13994 = vmatmul.mubr.msk.f32.gmra.mrb[10].mxu1 %vm2463_vm3, %v19351_v30  ;;  %v22733_v30 = vld [vmem:[#allocation117_spill] sm:$0xff] }
 0x3a3   :  { %13996 = vmatprep.mubr.msk.f32.mxu1 %vm16571_vm1, %v22562_v63 }
 0x3a4   :  { %12777 = vmatmul.mubr.msk.f32.gmra.mrb[10].mxu0 %vm2463_vm3, %v18807_v29 }
 0x3a5   :  { %12779 = vmatprep.mubr.msk.f32.mxu0 %vm16571_vm1, %v22562_v63 }
 0x3a6   :  { %13997 = vmatmul.mubr.msk.f32.gmra.mrb[12].mxu1 %vm2463_vm3, %v18467_v53 }
 0x3a7   :  { %13999 = vmatprep.mubr.msk.f32.mxu1 %vm16571_vm1, %v22562_v63 }
 0x3a8   :  { %12780 = vmatmul.mubr.msk.f32.gmra.mrb[12].mxu0 %vm2463_vm3, %v18819_v52 }
 0x3a9   :  { %12782 = vmatprep.mubr.msk.f32.mxu0 %vm16571_vm1, %v22562_v63 }
 0x3aa   :  { %14000 = vmatmul.mubr.msk.f32.gmra.mrb[14].mxu1 %vm2463_vm3, %v18486_v45  ;;  %v22720_v45 = vld [vmem:[#allocation142_spill] sm:$0xff] }
 0x3ab   :  { %14002 = vmatprep.mubr.msk.f32.mxu1 %vm16571_vm1, %v22562_v63  ;;  %v1785_v55 = vadd.f32 %v19487_v43, %v22720_v45  ;;  %v22737_v45 = vld [vmem:[#allocation123_spill] sm:$0xff] }
 0x3ac   :  { %12783 = vmatmul.mubr.msk.f32.gmra.mrb[14].mxu0 %vm2463_vm3, %v18831_v17 }
 0x3ad   :  { %12785 = vmatprep.mubr.msk.f32.mxu0 %vm16571_vm1, %v22562_v63  ;;  %v2235_v53 = vmul.f32 0.2, %v1785_v55  ;;  %vm2039_vm0 = vcmp.gt.f32.partialorder %v1785_v55, 0.0 }
 0x3ae   :  { %14003 = vmatmul.mubr.msk.f32.gmra.mrb[16].mxu1 %vm2463_vm3, %v18505_v44 }
 0x3af   :  { %14005 = vmatprep.mubr.msk.f32.mxu1 %vm16571_vm1, %v22562_v63  ;;  %v19671_v44 = vsel %vm2039_vm0, %v1785_v55, %v2235_v53  ;;  %v22739_v55 = vld [vmem:[#allocation126_spill] sm:$0xff]  ;;  %v10740_v53 = vld [vmem:[%s22337_s3 + $0x338] sm:$0xff] }
 0x3b0   :  { %12786 = vmatmul.mubr.msk.f32.gmra.mrb[16].mxu0 %vm2463_vm3, %v18843_v19 }
 0x3b1   :  { %12788 = vmatprep.mubr.msk.f32.mxu0 %vm16571_vm1, %v22562_v63 }
 0x3b2   :  { %14006 = vmatmul.mubr.msk.f32.gmra.mrb[18].mxu1 %vm2463_vm3, %v18525_v9 }
 0x3b3   :  { %14008 = vmatprep.mubr.msk.f32.mxu1 %vm16571_vm1, %v22562_v63 }
 0x3b4   :  { %12789 = vmatmul.mubr.msk.f32.gmra.mrb[18].mxu0 %vm2463_vm3, %v18853_v49 }
 0x3b5   :  { %12791 = vmatprep.mubr.msk.f32.mxu0 %vm16571_vm1, %v22562_v63 }
 0x3b6   :  { %14009 = vmatmul.mubr.msk.f32.gmra.mrb[20].mxu1 %vm2463_vm3, %v18543_v51 }
 0x3b7   :  { %14011 = vmatprep.mubr.msk.f32.mxu1 %vm16571_vm1, %v22562_v63 }
 0x3b8   :  { %12792 = vmatmul.mubr.msk.f32.gmra.mrb[20].mxu0 %vm2463_vm3, %v18871_v46 }
 0x3b9   :  { %12794 = vmatprep.mubr.msk.f32.mxu0 %vm16571_vm1, %v22562_v63 }
 0x3ba   :  { %14012 = vmatmul.mubr.msk.f32.gmra.mrb[22].mxu1 %vm2463_vm3, %v18563_v8  ;;  %v22721_v8 = vld [vmem:[#allocation146_spill] sm:$0xff] }
 0x3bb   :  { %14014 = vmatprep.mubr.msk.f32.mxu1 %vm16571_vm1, %v22562_v63  ;;  %v1820_v51 = vadd.f32 %v19487_v43, %v22721_v8  ;;  %v22743_v8 = vld [vmem:[#allocation132_spill] sm:$0xff] }
 0x3bc   :  { %12795 = vmatmul.mubr.msk.f32.gmra.mrb[22].mxu0 %vm2463_vm3, %v19671_v44 }
 0x3bd   :  { %12797 = vmatprep.mubr.msk.f32.mxu0 %vm16571_vm1, %v22562_v63  ;;  %v2242_v9 = vmul.f32 0.2, %v1820_v51  ;;  %vm2046_vm15 = vcmp.gt.f32.partialorder %v1820_v51, 0.0 }
 0x3be   :  { %14015 = vmatmul.mubr.msk.f32.gmra.mrb[24].mxu1 %vm2463_vm3, %v19435_v1  ;;  %v22732_v1 = vld [vmem:[#allocation152_spill] sm:$0xff] }
 0x3bf   :  { %14017 = vmatprep.mubr.msk.f32.mxu1 %vm16571_vm1, %v22562_v63 }
 0x3c0   :  { %12798 = vmatmul.mubr.msk.f32.gmra.mrb[24].mxu0 %vm2463_vm3, %v18905_v6 }
 0x3c1   :  { %12800 = vmatprep.mubr.msk.f32.mxu0 %vm16571_vm1, %v22562_v63 }
 0x3c2   :  { %14018 = vmatmul.mubr.msk.f32.gmra.mrb[26].mxu1 %vm2463_vm3, %v18600_v12 }
 0x3c3   :  { %14020 = vmatprep.mubr.msk.f32.mxu1 %vm16571_vm1, %v22562_v63 }
 0x3c4   :  { %12801 = vmatmul.mubr.msk.f32.gmra.mrb[26].mxu0 %vm2463_vm3, %v18924_v14 }
 0x3c5   :  { %12803 = vmatprep.mubr.msk.f32.mxu0 %vm16571_vm1, %v22562_v63 }
 0x3c6   :  { %14021 = vmatmul.mubr.msk.f32.gmra.mrb[28].mxu1 %vm2463_vm3, %v18620_v38  ;;  %v10307_v38 = vld [vmem:[%s22337_s3 + $0x110] sm:$0xff] }
 0x3c7   :  { %14023 = vmatprep.mubr.msk.f32.mxu1 %vm16571_vm1, %v22562_v63 }
 0x3c8   :  { %12804 = vmatmul.mubr.msk.f32.gmra.mrb[28].mxu0 %vm2463_vm3, %v18937_v42 }
 0x3c9   :  { %12806 = vmatprep.mubr.msk.f32.mxu0 %vm16571_vm1, %v22562_v63 }
 0x3ca   :  { %14024 = vmatmul.mubr.msk.f32.gmra.mrb[30].mxu1 %vm2463_vm3, %v18640_v25  ;;  %v10308_v25 = vld [vmem:[%s22337_s3 + $0x118] sm:$0xff] }
 0x3cb   :  { %14026 = vmatprep.mubr.msk.f32.mxu1 %vm16571_vm1, %v22562_v63 }
 0x3cc   :  { %12807 = vmatmul.mubr.msk.f32.gmra.mrb[30].mxu0 %vm2463_vm3, %v18949_v60 }
 0x3cd   :  { %12809 = vmatprep.mubr.msk.f32.mxu0 %vm16571_vm1, %v22562_v63 }
 0x3ce   :  { %14027 = vmatmul.mubr.msk.f32.gmra.mrb[32].mxu1 %vm2463_vm3, %v18665_v56  ;;  %v19731_v56 = vsel %vm2046_vm15, %v1820_v51, %v2242_v9  ;;  %v22750_v51 = vld [vmem:[#allocation143_spill] sm:$0xff]  ;;  %v22751_v9 = vld [vmem:[#allocation144_spill] sm:$0xff] }
 0x3cf   :  { %14029 = vmatprep.mubr.msk.f32.mxu1 %vm16571_vm1, %v22562_v63 }
 0x3d0   :  { %12810 = vmatmul.mubr.msk.f32.gmra.mrb[32].mxu0 %vm2463_vm3, %v18959_v39 }
 0x3d1   :  { %12812 = vmatprep.mubr.msk.f32.mxu0 %vm16571_vm1, %v22562_v63 }
 0x3d2   :  { %14030 = vmatmul.mubr.msk.f32.gmra.mrb[34].mxu1 %vm2463_vm3, %v18681_v50  ;;  %v14993_v50 = vpack.c.bf16 %v10308_v25, %v10307_v38  ;;  %v22754_v38 = vld [vmem:[#allocation36_spill] sm:$0xff] }
 0x3d3   :  { %14032 = vmatprep.mubr.msk.f32.mxu1 %vm16571_vm1, %v22562_v63  ;;  %v1130_v25 = vadd.f32 %v19487_v43, %v22754_v38 }
 0x3d4   :  { %12813 = vmatmul.mubr.msk.f32.gmra.mrb[34].mxu0 %vm2463_vm3, %v18971_v58 }
 0x3d5   :  { %12815 = vmatprep.mubr.msk.f32.mxu0 %vm16571_vm1, %v22562_v63  ;;  %vm1908_vm5 = vcmp.gt.f32.partialorder %v1130_v25, 0.0 }
 0x3d6   :  { %14033 = vmatmul.mubr.msk.f32.gmra.mrb[36].mxu1 %vm2463_vm3, %v18699_v18  ;;  %v10309_v18 = vld [vmem:[%s22337_s3 + $0x120] sm:$0xff] }
 0x3d7   :  { %14035 = vmatprep.mubr.msk.f32.mxu1 %vm16571_vm1, %v22562_v63 }
 0x3d8   :  { %12816 = vmatmul.mubr.msk.f32.gmra.mrb[36].mxu0 %vm2463_vm3, %v19731_v56 }
 0x3d9   :  { %12834 = vmatprep.mubr.msk.f32.mxu0 %vm16571_vm1, %v22562_v63 }
 0x3da   :  { %14036 = vmatmul.mubr.msk.f32.gmra.mrb[38].mxu1 %vm2463_vm3, %v19521_v11 }
 0x3db   :  { %14038 = vmatprep.mubr.msk.f32.mxu1 %vm16571_vm1, %v22562_v63 }
 0x3dc   :  { %12835 = vmatmul.mubr.f32.vlgmr.msra.gmra.mrb[196].mxu0 %v22562_v63 }
 0x3dd   :  { %12837 = vmatprep.mubr.msk.f32.mxu0 %vm16571_vm1, %v22562_v63 }
 0x3de   :  { %14039 = vmatmul.mubr.msk.f32.gmra.mrb[40].mxu1 %vm2463_vm3, %v18726_v3  ;;  %v10306_v3 = vld [vmem:[%s22337_s3 + $0x108] sm:$0xff] }
 0x3df   :  { %14041 = vmatprep.mubr.msk.f32.mxu1 %vm16571_vm1, %v22562_v63 }
 0x3e0   :  { %12838 = vmatmul.mubr.f32.gmra.mrb[198].mxu0 %v22562_v63 }
 0x3e1   :  { %12840 = vmatprep.mubr.msk.f32.mxu0 %vm16571_vm1, %v22562_v63 }
 0x3e2   :  { %14042 = vmatmul.mubr.msk.f32.gmra.mrb[42].mxu1 %vm2463_vm3, %v18741_v41  ;;  %v10310_v41 = vld [vmem:[%s22337_s3 + $0x128] sm:$0xff] }
 0x3e3   :  { %14044 = vmatprep.mubr.msk.f32.mxu1 %vm16571_vm1, %v22562_v63 }
 0x3e4   :  { %12841 = vmatmul.mubr.f32.gmra.mrb[200].mxu0 %v22562_v63 }
 0x3e5   :  { %12843 = vmatprep.mubr.msk.f32.mxu0 %vm16571_vm1, %v22562_v63 }
 0x3e6   :  { %14045 = vmatmul.mubr.msk.f32.gmra.mrb[44].mxu1 %vm2463_vm3, %v18756_v40  ;;  %v14996_v40 = vpack.c.bf16 %v10310_v41, %v10309_v18  ;;  %v2104_v41 = vmul.f32 0.2, %v1130_v25 }
 0x3e7   :  { %14047 = vmatprep.mubr.msk.f32.mxu1 %vm16571_vm1, %v22562_v63 }
 0x3e8   :  { %12844 = vmatmul.mubr.f32.gmra.mrb[202].mxu0 %v22562_v63 }
 0x3e9   :  { %12846 = vmatprep.mubr.msk.f32.mxu0 %vm16571_vm1, %v22562_v63 }
 0x3ea   :  { %14048 = vmatmul.mubr.msk.f32.gmra.mrb[46].mxu1 %vm2463_vm3, %v18767_v31  ;;  %v10305_v31 = vld [vmem:[%s22337_s3 + $0x100] sm:$0xff] }
 0x3eb   :  { %14050 = vmatprep.mubr.msk.f32.mxu1 %vm16571_vm1, %v22562_v63  ;;  %v14990_v12 = vpack.c.bf16 %v10306_v3, %v10305_v31  ;;  %v22753_v31 = vld [vmem:[#allocation33_spill] sm:$0xff] }
 0x3ec   :  { %12847 = vmatmul.mubr.f32.gmra.mrb[204].mxu0 %v22562_v63  ;;  %v1125_v3 = vadd.f32 %v19487_v43, %v22753_v31 }
 0x3ed   :  { %12849 = vmatprep.mubr.msk.f32.mxu0 %vm16571_vm1, %v22562_v63  ;;  %14991 = vmatpush3.bf16.msra.mxu0 %v14990_v12 }
 0x3ee   :  { %14051 = vmatmul.mubr.msk.f32.gmra.mrb[48].mxu1 %vm2463_vm3, %v18776_v36  ;;  %14992 = vmatprep.subr.bf16.mxu0 %v22576_v23  ;;  %v10311_v36 = vld [vmem:[%s22337_s3 + $0x130] sm:$0xff]  ;;  %v2103_v12 = vmul.f32 0.2, %v1125_v3  ;;  %vm1907_vm4 = vcmp.gt.f32.partialorder %v1125_v3, 0.0 }
 0x3ef   :  { %14053 = vmatprep.mubr.msk.f32.mxu1 %vm16571_vm1, %v22562_v63 }
 0x3f0   :  { %12850 = vmatmul.mubr.f32.gmra.mrb[206].mxu0 %v22562_v63 }
 0x3f1   :  { %12852 = vmatprep.mubr.msk.f32.mxu0 %vm16571_vm1, %v22562_v63  ;;  %14994 = vmatpush3.bf16.msra.mxu0 %v14993_v50  ;;  %v22755_v50 = vld [vmem:[#allocation35_spill] sm:$0xff] }
 0x3f2   :  { %14054 = vmatmul.mubr.msk.f32.gmra.mrb[50].mxu1 %vm2463_vm3, %v18787_v10  ;;  %14995 = vmatprep.subr.bf16.mxu0 %v22576_v23  ;;  %v10312_v10 = vld [vmem:[%s22337_s3 + $0x138] sm:$0xff]  ;;  %v1135_v18 = vadd.f32 %v19487_v43, %v22755_v50 }
 0x3f3   :  { %14056 = vmatprep.mubr.msk.f32.mxu1 %vm16571_vm1, %v22562_v63 }
 0x3f4   :  { %12853 = vmatmul.mubr.f32.gmra.mrb[208].mxu0 %v22562_v63  ;;  %vm1909_vm6 = vcmp.gt.f32.partialorder %v1135_v18, 0.0 }
 0x3f5   :  { %12855 = vmatprep.mubr.msk.f32.mxu0 %vm16571_vm1, %v22562_v63  ;;  %14997 = vmatpush3.bf16.msra.mxu0 %v14996_v40  ;;  %v20187_v40 = vsel %vm1907_vm4, %v1125_v3, %v2103_v12  ;;  %v10358_v12 = vld [vmem:[%s22337_s3 + $0x158] sm:$0xff] }
 0x3f6   :  { %14057 = vmatmul.mubr.msk.f32.gmra.mrb[52].mxu1 %vm2463_vm3, %v19610_v15  ;;  %14998 = vmatprep.subr.bf16.mxu0 %v22576_v23  ;;  %v10738_v15 = vld [vmem:[%s22337_s3 + $0x328] sm:$0xff] }
 0x3f7   :  { %14059 = vmatprep.mubr.msk.f32.mxu1 %vm16571_vm1, %v22562_v63 }
 0x3f8   :  { %12856 = vmatmul.mubr.msk.f32.gmra.mrb[210].mxu0 %vm2463_vm3, %v18061_v34 }
 0x3f9   :  { %12858 = vmatprep.mubr.msk.f32.mxu0 %vm16571_vm1, %v22562_v63 }
 0x3fa   :  { %14060 = vmatmul.mubr.msk.f32.gmra.mrb[54].mxu1 %vm2463_vm3, %v18807_v29  ;;  %v14999_v29 = vpack.c.bf16 %v10312_v10, %v10311_v36  ;;  %v2105_v36 = vmul.f32 0.2, %v1135_v18  ;;  %v22756_v10 = vld [vmem:[#allocation39_spill] sm:$0xff] }
 0x3fb   :  { %14062 = vmatprep.mubr.msk.f32.mxu1 %vm16571_vm1, %v22562_v63 }
 0x3fc   :  { %12859 = vmatmul.mubr.msk.f32.gmra.mrb[212].mxu0 %vm2463_vm3, %v18076_v59 }
 0x3fd   :  { %12861 = vmatprep.mubr.msk.f32.mxu0 %vm16571_vm1, %v22562_v63  ;;  %15000 = vmatpush3.bf16.msra.mxu0 %v14999_v29  ;;  %v1140_v29 = vadd.f32 %v19487_v43, %v22756_v10  ;;  %v22767_v10 = vld [vmem:[#allocation55_spill] sm:$0xff] }
 0x3fe   :  { %14063 = vmatmul.mubr.msk.f32.gmra.mrb[56].mxu1 %vm2463_vm3, %v18819_v52  ;;  %15001 = vmatprep.subr.bf16.mxu0 %v22576_v23  ;;  %v22722_v52 = vld [vmem:[#allocation107_spill] sm:$0xff] }
 0x3ff   :  { %14065 = vmatprep.mubr.msk.f32.mxu1 %vm16571_vm1, %v22562_v63  ;;  %vm1910_vm7 = vcmp.gt.f32.partialorder %v1140_v29, 0.0 }
 0x400   :  { %12862 = vmatmul.mubr.msk.f32.gmra.mrb[214].mxu0 %vm2463_vm3, %v18086_v24 }
 0x401   :  { %12864 = vmatprep.mubr.msk.f32.mxu0 %vm16571_vm1, %v22562_v63 }
 0x402   :  { %14066 = vmatmul.mubr.msk.f32.gmra.mrb[58].mxu1 %vm2463_vm3, %v18831_v17  ;;  %v22723_v17 = vld [vmem:[#allocation148_spill] sm:$0xff] }
 0x403   :  { %14068 = vmatprep.mubr.msk.f32.mxu1 %vm16571_vm1, %v22562_v63 }
 0x404   :  { %12865 = vmatmul.mubr.msk.f32.gmra.mrb[216].mxu0 %vm2463_vm3, %v18097_v13 }
 0x405   :  { %12867 = vmatprep.mubr.msk.f32.mxu0 %vm16571_vm1, %v22562_v63 }
 0x406   :  { %14069 = vmatmul.mubr.msk.f32.gmra.mrb[60].mxu1 %vm2463_vm3, %v18843_v19  ;;  %v22724_v19 = vld [vmem:[#allocation108_spill] sm:$0xff] }
 0x407   :  { %14071 = vmatprep.mubr.msk.f32.mxu1 %vm16571_vm1, %v22562_v63 }
 0x408   :  { %12868 = vmatmul.mubr.msk.f32.gmra.mrb[218].mxu0 %vm2463_vm3, %v18108_v0 }
 0x409   :  { %12870 = vmatprep.mubr.msk.f32.mxu0 %vm16571_vm1, %v22562_v63 }
 0x40a   :  { %14072 = vmatmul.mubr.msk.f32.gmra.mrb[62].mxu1 %vm2463_vm3, %v18853_v49  ;;  %v22725_v49 = vld [vmem:[#allocation149_spill] sm:$0xff] }
 0x40b   :  { %14074 = vmatprep.mubr.msk.f32.mxu1 %vm16571_vm1, %v22562_v63 }
 0x40c   :  { %12871 = vmatmul.mubr.msk.f32.gmra.mrb[220].mxu0 %vm2463_vm3, %v18125_v57 }
 0x40d   :  { %12873 = vmatprep.mubr.msk.f32.mxu0 %vm16571_vm1, %v22562_v63 }
 0x40e   :  { %14075 = vmatmul.mubr.msk.f32.gmra.mrb[64].mxu1 %vm2463_vm3, %v18871_v46  ;;  %v22726_v46 = vld [vmem:[#allocation109_spill] sm:$0xff] }
 0x40f   :  { %14077 = vmatprep.mubr.msk.f32.mxu1 %vm16571_vm1, %v22562_v63 }
 0x410   :  { %12874 = vmatmul.mubr.f32.gmra.mrb[222].mxu0 %v22562_v63 }
 0x411   :  { %12876 = vmatprep.mubr.msk.f32.mxu0 %vm16571_vm1, %v22562_v63 }
 0x412   :  { %14078 = vmatmul.mubr.msk.f32.gmra.mrb[66].mxu1 %vm2463_vm3, %v19671_v44 }
 0x413   :  { %14080 = vmatprep.mubr.msk.f32.mxu1 %vm16571_vm1, %v22562_v63 }
 0x414   :  { %12877 = vmatmul.mubr.msk.f32.gmra.mrb[224].mxu0 %vm2463_vm3, %v18161_v28 }
 0x415   :  { %12879 = vmatprep.mubr.msk.f32.mxu0 %vm16571_vm1, %v22562_v63 }
 0x416   :  { %14081 = vmatmul.mubr.msk.f32.gmra.mrb[68].mxu1 %vm2463_vm3, %v18905_v6  ;;  %v22727_v6 = vld [vmem:[#allocation150_spill] sm:$0xff] }
 0x417   :  { %14083 = vmatprep.mubr.msk.f32.mxu1 %vm16571_vm1, %v22562_v63 }
 0x418   :  { %12880 = vmatmul.mubr.msk.f32.gmra.mrb[226].mxu0 %vm2463_vm3, %v18180_v33 }
 0x419   :  { %12882 = vmatprep.mubr.msk.f32.mxu0 %vm16571_vm1, %v22562_v63 }
 0x41a   :  { %14084 = vmatmul.mubr.msk.f32.gmra.mrb[70].mxu1 %vm2463_vm3, %v18924_v14  ;;  %v22728_v14 = vld [vmem:[#allocation111_spill] sm:$0xff] }
 0x41b   :  { %14086 = vmatprep.mubr.msk.f32.mxu1 %vm16571_vm1, %v22562_v63 }
 0x41c   :  { %12883 = vmatmul.mubr.msk.f32.gmra.mrb[228].mxu0 %vm2463_vm3, %v18193_v16 }
 0x41d   :  { %12885 = vmatprep.mubr.msk.f32.mxu0 %vm16571_vm1, %v22562_v63 }
 0x41e   :  { %14087 = vmatmul.mubr.msk.f32.gmra.mrb[72].mxu1 %vm2463_vm3, %v18937_v42  ;;  %v22729_v42 = vld [vmem:[#allocation151_spill] sm:$0xff] }
 0x41f   :  { %14089 = vmatprep.mubr.msk.f32.mxu1 %vm16571_vm1, %v22562_v63 }
 0x420   :  { %12886 = vmatmul.mubr.msk.f32.gmra.mrb[230].mxu0 %vm2463_vm3, %v18205_v32 }
 0x421   :  { %12888 = vmatprep.mubr.msk.f32.mxu0 %vm16571_vm1, %v22562_v63 }
 0x422   :  { %14090 = vmatmul.mubr.msk.f32.gmra.mrb[74].mxu1 %vm2463_vm3, %v18949_v60  ;;  %v22730_v60 = vld [vmem:[#allocation114_spill] sm:$0xff] }
 0x423   :  { %14092 = vmatprep.mubr.msk.f32.mxu1 %vm16571_vm1, %v22562_v63 }
 0x424   :  { %12889 = vmatmul.mubr.msk.f32.gmra.mrb[232].mxu0 %vm2463_vm3, %v22676_v35 }
 0x425   :  { %12891 = vmatprep.mubr.msk.f32.mxu0 %vm16571_vm1, %v22562_v63 }
 0x426   :  { %14093 = vmatmul.mubr.msk.f32.gmra.mrb[76].mxu1 %vm2463_vm3, %v18959_v39  ;;  %v22731_v39 = vld [vmem:[#allocation147_spill] sm:$0xff] }
 0x427   :  { %14095 = vmatprep.mubr.msk.f32.mxu1 %vm16571_vm1, %v22562_v63 }
 0x428   :  { %12892 = vmatmul.mubr.msk.f32.gmra.mrb[234].mxu0 %vm2463_vm3, %v22677_v22 }
 0x429   :  { %12894 = vmatprep.mubr.msk.f32.mxu0 %vm16571_vm1, %v22562_v63 }
 0x42a   :  { %14096 = vmatmul.mubr.msk.f32.gmra.mrb[78].mxu1 %vm2463_vm3, %v18971_v58  ;;  %v1855_v58 = vadd.f32 %v19487_v43, %v22731_v39 }
 0x42b   :  { %14098 = vmatprep.mubr.msk.f32.mxu1 %vm16571_vm1, %v22562_v63 }
 0x42c   :  { %12895 = vmatmul.mubr.f32.gmra.mrb[236].mxu0 %v22562_v63  ;;  %v2249_v11 = vmul.f32 0.2, %v1855_v58  ;;  %vm2053_vm2 = vcmp.gt.f32.partialorder %v1855_v58, 0.0 }
 0x42d   :  { %12897 = vmatprep.mubr.msk.f32.mxu0 %vm16571_vm1, %v22562_v63 }
 0x42e   :  { %14099 = vmatmul.mubr.msk.f32.gmra.mrb[80].mxu1 %vm2463_vm3, %v19731_v56  ;;  %v2445_v27 = vsel %vm2053_vm2, %v1855_v58, %v2249_v11  ;;  %v22752_v56 = vld [vmem:[#allocation145_spill] sm:$0xff] }
 0x42f   :  { %14101 = vmatprep.mubr.msk.f32.mxu1 %vm16571_vm1, %v22562_v63 }
 0x430   :  { %12898 = vmatmul.mubr.msk.f32.gmra.mrb[238].mxu0 %vm2463_vm3, %v22722_v52 }
 0x431   :  { %12900 = vmatprep.mubr.msk.f32.mxu0 %vm16571_vm1, %v22562_v63 }
 0x432   :  { %14102 = vmatmul.mubr.msk.f32.gmra.mrb[82].mxu1 %vm2463_vm3, %v22723_v17  ;;  %v22757_v17 = vld [vmem:[#allocation38_spill] sm:$0xff] }
 0x433   :  { %14104 = vmatprep.mubr.msk.f32.mxu1 %vm16571_vm1, %v22562_v63 }
 0x434   :  { %12901 = vmatmul.mubr.msk.f32.gmra.mrb[240].mxu0 %vm2463_vm3, %v22724_v19 }
 0x435   :  { %12903 = vmatprep.mubr.msk.f32.mxu0 %vm16571_vm1, %v22562_v63 }
 0x436   :  { %14105 = vmatmul.mubr.msk.f32.gmra.mrb[84].mxu1 %vm2463_vm3, %v22725_v49  ;;  %v2106_v49 = vmul.f32 0.2, %v1140_v29 }
 0x437   :  { %14107 = vmatprep.mubr.msk.f32.mxu1 %vm16571_vm1, %v22562_v63 }
 0x438   :  { %12904 = vmatmul.mubr.msk.f32.gmra.mrb[242].mxu0 %vm2463_vm3, %v22726_v46 }
 0x439   :  { %12906 = vmatprep.mubr.msk.f32.mxu0 %vm16571_vm1, %v22562_v63 }
 0x43a   :  { %14108 = vmatmul.mubr.msk.f32.gmra.mrb[86].mxu1 %vm2463_vm3, %v22727_v6 }
 0x43b   :  { %14110 = vmatprep.mubr.msk.f32.mxu1 %vm16571_vm1, %v22562_v63 }
 0x43c   :  { %12907 = vmatmul.mubr.msk.f32.gmra.mrb[244].mxu0 %vm2463_vm3, %v22728_v14 }
 0x43d   :  { %12909 = vmatprep.mubr.msk.f32.mxu0 %vm16571_vm1, %v22562_v63 }
 0x43e   :  { %14111 = vmatmul.mubr.msk.f32.gmra.mrb[88].mxu1 %vm2463_vm3, %v22729_v42 }
 0x43f   :  { %14113 = vmatprep.mubr.msk.f32.mxu1 %vm16571_vm1, %v22562_v63 }
 0x440   :  { %12910 = vmatmul.mubr.msk.f32.gmra.mrb[246].mxu0 %vm2463_vm3, %v22730_v60 }
 0x441   :  { %12912 = vmatprep.mubr.msk.f32.mxu0 %vm16571_vm1, %v22562_v63 }
 0x442   :  { %14114 = vmatmul.mubr.msk.f32.gmra.mrb[90].mxu1 %vm2463_vm3, %v22732_v1  ;;  %v22759_v1 = vld [vmem:[#allocation45_spill] sm:$0xff] }
 0x443   :  { %14116 = vmatprep.mubr.msk.f32.mxu1 %vm16571_vm1, %v22562_v63 }
 0x444   :  { %12913 = vmatmul.mubr.msk.f32.gmra.mrb[248].mxu0 %vm2463_vm3, %v22733_v30 }
 0x445   :  { %12915 = vmatprep.mubr.msk.f32.mxu0 %vm16571_vm1, %v22562_v63 }
 0x446   :  { %14117 = vmatmul.mubr.msk.f32.gmra.mrb[92].mxu1 %vm2463_vm3, %v22734_v61  ;;  %v22760_v61 = vld [vmem:[#allocation44_spill] sm:$0xff] }
 0x447   :  { %14119 = vmatprep.mubr.msk.f32.mxu1 %vm16571_vm1, %v22562_v63  ;;  %v1165_v2 = vadd.f32 %v19487_v43, %v22760_v61 }
 0x448   :  { %12916 = vmatmul.mubr.f32.gmra.mrb[250].mxu0 %v22562_v63 }
 0x449   :  { %12918 = vmatprep.mubr.msk.f32.mxu0 %vm16571_vm1, %v22562_v63  ;;  %vm1915_vm11 = vcmp.gt.f32.partialorder %v1165_v2, 0.0 }
 0x44a   :  { %14120 = vmatmul.mubr.msk.f32.gmra.mrb[94].mxu1 %vm2463_vm3, %v2445_v27  ;;  %v2111_v27 = vmul.f32 0.2, %v1165_v2 }
 0x44b   :  { %14138 = vmatprep.mubr.msk.f32.mxu1 %vm16571_vm1, %v22562_v63 }
 0x44c   :  { %12919 = vmatmul.mubr.msk.f32.gmra.mrb[252].mxu0 %vm2463_vm3, %v22735_v37 }
 0x44d   :  { %12921 = vmatprep.mubr.msk.f32.mxu0 %vm16571_vm1, %v22562_v63 }
 0x44e   :  { %14139 = vmatmul.mubr.msk.f32.vlgmr.msra.gmra.mrb[96].mxu1 %vm2463_vm3, %v18061_v34  ;;  %v15092_v34 = vpack.c.bf16 %v10738_v15, %v10737_v54  ;;  %v20277_v54 = vsel %vm1915_vm11, %v1165_v2, %v2111_v27  ;;  %v22770_v27 = vld [vmem:[#allocation62_spill] sm:$0xff] }
 0x44f   :  { %15087 = vmatpush3.bf16.msra.mxu1 %v15086_v62  ;;  %14141 = vmatprep.mubr.msk.f32.mxu1 %vm16571_vm1, %v22562_v63  ;;  %v22761_v62 = vld [vmem:[#allocation47_spill] sm:$0xff] }
 0x450   :  { %12922 = vmatmul.mubr.msk.f32.gmra.mrb[254].mxu0 %vm2463_vm3, %v22736_v21  ;;  %15088 = vmatprep.subr.bf16.mxu1 %v22576_v23 }
 0x451   :  { %12924 = vmatprep.mubr.msk.f32.mxu0 %vm16571_vm1, %v22562_v63 }
 0x452   :  { %14142 = vmatmul.mubr.msk.f32.gmra.mrb[0].mxu1 %vm2463_vm3, %v18076_v59  ;;  %v22738_v59 = vld [vmem:[#allocation125_spill] sm:$0xff] }
 0x453   :  { %14144 = vmatprep.mubr.msk.f32.mxu1 %vm16571_vm1, %v22562_v63  ;;  %15090 = vmatpush3.bf16.msra.mxu1 %v15089_v20  ;;  %v1175_v20 = vadd.f32 %v19487_v43, %v22762_v4 }
 0x454   :  { %12925 = vmatmul.mubr.msk.f32.gmra.mrb[0].mxu0 %vm2463_vm3, %v22737_v45  ;;  %15091 = vmatprep.subr.bf16.mxu1 %v22576_v23 }
 0x455   :  { %12927 = vmatprep.mubr.msk.f32.mxu0 %vm16571_vm1, %v22562_v63  ;;  %v2113_v15 = vmul.f32 0.2, %v1175_v20  ;;  %vm1917_vm13 = vcmp.gt.f32.partialorder %v1175_v20, 0.0 }
 0x456   :  { %14145 = vmatmul.mubr.msk.f32.gmra.mrb[2].mxu1 %vm2463_vm3, %v18086_v24  ;;  %v22740_v24 = vld [vmem:[#allocation127_spill] sm:$0xff] }
 0x457   :  { %14147 = vmatprep.mubr.msk.f32.mxu1 %vm16571_vm1, %v22562_v63  ;;  %15093 = vmatpush3.bf16.msra.mxu1 %v15092_v34  ;;  %v22763_v34 = vld [vmem:[#allocation50_spill] sm:$0xff] }
 0x458   :  { %12928 = vmatmul.mubr.msk.f32.gmra.mrb[2].mxu0 %vm2463_vm3, %v22738_v59  ;;  %15094 = vmatprep.subr.bf16.mxu1 %v22576_v23 }
 0x459   :  { %12930 = vmatprep.mubr.msk.f32.mxu0 %vm16571_vm1, %v22562_v63 }
 0x45a   :  { %14148 = vmatmul.mubr.msk.f32.gmra.mrb[4].mxu1 %vm2463_vm3, %v18097_v13  ;;  %v10739_v13 = vld [vmem:[%s22337_s3 + $0x330] sm:$0xff] }
 0x45b   :  { %14150 = vmatprep.mubr.msk.f32.mxu1 %vm16571_vm1, %v22562_v63  ;;  %v15095_v44 = vpack.c.bf16 %v10740_v53, %v10739_v13  ;;  %v20301_v53 = vsel %vm1917_vm13, %v1175_v20, %v2113_v15  ;;  %v22771_v20 = vld [vmem:[#allocation65_spill] sm:$0xff]  ;;  %v22772_v15 = vld [vmem:[#allocation64_spill] sm:$0xff] }
 0x45c   :  { %12931 = vmatmul.mubr.msk.f32.gmra.mrb[4].mxu0 %vm2463_vm3, %v22739_v55 }
 0x45d   :  { %12933 = vmatprep.mubr.msk.f32.mxu0 %vm16571_vm1, %v22562_v63  ;;  %15096 = vmatpush3.bf16.msra.mxu1 %v15095_v44 }
 0x45e   :  { %14151 = vmatmul.mubr.msk.f32.gmra.mrb[6].mxu1 %vm2463_vm3, %v18108_v0  ;;  %15097 = vmatprep.subr.bf16.mxu1 %v22576_v23  ;;  %v22741_v0 = vld [vmem:[#allocation130_spill] sm:$0xff] }
 0x45f   :  { %14153 = vmatprep.mubr.msk.f32.mxu1 %vm16571_vm1, %v22562_v63 }
 0x460   :  { %12934 = vmatmul.mubr.msk.f32.gmra.mrb[6].mxu0 %vm2463_vm3, %v22740_v24 }
 0x461   :  { %12936 = vmatprep.mubr.msk.f32.mxu0 %vm16571_vm1, %v22562_v63 }
 0x462   :  { %14154 = vmatmul.mubr.msk.f32.gmra.mrb[8].mxu1 %vm2463_vm3, %v18125_v57  ;;  %v22742_v57 = vld [vmem:[#allocation131_spill] sm:$0xff] }
 0x463   :  { %14156 = vmatprep.mubr.msk.f32.mxu1 %vm16571_vm1, %v22562_v63 }
 0x464   :  { %12937 = vmatmul.mubr.f32.gmra.mrb[8].mxu0 %v22562_v63 }
 0x465   :  { %12939 = vmatprep.mubr.msk.f32.mxu0 %vm16571_vm1, %v22562_v63 }
 0x466   :  { %14157 = vmatmul.mubr.f32.gmra.mrb[10].mxu1 %v22562_v63 }
 0x467   :  { %14159 = vmatprep.mubr.msk.f32.mxu1 %vm16571_vm1, %v22562_v63 }
 0x468   :  { %12940 = vmatmul.mubr.msk.f32.gmra.mrb[10].mxu0 %vm2463_vm3, %v22741_v0 }
 0x469   :  { %12942 = vmatprep.mubr.msk.f32.mxu0 %vm16571_vm1, %v22562_v63 }
 0x46a   :  { %14160 = vmatmul.mubr.msk.f32.gmra.mrb[12].mxu1 %vm2463_vm3, %v18161_v28  ;;  %v22744_v28 = vld [vmem:[#allocation134_spill] sm:$0xff] }
 0x46b   :  { %14162 = vmatprep.mubr.msk.f32.mxu1 %vm16571_vm1, %v22562_v63 }
 0x46c   :  { %12943 = vmatmul.mubr.msk.f32.gmra.mrb[12].mxu0 %vm2463_vm3, %v22742_v57 }
 0x46d   :  { %12945 = vmatprep.mubr.msk.f32.mxu0 %vm16571_vm1, %v22562_v63 }
 0x46e   :  { %14163 = vmatmul.mubr.msk.f32.gmra.mrb[14].mxu1 %vm2463_vm3, %v18180_v33  ;;  %v22745_v33 = vld [vmem:[#allocation135_spill] sm:$0xff] }
 0x46f   :  { %14165 = vmatprep.mubr.msk.f32.mxu1 %vm16571_vm1, %v22562_v63 }
 0x470   :  { %12946 = vmatmul.mubr.msk.f32.gmra.mrb[14].mxu0 %vm2463_vm3, %v22743_v8 }
 0x471   :  { %12948 = vmatprep.mubr.msk.f32.mxu0 %vm16571_vm1, %v22562_v63 }
 0x472   :  { %14166 = vmatmul.mubr.msk.f32.gmra.mrb[16].mxu1 %vm2463_vm3, %v18193_v16  ;;  %v22746_v16 = vld [vmem:[#allocation136_spill] sm:$0xff] }
 0x473   :  { %14168 = vmatprep.mubr.msk.f32.mxu1 %vm16571_vm1, %v22562_v63 }
 0x474   :  { %12949 = vmatmul.mubr.msk.f32.gmra.mrb[16].mxu0 %vm2463_vm3, %v22744_v28 }
 0x475   :  { %12951 = vmatprep.mubr.msk.f32.mxu0 %vm16571_vm1, %v22562_v63 }
 0x476   :  { %14169 = vmatmul.mubr.msk.f32.gmra.mrb[18].mxu1 %vm2463_vm3, %v18205_v32  ;;  %v22747_v32 = vld [vmem:[#allocation139_spill] sm:$0xff] }
 0x477   :  { %14171 = vmatprep.mubr.msk.f32.mxu1 %vm16571_vm1, %v22562_v63 }
 0x478   :  { %12952 = vmatmul.mubr.msk.f32.gmra.mrb[18].mxu0 %vm2463_vm3, %v22745_v33 }
 0x479   :  { %12954 = vmatprep.mubr.msk.f32.mxu0 %vm16571_vm1, %v22562_v63 }
 0x47a   :  { %14172 = vmatmul.mubr.msk.f32.gmra.mrb[20].mxu1 %vm2463_vm3, %v22676_v35  ;;  %v22748_v35 = vld [vmem:[#allocation140_spill] sm:$0xff] }
 0x47b   :  { %14174 = vmatprep.mubr.msk.f32.mxu1 %vm16571_vm1, %v22562_v63 }
 0x47c   :  { %12955 = vmatmul.mubr.msk.f32.gmra.mrb[20].mxu0 %vm2463_vm3, %v22746_v16 }
 0x47d   :  { %12957 = vmatprep.mubr.msk.f32.mxu0 %vm16571_vm1, %v22562_v63 }
 0x47e   :  { %14175 = vmatmul.mubr.msk.f32.gmra.mrb[22].mxu1 %vm2463_vm3, %v22677_v22  ;;  %v22749_v22 = vld [vmem:[#allocation141_spill] sm:$0xff] }
 0x47f   :  { %14177 = vmatprep.mubr.msk.f32.mxu1 %vm16571_vm1, %v22562_v63 }
 0x480   :  { %12958 = vmatmul.mubr.f32.gmra.mrb[22].mxu0 %v22562_v63 }
 0x481   :  { %12960 = vmatprep.mubr.msk.f32.mxu0 %vm16571_vm1, %v22562_v63 }
 0x482   :  { %14178 = vmatmul.mubr.f32.gmra.mrb[24].mxu1 %v22562_v63 }
 0x483   :  { %14180 = vmatprep.mubr.msk.f32.mxu1 %vm16571_vm1, %v22562_v63 }
 0x484   :  { %12961 = vmatmul.mubr.msk.f32.gmra.mrb[24].mxu0 %vm2463_vm3, %v22747_v32 }
 0x485   :  { %12963 = vmatprep.mubr.msk.f32.mxu0 %vm16571_vm1, %v22562_v63 }
 0x486   :  { %14181 = vmatmul.mubr.msk.f32.gmra.mrb[26].mxu1 %vm2463_vm3, %v22722_v52  ;;  %v20199_v52 = vsel %vm1908_vm5, %v1130_v25, %v2104_v41  ;;  %v22766_v25 = vld [vmem:[#allocation56_spill] sm:$0xff]  ;;  %v10359_v41 = vld [vmem:[%s22337_s3 + $0x160] sm:$0xff] }
 0x487   :  { %14183 = vmatprep.mubr.msk.f32.mxu1 %vm16571_vm1, %v22562_v63  ;;  %v1200_v50 = vadd.f32 %v19487_v43, %v22766_v25 }
 0x488   :  { %12964 = vmatmul.mubr.msk.f32.gmra.mrb[26].mxu0 %vm2463_vm3, %v22748_v35 }
 0x489   :  { %12966 = vmatprep.mubr.msk.f32.mxu0 %vm16571_vm1, %v22562_v63  ;;  %vm1922_vm2 = vcmp.gt.f32.partialorder %v1200_v50, 0.0 }
 0x48a   :  { %14184 = vmatmul.mubr.msk.f32.gmra.mrb[28].mxu1 %vm2463_vm3, %v22724_v19  ;;  %v1145_v19 = vadd.f32 %v19487_v43, %v22757_v17  ;;  %v2118_v17 = vmul.f32 0.2, %v1200_v50 }
 0x48b   :  { %14186 = vmatprep.mubr.msk.f32.mxu1 %vm16571_vm1, %v22562_v63 }
 0x48c   :  { %12967 = vmatmul.mubr.msk.f32.gmra.mrb[28].mxu0 %vm2463_vm3, %v22749_v22  ;;  %v2107_v6 = vmul.f32 0.2, %v1145_v19  ;;  %vm1911_vm8 = vcmp.gt.f32.partialorder %v1145_v19, 0.0 }
 0x48d   :  { %12969 = vmatprep.mubr.msk.f32.mxu0 %vm16571_vm1, %v22562_v63 }
 0x48e   :  { %14187 = vmatmul.mubr.msk.f32.gmra.mrb[30].mxu1 %vm2463_vm3, %v22726_v46  ;;  %v20211_v46 = vsel %vm1909_vm6, %v1135_v18, %v2105_v36  ;;  %v20233_v58 = vsel %vm1911_vm8, %v1145_v19, %v2107_v6  ;;  %v10360_v36 = vld [vmem:[%s22337_s3 + $0x168] sm:$0xff] }
 0x48f   :  { %14189 = vmatprep.mubr.msk.f32.mxu1 %vm16571_vm1, %v22562_v63 }
 0x490   :  { %12970 = vmatmul.mubr.msk.f32.gmra.mrb[30].mxu0 %vm2463_vm3, %v22750_v51 }
 0x491   :  { %12972 = vmatprep.mubr.msk.f32.mxu0 %vm16571_vm1, %v22562_v63 }
 0x492   :  { %14190 = vmatmul.mubr.msk.f32.gmra.mrb[32].mxu1 %vm2463_vm3, %v22728_v14  ;;  %v22758_v14 = vld [vmem:[#allocation42_spill] sm:$0xff] }
 0x493   :  { %14192 = vmatprep.mubr.msk.f32.mxu1 %vm16571_vm1, %v22562_v63  ;;  %v1150_v42 = vadd.f32 %v19487_v43, %v22758_v14  ;;  %v20383_v14 = vld [vmem:[%s22338_s2] ss:$0 sm:$0xff] }
 0x494   :  { %12973 = vmatmul.mubr.msk.f32.gmra.mrb[32].mxu0 %vm2463_vm3, %v22751_v9 }
 0x495   :  { %12975 = vmatprep.mubr.msk.f32.mxu0 %vm16571_vm1, %v22562_v63  ;;  %v2108_v39 = vmul.f32 0.2, %v1150_v42  ;;  %vm1912_vm9 = vcmp.gt.f32.partialorder %v1150_v42, 0.0 }
 0x496   :  { %14193 = vmatmul.mubr.msk.f32.gmra.mrb[34].mxu1 %vm2463_vm3, %v22730_v60  ;;  %v20223_v60 = vsel %vm1910_vm7, %v1140_v29, %v2106_v49  ;;  %v1205_v29 = vadd.f32 %v19487_v43, %v22767_v10  ;;  %v10362_v49 = vld [vmem:[%s22337_s3 + $0x178] sm:$0xff] }
 0x497   :  { %14195 = vmatprep.mubr.msk.f32.mxu1 %vm16571_vm1, %v22562_v63  ;;  %v20245_v11 = vsel %vm1912_vm9, %v1150_v42, %v2108_v39  ;;  %v22768_v42 = vld [vmem:[#allocation59_spill] sm:$0xff] }
 0x498   :  { %12976 = vmatmul.mubr.msk.f32.gmra.mrb[34].mxu0 %vm2463_vm3, %v22752_v56  ;;  %v2119_v6 = vmul.f32 0.2, %v1205_v29  ;;  %v1210_v39 = vadd.f32 %v20383_v14, %v22768_v42  ;;  %vm1923_vm4 = vcmp.gt.f32.partialorder %v1205_v29, 0.0 }
 0x499   :  { %12978 = vmatprep.mubr.msk.f32.mxu0 %vm16571_vm1, %v22562_v63 }
 0x49a   :  { %14196 = vmatmul.mubr.msk.f32.gmra.mrb[36].mxu1 %vm2463_vm3, %v22733_v30  ;;  %v1160_v30 = vadd.f32 %v19487_v43, %v22759_v1  ;;  %v2120_v2 = vmul.f32 0.2, %v1210_v39  ;;  %vm1924_vm5 = vcmp.gt.f32.partialorder %v1210_v39, 0.0 }
 0x49b   :  { %14198 = vmatprep.mubr.msk.f32.mxu1 %vm16571_vm1, %v22562_v63 }
 0x49c   :  { %12979 = vmatmul.mubr.f32.gmra.mrb[36].mxu0 %v22562_v63  ;;  %v2110_v47 = vmul.f32 0.2, %v1160_v30  ;;  %vm1914_vm10 = vcmp.gt.f32.partialorder %v1160_v30, 0.0 }
 0x49d   :  { %12997 = vmatprep.mubr.msk.f32.mxu0 %vm16571_vm1, %v22562_v63 }
 0x49e   :  { %14199 = vmatmul.mubr.f32.gmra.mrb[38].mxu1 %v22562_v63  ;;  %v20265_v48 = vsel %vm1914_vm10, %v1160_v30, %v2110_v47  ;;  %v22769_v30 = vld [vmem:[#allocation58_spill] sm:$0xff]  ;;  %v20400_v47 = vsel %vm1923_vm4, %v1205_v29, %v2119_v6  ;;  %v22781_v6 = vld [vmem:[#allocation76_spill] sm:$0xff] }
 0x49f   :  { %14201 = vmatprep.mubr.msk.f32.mxu1 %vm16571_vm1, %v22562_v63  ;;  %v1215_v61 = vadd.f32 %v20383_v14, %v22769_v30  ;;  %v1270_v42 = vadd.f32 %v20383_v14, %v22781_v6  ;;  %v10780_v30 = vld [vmem:[%s22337_s3 + $0x358] sm:$0xff] }
 0x4a0   :  { %12998 = vmatmul.mubr.f32.vlgmr.msra.gmra.mrb[196].mxu0 %v22562_v63 }
 0x4a1   :  { %13000 = vmatprep.mubr.msk.f32.mxu0 %vm16571_vm1, %v22562_v63  ;;  %vm1925_vm6 = vcmp.gt.f32.partialorder %v1215_v61, 0.0 }
 0x4a2   :  { %14202 = vmatmul.mubr.msk.f32.gmra.mrb[40].mxu1 %vm2463_vm3, %v22735_v37  ;;  %v1170_v37 = vadd.f32 %v19487_v43, %v22761_v62  ;;  %v1220_v62 = vadd.f32 %v20383_v14, %v22770_v27 }
 0x4a3   :  { %14204 = vmatprep.mubr.msk.f32.mxu1 %vm16571_vm1, %v22562_v63 }
 0x4a4   :  { %13001 = vmatmul.mubr.msk.f32.gmra.mrb[198].mxu0 %vm2463_vm3, %v20187_v40  ;;  %vm1916_vm12 = vcmp.gt.f32.partialorder %v1170_v37, 0.0  ;;  %vm1926_vm7 = vcmp.gt.f32.partialorder %v1220_v62, 0.0 }
 0x4a5   :  { %13003 = vmatprep.mubr.msk.f32.mxu0 %vm16571_vm1, %v22562_v63 }
 0x4a6   :  { %14205 = vmatmul.mubr.msk.f32.gmra.mrb[42].mxu1 %vm2463_vm3, %v22736_v21  ;;  %v2112_v21 = vmul.f32 0.2, %v1170_v37 }
 0x4a7   :  { %14207 = vmatprep.mubr.msk.f32.mxu1 %vm16571_vm1, %v22562_v63 }
 0x4a8   :  { %13004 = vmatmul.mubr.msk.f32.gmra.mrb[200].mxu0 %vm2463_vm3, %v20199_v52 }
 0x4a9   :  { %13006 = vmatprep.mubr.msk.f32.mxu0 %vm16571_vm1, %v22562_v63 }
 0x4aa   :  { %14208 = vmatmul.mubr.msk.f32.gmra.mrb[44].mxu1 %vm2463_vm3, %v22737_v45  ;;  %v1180_v45 = vadd.f32 %v19487_v43, %v22763_v34  ;;  %v1235_v34 = vadd.f32 %v20383_v14, %v22772_v15 }
 0x4ab   :  { %14210 = vmatprep.mubr.msk.f32.mxu1 %vm16571_vm1, %v22562_v63 }
 0x4ac   :  { %13007 = vmatmul.mubr.msk.f32.gmra.mrb[202].mxu0 %vm2463_vm3, %v20211_v46  ;;  %v2114_v13 = vmul.f32 0.2, %v1180_v45  ;;  %vm1918_vm14 = vcmp.gt.f32.partialorder %v1180_v45, 0.0  ;;  %vm1929_vm9 = vcmp.gt.f32.partialorder %v1235_v34, 0.0 }
 0x4ad   :  { %13009 = vmatprep.mubr.msk.f32.mxu0 %vm16571_vm1, %v22562_v63 }
 0x4ae   :  { %14211 = vmatmul.mubr.msk.f32.gmra.mrb[46].mxu1 %vm2463_vm3, %v22738_v59  ;;  %v20289_v59 = vsel %vm1916_vm12, %v1170_v37, %v2112_v21  ;;  %v20412_v37 = vsel %vm1924_vm5, %v1210_v39, %v2120_v2  ;;  %v1230_v21 = vadd.f32 %v20383_v14, %v22771_v20  ;;  %v10782_v20 = vld [vmem:[%s22337_s3 + $0x368] sm:$0xff] }
 0x4af   :  { %14213 = vmatprep.mubr.msk.f32.mxu1 %vm16571_vm1, %v22562_v63 }
 0x4b0   :  { %13010 = vmatmul.mubr.msk.f32.gmra.mrb[204].mxu0 %vm2463_vm3, %v20223_v60  ;;  %vm1928_vm8 = vcmp.gt.f32.partialorder %v1230_v21, 0.0 }
 0x4b1   :  { %13012 = vmatprep.mubr.msk.f32.mxu0 %vm16571_vm1, %v22562_v63 }
 0x4b2   :  { %14214 = vmatmul.mubr.msk.f32.gmra.mrb[48].mxu1 %vm2463_vm3, %v22739_v55  ;;  %v22764_v55 = vld [vmem:[#allocation49_spill] sm:$0xff] }
 0x4b3   :  { %14216 = vmatprep.mubr.msk.f32.mxu1 %vm16571_vm1, %v22562_v63 }
 0x4b4   :  { %13013 = vmatmul.mubr.msk.f32.gmra.mrb[206].mxu0 %vm2463_vm3, %v20233_v58 }
 0x4b5   :  { %13015 = vmatprep.mubr.msk.f32.mxu0 %vm16571_vm1, %v22562_v63 }
 0x4b6   :  { %14217 = vmatmul.mubr.msk.f32.gmra.mrb[50].mxu1 %vm2463_vm3, %v22740_v24  ;;  %v1185_v24 = vadd.f32 %v19487_v43, %v22764_v55  ;;  %v2125_v55 = vmul.f32 0.2, %v1235_v34 }
 0x4b7   :  { %14219 = vmatprep.mubr.msk.f32.mxu1 %vm16571_vm1, %v22562_v63 }
 0x4b8   :  { %13016 = vmatmul.mubr.msk.f32.gmra.mrb[208].mxu0 %vm2463_vm3, %v20245_v11  ;;  %v2115_v44 = vmul.f32 0.2, %v1185_v24  ;;  %vm1919_vm0 = vcmp.gt.f32.partialorder %v1185_v24, 0.0 }
 0x4b9   :  { %13018 = vmatprep.mubr.msk.f32.mxu0 %vm16571_vm1, %v22562_v63 }
 0x4ba   :  { %14220 = vmatmul.mubr.f32.gmra.mrb[52].mxu1 %v22562_v63  ;;  %v20329_v31 = vsel %vm1919_vm0, %v1185_v24, %v2115_v44  ;;  %v22774_v24 = vld [vmem:[#allocation67_spill] sm:$0xff]  ;;  %vm1936_vm0 = vcmp.gt.f32.partialorder %v1270_v42, 0.0 }
 0x4bb   :  { %14222 = vmatprep.mubr.msk.f32.mxu1 %vm16571_vm1, %v22562_v63 }
 0x4bc   :  { %13019 = vmatmul.mubr.f32.gmra.mrb[210].mxu0 %v22562_v63 }
 0x4bd   :  { %13021 = vmatprep.mubr.msk.f32.mxu0 %vm16571_vm1, %v22562_v63 }
 0x4be   :  { %14223 = vmatmul.mubr.msk.f32.gmra.mrb[54].mxu1 %vm2463_vm3, %v22741_v0  ;;  %v20311_v0 = vsel %vm1918_vm14, %v1180_v45, %v2114_v13  ;;  %v22773_v45 = vld [vmem:[#allocation104_spill] sm:$0xff]  ;;  %v1240_v13 = vadd.f32 %v20383_v14, %v22774_v24  ;;  %v22784_v24 = vld [vmem:[#allocation78_spill] sm:$0xff] }
 0x4bf   :  { %14225 = vmatprep.mubr.msk.f32.mxu1 %vm16571_vm1, %v22562_v63 }
 0x4c0   :  { %13022 = vmatmul.mubr.msk.f32.gmra.mrb[212].mxu0 %vm2463_vm3, %v20265_v48  ;;  %vm1930_vm10 = vcmp.gt.f32.partialorder %v1240_v13, 0.0 }
 0x4c1   :  { %13024 = vmatprep.mubr.msk.f32.mxu0 %vm16571_vm1, %v22562_v63 }
 0x4c2   :  { %14226 = vmatmul.mubr.msk.f32.gmra.mrb[56].mxu1 %vm2463_vm3, %v22742_v57  ;;  %v10355_v57 = vld [vmem:[%s22337_s3 + $0x140] sm:$0xff] }
 0x4c3   :  { %14228 = vmatprep.mubr.msk.f32.mxu1 %vm16571_vm1, %v22562_v63 }
 0x4c4   :  { %13025 = vmatmul.mubr.msk.f32.gmra.mrb[214].mxu0 %vm2463_vm3, %v20277_v54 }
 0x4c5   :  { %13027 = vmatprep.mubr.msk.f32.mxu0 %vm16571_vm1, %v22562_v63 }
 0x4c6   :  { %14229 = vmatmul.mubr.msk.f32.gmra.mrb[58].mxu1 %vm2463_vm3, %v22743_v8  ;;  %v10356_v8 = vld [vmem:[%s22337_s3 + $0x148] sm:$0xff] }
 0x4c7   :  { %14231 = vmatprep.mubr.msk.f32.mxu1 %vm16571_vm1, %v22562_v63  ;;  %v15002_v3 = vpack.c.bf16 %v10356_v8, %v10355_v57  ;;  %v22775_v57 = vld [vmem:[#allocation105_spill] sm:$0xff]  ;;  %v22776_v8 = vld [vmem:[#allocation66_spill] sm:$0xff] }
 0x4c8   :  { %13028 = vmatmul.mubr.msk.f32.gmra.mrb[216].mxu0 %vm2463_vm3, %v20289_v59 }
 0x4c9   :  { %13030 = vmatprep.mubr.msk.f32.mxu0 %vm16571_vm1, %v22562_v63  ;;  %15003 = vmatpush3.bf16.msra.mxu0 %v15002_v3  ;;  %v20466_v3 = vsel %vm1929_vm9, %v1235_v34, %v2125_v55  ;;  %v22783_v34 = vld [vmem:[#allocation79_spill] sm:$0xff] }
 0x4ca   :  { %14232 = vmatmul.mubr.msk.f32.gmra.mrb[60].mxu1 %vm2463_vm3, %v22744_v28  ;;  %v22765_v28 = vld [vmem:[#allocation52_spill] sm:$0xff]  ;;  %15004 = vmatprep.subr.bf16.mxu0 %v22576_v23 }
 0x4cb   :  { %14234 = vmatprep.mubr.msk.f32.mxu1 %vm16571_vm1, %v22562_v63 }
 0x4cc   :  { %13031 = vmatmul.mubr.msk.f32.gmra.mrb[218].mxu0 %vm2463_vm3, %v20301_v53 }
 0x4cd   :  { %13033 = vmatprep.mubr.msk.f32.mxu0 %vm16571_vm1, %v22562_v63 }
 0x4ce   :  { %14235 = vmatmul.mubr.msk.f32.gmra.mrb[62].mxu1 %vm2463_vm3, %v22745_v33  ;;  %v1195_v33 = vadd.f32 %v19487_v43, %v22765_v28  ;;  %v10361_v43 = vld [vmem:[%s22337_s3 + $0x170] sm:$0xff]  ;;  %v1245_v28 = vadd.f32 %v20383_v14, %v22776_v8 }
 0x4cf   :  { %14237 = vmatprep.mubr.msk.f32.mxu1 %vm16571_vm1, %v22562_v63  ;;  %v15011_v1 = vpack.c.bf16 %v10362_v49, %v10361_v43  ;;  %v10777_v43 = vld [vmem:[%s22337_s3 + $0x340] sm:$0xff]  ;;  %v10778_v49 = vld [vmem:[%s22337_s3 + $0x348] sm:$0xff] }
 0x4d0   :  { %13034 = vmatmul.mubr.msk.f32.gmra.mrb[220].mxu0 %vm2463_vm3, %v20311_v0  ;;  %v2117_v38 = vmul.f32 0.2, %v1195_v33  ;;  %vm1921_vm15 = vcmp.gt.f32.partialorder %v1195_v33, 0.0  ;;  %vm1931_vm11 = vcmp.gt.f32.partialorder %v1245_v28, 0.0  ;;  %v15098_v39 = vpack.c.bf16 %v10778_v49, %v10777_v43 }
 0x4d1   :  { %13036 = vmatprep.mubr.msk.f32.mxu0 %vm16571_vm1, %v22562_v63 }
 0x4d2   :  { %14238 = vmatmul.mubr.msk.f32.gmra.mrb[64].mxu1 %vm2463_vm3, %v22746_v16  ;;  %v10357_v16 = vld [vmem:[%s22337_s3 + $0x150] sm:$0xff]  ;;  %v20363_v19 = vsel %vm1921_vm15, %v1195_v33, %v2117_v38  ;;  %v2126_v33 = vmul.f32 0.2, %v1240_v13  ;;  %v22778_v38 = vld [vmem:[#allocation70_spill] sm:$0xff] }
 0x4d3   :  { %14240 = vmatprep.mubr.msk.f32.mxu1 %vm16571_vm1, %v22562_v63  ;;  %v15005_v18 = vpack.c.bf16 %v10358_v12, %v10357_v16  ;;  %v22777_v16 = vld [vmem:[#allocation106_spill] sm:$0xff]  ;;  %v2127_v12 = vmul.f32 0.2, %v1245_v28  ;;  %v1250_v25 = vadd.f32 %v20383_v14, %v22778_v38 }
 0x4d4   :  { %13037 = vmatmul.mubr.msk.f32.gmra.mrb[222].mxu0 %vm2463_vm3, %v20329_v31 }
 0x4d5   :  { %13039 = vmatprep.mubr.msk.f32.mxu0 %vm16571_vm1, %v22562_v63  ;;  %15006 = vmatpush3.bf16.msra.mxu0 %v15005_v18  ;;  %v22779_v18 = vld [vmem:[#allocation69_spill] sm:$0xff]  ;;  %v20490_v10 = vsel %vm1931_vm11, %v1245_v28, %v2127_v12  ;;  %vm1932_vm12 = vcmp.gt.f32.partialorder %v1250_v25, 0.0 }
 0x4d6   :  { %14241 = vmatmul.mubr.f32.gmra.mrb[66].mxu1 %v22562_v63  ;;  %15007 = vmatprep.subr.bf16.mxu0 %v22576_v23 }
 0x4d7   :  { %14243 = vmatprep.mubr.msk.f32.mxu1 %vm16571_vm1, %v22562_v63 }
 0x4d8   :  { %13040 = vmatmul.mubr.f32.gmra.mrb[224].mxu0 %v22562_v63 }
 0x4d9   :  { %13042 = vmatprep.mubr.msk.f32.mxu0 %vm16571_vm1, %v22562_v63 }
 0x4da   :  { %14244 = vmatmul.mubr.msk.f32.gmra.mrb[68].mxu1 %vm2463_vm3, %v22747_v32  ;;  %v15008_v32 = vpack.c.bf16 %v10360_v36, %v10359_v41  ;;  %v1255_v41 = vadd.f32 %v20383_v14, %v22779_v18  ;;  %v2128_v36 = vmul.f32 0.2, %v1250_v25  ;;  %v10784_v18 = vld [vmem:[%s22337_s3 + $0x378] sm:$0xff] }
 0x4db   :  { %14246 = vmatprep.mubr.msk.f32.mxu1 %vm16571_vm1, %v22562_v63 }
 0x4dc   :  { %13043 = vmatmul.mubr.msk.f32.gmra.mrb[226].mxu0 %vm2463_vm3, %v20363_v19  ;;  %v20500_v29 = vsel %vm1932_vm12, %v1250_v25, %v2128_v36  ;;  %vm1933_vm13 = vcmp.gt.f32.partialorder %v1255_v41, 0.0  ;;  %v10783_v25 = vld [vmem:[%s22337_s3 + $0x370] sm:$0xff] }
 0x4dd   :  { %13045 = vmatprep.mubr.msk.f32.mxu0 %vm16571_vm1, %v22562_v63  ;;  %15009 = vmatpush3.bf16.msra.mxu0 %v15008_v32 }
 0x4de   :  { %14247 = vmatmul.mubr.msk.f32.gmra.mrb[70].mxu1 %vm2463_vm3, %v22748_v35  ;;  %15010 = vmatprep.subr.bf16.mxu0 %v22576_v23  ;;  %v20387_v35 = vsel %vm1922_vm2, %v1200_v50, %v2118_v17  ;;  %v20478_v50 = vsel %vm1930_vm10, %v1240_v13, %v2126_v33  ;;  %v22780_v17 = vld [vmem:[#allocation72_spill] sm:$0xff]  ;;  %v1285_v13 = vadd.f32 %v20383_v14, %v22784_v24  ;;  %v22785_v33 = vld [vmem:[#allocation82_spill] sm:$0xff] }
 0x4df   :  { %14249 = vmatprep.mubr.msk.f32.mxu1 %vm16571_vm1, %v22562_v63  ;;  %v1265_v32 = vadd.f32 %v20383_v14, %v22780_v17 }
 0x4e0   :  { %13046 = vmatmul.mubr.msk.f32.gmra.mrb[228].mxu0 %vm2463_vm3, %v20387_v35  ;;  %v2135_v8 = vmul.f32 0.2, %v1285_v13  ;;  %vm1939_vm4 = vcmp.gt.f32.partialorder %v1285_v13, 0.0 }
 0x4e1   :  { %13048 = vmatprep.mubr.msk.f32.mxu0 %vm16571_vm1, %v22562_v63  ;;  %15012 = vmatpush3.bf16.msra.mxu0 %v15011_v1  ;;  %vm1935_vm14 = vcmp.gt.f32.partialorder %v1265_v32, 0.0  ;;  %v10779_v1 = vld [vmem:[%s22337_s3 + $0x350] sm:$0xff] }
 0x4e2   :  { %14250 = vmatmul.mubr.msk.f32.gmra.mrb[72].mxu1 %vm2463_vm3, %v22749_v22  ;;  %15013 = vmatprep.subr.bf16.mxu0 %v22576_v23  ;;  %v2121_v22 = vmul.f32 0.2, %v1215_v61  ;;  %v20598_v12 = vsel %vm1939_vm4, %v1285_v13, %v2135_v8  ;;  %v22796_v8 = vld [vmem:[#allocation92_spill] sm:$0xff] }
 0x4e3   :  { %14252 = vmatprep.mubr.msk.f32.mxu1 %vm16571_vm1, %v22562_v63 }
 0x4e4   :  { %13049 = vmatmul.mubr.msk.f32.gmra.mrb[230].mxu0 %vm2463_vm3, %v20400_v47  ;;  %v20422_v4 = vsel %vm1925_vm6, %v1215_v61, %v2121_v22  ;;  %v22782_v61 = vld [vmem:[#allocation75_spill] sm:$0xff]  ;;  %v2132_v22 = vmul.f32 0.2, %v1270_v42 }
 0x4e5   :  { %13051 = vmatprep.mubr.msk.f32.mxu0 %vm16571_vm1, %v22562_v63  ;;  %v1275_v2 = vadd.f32 %v20383_v14, %v22782_v61 }
 0x4e6   :  { %14253 = vmatmul.mubr.msk.f32.gmra.mrb[74].mxu1 %vm2463_vm3, %v22750_v51  ;;  %v2122_v51 = vmul.f32 0.2, %v1220_v62  ;;  %v20560_v15 = vsel %vm1936_vm0, %v1270_v42, %v2132_v22  ;;  %v22788_v42 = vld [vmem:[#allocation87_spill] sm:$0xff] }
 0x4e7   :  { %14255 = vmatprep.mubr.msk.f32.mxu1 %vm16571_vm1, %v22562_v63  ;;  %vm1937_vm15 = vcmp.gt.f32.partialorder %v1275_v2, 0.0 }
 0x4e8   :  { %13052 = vmatmul.mubr.msk.f32.gmra.mrb[232].mxu0 %vm2463_vm3, %v20412_v37 }
 0x4e9   :  { %13054 = vmatprep.mubr.msk.f32.mxu0 %vm16571_vm1, %v22562_v63 }
 0x4ea   :  { %14256 = vmatmul.mubr.msk.f32.gmra.mrb[76].mxu1 %vm2463_vm3, %v22751_v9  ;;  %v20434_v9 = vsel %vm1926_vm7, %v1220_v62, %v2122_v51  ;;  %v15101_v62 = vpack.c.bf16 %v10780_v30, %v10779_v1  ;;  %v10781_v51 = vld [vmem:[%s22337_s3 + $0x360] sm:$0xff] }
 0x4eb   :  { %14258 = vmatprep.mubr.msk.f32.mxu1 %vm16571_vm1, %v22562_v63  ;;  %v22789_v30 = vld [vmem:[#allocation86_spill] sm:$0xff] }
 0x4ec   :  { %13055 = vmatmul.mubr.msk.f32.gmra.mrb[234].mxu0 %vm2463_vm3, %v20422_v4  ;;  %v1315_v61 = vadd.f32 %v20383_v14, %v22789_v30 }
 0x4ed   :  { %13057 = vmatprep.mubr.msk.f32.mxu0 %vm16571_vm1, %v22562_v63 }
 0x4ee   :  { %14259 = vmatmul.mubr.msk.f32.gmra.mrb[78].mxu1 %vm2463_vm3, %v22752_v56  ;;  %v2124_v56 = vmul.f32 0.2, %v1230_v21  ;;  %v2141_v22 = vmul.f32 0.2, %v1315_v61  ;;  %vm1945_vm9 = vcmp.gt.f32.partialorder %v1315_v61, 0.0 }
 0x4ef   :  { %14261 = vmatprep.mubr.msk.f32.mxu1 %vm16571_vm1, %v22562_v63 }
 0x4f0   :  { %13058 = vmatmul.mubr.msk.f32.gmra.mrb[236].mxu0 %vm2463_vm3, %v20434_v9  ;;  %v20454_v44 = vsel %vm1928_vm8, %v1230_v21, %v2124_v56  ;;  %v2133_v21 = vmul.f32 0.2, %v1275_v2  ;;  %v1280_v56 = vadd.f32 %v20383_v14, %v22783_v34  ;;  %v22793_v34 = vld [vmem:[#allocation89_spill] sm:$0xff] }
 0x4f1   :  { %13060 = vmatprep.mubr.msk.f32.mxu0 %vm16571_vm1, %v22562_v63 }
 0x4f2   :  { %14262 = vmatmul.mubr.f32.gmra.mrb[80].mxu1 %v22562_v63  ;;  %v20573_v55 = vsel %vm1937_vm15, %v1275_v2, %v2133_v21  ;;  %vm1938_vm2 = vcmp.gt.f32.partialorder %v1280_v56, 0.0  ;;  %v20671_v21 = vsel %vm1945_vm9, %v1315_v61, %v2141_v22 }
 0x4f3   :  { %14264 = vmatprep.mubr.msk.f32.mxu1 %vm16571_vm1, %v22562_v63  ;;  %22792 = vst [vmem:[#allocation128_spill] sm:$0xff] %v20671_v21 }
 0x4f4   :  { %13061 = vmatmul.mubr.f32.gmra.mrb[238].mxu0 %v22562_v63 }
 0x4f5   :  { %13063 = vmatprep.mubr.msk.f32.mxu0 %vm16571_vm1, %v22562_v63 }
 0x4f6   :  { %14265 = vmatmul.mubr.msk.f32.gmra.mrb[82].mxu1 %vm2463_vm3, %v22773_v45  ;;  %v15104_v45 = vpack.c.bf16 %v10782_v20, %v10781_v51  ;;  %v22791_v51 = vld [vmem:[#allocation90_spill] sm:$0xff] }
 0x4f7   :  { %14267 = vmatprep.mubr.msk.f32.mxu1 %vm16571_vm1, %v22562_v63  ;;  %v1320_v20 = vadd.f32 %v20383_v14, %v22791_v51  ;;  %v22805_v51 = vld [vmem:[#allocation102_spill] sm:$0xff] }
 0x4f8   :  { %13064 = vmatmul.mubr.msk.f32.gmra.mrb[240].mxu0 %vm2463_vm3, %v20454_v44 }
 0x4f9   :  { %13066 = vmatprep.mubr.msk.f32.mxu0 %vm16571_vm1, %v22562_v63  ;;  %vm1946_vm10 = vcmp.gt.f32.partialorder %v1320_v20, 0.0 }
 0x4fa   :  { %14268 = vmatmul.mubr.msk.f32.gmra.mrb[84].mxu1 %vm2463_vm3, %v22775_v57  ;;  %v2134_v57 = vmul.f32 0.2, %v1280_v56 }
 0x4fb   :  { %14270 = vmatprep.mubr.msk.f32.mxu1 %vm16571_vm1, %v22562_v63 }
 0x4fc   :  { %13067 = vmatmul.mubr.msk.f32.gmra.mrb[242].mxu0 %vm2463_vm3, %v20466_v3  ;;  %v20586_v28 = vsel %vm1938_vm2, %v1280_v56, %v2134_v57  ;;  %v1325_v56 = vadd.f32 %v20383_v14, %v22793_v34 }
 0x4fd   :  { %13069 = vmatprep.mubr.msk.f32.mxu0 %vm16571_vm1, %v22562_v63 }
 0x4fe   :  { %14271 = vmatmul.mubr.msk.f32.gmra.mrb[86].mxu1 %vm2463_vm3, %v22777_v16  ;;  %v1290_v16 = vadd.f32 %v20383_v14, %v22785_v33  ;;  %v2143_v24 = vmul.f32 0.2, %v1325_v56  ;;  %vm1947_vm11 = vcmp.gt.f32.partialorder %v1325_v56, 0.0  ;;  %v1335_v33 = vadd.f32 %v20383_v14, %v22796_v8 }
 0x4ff   :  { %14273 = vmatprep.mubr.msk.f32.mxu1 %vm16571_vm1, %v22562_v63 }
 0x500   :  { %13070 = vmatmul.mubr.msk.f32.gmra.mrb[244].mxu0 %vm2463_vm3, %v20478_v50  ;;  %v2136_v38 = vmul.f32 0.2, %v1290_v16  ;;  %vm1940_vm5 = vcmp.gt.f32.partialorder %v1290_v16, 0.0  ;;  %v20693_v57 = vsel %vm1947_vm11, %v1325_v56, %v2143_v24  ;;  %vm1949_vm12 = vcmp.gt.f32.partialorder %v1335_v33, 0.0 }
 0x501   :  { %13072 = vmatprep.mubr.msk.f32.mxu0 %vm16571_vm1, %v22562_v63  ;;  %22795 = vst [vmem:[#allocation137_spill] sm:$0xff] %v20693_v57 }
 0x502   :  { %14274 = vmatmul.mubr.msk.f32.gmra.mrb[88].mxu1 %vm2463_vm3, %v19505_v5  ;;  %v2129_v5 = vmul.f32 0.2, %v1255_v41  ;;  %v20614_v36 = vsel %vm1940_vm5, %v1290_v16, %v2136_v38  ;;  %v2145_v16 = vmul.f32 0.2, %v1335_v33  ;;  %v22797_v38 = vld [vmem:[#allocation96_spill] sm:$0xff] }
 0x503   :  { %14276 = vmatprep.mubr.msk.f32.mxu1 %vm16571_vm1, %v22562_v63 }
 0x504   :  { %13073 = vmatmul.mubr.msk.f32.gmra.mrb[246].mxu0 %vm2463_vm3, %v20490_v10 }
 0x505   :  { %13075 = vmatprep.mubr.msk.f32.mxu0 %vm16571_vm1, %v22562_v63 }
 0x506   :  { %14277 = vmatmul.mubr.msk.f32.gmra.mrb[90].mxu1 %vm2463_vm3, %v19515_v7  ;;  %v20512_v7 = vsel %vm1933_vm13, %v1255_v41, %v2129_v5  ;;  %v15107_v41 = vpack.c.bf16 %v10784_v18, %v10783_v25  ;;  %v22786_v5 = vld [vmem:[#allocation85_spill] sm:$0xff]  ;;  %v1340_v25 = vadd.f32 %v20383_v14, %v22797_v38  ;;  %v20713_v18 = vsel %vm1949_vm12, %v1335_v33, %v2145_v16  ;;  %v22809_v16 = vld [vmem:[#allocation6_spill] sm:$0xff] }
 0x507   :  { %14279 = vmatprep.mubr.msk.f32.mxu1 %vm16571_vm1, %v22562_v63  ;;  %v1300_v17 = vadd.f32 %v20383_v14, %v22786_v5  ;;  %22798 = vst [vmem:[#allocation129_spill] sm:$0xff] %v20713_v18  ;;  %v885_v38 = vadd.f32 %v20383_v14, %v22809_v16 }
 0x508   :  { %13076 = vmatmul.mubr.msk.f32.gmra.mrb[248].mxu0 %vm2463_vm3, %v20500_v29  ;;  %vm1950_vm13 = vcmp.gt.f32.partialorder %v1340_v25, 0.0 }
 0x509   :  { %13078 = vmatprep.mubr.msk.f32.mxu0 %vm16571_vm1, %v22562_v63  ;;  %v2138_v49 = vmul.f32 0.2, %v1300_v17  ;;  %vm1942_vm6 = vcmp.gt.f32.partialorder %v1300_v17, 0.0  ;;  %vm1859_vm5 = vcmp.gt.f32.partialorder %v885_v38, 0.0 }
 0x50a   :  { %14280 = vmatmul.mubr.msk.f32.gmra.mrb[92].mxu1 %vm2463_vm3, %v19533_v26  ;;  %v2131_v26 = vmul.f32 0.2, %v1265_v32 }
 0x50b   :  { %14282 = vmatprep.mubr.msk.f32.mxu1 %vm16571_vm1, %v22562_v63  ;;  %v20635_v6 = vsel %vm1942_vm6, %v1300_v17, %v2138_v49  ;;  %v2146_v17 = vmul.f32 0.2, %v1340_v25  ;;  %v22801_v49 = vld [vmem:[#allocation99_spill] sm:$0xff] }
 0x50c   :  { %13079 = vmatmul.mubr.msk.f32.gmra.mrb[250].mxu0 %vm2463_vm3, %v20512_v7  ;;  %v20543_v27 = vsel %vm1935_vm14, %v1265_v32, %v2131_v26  ;;  %v22787_v32 = vld [vmem:[#allocation84_spill] sm:$0xff] }
 0x50d   :  { %13081 = vmatprep.mubr.msk.f32.mxu0 %vm16571_vm1, %v22562_v63  ;;  %v1305_v43 = vadd.f32 %v20383_v14, %v22787_v32 }
 0x50e   :  { %14283 = vmatmul.mubr.f32.gmra.mrb[94].mxu1 %v22562_v63 }
 0x50f   :  { %14301 = vmatprep.mubr.msk.f32.mxu1 %vm16571_vm1, %v22562_v63  ;;  %v2139_v26 = vmul.f32 0.2, %v1305_v43  ;;  %vm1943_vm7 = vcmp.gt.f32.partialorder %v1305_v43, 0.0 }
 0x510   :  { %13082 = vmatmul.mubr.f32.gmra.mrb[252].mxu0 %v22562_v63 }
 0x511   :  { %13084 = vmatprep.mubr.msk.f32.mxu0 %vm16571_vm1, %v22562_v63  ;;  %v20647_v1 = vsel %vm1943_vm7, %v1305_v43, %v2139_v26  ;;  %v20725_v43 = vsel %vm1950_vm13, %v1340_v25, %v2146_v17  ;;  %v1350_v26 = vadd.f32 %v20383_v14, %v22801_v49  ;;  %v22811_v17 = vld [vmem:[#allocation8_spill] sm:$0xff]  ;;  %v22813_v49 = vld [vmem:[#allocation11_spill] sm:$0xff] }
 0x512   :  { %14302 = vmatmul.mubr.f32.vlgmr.msra.gmra.mrb[96].mxu1 %v22562_v63  ;;  %22800 = vst [vmem:[#allocation112_spill] sm:$0xff] %v20725_v43 }
 0x513   :  { %15099 = vmatpush3.bf16.msra.mxu1 %v15098_v39  ;;  %14304 = vmatprep.mubr.msk.f32.mxu1 %vm16571_vm1, %v22562_v63  ;;  %v1310_v39 = vadd.f32 %v20383_v14, %v22788_v42  ;;  %v2148_v61 = vmul.f32 0.2, %v1350_v26  ;;  %vm1952_vm0 = vcmp.gt.f32.partialorder %v1350_v26, 0.0 }
 0x514   :  { %13085 = vmatmul.mubr.msk.f32.gmra.mrb[254].mxu0 %vm2463_vm3, %v20543_v27  ;;  %15100 = vmatprep.subr.bf16.mxu1 %v22576_v23 }
 0x515   :  { %13087 = vmatprep.mubr.msk.f32.mxu0 %vm16571_vm1, %v22562_v63  ;;  %v2140_v2 = vmul.f32 0.2, %v1310_v39  ;;  %vm1944_vm8 = vcmp.gt.f32.partialorder %v1310_v39, 0.0  ;;  %v20749_v22 = vsel %vm1952_vm0, %v1350_v26, %v2148_v61  ;;  %v22814_v26 = vld [vmem:[#allocation9_spill] sm:$0xff] }
 0x516   :  { %14305 = vmatmul.mubr.msk.f32.gmra.mrb[0].mxu1 %vm2463_vm3, %v20265_v48  ;;  %22804 = vst [vmem:[#allocation115_spill] sm:$0xff] %v20749_v22 }
 0x517   :  { %14307 = vmatprep.mubr.msk.f32.mxu1 %vm16571_vm1, %v22562_v63  ;;  %15102 = vmatpush3.bf16.msra.mxu1 %v15101_v62  ;;  %v20659_v62 = vsel %vm1944_vm8, %v1310_v39, %v2140_v2  ;;  %v22803_v39 = vld [vmem:[#allocation98_spill] sm:$0xff] }
 0x518   :  { %13088 = vmatmul.mubr.msk.f32.gmra.mrb[0].mxu0 %vm2463_vm3, %v20560_v15  ;;  %15103 = vmatprep.subr.bf16.mxu1 %v22576_v23  ;;  %22790 = vst [vmem:[#allocation119_spill] sm:$0xff] %v20659_v62  ;;  %v1355_v30 = vadd.f32 %v20383_v14, %v22803_v39  ;;  %v915_v39 = vadd.f32 %v20383_v14, %v22814_v26  ;;  %v10414_v26 = vld [vmem:[%s22337_s3 + $0x190] sm:$0xff] }
 0x519   :  { %13090 = vmatprep.mubr.msk.f32.mxu0 %vm16571_vm1, %v22562_v63 }
 0x51a   :  { %14308 = vmatmul.mubr.msk.f32.gmra.mrb[2].mxu1 %vm2463_vm3, %v20277_v54  ;;  %v2149_v2 = vmul.f32 0.2, %v1355_v30  ;;  %vm1953_vm15 = vcmp.gt.f32.partialorder %v1355_v30, 0.0  ;;  %v2061_v61 = vmul.f32 0.2, %v915_v39  ;;  %vm1865_vm6 = vcmp.gt.f32.partialorder %v915_v39, 0.0 }
 0x51b   :  { %14310 = vmatprep.mubr.msk.f32.mxu1 %vm16571_vm1, %v22562_v63  ;;  %15105 = vmatpush3.bf16.msra.mxu1 %v15104_v45  ;;  %v2142_v45 = vmul.f32 0.2, %v1320_v20 }
 0x51c   :  { %13091 = vmatmul.mubr.msk.f32.gmra.mrb[2].mxu0 %vm2463_vm3, %v20573_v55  ;;  %15106 = vmatprep.subr.bf16.mxu1 %v22576_v23  ;;  %v20761_v34 = vsel %vm1953_vm15, %v1355_v30, %v2149_v2  ;;  %v22815_v30 = vld [vmem:[#allocation12_spill] sm:$0xff]  ;;  %v22816_v2 = vld [vmem:[#allocation13_spill] sm:$0xff] }
 0x51d   :  { %13093 = vmatprep.mubr.msk.f32.mxu0 %vm16571_vm1, %v22562_v63  ;;  %v20683_v13 = vsel %vm1946_vm10, %v1320_v20, %v2142_v45  ;;  %v1360_v20 = vadd.f32 %v20383_v14, %v22805_v51  ;;  %22806 = vst [vmem:[#allocation113_spill] sm:$0xff] %v20761_v34  ;;  %v22807_v45 = vld [vmem:[#allocation7_spill] sm:$0xff]  ;;  %v20843_v51 = vsel %vm1865_vm6, %v915_v39, %v2061_v61  ;;  %v10415_v39 = vld [vmem:[%s22337_s3 + $0x198] sm:$0xff] }
 0x51e   :  { %14311 = vmatmul.mubr.msk.f32.gmra.mrb[4].mxu1 %vm2463_vm3, %v20289_v59  ;;  %22794 = vst [vmem:[#allocation124_spill] sm:$0xff] %v20683_v13  ;;  %v880_v24 = vadd.f32 %v20383_v14, %v22807_v45  ;;  %v22819_v45 = vld [vmem:[#allocation18_spill] sm:$0xff]  ;;  %v15017_v61 = vpack.c.bf16 %v10415_v39, %v10414_v26  ;;  %v22825_v26 = vld [vmem:[#allocation24_spill] sm:$0xff] }
 0x51f   :  { %14313 = vmatprep.mubr.msk.f32.mxu1 %vm16571_vm1, %v22562_v63  ;;  %15108 = vmatpush3.bf16.msra.mxu1 %v15107_v41  ;;  %v22799_v41 = vld [vmem:[#allocation95_spill] sm:$0xff]  ;;  %v2150_v56 = vmul.f32 0.2, %v1360_v20  ;;  %vm1954_vm2 = vcmp.gt.f32.partialorder %v1360_v20, 0.0  ;;  %v22826_v39 = vld [vmem:[#allocation26_spill] sm:$0xff] }
 0x520   :  { %13094 = vmatmul.mubr.msk.f32.gmra.mrb[4].mxu0 %vm2463_vm3, %v20586_v28  ;;  %15109 = vmatprep.subr.bf16.mxu1 %v22576_v23  ;;  %v1345_v5 = vadd.f32 %v20383_v14, %v22799_v41  ;;  %v2054_v33 = vmul.f32 0.2, %v880_v24  ;;  %vm1858_vm4 = vcmp.gt.f32.partialorder %v880_v24, 0.0  ;;  %v2055_v41 = vmul.f32 0.2, %v885_v38 }
 0x521   :  { %13096 = vmatprep.mubr.msk.f32.mxu0 %vm16571_vm1, %v22562_v63  ;;  %v20773_v8 = vsel %vm1954_vm2, %v1360_v20, %v2150_v56  ;;  %v22817_v20 = vld [vmem:[#allocation15_spill] sm:$0xff]  ;;  %v22818_v56 = vld [vmem:[#allocation16_spill] sm:$0xff] }
 0x522   :  { %14314 = vmatmul.mubr.msk.f32.gmra.mrb[6].mxu1 %vm2463_vm3, %v20301_v53  ;;  %v2147_v32 = vmul.f32 0.2, %v1345_v5  ;;  %vm1951_vm14 = vcmp.gt.f32.partialorder %v1345_v5, 0.0  ;;  %22808 = vst [vmem:[#allocation118_spill] sm:$0xff] %v20773_v8  ;;  %v2250_v25 = vsel %vm1858_vm4, %v880_v24, %v2054_v33  ;;  %v22820_v24 = vld [vmem:[#allocation19_spill] sm:$0xff]  ;;  %v22821_v33 = vld [vmem:[#allocation14_spill] sm:$0xff] }
 0x523   :  { %14316 = vmatprep.mubr.msk.f32.mxu1 %vm16571_vm1, %v22562_v63  ;;  %v950_v16 = vadd.f32 %v20383_v14, %v22821_v33  ;;  %v10417_v33 = vld [vmem:[%s22337_s3 + $0x1a8] sm:$0xff] }
 0x524   :  { %13097 = vmatmul.mubr.msk.f32.gmra.mrb[6].mxu0 %vm2463_vm3, %v20598_v12  ;;  %v20737_v42 = vsel %vm1951_vm14, %v1345_v5, %v2147_v32  ;;  %v20791_v5 = vsel %vm1859_vm5, %v885_v38, %v2055_v41  ;;  %v22812_v32 = vld [vmem:[#allocation10_spill] sm:$0xff]  ;;  %v22822_v38 = vld [vmem:[#allocation20_spill] sm:$0xff]  ;;  %v10413_v41 = vld [vmem:[%s22337_s3 + $0x188] sm:$0xff] }
 0x525   :  { %13099 = vmatprep.mubr.msk.f32.mxu0 %vm16571_vm1, %v22562_v63  ;;  %22802 = vst [vmem:[#allocation110_spill] sm:$0xff] %v20737_v42  ;;  %22810 = vst [vmem:[#allocation116_spill] sm:$0xff] %v20791_v5  ;;  %vm1872_vm7 = vcmp.gt.f32.partialorder %v950_v16, 0.0 }
 0x526   :  { %14317 = vmatmul.mubr.msk.f32.gmra.mrb[8].mxu1 %vm2463_vm3, %v20311_v0 }
 0x527   :  { %14319 = vmatprep.mubr.msk.f32.mxu1 %vm16571_vm1, %v22562_v63 }
 0x528   :  { %13100 = vmatmul.mubr.msk.f32.gmra.mrb[8].mxu0 %vm2463_vm3, %v20614_v36 }
 0x529   :  { %13102 = vmatprep.mubr.msk.f32.mxu0 %vm16571_vm1, %v22562_v63 }
 0x52a   :  { %14320 = vmatmul.mubr.msk.f32.gmra.mrb[10].mxu1 %vm2463_vm3, %v20329_v31 }
 0x52b   :  { %14322 = vmatprep.mubr.msk.f32.mxu1 %vm16571_vm1, %v22562_v63 }
 0x52c   :  { %13103 = vmatmul.mubr.f32.gmra.mrb[10].mxu0 %v22562_v63 }
 0x52d   :  { %13105 = vmatprep.mubr.msk.f32.mxu0 %vm16571_vm1, %v22562_v63 }
 0x52e   :  { %14323 = vmatmul.mubr.f32.gmra.mrb[12].mxu1 %v22562_v63 }
 0x52f   :  { %14325 = vmatprep.mubr.msk.f32.mxu1 %vm16571_vm1, %v22562_v63 }
 0x530   :  { %13106 = vmatmul.mubr.msk.f32.gmra.mrb[12].mxu0 %vm2463_vm3, %v20635_v6 }
 0x531   :  { %13108 = vmatprep.mubr.msk.f32.mxu0 %vm16571_vm1, %v22562_v63 }
 0x532   :  { %14326 = vmatmul.mubr.msk.f32.gmra.mrb[14].mxu1 %vm2463_vm3, %v20363_v19 }
 0x533   :  { %14328 = vmatprep.mubr.msk.f32.mxu1 %vm16571_vm1, %v22562_v63 }
 0x534   :  { %13109 = vmatmul.mubr.msk.f32.gmra.mrb[14].mxu0 %vm2463_vm3, %v20647_v1 }
 0x535   :  { %13111 = vmatprep.mubr.msk.f32.mxu0 %vm16571_vm1, %v22562_v63 }
 0x536   :  { %14329 = vmatmul.mubr.msk.f32.gmra.mrb[16].mxu1 %vm2463_vm3, %v20387_v35 }
 0x537   :  { %14331 = vmatprep.mubr.msk.f32.mxu1 %vm16571_vm1, %v22562_v63 }
 0x538   :  { %13112 = vmatmul.mubr.msk.f32.gmra.mrb[16].mxu0 %vm2463_vm3, %v20659_v62 }
 0x539   :  { %13114 = vmatprep.mubr.msk.f32.mxu0 %vm16571_vm1, %v22562_v63 }
 0x53a   :  { %14332 = vmatmul.mubr.msk.f32.gmra.mrb[18].mxu1 %vm2463_vm3, %v20400_v47 }
 0x53b   :  { %14334 = vmatprep.mubr.msk.f32.mxu1 %vm16571_vm1, %v22562_v63 }
 0x53c   :  { %13115 = vmatmul.mubr.msk.f32.gmra.mrb[18].mxu0 %vm2463_vm3, %v20671_v21 }
 0x53d   :  { %13117 = vmatprep.mubr.msk.f32.mxu0 %vm16571_vm1, %v22562_v63 }
 0x53e   :  { %14335 = vmatmul.mubr.msk.f32.gmra.mrb[20].mxu1 %vm2463_vm3, %v20412_v37 }
 0x53f   :  { %14337 = vmatprep.mubr.msk.f32.mxu1 %vm16571_vm1, %v22562_v63 }
 0x540   :  { %13118 = vmatmul.mubr.msk.f32.gmra.mrb[20].mxu0 %vm2463_vm3, %v20683_v13 }
 0x541   :  { %13120 = vmatprep.mubr.msk.f32.mxu0 %vm16571_vm1, %v22562_v63 }
 0x542   :  { %14338 = vmatmul.mubr.msk.f32.gmra.mrb[22].mxu1 %vm2463_vm3, %v20422_v4 }
 0x543   :  { %14340 = vmatprep.mubr.msk.f32.mxu1 %vm16571_vm1, %v22562_v63 }
 0x544   :  { %13121 = vmatmul.mubr.msk.f32.gmra.mrb[22].mxu0 %vm2463_vm3, %v20693_v57 }
 0x545   :  { %13123 = vmatprep.mubr.msk.f32.mxu0 %vm16571_vm1, %v22562_v63 }
 0x546   :  { %14341 = vmatmul.mubr.msk.f32.gmra.mrb[24].mxu1 %vm2463_vm3, %v20434_v9 }
 0x547   :  { %14343 = vmatprep.mubr.msk.f32.mxu1 %vm16571_vm1, %v22562_v63 }
 0x548   :  { %13124 = vmatmul.mubr.f32.gmra.mrb[24].mxu0 %v22562_v63 }
 0x549   :  { %13126 = vmatprep.mubr.msk.f32.mxu0 %vm16571_vm1, %v22562_v63 }
 0x54a   :  { %14344 = vmatmul.mubr.f32.gmra.mrb[26].mxu1 %v22562_v63 }
 0x54b   :  { %14346 = vmatprep.mubr.msk.f32.mxu1 %vm16571_vm1, %v22562_v63 }
 0x54c   :  { %13127 = vmatmul.mubr.msk.f32.gmra.mrb[26].mxu0 %vm2463_vm3, %v20713_v18 }
 0x54d   :  { %13129 = vmatprep.mubr.msk.f32.mxu0 %vm16571_vm1, %v22562_v63 }
 0x54e   :  { %14347 = vmatmul.mubr.msk.f32.gmra.mrb[28].mxu1 %vm2463_vm3, %v20454_v44 }
 0x54f   :  { %14349 = vmatprep.mubr.msk.f32.mxu1 %vm16571_vm1, %v22562_v63 }
 0x550   :  { %13130 = vmatmul.mubr.msk.f32.gmra.mrb[28].mxu0 %vm2463_vm3, %v20725_v43 }
 0x551   :  { %13132 = vmatprep.mubr.msk.f32.mxu0 %vm16571_vm1, %v22562_v63 }
 0x552   :  { %14350 = vmatmul.mubr.msk.f32.gmra.mrb[30].mxu1 %vm2463_vm3, %v20466_v3 }
 0x553   :  { %14352 = vmatprep.mubr.msk.f32.mxu1 %vm16571_vm1, %v22562_v63 }
 0x554   :  { %13133 = vmatmul.mubr.msk.f32.gmra.mrb[30].mxu0 %vm2463_vm3, %v20737_v42 }
 0x555   :  { %13135 = vmatprep.mubr.msk.f32.mxu0 %vm16571_vm1, %v22562_v63 }
 0x556   :  { %14353 = vmatmul.mubr.msk.f32.gmra.mrb[32].mxu1 %vm2463_vm3, %v20478_v50 }
 0x557   :  { %14355 = vmatprep.mubr.msk.f32.mxu1 %vm16571_vm1, %v22562_v63 }
 0x558   :  { %13136 = vmatmul.mubr.msk.f32.gmra.mrb[32].mxu0 %vm2463_vm3, %v20749_v22 }
 0x559   :  { %13138 = vmatprep.mubr.msk.f32.mxu0 %vm16571_vm1, %v22562_v63 }
 0x55a   :  { %14356 = vmatmul.mubr.msk.f32.gmra.mrb[34].mxu1 %vm2463_vm3, %v20490_v10 }
 0x55b   :  { %14358 = vmatprep.mubr.msk.f32.mxu1 %vm16571_vm1, %v22562_v63 }
 0x55c   :  { %13139 = vmatmul.mubr.msk.f32.gmra.mrb[34].mxu0 %vm2463_vm3, %v20761_v34 }
 0x55d   :  { %13141 = vmatprep.mubr.msk.f32.mxu0 %vm16571_vm1, %v22562_v63 }
 0x55e   :  { %14359 = vmatmul.mubr.msk.f32.gmra.mrb[36].mxu1 %vm2463_vm3, %v20500_v29 }
 0x55f   :  { %14361 = vmatprep.mubr.msk.f32.mxu1 %vm16571_vm1, %v22562_v63 }
 0x560   :  { %13142 = vmatmul.mubr.msk.f32.gmra.mrb[36].mxu0 %vm2463_vm3, %v20773_v8 }
 0x561   :  { %13160 = vmatprep.mubr.msk.f32.mxu0 %vm16571_vm1, %v22562_v63 }
 0x562   :  { %14362 = vmatmul.mubr.msk.f32.gmra.mrb[38].mxu1 %vm2463_vm3, %v20512_v7 }
 0x563   :  { %14364 = vmatprep.mubr.msk.f32.mxu1 %vm16571_vm1, %v22562_v63 }
 0x564   :  { %13161 = vmatmul.mubr.msk.f32.vlgmr.msra.gmra.mrb[196].mxu0 %vm2463_vm3, %v2250_v25  ;;  %v10412_v25 = vld [vmem:[%s22337_s3 + $0x180] sm:$0xff] }
 0x565   :  { %13163 = vmatprep.mubr.msk.f32.mxu0 %vm16571_vm1, %v22562_v63 }
 0x566   :  { %14365 = vmatmul.mubr.f32.gmra.mrb[40].mxu1 %v22562_v63 }
 0x567   :  { %14367 = vmatprep.mubr.msk.f32.mxu1 %vm16571_vm1, %v22562_v63 }
 0x568   :  { %13164 = vmatmul.mubr.msk.f32.gmra.mrb[198].mxu0 %vm2463_vm3, %v20791_v5  ;;  %v22834_v5 = vld [vmem:[#allocation37_spill] sm:$0xff] }
 0x569   :  { %13166 = vmatprep.mubr.msk.f32.mxu0 %vm16571_vm1, %v22562_v63 }
 0x56a   :  { %14368 = vmatmul.mubr.msk.f32.gmra.mrb[42].mxu1 %vm2463_vm3, %v20543_v27 }
 0x56b   :  { %14370 = vmatprep.mubr.msk.f32.mxu1 %vm16571_vm1, %v22562_v63 }
 0x56c   :  { %13167 = vmatmul.mubr.msk.f32.gmra.mrb[200].mxu0 %vm2463_vm3, %v22811_v17  ;;  %v2068_v17 = vmul.f32 0.2, %v950_v16 }
 0x56d   :  { %13169 = vmatprep.mubr.msk.f32.mxu0 %vm16571_vm1, %v22562_v63 }
 0x56e   :  { %14371 = vmatmul.mubr.msk.f32.gmra.mrb[44].mxu1 %vm2463_vm3, %v20560_v15 }
 0x56f   :  { %14373 = vmatprep.mubr.msk.f32.mxu1 %vm16571_vm1, %v22562_v63 }
 0x570   :  { %13170 = vmatmul.mubr.msk.f32.gmra.mrb[202].mxu0 %vm2463_vm3, %v22812_v32  ;;  %v15014_v32 = vpack.c.bf16 %v10413_v41, %v10412_v25  ;;  %v22824_v25 = vld [vmem:[#allocation23_spill] sm:$0xff]  ;;  %v10418_v41 = vld [vmem:[%s22337_s3 + $0x1b0] sm:$0xff] }
 0x571   :  { %13172 = vmatprep.mubr.msk.f32.mxu0 %vm16571_vm1, %v22562_v63 }
 0x572   :  { %14374 = vmatmul.mubr.msk.f32.gmra.mrb[46].mxu1 %vm2463_vm3, %v20573_v55  ;;  %15015 = vmatpush3.bf16.msra.mxu0 %v15014_v32 }
 0x573   :  { %14376 = vmatprep.mubr.msk.f32.mxu1 %vm16571_vm1, %v22562_v63  ;;  %15016 = vmatprep.subr.bf16.mxu0 %v22576_v23 }
 0x574   :  { %13173 = vmatmul.mubr.msk.f32.gmra.mrb[204].mxu0 %vm2463_vm3, %v22813_v49  ;;  %v22823_v49 = vld [vmem:[#allocation21_spill] sm:$0xff] }
 0x575   :  { %13175 = vmatprep.mubr.msk.f32.mxu0 %vm16571_vm1, %v22562_v63 }
 0x576   :  { %14377 = vmatmul.mubr.msk.f32.gmra.mrb[48].mxu1 %vm2463_vm3, %v20586_v28  ;;  %15018 = vmatpush3.bf16.msra.mxu0 %v15017_v61  ;;  %v22827_v61 = vld [vmem:[#allocation27_spill] sm:$0xff] }
 0x577   :  { %14379 = vmatprep.mubr.msk.f32.mxu1 %vm16571_vm1, %v22562_v63  ;;  %15019 = vmatprep.subr.bf16.mxu0 %v22576_v23 }
 0x578   :  { %13176 = vmatmul.mubr.msk.f32.gmra.mrb[206].mxu0 %vm2463_vm3, %v22815_v30  ;;  %v20915_v30 = vsel %vm1872_vm7, %v950_v16, %v2068_v17  ;;  %v10419_v17 = vld [vmem:[%s22337_s3 + $0x1b8] sm:$0xff] }
 0x579   :  { %13178 = vmatprep.mubr.msk.f32.mxu0 %vm16571_vm1, %v22562_v63  ;;  %v15023_v32 = vpack.c.bf16 %v10419_v17, %v10418_v41  ;;  %v22830_v17 = vld [vmem:[#allocation29_spill] sm:$0xff] }
 0x57a   :  { %14380 = vmatmul.mubr.msk.f32.gmra.mrb[50].mxu1 %vm2463_vm3, %v20598_v12 }
 0x57b   :  { %14382 = vmatprep.mubr.msk.f32.mxu1 %vm16571_vm1, %v22562_v63 }
 0x57c   :  { %13179 = vmatmul.mubr.msk.f32.gmra.mrb[208].mxu0 %vm2463_vm3, %v22816_v2  ;;  %v10416_v2 = vld [vmem:[%s22337_s3 + $0x1a0] sm:$0xff] }
 0x57d   :  { %13181 = vmatprep.mubr.msk.f32.mxu0 %vm16571_vm1, %v22562_v63  ;;  %v15020_v16 = vpack.c.bf16 %v10417_v33, %v10416_v2  ;;  %v22828_v2 = vld [vmem:[#allocation17_spill] sm:$0xff] }
 0x57e   :  { %14383 = vmatmul.mubr.msk.f32.gmra.mrb[52].mxu1 %vm2463_vm3, %v20614_v36  ;;  %v985_v33 = vadd.f32 %v20383_v14, %v22828_v2  ;;  %v22831_v2 = vld [vmem:[#allocation31_spill] sm:$0xff] }
 0x57f   :  { %14385 = vmatprep.mubr.msk.f32.mxu1 %vm16571_vm1, %v22562_v63  ;;  %15021 = vmatpush3.bf16.msra.mxu0 %v15020_v16  ;;  %v22829_v16 = vld [vmem:[#allocation28_spill] sm:$0xff] }
 0x580   :  { %13182 = vmatmul.mubr.msk.f32.gmra.mrb[210].mxu0 %vm2463_vm3, %v20843_v51  ;;  %15022 = vmatprep.subr.bf16.mxu0 %v22576_v23  ;;  %v2075_v41 = vmul.f32 0.2, %v985_v33  ;;  %vm1879_vm8 = vcmp.gt.f32.partialorder %v985_v33, 0.0 }
 0x581   :  { %13184 = vmatprep.mubr.msk.f32.mxu0 %vm16571_vm1, %v22562_v63 }
 0x582   :  { %14386 = vmatmul.mubr.f32.gmra.mrb[54].mxu1 %v22562_v63 }
 0x583   :  { %14388 = vmatprep.mubr.msk.f32.mxu1 %vm16571_vm1, %v22562_v63  ;;  %15024 = vmatpush3.bf16.msra.mxu0 %v15023_v32  ;;  %v20989_v32 = vsel %vm1879_vm8, %v985_v33, %v2075_v41  ;;  %v22832_v33 = vld [vmem:[#allocation32_spill] sm:$0xff]  ;;  %v22833_v41 = vld [vmem:[#allocation34_spill] sm:$0xff] }
 0x584   :  { %13185 = vmatmul.mubr.msk.f32.gmra.mrb[212].mxu0 %vm2463_vm3, %v22817_v20  ;;  %15025 = vmatprep.subr.bf16.mxu0 %v22576_v23 }
 0x585   :  { %13187 = vmatprep.mubr.msk.f32.mxu0 %vm16571_vm1, %v22562_v63 }
 0x586   :  { %14389 = vmatmul.mubr.msk.f32.gmra.mrb[56].mxu1 %vm2463_vm3, %v20635_v6 }
 0x587   :  { %14391 = vmatprep.mubr.msk.f32.mxu1 %vm16571_vm1, %v22562_v63 }
 0x588   :  { %13188 = vmatmul.mubr.msk.f32.gmra.mrb[214].mxu0 %vm2463_vm3, %v22818_v56 }
 0x589   :  { %13190 = vmatprep.mubr.msk.f32.mxu0 %vm16571_vm1, %v22562_v63 }
 0x58a   :  { %14392 = vmatmul.mubr.msk.f32.gmra.mrb[58].mxu1 %vm2463_vm3, %v20647_v1 }
 0x58b   :  { %14394 = vmatprep.mubr.msk.f32.mxu1 %vm16571_vm1, %v22562_v63 }
 0x58c   :  { %13191 = vmatmul.mubr.msk.f32.gmra.mrb[216].mxu0 %vm2463_vm3, %v22819_v45 }
 0x58d   :  { %13193 = vmatprep.mubr.msk.f32.mxu0 %vm16571_vm1, %v22562_v63 }
 0x58e   :  { %14395 = vmatmul.mubr.msk.f32.gmra.mrb[60].mxu1 %vm2463_vm3, %v20659_v62  ;;  %v10830_v62 = vld [vmem:[%s22337_s3 + $0x398] sm:$0xff] }
 0x58f   :  { %14397 = vmatprep.mubr.msk.f32.mxu1 %vm16571_vm1, %v22562_v63 }
 0x590   :  { %13194 = vmatmul.mubr.msk.f32.gmra.mrb[218].mxu0 %vm2463_vm3, %v22820_v24 }
 0x591   :  { %13196 = vmatprep.mubr.msk.f32.mxu0 %vm16571_vm1, %v22562_v63 }
 0x592   :  { %14398 = vmatmul.mubr.msk.f32.gmra.mrb[62].mxu1 %vm2463_vm3, %v20671_v21  ;;  %v10829_v21 = vld [vmem:[%s22337_s3 + $0x390] sm:$0xff] }
 0x593   :  { %14400 = vmatprep.mubr.msk.f32.mxu1 %vm16571_vm1, %v22562_v63 }
 0x594   :  { %13197 = vmatmul.mubr.msk.f32.gmra.mrb[220].mxu0 %vm2463_vm3, %v22822_v38 }
 0x595   :  { %13199 = vmatprep.mubr.msk.f32.mxu0 %vm16571_vm1, %v22562_v63 }
 0x596   :  { %14401 = vmatmul.mubr.msk.f32.gmra.mrb[64].mxu1 %vm2463_vm3, %v20683_v13 }
 0x597   :  { %14403 = vmatprep.mubr.msk.f32.mxu1 %vm16571_vm1, %v22562_v63 }
 0x598   :  { %13200 = vmatmul.mubr.msk.f32.gmra.mrb[222].mxu0 %vm2463_vm3, %v22823_v49 }
 0x599   :  { %13202 = vmatprep.mubr.msk.f32.mxu0 %vm16571_vm1, %v22562_v63 }
 0x59a   :  { %14404 = vmatmul.mubr.msk.f32.gmra.mrb[66].mxu1 %vm2463_vm3, %v20693_v57 }
 0x59b   :  { %14406 = vmatprep.mubr.msk.f32.mxu1 %vm16571_vm1, %v22562_v63 }
 0x59c   :  { %13203 = vmatmul.mubr.msk.f32.gmra.mrb[224].mxu0 %vm2463_vm3, %v20915_v30 }
 0x59d   :  { %13205 = vmatprep.mubr.msk.f32.mxu0 %vm16571_vm1, %v22562_v63 }
 0x59e   :  { %14407 = vmatmul.mubr.f32.gmra.mrb[68].mxu1 %v22562_v63 }
 0x59f   :  { %14409 = vmatprep.mubr.msk.f32.mxu1 %vm16571_vm1, %v22562_v63 }
 0x5a0   :  { %13206 = vmatmul.mubr.msk.f32.gmra.mrb[226].mxu0 %vm2463_vm3, %v22824_v25 }
 0x5a1   :  { %13208 = vmatprep.mubr.msk.f32.mxu0 %vm16571_vm1, %v22562_v63 }
 0x5a2   :  { %14410 = vmatmul.mubr.msk.f32.gmra.mrb[70].mxu1 %vm2463_vm3, %v20713_v18  ;;  %v10828_v18 = vld [vmem:[%s22337_s3 + $0x388] sm:$0xff] }
 0x5a3   :  { %14412 = vmatprep.mubr.msk.f32.mxu1 %vm16571_vm1, %v22562_v63 }
 0x5a4   :  { %13209 = vmatmul.mubr.msk.f32.gmra.mrb[228].mxu0 %vm2463_vm3, %v22825_v26 }
 0x5a5   :  { %13211 = vmatprep.mubr.msk.f32.mxu0 %vm16571_vm1, %v22562_v63 }
 0x5a6   :  { %14413 = vmatmul.mubr.msk.f32.gmra.mrb[72].mxu1 %vm2463_vm3, %v20725_v43  ;;  %v22837_v43 = vld [vmem:[#allocation43_spill] sm:$0xff] }
 0x5a7   :  { %14415 = vmatprep.mubr.msk.f32.mxu1 %vm16571_vm1, %v22562_v63 }
 0x5a8   :  { %13212 = vmatmul.mubr.msk.f32.gmra.mrb[230].mxu0 %vm2463_vm3, %v22826_v39 }
 0x5a9   :  { %13214 = vmatprep.mubr.msk.f32.mxu0 %vm16571_vm1, %v22562_v63 }
 0x5aa   :  { %14416 = vmatmul.mubr.msk.f32.gmra.mrb[74].mxu1 %vm2463_vm3, %v20737_v42 }
 0x5ab   :  { %14418 = vmatprep.mubr.msk.f32.mxu1 %vm16571_vm1, %v22562_v63 }
 0x5ac   :  { %13215 = vmatmul.mubr.msk.f32.gmra.mrb[232].mxu0 %vm2463_vm3, %v22827_v61 }
 0x5ad   :  { %13217 = vmatprep.mubr.msk.f32.mxu0 %vm16571_vm1, %v22562_v63 }
 0x5ae   :  { %14419 = vmatmul.mubr.msk.f32.gmra.mrb[76].mxu1 %vm2463_vm3, %v20749_v22  ;;  %v22836_v22 = vld [vmem:[#allocation40_spill] sm:$0xff] }
 0x5af   :  { %14421 = vmatprep.mubr.msk.f32.mxu1 %vm16571_vm1, %v22562_v63 }
 0x5b0   :  { %13218 = vmatmul.mubr.msk.f32.gmra.mrb[234].mxu0 %vm2463_vm3, %v22829_v16 }
 0x5b1   :  { %13220 = vmatprep.mubr.msk.f32.mxu0 %vm16571_vm1, %v22562_v63 }
 0x5b2   :  { %14422 = vmatmul.mubr.msk.f32.gmra.mrb[78].mxu1 %vm2463_vm3, %v20761_v34 }
 0x5b3   :  { %14424 = vmatprep.mubr.msk.f32.mxu1 %vm16571_vm1, %v22562_v63 }
 0x5b4   :  { %13221 = vmatmul.mubr.msk.f32.gmra.mrb[236].mxu0 %vm2463_vm3, %v22830_v17 }
 0x5b5   :  { %13223 = vmatprep.mubr.msk.f32.mxu0 %vm16571_vm1, %v22562_v63 }
 0x5b6   :  { %14425 = vmatmul.mubr.msk.f32.gmra.mrb[80].mxu1 %vm2463_vm3, %v20773_v8  ;;  %v22835_v8 = vld [vmem:[#allocation22_spill] sm:$0xff] }
 0x5b7   :  { %14427 = vmatprep.mubr.msk.f32.mxu1 %vm16571_vm1, %v22562_v63  ;;  %v1020_v34 = vadd.f32 %v20383_v14, %v22835_v8  ;;  %v10827_v8 = vld [vmem:[%s22337_s3 + $0x380] sm:$0xff] }
 0x5b8   :  { %13224 = vmatmul.mubr.msk.f32.gmra.mrb[238].mxu0 %vm2463_vm3, %v20989_v32  ;;  %v15110_v13 = vpack.c.bf16 %v10828_v18, %v10827_v8  ;;  %v15113_v18 = vpack.c.bf16 %v10830_v62, %v10829_v21  ;;  %v10832_v8 = vld [vmem:[%s22337_s3 + $0x3a8] sm:$0xff] }
 0x5b9   :  { %13226 = vmatprep.mubr.msk.f32.mxu0 %vm16571_vm1, %v22562_v63  ;;  %v2082_v42 = vmul.f32 0.2, %v1020_v34  ;;  %vm1886_vm9 = vcmp.gt.f32.partialorder %v1020_v34, 0.0  ;;  %v22839_v21 = vld [vmem:[#allocation51_spill] sm:$0xff] }
 0x5ba   :  { %14428 = vmatmul.mubr.f32.gmra.mrb[82].mxu1 %v22562_v63 }
 0x5bb   :  { %14430 = vmatprep.mubr.msk.f32.mxu1 %vm16571_vm1, %v22562_v63  ;;  %v21048_v57 = vsel %vm1886_vm9, %v1020_v34, %v2082_v42  ;;  %v22838_v42 = vld [vmem:[#allocation48_spill] sm:$0xff]  ;;  %v10831_v34 = vld [vmem:[%s22337_s3 + $0x3a0] sm:$0xff] }
 0x5bc   :  { %13227 = vmatmul.mubr.msk.f32.gmra.mrb[240].mxu0 %vm2463_vm3, %v22831_v2  ;;  %v15116_v62 = vpack.c.bf16 %v10832_v8, %v10831_v34  ;;  %v22843_v8 = vld [vmem:[#allocation60_spill] sm:$0xff] }
 0x5bd   :  { %13229 = vmatprep.mubr.msk.f32.mxu0 %vm16571_vm1, %v22562_v63 }
 0x5be   :  { %14431 = vmatmul.mubr.f32.gmra.mrb[84].mxu1 %v22562_v63 }
 0x5bf   :  { %14433 = vmatprep.mubr.msk.f32.mxu1 %vm16571_vm1, %v22562_v63 }
 0x5c0   :  { %13230 = vmatmul.mubr.msk.f32.gmra.mrb[242].mxu0 %vm2463_vm3, %v22832_v33 }
 0x5c1   :  { %13232 = vmatprep.mubr.msk.f32.mxu0 %vm16571_vm1, %v22562_v63 }
 0x5c2   :  { %14434 = vmatmul.mubr.f32.gmra.mrb[86].mxu1 %v22562_v63 }
 0x5c3   :  { %14436 = vmatprep.mubr.msk.f32.mxu1 %vm16571_vm1, %v22562_v63 }
 0x5c4   :  { %13233 = vmatmul.mubr.msk.f32.gmra.mrb[244].mxu0 %vm2463_vm3, %v22833_v41 }
 0x5c5   :  { %13235 = vmatprep.mubr.msk.f32.mxu0 %vm16571_vm1, %v22562_v63 }
 0x5c6   :  { %14437 = vmatmul.mubr.f32.gmra.mrb[88].mxu1 %v22562_v63 }
 0x5c7   :  { %14439 = vmatprep.mubr.msk.f32.mxu1 %vm16571_vm1, %v22562_v63 }
 0x5c8   :  { %13236 = vmatmul.mubr.msk.f32.gmra.mrb[246].mxu0 %vm2463_vm3, %v22834_v5 }
 0x5c9   :  { %13238 = vmatprep.mubr.msk.f32.mxu0 %vm16571_vm1, %v22562_v63 }
 0x5ca   :  { %14440 = vmatmul.mubr.f32.gmra.mrb[90].mxu1 %v22562_v63 }
 0x5cb   :  { %14442 = vmatprep.mubr.msk.f32.mxu1 %vm16571_vm1, %v22562_v63 }
 0x5cc   :  { %13239 = vmatmul.mubr.msk.f32.gmra.mrb[248].mxu0 %vm2463_vm3, %v22836_v22 }
 0x5cd   :  { %13241 = vmatprep.mubr.msk.f32.mxu0 %vm16571_vm1, %v22562_v63 }
 0x5ce   :  { %14443 = vmatmul.mubr.f32.gmra.mrb[92].mxu1 %v22562_v63 }
 0x5cf   :  { %14445 = vmatprep.mubr.msk.f32.mxu1 %vm16571_vm1, %v22562_v63 }
 0x5d0   :  { %13242 = vmatmul.mubr.msk.f32.gmra.mrb[250].mxu0 %vm2463_vm3, %v22837_v43 }
 0x5d1   :  { %13244 = vmatprep.mubr.msk.f32.mxu0 %vm16571_vm1, %v22562_v63 }
 0x5d2   :  { %14446 = vmatmul.mubr.f32.gmra.mrb[94].mxu1 %v22562_v63 }
 0x5d3   :  { %14464 = vmatprep.mubr.msk.f32.mxu1 %vm16571_vm1, %v22562_v63 }
 0x5d4   :  { %13245 = vmatmul.mubr.msk.f32.gmra.mrb[252].mxu0 %vm2463_vm3, %v21048_v57 }
 0x5d5   :  { %13247 = vmatprep.mubr.msk.f32.mxu0 %vm16571_vm1, %v22562_v63 }
 0x5d6   :  { %14465 = vmatmul.mubr.msk.f32.vlgmr.msra.gmra.mrb[96].mxu1 %vm2463_vm3, %v20843_v51  ;;  %v22841_v51 = vld [vmem:[#allocation57_spill] sm:$0xff] }
 0x5d7   :  { %15111 = vmatpush3.bf16.msra.mxu1 %v15110_v13  ;;  %14467 = vmatprep.mubr.msk.f32.mxu1 %vm16571_vm1, %v22562_v63  ;;  %v22840_v13 = vld [vmem:[#allocation54_spill] sm:$0xff] }
 0x5d8   :  { %13248 = vmatmul.mubr.msk.f32.gmra.mrb[254].mxu0 %vm2463_vm3, %v22838_v42  ;;  %15112 = vmatprep.subr.bf16.mxu1 %v22576_v23 }
 0x5d9   :  { %13250 = vmatprep.mubr.msk.f32.mxu0 %vm16571_vm1, %v22562_v63 }
 0x5da   :  { %14468 = vmatmul.mubr.msk.f32.gmra.mrb[0].mxu1 %vm2463_vm3, %v22817_v20 }
 0x5db   :  { %14470 = vmatprep.mubr.msk.f32.mxu1 %vm16571_vm1, %v22562_v63  ;;  %15114 = vmatpush3.bf16.msra.mxu1 %v15113_v18  ;;  %v22842_v18 = vld [vmem:[#allocation25_spill] sm:$0xff] }
 0x5dc   :  { %13251 = vmatmul.mubr.msk.f32.gmra.mrb[0].mxu0 %vm2463_vm3, %v22839_v21  ;;  %15115 = vmatprep.subr.bf16.mxu1 %v22576_v23  ;;  %v1055_v34 = vadd.f32 %v20383_v14, %v22842_v18 }
 0x5dd   :  { %13253 = vmatprep.mubr.msk.f32.mxu0 %vm16571_vm1, %v22562_v63 }
 0x5de   :  { %14471 = vmatmul.mubr.msk.f32.gmra.mrb[2].mxu1 %vm2463_vm3, %v22818_v56  ;;  %v2089_v18 = vmul.f32 0.2, %v1055_v34  ;;  %v22844_v56 = vld [vmem:[#allocation63_spill] sm:$0xff]  ;;  %vm1893_vm10 = vcmp.gt.f32.partialorder %v1055_v34, 0.0 }
 0x5df   :  { %14473 = vmatprep.mubr.msk.f32.mxu1 %vm16571_vm1, %v22562_v63  ;;  %15117 = vmatpush3.bf16.msra.mxu1 %v15116_v62  ;;  %v10833_v62 = vld [vmem:[%s22337_s3 + $0x3b0] sm:$0xff] }
 0x5e0   :  { %13254 = vmatmul.mubr.msk.f32.gmra.mrb[2].mxu0 %vm2463_vm3, %v22840_v13  ;;  %15118 = vmatprep.subr.bf16.mxu1 %v22576_v23 }
 0x5e1   :  { %13256 = vmatprep.mubr.msk.f32.mxu0 %vm16571_vm1, %v22562_v63 }
 0x5e2   :  { %14474 = vmatmul.mubr.msk.f32.gmra.mrb[4].mxu1 %vm2463_vm3, %v22819_v45  ;;  %v10834_v45 = vld [vmem:[%s22337_s3 + $0x3b8] sm:$0xff] }
 0x5e3   :  { %14476 = vmatprep.mubr.msk.f32.mxu1 %vm16571_vm1, %v22562_v63 }
 0x5e4   :  { %13257 = vmatmul.mubr.msk.f32.gmra.mrb[4].mxu0 %vm2463_vm3, %v22841_v51 }
 0x5e5   :  { %13259 = vmatprep.mubr.msk.f32.mxu0 %vm16571_vm1, %v22562_v63 }
 0x5e6   :  { %14477 = vmatmul.mubr.msk.f32.gmra.mrb[6].mxu1 %vm2463_vm3, %v22820_v24  ;;  %v15119_v24 = vpack.c.bf16 %v10834_v45, %v10833_v62  ;;  %v21130_v45 = vsel %vm1893_vm10, %v1055_v34, %v2089_v18  ;;  %v22846_v34 = vld [vmem:[#allocation71_spill] sm:$0xff]  ;;  %v22848_v62 = vld [vmem:[#allocation77_spill] sm:$0xff]  ;;  %v22849_v18 = vld [vmem:[#allocation30_spill] sm:$0xff] }
 0x5e7   :  { %14479 = vmatprep.mubr.msk.f32.mxu1 %vm16571_vm1, %v22562_v63 }
 0x5e8   :  { %13260 = vmatmul.mubr.msk.f32.gmra.mrb[6].mxu0 %vm2463_vm3, %v22843_v8  ;;  %15120 = vmatpush3.bf16.msra.mxu1 %v15119_v24  ;;  %v22845_v24 = vld [vmem:[#allocation68_spill] sm:$0xff] }
 0x5e9   :  { %13262 = vmatprep.mubr.msk.f32.mxu0 %vm16571_vm1, %v22562_v63  ;;  %15121 = vmatprep.subr.bf16.mxu1 %v22576_v23 }
 0x5ea   :  { %14480 = vmatmul.mubr.msk.f32.gmra.mrb[8].mxu1 %vm2463_vm3, %v22822_v38 }
 0x5eb   :  { %14482 = vmatprep.mubr.msk.f32.mxu1 %vm16571_vm1, %v22562_v63 }
 0x5ec   :  { %13263 = vmatmul.mubr.msk.f32.gmra.mrb[8].mxu0 %vm2463_vm3, %v22844_v56 }
 0x5ed   :  { %13265 = vmatprep.mubr.msk.f32.mxu0 %vm16571_vm1, %v22562_v63 }
 0x5ee   :  { %14483 = vmatmul.mubr.msk.f32.gmra.mrb[10].mxu1 %vm2463_vm3, %v22823_v49 }
 0x5ef   :  { %14485 = vmatprep.mubr.msk.f32.mxu1 %vm16571_vm1, %v22562_v63 }
 0x5f0   :  { %13266 = vmatmul.mubr.msk.f32.gmra.mrb[10].mxu0 %vm2463_vm3, %v21130_v45 }
 0x5f1   :  { %13268 = vmatprep.mubr.msk.f32.mxu0 %vm16571_vm1, %v22562_v63 }
 0x5f2   :  { %14486 = vmatmul.mubr.msk.f32.gmra.mrb[12].mxu1 %vm2463_vm3, %v20915_v30  ;;  %v22847_v30 = vld [vmem:[#allocation74_spill] sm:$0xff] }
 0x5f3   :  { %14488 = vmatprep.mubr.msk.f32.mxu1 %vm16571_vm1, %v22562_v63 }
 0x5f4   :  { %13269 = vmatmul.mubr.msk.f32.gmra.mrb[12].mxu0 %vm2463_vm3, %v22845_v24 }
 0x5f5   :  { %13271 = vmatprep.mubr.msk.f32.mxu0 %vm16571_vm1, %v22562_v63 }
 0x5f6   :  { %14489 = vmatmul.mubr.msk.f32.gmra.mrb[14].mxu1 %vm2463_vm3, %v22824_v25  ;;  %v22850_v25 = vld [vmem:[#allocation80_spill] sm:$0xff] }
 0x5f7   :  { %14491 = vmatprep.mubr.msk.f32.mxu1 %vm16571_vm1, %v22562_v63 }
 0x5f8   :  { %13272 = vmatmul.mubr.msk.f32.gmra.mrb[14].mxu0 %vm2463_vm3, %v22846_v34 }
 0x5f9   :  { %13274 = vmatprep.mubr.msk.f32.mxu0 %vm16571_vm1, %v22562_v63 }
 0x5fa   :  { %14492 = vmatmul.mubr.msk.f32.gmra.mrb[16].mxu1 %vm2463_vm3, %v22825_v26  ;;  %v1090_v26 = vadd.f32 %v20383_v14, %v22849_v18  ;;  %v22852_v18 = vld [vmem:[#allocation88_spill] sm:$0xff] }
 0x5fb   :  { %14494 = vmatprep.mubr.msk.f32.mxu1 %vm16571_vm1, %v22562_v63 }
 0x5fc   :  { %13275 = vmatmul.mubr.msk.f32.gmra.mrb[16].mxu0 %vm2463_vm3, %v22847_v30  ;;  %vm1900_vm11 = vcmp.gt.f32.partialorder %v1090_v26, 0.0 }
 0x5fd   :  { %13277 = vmatprep.mubr.msk.f32.mxu0 %vm16571_vm1, %v22562_v63 }
 0x5fe   :  { %14495 = vmatmul.mubr.msk.f32.gmra.mrb[18].mxu1 %vm2463_vm3, %v22826_v39  ;;  %v2096_v39 = vmul.f32 0.2, %v1090_v26 }
 0x5ff   :  { %14497 = vmatprep.mubr.msk.f32.mxu1 %vm16571_vm1, %v22562_v63 }
 0x600   :  { %13278 = vmatmul.mubr.msk.f32.gmra.mrb[18].mxu0 %vm2463_vm3, %v22848_v62  ;;  %v21190_v14 = vsel %vm1900_vm11, %v1090_v26, %v2096_v39  ;;  %v22853_v26 = vld [vmem:[#allocation91_spill] sm:$0xff]  ;;  %v22854_v39 = vld [vmem:[#allocation94_spill] sm:$0xff] }
 0x601   :  { %13280 = vmatprep.mubr.msk.f32.mxu0 %vm16571_vm1, %v22562_v63 }
 0x602   :  { %14498 = vmatmul.mubr.msk.f32.gmra.mrb[20].mxu1 %vm2463_vm3, %v22827_v61  ;;  %v22851_v61 = vld [vmem:[#allocation83_spill] sm:$0xff] }
 0x603   :  { %14500 = vmatprep.mubr.msk.f32.mxu1 %vm16571_vm1, %v22562_v63 }
 0x604   :  { %13281 = vmatmul.mubr.msk.f32.gmra.mrb[20].mxu0 %vm2463_vm3, %v22850_v25 }
 0x605   :  { %13283 = vmatprep.mubr.msk.f32.mxu0 %vm16571_vm1, %v22562_v63 }
 0x606   :  { %14501 = vmatmul.mubr.msk.f32.gmra.mrb[22].mxu1 %vm2463_vm3, %v22829_v16 }
 0x607   :  { %14503 = vmatprep.mubr.msk.f32.mxu1 %vm16571_vm1, %v22562_v63 }
 0x608   :  { %13284 = vmatmul.mubr.msk.f32.gmra.mrb[22].mxu0 %vm2463_vm3, %v22851_v61 }
 0x609   :  { %13286 = vmatprep.mubr.msk.f32.mxu0 %vm16571_vm1, %v22562_v63 }
 0x60a   :  { %14504 = vmatmul.mubr.msk.f32.gmra.mrb[24].mxu1 %vm2463_vm3, %v22830_v17 }
 0x60b   :  { %14506 = vmatprep.mubr.msk.f32.mxu1 %vm16571_vm1, %v22562_v63 }
 0x60c   :  { %13287 = vmatmul.mubr.msk.f32.gmra.mrb[24].mxu0 %vm2463_vm3, %v21190_v14 }
 0x60d   :  { %13289 = vmatprep.mubr.msk.f32.mxu0 %vm16571_vm1, %v22562_v63 }
 0x60e   :  { %14507 = vmatmul.mubr.msk.f32.gmra.mrb[26].mxu1 %vm2463_vm3, %v20989_v32  ;;  %v22855_v32 = vld [vmem:[#allocation97_spill] sm:$0xff] }
 0x60f   :  { %14509 = vmatprep.mubr.msk.f32.mxu1 %vm16571_vm1, %v22562_v63 }
 0x610   :  { %13290 = vmatmul.mubr.msk.f32.gmra.mrb[26].mxu0 %vm2463_vm3, %v22852_v18 }
 0x611   :  { %13292 = vmatprep.mubr.msk.f32.mxu0 %vm16571_vm1, %v22562_v63 }
 0x612   :  { %14510 = vmatmul.mubr.msk.f32.gmra.mrb[28].mxu1 %vm2463_vm3, %v22831_v2 }
 0x613   :  { %14512 = vmatprep.mubr.msk.f32.mxu1 %vm16571_vm1, %v22562_v63 }
 0x614   :  { %13293 = vmatmul.mubr.msk.f32.gmra.mrb[28].mxu0 %vm2463_vm3, %v22853_v26 }
 0x615   :  { %13295 = vmatprep.mubr.msk.f32.mxu0 %vm16571_vm1, %v22562_v63 }
 0x616   :  { %14513 = vmatmul.mubr.msk.f32.gmra.mrb[30].mxu1 %vm2463_vm3, %v22832_v33  ;;  %v22856_v33 = vld [vmem:[#allocation100_spill] sm:$0xff] }
 0x617   :  { %14515 = vmatprep.mubr.msk.f32.mxu1 %vm16571_vm1, %v22562_v63 }
 0x618   :  { %13296 = vmatmul.mubr.msk.f32.gmra.mrb[30].mxu0 %vm2463_vm3, %v22854_v39 }
 0x619   :  { %13298 = vmatprep.mubr.msk.f32.mxu0 %vm16571_vm1, %v22562_v63 }
 0x61a   :  { %14516 = vmatmul.mubr.msk.f32.gmra.mrb[32].mxu1 %vm2463_vm3, %v22833_v41  ;;  %v22857_v41 = vld [vmem:[#allocation103_spill] sm:$0xff] }
 0x61b   :  { %14518 = vmatprep.mubr.msk.f32.mxu1 %vm16571_vm1, %v22562_v63 }
 0x61c   :  { %13299 = vmatmul.mubr.msk.f32.gmra.mrb[32].mxu0 %vm2463_vm3, %v22855_v32 }
 0x61d   :  { %13301 = vmatprep.mubr.msk.f32.mxu0 %vm16571_vm1, %v22562_v63 }
 0x61e   :  { %14519 = vmatmul.mubr.msk.f32.gmra.mrb[34].mxu1 %vm2463_vm3, %v22834_v5 }
 0x61f   :  { %14521 = vmatprep.mubr.msk.f32.mxu1 %vm16571_vm1, %v22562_v63 }
 0x620   :  { %13302 = vmatmul.mubr.msk.f32.gmra.mrb[34].mxu0 %vm2463_vm3, %v22856_v33 }
 0x621   :  { %13304 = vmatprep.mubr.msk.f32.mxu0 %vm16571_vm1, %v22562_v63 }
 0x622   :  { %14522 = vmatmul.mubr.msk.f32.gmra.mrb[36].mxu1 %vm2463_vm3, %v22836_v22  ;;  %v22858_v22 = vld [vmem:[#allocation2_spill] sm:$0xff] }
 0x623   :  { %14524 = vmatprep.mubr.msk.f32.mxu1 %vm16571_vm1, %v22562_v63 }
 0x624   :  { %13305 = vmatmul.mubr.msk.f32.gmra.mrb[36].mxu0 %vm2463_vm3, %v22857_v41 }
 0x625   :  { %13323 = vmatprep.mubr.msk.f32.mxu0 %vm16571_vm1, %v22562_v63 }
 0x626   :  { %14525 = vmatmul.mubr.msk.f32.gmra.mrb[38].mxu1 %vm2463_vm3, %v22837_v43 }
 0x627   :  { %14527 = vmatprep.mubr.msk.f32.mxu1 %vm16571_vm1, %v22562_v63 }
 0x628   :  { %13324 = vmatmul.mubr.msk.f32.vlgmr.msra.gmra.mrb[196].mxu0 %vm2463_vm3, %v20187_v40  ;;  %v22859_v40 = vld [vmem:[#allocation3_spill] sm:$0xff] }
 0x629   :  { %13326 = vmatprep.mubr.msk.f32.mxu0 %vm16571_vm1, %v22562_v63  ;;  %15027 = vmatpush3.bf16.msra.mxu0 %v22858_v22  ;;  %v22862_v22 = vld [vmem:[#allocation41_spill] sm:$0xff] }
 0x62a   :  { %14528 = vmatmul.mubr.msk.f32.gmra.mrb[40].mxu1 %vm2463_vm3, %v21048_v57  ;;  %15028 = vmatprep.subr.bf16.mxu0 %v22576_v23  ;;  %v21290_v57 = vld [vmem:[%s22338_s2] ss:$0 sm:$0xff] }
 0x62b   :  { %14530 = vmatprep.mubr.msk.f32.mxu1 %vm16571_vm1, %v22562_v63 }
 0x62c   :  { %13327 = vmatmul.mubr.msk.f32.gmra.mrb[198].mxu0 %vm2463_vm3, %v20199_v52  ;;  %v22860_v52 = vld [vmem:[#allocation4_spill] sm:$0xff] }
 0x62d   :  { %13329 = vmatprep.mubr.msk.f32.mxu0 %vm16571_vm1, %v22562_v63  ;;  %15030 = vmatpush3.bf16.msra.mxu0 %v22859_v40  ;;  %v1155_v40 = vadd.f32 %v21290_v57, %v22862_v22 }
 0x62e   :  { %14531 = vmatmul.mubr.msk.f32.gmra.mrb[42].mxu1 %vm2463_vm3, %v22838_v42  ;;  %15031 = vmatprep.subr.bf16.mxu0 %v22576_v23 }
 0x62f   :  { %14533 = vmatprep.mubr.msk.f32.mxu1 %vm16571_vm1, %v22562_v63  ;;  %vm1913_vm12 = vcmp.gt.f32.partialorder %v1155_v40, 0.0 }
 0x630   :  { %13330 = vmatmul.mubr.msk.f32.gmra.mrb[200].mxu0 %vm2463_vm3, %v20211_v46  ;;  %v22861_v46 = vld [vmem:[#allocation5_spill] sm:$0xff] }
 0x631   :  { %13332 = vmatprep.mubr.msk.f32.mxu0 %vm16571_vm1, %v22562_v63  ;;  %15033 = vmatpush3.bf16.msra.mxu0 %v22860_v52 }
 0x632   :  { %14534 = vmatmul.mubr.msk.f32.gmra.mrb[44].mxu1 %vm2463_vm3, %v22839_v21  ;;  %15034 = vmatprep.subr.bf16.mxu0 %v22576_v23 }
 0x633   :  { %14536 = vmatprep.mubr.msk.f32.mxu1 %vm16571_vm1, %v22562_v63 }
 0x634   :  { %13333 = vmatmul.mubr.msk.f32.gmra.mrb[202].mxu0 %vm2463_vm3, %v20223_v60  ;;  %v2109_v60 = vmul.f32 0.2, %v1155_v40 }
 0x635   :  { %13335 = vmatprep.mubr.msk.f32.mxu0 %vm16571_vm1, %v22562_v63  ;;  %15036 = vmatpush3.bf16.msra.mxu0 %v22861_v46 }
 0x636   :  { %14537 = vmatmul.mubr.msk.f32.gmra.mrb[46].mxu1 %vm2463_vm3, %v22840_v13 }
 0x637   :  { %14539 = vmatprep.mubr.msk.f32.mxu1 %vm16571_vm1, %v22562_v63 }
 0x638   :  { %13336 = vmatmul.mubr.msk.f32.gmra.mrb[204].mxu0 %vm2463_vm3, %v20233_v58  ;;  %v2305_v58 = vsel %vm1913_vm12, %v1155_v40, %v2109_v60 }
 0x639   :  { %13338 = vmatprep.mubr.msk.f32.mxu0 %vm16571_vm1, %v22562_v63 }
 0x63a   :  { %14540 = vmatmul.mubr.msk.f32.gmra.mrb[48].mxu1 %vm2463_vm3, %v22841_v51 }
 0x63b   :  { %14542 = vmatprep.mubr.msk.f32.mxu1 %vm16571_vm1, %v22562_v63 }
 0x63c   :  { %13339 = vmatmul.mubr.msk.f32.gmra.mrb[206].mxu0 %vm2463_vm3, %v20245_v11  ;;  %v22863_v11 = vld [vmem:[#allocation53_spill] sm:$0xff] }
 0x63d   :  { %13341 = vmatprep.mubr.msk.f32.mxu0 %vm16571_vm1, %v22562_v63 }
 0x63e   :  { %14543 = vmatmul.mubr.msk.f32.gmra.mrb[50].mxu1 %vm2463_vm3, %v22843_v8 }
 0x63f   :  { %14545 = vmatprep.mubr.msk.f32.mxu1 %vm16571_vm1, %v22562_v63 }
 0x640   :  { %13342 = vmatmul.mubr.msk.f32.gmra.mrb[208].mxu0 %vm2463_vm3, %v2305_v58  ;;  %v22865_v58 = vld [vmem:[#allocation73_spill] sm:$0xff] }
 0x641   :  { %13344 = vmatprep.mubr.msk.f32.mxu0 %vm16571_vm1, %v22562_v63 }
 0x642   :  { %14546 = vmatmul.mubr.msk.f32.gmra.mrb[52].mxu1 %vm2463_vm3, %v22844_v56 }
 0x643   :  { %14548 = vmatprep.mubr.msk.f32.mxu1 %vm16571_vm1, %v22562_v63 }
 0x644   :  { %13345 = vmatmul.mubr.msk.f32.gmra.mrb[210].mxu0 %vm2463_vm3, %v20265_v48 }
 0x645   :  { %13347 = vmatprep.mubr.msk.f32.mxu0 %vm16571_vm1, %v22562_v63 }
 0x646   :  { %14549 = vmatmul.mubr.msk.f32.gmra.mrb[54].mxu1 %vm2463_vm3, %v21130_v45  ;;  %v1190_v45 = vadd.f32 %v21290_v57, %v22863_v11  ;;  %v1260_v11 = vadd.f32 %v21290_v57, %v22865_v58  ;;  %v10879_v58 = vld [vmem:[%s22337_s3 + $0x3d0] sm:$0xff] }
 0x647   :  { %14551 = vmatprep.mubr.msk.f32.mxu1 %vm16571_vm1, %v22562_v63 }
 0x648   :  { %13348 = vmatmul.mubr.msk.f32.gmra.mrb[212].mxu0 %vm2463_vm3, %v20277_v54  ;;  %v2116_v52 = vmul.f32 0.2, %v1190_v45  ;;  %vm1920_vm13 = vcmp.gt.f32.partialorder %v1190_v45, 0.0  ;;  %vm1934_vm0 = vcmp.gt.f32.partialorder %v1260_v11, 0.0 }
 0x649   :  { %13350 = vmatprep.mubr.msk.f32.mxu0 %vm16571_vm1, %v22562_v63 }
 0x64a   :  { %14552 = vmatmul.mubr.msk.f32.gmra.mrb[56].mxu1 %vm2463_vm3, %v22845_v24  ;;  %v21367_v46 = vsel %vm1920_vm13, %v1190_v45, %v2116_v52  ;;  %v2130_v45 = vmul.f32 0.2, %v1260_v11 }
 0x64b   :  { %14554 = vmatprep.mubr.msk.f32.mxu1 %vm16571_vm1, %v22562_v63 }
 0x64c   :  { %13351 = vmatmul.mubr.msk.f32.gmra.mrb[214].mxu0 %vm2463_vm3, %v20289_v59  ;;  %v21481_v52 = vsel %vm1934_vm0, %v1260_v11, %v2130_v45  ;;  %v10880_v11 = vld [vmem:[%s22337_s3 + $0x3d8] sm:$0xff] }
 0x64d   :  { %13353 = vmatprep.mubr.msk.f32.mxu0 %vm16571_vm1, %v22562_v63  ;;  %v15125_v45 = vpack.c.bf16 %v10880_v11, %v10879_v58  ;;  %v22870_v11 = vld [vmem:[#allocation124_spill] sm:$0xff] }
 0x64e   :  { %14555 = vmatmul.mubr.msk.f32.gmra.mrb[58].mxu1 %vm2463_vm3, %v22846_v34 }
 0x64f   :  { %14557 = vmatprep.mubr.msk.f32.mxu1 %vm16571_vm1, %v22562_v63 }
 0x650   :  { %13354 = vmatmul.mubr.msk.f32.gmra.mrb[216].mxu0 %vm2463_vm3, %v20301_v53 }
 0x651   :  { %13356 = vmatprep.mubr.msk.f32.mxu0 %vm16571_vm1, %v22562_v63 }
 0x652   :  { %14558 = vmatmul.mubr.msk.f32.gmra.mrb[60].mxu1 %vm2463_vm3, %v22847_v30 }
 0x653   :  { %14560 = vmatprep.mubr.msk.f32.mxu1 %vm16571_vm1, %v22562_v63 }
 0x654   :  { %13357 = vmatmul.mubr.msk.f32.gmra.mrb[218].mxu0 %vm2463_vm3, %v20311_v0 }
 0x655   :  { %13359 = vmatprep.mubr.msk.f32.mxu0 %vm16571_vm1, %v22562_v63 }
 0x656   :  { %14561 = vmatmul.mubr.msk.f32.gmra.mrb[62].mxu1 %vm2463_vm3, %v22848_v62 }
 0x657   :  { %14563 = vmatprep.mubr.msk.f32.mxu1 %vm16571_vm1, %v22562_v63 }
 0x658   :  { %13360 = vmatmul.mubr.msk.f32.gmra.mrb[220].mxu0 %vm2463_vm3, %v20329_v31 }
 0x659   :  { %13362 = vmatprep.mubr.msk.f32.mxu0 %vm16571_vm1, %v22562_v63 }
 0x65a   :  { %14564 = vmatmul.mubr.msk.f32.gmra.mrb[64].mxu1 %vm2463_vm3, %v22850_v25 }
 0x65b   :  { %14566 = vmatprep.mubr.msk.f32.mxu1 %vm16571_vm1, %v22562_v63 }
 0x65c   :  { %13363 = vmatmul.mubr.msk.f32.gmra.mrb[222].mxu0 %vm2463_vm3, %v21367_v46 }
 0x65d   :  { %13365 = vmatprep.mubr.msk.f32.mxu0 %vm16571_vm1, %v22562_v63 }
 0x65e   :  { %14567 = vmatmul.mubr.msk.f32.gmra.mrb[66].mxu1 %vm2463_vm3, %v22851_v61 }
 0x65f   :  { %14569 = vmatprep.mubr.msk.f32.mxu1 %vm16571_vm1, %v22562_v63 }
 0x660   :  { %13366 = vmatmul.mubr.msk.f32.gmra.mrb[224].mxu0 %vm2463_vm3, %v20363_v19 }
 0x661   :  { %13368 = vmatprep.mubr.msk.f32.mxu0 %vm16571_vm1, %v22562_v63 }
 0x662   :  { %14570 = vmatmul.mubr.msk.f32.gmra.mrb[68].mxu1 %vm2463_vm3, %v21190_v14  ;;  %v22864_v14 = vld [vmem:[#allocation61_spill] sm:$0xff] }
 0x663   :  { %14572 = vmatprep.mubr.msk.f32.mxu1 %vm16571_vm1, %v22562_v63  ;;  %v1225_v22 = vadd.f32 %v21290_v57, %v22864_v14  ;;  %v10877_v14 = vld [vmem:[%s22337_s3 + $0x3c0] sm:$0xff] }
 0x664   :  { %13369 = vmatmul.mubr.msk.f32.gmra.mrb[226].mxu0 %vm2463_vm3, %v20387_v35 }
 0x665   :  { %13371 = vmatprep.mubr.msk.f32.mxu0 %vm16571_vm1, %v22562_v63  ;;  %v2123_v40 = vmul.f32 0.2, %v1225_v22  ;;  %vm1927_vm14 = vcmp.gt.f32.partialorder %v1225_v22, 0.0 }
 0x666   :  { %14573 = vmatmul.mubr.msk.f32.gmra.mrb[70].mxu1 %vm2463_vm3, %v22852_v18 }
 0x667   :  { %14575 = vmatprep.mubr.msk.f32.mxu1 %vm16571_vm1, %v22562_v63  ;;  %v21427_v60 = vsel %vm1927_vm14, %v1225_v22, %v2123_v40  ;;  %v10878_v22 = vld [vmem:[%s22337_s3 + $0x3c8] sm:$0xff] }
 0x668   :  { %13372 = vmatmul.mubr.msk.f32.gmra.mrb[228].mxu0 %vm2463_vm3, %v20400_v47  ;;  %v15122_v40 = vpack.c.bf16 %v10878_v22, %v10877_v14  ;;  %v10881_v14 = vld [vmem:[%s22337_s3 + $0x3e0] sm:$0xff]  ;;  %v10882_v22 = vld [vmem:[%s22337_s3 + $0x3e8] sm:$0xff] }
 0x669   :  { %13374 = vmatprep.mubr.msk.f32.mxu0 %vm16571_vm1, %v22562_v63 }
 0x66a   :  { %14576 = vmatmul.mubr.msk.f32.gmra.mrb[72].mxu1 %vm2463_vm3, %v22853_v26 }
 0x66b   :  { %14578 = vmatprep.mubr.msk.f32.mxu1 %vm16571_vm1, %v22562_v63 }
 0x66c   :  { %13375 = vmatmul.mubr.msk.f32.gmra.mrb[230].mxu0 %vm2463_vm3, %v20412_v37 }
 0x66d   :  { %13377 = vmatprep.mubr.msk.f32.mxu0 %vm16571_vm1, %v22562_v63 }
 0x66e   :  { %14579 = vmatmul.mubr.msk.f32.gmra.mrb[74].mxu1 %vm2463_vm3, %v22854_v39 }
 0x66f   :  { %14581 = vmatprep.mubr.msk.f32.mxu1 %vm16571_vm1, %v22562_v63 }
 0x670   :  { %13378 = vmatmul.mubr.msk.f32.gmra.mrb[232].mxu0 %vm2463_vm3, %v20422_v4 }
 0x671   :  { %13380 = vmatprep.mubr.msk.f32.mxu0 %vm16571_vm1, %v22562_v63 }
 0x672   :  { %14582 = vmatmul.mubr.msk.f32.gmra.mrb[76].mxu1 %vm2463_vm3, %v22855_v32 }
 0x673   :  { %14584 = vmatprep.mubr.msk.f32.mxu1 %vm16571_vm1, %v22562_v63 }
 0x674   :  { %13381 = vmatmul.mubr.msk.f32.gmra.mrb[234].mxu0 %vm2463_vm3, %v20434_v9 }
 0x675   :  { %13383 = vmatprep.mubr.msk.f32.mxu0 %vm16571_vm1, %v22562_v63 }
 0x676   :  { %14585 = vmatmul.mubr.msk.f32.gmra.mrb[78].mxu1 %vm2463_vm3, %v22856_v33 }
 0x677   :  { %14587 = vmatprep.mubr.msk.f32.mxu1 %vm16571_vm1, %v22562_v63 }
 0x678   :  { %13384 = vmatmul.mubr.msk.f32.gmra.mrb[236].mxu0 %vm2463_vm3, %v21427_v60 }
 0x679   :  { %13386 = vmatprep.mubr.msk.f32.mxu0 %vm16571_vm1, %v22562_v63 }
 0x67a   :  { %14588 = vmatmul.mubr.msk.f32.gmra.mrb[80].mxu1 %vm2463_vm3, %v22857_v41 }
 0x67b   :  { %14590 = vmatprep.mubr.msk.f32.mxu1 %vm16571_vm1, %v22562_v63 }
 0x67c   :  { %13387 = vmatmul.mubr.msk.f32.gmra.mrb[238].mxu0 %vm2463_vm3, %v20454_v44 }
 0x67d   :  { %13389 = vmatprep.mubr.msk.f32.mxu0 %vm16571_vm1, %v22562_v63 }
 0x67e   :  { %14591 = vmatmul.mubr.f32.gmra.mrb[82].mxu1 %v22562_v63 }
 0x67f   :  { %14593 = vmatprep.mubr.msk.f32.mxu1 %vm16571_vm1, %v22562_v63 }
 0x680   :  { %13390 = vmatmul.mubr.msk.f32.gmra.mrb[240].mxu0 %vm2463_vm3, %v20466_v3 }
 0x681   :  { %13392 = vmatprep.mubr.msk.f32.mxu0 %vm16571_vm1, %v22562_v63 }
 0x682   :  { %14594 = vmatmul.mubr.f32.gmra.mrb[84].mxu1 %v22562_v63 }
 0x683   :  { %14596 = vmatprep.mubr.msk.f32.mxu1 %vm16571_vm1, %v22562_v63 }
 0x684   :  { %13393 = vmatmul.mubr.msk.f32.gmra.mrb[242].mxu0 %vm2463_vm3, %v20478_v50 }
 0x685   :  { %13395 = vmatprep.mubr.msk.f32.mxu0 %vm16571_vm1, %v22562_v63 }
 0x686   :  { %14597 = vmatmul.mubr.f32.gmra.mrb[86].mxu1 %v22562_v63 }
 0x687   :  { %14599 = vmatprep.mubr.msk.f32.mxu1 %vm16571_vm1, %v22562_v63 }
 0x688   :  { %13396 = vmatmul.mubr.msk.f32.gmra.mrb[244].mxu0 %vm2463_vm3, %v20490_v10 }
 0x689   :  { %13398 = vmatprep.mubr.msk.f32.mxu0 %vm16571_vm1, %v22562_v63 }
 0x68a   :  { %14600 = vmatmul.mubr.f32.gmra.mrb[88].mxu1 %v22562_v63 }
 0x68b   :  { %14602 = vmatprep.mubr.msk.f32.mxu1 %vm16571_vm1, %v22562_v63 }
 0x68c   :  { %13399 = vmatmul.mubr.msk.f32.gmra.mrb[246].mxu0 %vm2463_vm3, %v20500_v29 }
 0x68d   :  { %13401 = vmatprep.mubr.msk.f32.mxu0 %vm16571_vm1, %v22562_v63 }
 0x68e   :  { %14603 = vmatmul.mubr.f32.gmra.mrb[90].mxu1 %v22562_v63 }
 0x68f   :  { %14605 = vmatprep.mubr.msk.f32.mxu1 %vm16571_vm1, %v22562_v63 }
 0x690   :  { %13402 = vmatmul.mubr.msk.f32.gmra.mrb[248].mxu0 %vm2463_vm3, %v20512_v7 }
 0x691   :  { %13404 = vmatprep.mubr.msk.f32.mxu0 %vm16571_vm1, %v22562_v63 }
 0x692   :  { %14606 = vmatmul.mubr.f32.gmra.mrb[92].mxu1 %v22562_v63 }
 0x693   :  { %14608 = vmatprep.mubr.msk.f32.mxu1 %vm16571_vm1, %v22562_v63 }
 0x694   :  { %13405 = vmatmul.mubr.msk.f32.gmra.mrb[250].mxu0 %vm2463_vm3, %v21481_v52 }
 0x695   :  { %13407 = vmatprep.mubr.msk.f32.mxu0 %vm16571_vm1, %v22562_v63 }
 0x696   :  { %14609 = vmatmul.mubr.f32.gmra.mrb[94].mxu1 %v22562_v63 }
 0x697   :  { %14627 = vmatprep.mubr.msk.f32.mxu1 %vm16571_vm1, %v22562_v63 }
 0x698   :  { %13408 = vmatmul.mubr.msk.f32.gmra.mrb[252].mxu0 %vm2463_vm3, %v20543_v27 }
 0x699   :  { %13410 = vmatprep.mubr.msk.f32.mxu0 %vm16571_vm1, %v22562_v63 }
 0x69a   :  { %14628 = vmatmul.mubr.msk.f32.vlgmr.msra.gmra.mrb[96].mxu1 %vm2463_vm3, %v20265_v48  ;;  %v15128_v48 = vpack.c.bf16 %v10882_v22, %v10881_v14  ;;  %v22877_v22 = vld [vmem:[#allocation113_spill] sm:$0xff] }
 0x69b   :  { %15123 = vmatpush3.bf16.msra.mxu1 %v15122_v40  ;;  %14630 = vmatprep.mubr.msk.f32.mxu1 %vm16571_vm1, %v22562_v63 }
 0x69c   :  { %13411 = vmatmul.mubr.msk.f32.gmra.mrb[254].mxu0 %vm2463_vm3, %v20560_v15  ;;  %15124 = vmatprep.subr.bf16.mxu1 %v22576_v23 }
 0x69d   :  { %13413 = vmatprep.mubr.msk.f32.mxu0 %vm16571_vm1, %v22562_v63 }
 0x69e   :  { %14631 = vmatmul.mubr.msk.f32.gmra.mrb[0].mxu1 %vm2463_vm3, %v20277_v54  ;;  %v22866_v54 = vld [vmem:[#allocation81_spill] sm:$0xff] }
 0x69f   :  { %14633 = vmatprep.mubr.msk.f32.mxu1 %vm16571_vm1, %v22562_v63  ;;  %15126 = vmatpush3.bf16.msra.mxu1 %v15125_v45  ;;  %v1295_v40 = vadd.f32 %v21290_v57, %v22866_v54 }
 0x6a0   :  { %13414 = vmatmul.mubr.msk.f32.gmra.mrb[0].mxu0 %vm2463_vm3, %v20573_v55  ;;  %15127 = vmatprep.subr.bf16.mxu1 %v22576_v23 }
 0x6a1   :  { %13416 = vmatprep.mubr.msk.f32.mxu0 %vm16571_vm1, %v22562_v63  ;;  %vm1941_vm15 = vcmp.gt.f32.partialorder %v1295_v40, 0.0 }
 0x6a2   :  { %14634 = vmatmul.mubr.msk.f32.gmra.mrb[2].mxu1 %vm2463_vm3, %v20289_v59  ;;  %v10883_v59 = vld [vmem:[%s22337_s3 + $0x3f0] sm:$0xff] }
 0x6a3   :  { %14636 = vmatprep.mubr.msk.f32.mxu1 %vm16571_vm1, %v22562_v63  ;;  %15129 = vmatpush3.bf16.msra.mxu1 %v15128_v48 }
 0x6a4   :  { %13417 = vmatmul.mubr.msk.f32.gmra.mrb[2].mxu0 %vm2463_vm3, %v20586_v28  ;;  %15130 = vmatprep.subr.bf16.mxu1 %v22576_v23  ;;  %v2137_v23 = vmul.f32 0.2, %v1295_v40 }
 0x6a5   :  { %13419 = vmatprep.mubr.msk.f32.mxu0 %vm16571_vm1, %v22562_v63 }
 0x6a6   :  { %14637 = vmatmul.mubr.msk.f32.gmra.mrb[4].mxu1 %vm2463_vm3, %v20301_v53  ;;  %v10884_v53 = vld [vmem:[%s22337_s3 + $0x3f8] sm:$0xff]  ;;  %v21567_v58 = vsel %vm1941_vm15, %v1295_v40, %v2137_v23 }
 0x6a7   :  { %14639 = vmatprep.mubr.msk.f32.mxu1 %vm16571_vm1, %v22562_v63 }
 0x6a8   :  { %13420 = vmatmul.mubr.msk.f32.gmra.mrb[4].mxu0 %vm2463_vm3, %v20598_v12 }
 0x6a9   :  { %13422 = vmatprep.mubr.msk.f32.mxu0 %vm16571_vm1, %v22562_v63 }
 0x6aa   :  { %14640 = vmatmul.mubr.msk.f32.gmra.mrb[6].mxu1 %vm2463_vm3, %v20311_v0  ;;  %v15131_v0 = vpack.c.bf16 %v10884_v53, %v10883_v59 }
 0x6ab   :  { %14642 = vmatprep.mubr.msk.f32.mxu1 %vm16571_vm1, %v22562_v63 }
 0x6ac   :  { %13423 = vmatmul.mubr.msk.f32.gmra.mrb[6].mxu0 %vm2463_vm3, %v20614_v36  ;;  %15132 = vmatpush3.bf16.msra.mxu1 %v15131_v0 }
 0x6ad   :  { %13425 = vmatprep.mubr.msk.f32.mxu0 %vm16571_vm1, %v22562_v63 }
 0x6ae   :  { %14643 = vmatmul.mubr.msk.f32.gmra.mrb[8].mxu1 %vm2463_vm3, %v20329_v31  ;;  %v22867_v31 = vld [vmem:[#allocation119_spill] sm:$0xff] }
 0x6af   :  { %14645 = vmatprep.mubr.msk.f32.mxu1 %vm16571_vm1, %v22562_v63 }
 0x6b0   :  { %13426 = vmatmul.mubr.msk.f32.gmra.mrb[8].mxu0 %vm2463_vm3, %v21567_v58 }
 0x6b1   :  { %13428 = vmatprep.mubr.msk.f32.mxu0 %vm16571_vm1, %v22562_v63 }
 0x6b2   :  { %14646 = vmatmul.mubr.msk.f32.gmra.mrb[10].mxu1 %vm2463_vm3, %v21367_v46 }
 0x6b3   :  { %14648 = vmatprep.mubr.msk.f32.mxu1 %vm16571_vm1, %v22562_v63 }
 0x6b4   :  { %13429 = vmatmul.mubr.msk.f32.gmra.mrb[10].mxu0 %vm2463_vm3, %v20635_v6 }
 0x6b5   :  { %13431 = vmatprep.mubr.msk.f32.mxu0 %vm16571_vm1, %v22562_v63 }
 0x6b6   :  { %14649 = vmatmul.mubr.msk.f32.gmra.mrb[12].mxu1 %vm2463_vm3, %v20363_v19  ;;  %v22868_v19 = vld [vmem:[#allocation128_spill] sm:$0xff] }
 0x6b7   :  { %14651 = vmatprep.mubr.msk.f32.mxu1 %vm16571_vm1, %v22562_v63 }
 0x6b8   :  { %13432 = vmatmul.mubr.msk.f32.gmra.mrb[12].mxu0 %vm2463_vm3, %v20647_v1 }
 0x6b9   :  { %13434 = vmatprep.mubr.msk.f32.mxu0 %vm16571_vm1, %v22562_v63 }
 0x6ba   :  { %14652 = vmatmul.mubr.msk.f32.gmra.mrb[14].mxu1 %vm2463_vm3, %v20387_v35  ;;  %v22869_v35 = vld [vmem:[#allocation93_spill] sm:$0xff] }
 0x6bb   :  { %14654 = vmatprep.mubr.msk.f32.mxu1 %vm16571_vm1, %v22562_v63  ;;  %v1330_v46 = vadd.f32 %v21290_v57, %v22869_v35 }
 0x6bc   :  { %13435 = vmatmul.mubr.msk.f32.gmra.mrb[14].mxu0 %vm2463_vm3, %v22867_v31 }
 0x6bd   :  { %13437 = vmatprep.mubr.msk.f32.mxu0 %vm16571_vm1, %v22562_v63  ;;  %vm1948_vm2 = vcmp.gt.f32.partialorder %v1330_v46, 0.0 }
 0x6be   :  { %14655 = vmatmul.mubr.msk.f32.gmra.mrb[16].mxu1 %vm2463_vm3, %v20400_v47  ;;  %v2144_v47 = vmul.f32 0.2, %v1330_v46 }
 0x6bf   :  { %14657 = vmatprep.mubr.msk.f32.mxu1 %vm16571_vm1, %v22562_v63 }
 0x6c0   :  { %13438 = vmatmul.mubr.msk.f32.gmra.mrb[16].mxu0 %vm2463_vm3, %v22868_v19  ;;  %v21627_v45 = vsel %vm1948_vm2, %v1330_v46, %v2144_v47 }
 0x6c1   :  { %13440 = vmatprep.mubr.msk.f32.mxu0 %vm16571_vm1, %v22562_v63 }
 0x6c2   :  { %14658 = vmatmul.mubr.msk.f32.gmra.mrb[18].mxu1 %vm2463_vm3, %v20412_v37  ;;  %v22871_v37 = vld [vmem:[#allocation137_spill] sm:$0xff] }
 0x6c3   :  { %14660 = vmatprep.mubr.msk.f32.mxu1 %vm16571_vm1, %v22562_v63 }
 0x6c4   :  { %13441 = vmatmul.mubr.msk.f32.gmra.mrb[18].mxu0 %vm2463_vm3, %v22870_v11 }
 0x6c5   :  { %13443 = vmatprep.mubr.msk.f32.mxu0 %vm16571_vm1, %v22562_v63 }
 0x6c6   :  { %14661 = vmatmul.mubr.msk.f32.gmra.mrb[20].mxu1 %vm2463_vm3, %v20422_v4  ;;  %v22872_v4 = vld [vmem:[#allocation129_spill] sm:$0xff] }
 0x6c7   :  { %14663 = vmatprep.mubr.msk.f32.mxu1 %vm16571_vm1, %v22562_v63 }
 0x6c8   :  { %13444 = vmatmul.mubr.msk.f32.gmra.mrb[20].mxu0 %vm2463_vm3, %v22871_v37 }
 0x6c9   :  { %13446 = vmatprep.mubr.msk.f32.mxu0 %vm16571_vm1, %v22562_v63 }
 0x6ca   :  { %14664 = vmatmul.mubr.msk.f32.gmra.mrb[22].mxu1 %vm2463_vm3, %v20434_v9  ;;  %v22873_v9 = vld [vmem:[#allocation112_spill] sm:$0xff] }
 0x6cb   :  { %14666 = vmatprep.mubr.msk.f32.mxu1 %vm16571_vm1, %v22562_v63 }
 0x6cc   :  { %13447 = vmatmul.mubr.msk.f32.gmra.mrb[22].mxu0 %vm2463_vm3, %v21627_v45 }
 0x6cd   :  { %13449 = vmatprep.mubr.msk.f32.mxu0 %vm16571_vm1, %v22562_v63 }
 0x6ce   :  { %14667 = vmatmul.mubr.msk.f32.gmra.mrb[24].mxu1 %vm2463_vm3, %v21427_v60  ;;  %v22874_v60 = vld [vmem:[#allocation110_spill] sm:$0xff] }
 0x6cf   :  { %14669 = vmatprep.mubr.msk.f32.mxu1 %vm16571_vm1, %v22562_v63 }
 0x6d0   :  { %13450 = vmatmul.mubr.msk.f32.gmra.mrb[24].mxu0 %vm2463_vm3, %v22872_v4 }
 0x6d1   :  { %13452 = vmatprep.mubr.msk.f32.mxu0 %vm16571_vm1, %v22562_v63 }
 0x6d2   :  { %14670 = vmatmul.mubr.msk.f32.gmra.mrb[26].mxu1 %vm2463_vm3, %v20454_v44  ;;  %v22875_v44 = vld [vmem:[#allocation115_spill] sm:$0xff] }
 0x6d3   :  { %14672 = vmatprep.mubr.msk.f32.mxu1 %vm16571_vm1, %v22562_v63 }
 0x6d4   :  { %13453 = vmatmul.mubr.msk.f32.gmra.mrb[26].mxu0 %vm2463_vm3, %v22873_v9 }
 0x6d5   :  { %13455 = vmatprep.mubr.msk.f32.mxu0 %vm16571_vm1, %v22562_v63 }
 0x6d6   :  { %14673 = vmatmul.mubr.msk.f32.gmra.mrb[28].mxu1 %vm2463_vm3, %v20466_v3  ;;  %v22876_v3 = vld [vmem:[#allocation101_spill] sm:$0xff] }
 0x6d7   :  { %14675 = vmatprep.mubr.msk.f32.mxu1 %vm16571_vm1, %v22562_v63  ;;  %v1365_v14 = vadd.f32 %v21290_v57, %v22876_v3 }
 0x6d8   :  { %13456 = vmatmul.mubr.msk.f32.gmra.mrb[28].mxu0 %vm2463_vm3, %v22874_v60 }
 0x6d9   :  { %13458 = vmatprep.mubr.msk.f32.mxu0 %vm16571_vm1, %v22562_v63  ;;  %vm1955_vm4 = vcmp.gt.f32.partialorder %v1365_v14, 0.0 }
 0x6da   :  { %14676 = vmatmul.mubr.msk.f32.gmra.mrb[30].mxu1 %vm2463_vm3, %v20478_v50  ;;  %v2151_v50 = vmul.f32 0.2, %v1365_v14 }
 0x6db   :  { %14678 = vmatprep.mubr.msk.f32.mxu1 %vm16571_vm1, %v22562_v63 }
 0x6dc   :  { %13459 = vmatmul.mubr.msk.f32.gmra.mrb[30].mxu0 %vm2463_vm3, %v22875_v44  ;;  %v21687_v57 = vsel %vm1955_vm4, %v1365_v14, %v2151_v50 }
 0x6dd   :  { %13461 = vmatprep.mubr.msk.f32.mxu0 %vm16571_vm1, %v22562_v63 }
 0x6de   :  { %14679 = vmatmul.mubr.msk.f32.gmra.mrb[32].mxu1 %vm2463_vm3, %v20490_v10  ;;  %v22878_v10 = vld [vmem:[#allocation118_spill] sm:$0xff] }
 0x6df   :  { %14681 = vmatprep.mubr.msk.f32.mxu1 %vm16571_vm1, %v22562_v63 }
 0x6e0   :  { %13462 = vmatmul.mubr.msk.f32.gmra.mrb[32].mxu0 %vm2463_vm3, %v22877_v22 }
 0x6e1   :  { %13464 = vmatprep.mubr.msk.f32.mxu0 %vm16571_vm1, %v22562_v63 }
 0x6e2   :  { %14682 = vmatmul.mubr.msk.f32.gmra.mrb[34].mxu1 %vm2463_vm3, %v20500_v29  ;;  %v22879_v29 = vld [vmem:[#allocation116_spill] sm:$0xff] }
 0x6e3   :  { %14684 = vmatprep.mubr.msk.f32.mxu1 %vm16571_vm1, %v22562_v63 }
 0x6e4   :  { %13465 = vmatmul.mubr.msk.f32.gmra.mrb[34].mxu0 %vm2463_vm3, %v22878_v10 }
 0x6e5   :  { %13467 = vmatprep.mubr.msk.f32.mxu0 %vm16571_vm1, %v22562_v63 }
 0x6e6   :  { %14685 = vmatmul.mubr.msk.f32.gmra.mrb[36].mxu1 %vm2463_vm3, %v20512_v7 }
 0x6e7   :  { %14687 = vmatprep.mubr.msk.f32.mxu1 %vm16571_vm1, %v22562_v63 }
 0x6e8   :  { %13468 = vmatmul.mubr.msk.f32.gmra.mrb[36].mxu0 %vm2463_vm3, %v21687_v57 }
 0x6e9   :  { %13486 = vmatprep.mubr.msk.f32.mxu0 %vm16571_vm1, %v22562_v63 }
 0x6ea   :  { %14688 = vmatmul.mubr.msk.f32.gmra.mrb[38].mxu1 %vm2463_vm3, %v21481_v52 }
 0x6eb   :  { %14690 = vmatprep.mubr.msk.f32.mxu1 %vm16571_vm1, %v22562_v63 }
 0x6ec   :  { %13487 = vmatmul.mubr.msk.f32.vlgmr.msra.gmra.mrb[196].mxu0 %vm2463_vm3, %v22879_v29 }
 0x6ee   :  { %14691 = vmatmul.mubr.msk.f32.gmra.mrb[40].mxu1 %vm2463_vm3, %v20543_v27 }
 0x6ef   :  { %14693 = vmatprep.mubr.msk.f32.mxu1 %vm16571_vm1, %v22562_v63 }
 0x6f2   :  { %14694 = vmatmul.mubr.msk.f32.gmra.mrb[42].mxu1 %vm2463_vm3, %v20560_v15 }
 0x6f3   :  { %14696 = vmatprep.mubr.msk.f32.mxu1 %vm16571_vm1, %v22562_v63 }
 0x6f6   :  { %14697 = vmatmul.mubr.msk.f32.gmra.mrb[44].mxu1 %vm2463_vm3, %v20573_v55 }
 0x6f7   :  { %14699 = vmatprep.mubr.msk.f32.mxu1 %vm16571_vm1, %v22562_v63 }
 0x6fa   :  { %14700 = vmatmul.mubr.msk.f32.gmra.mrb[46].mxu1 %vm2463_vm3, %v20586_v28 }
 0x6fb   :  { %14702 = vmatprep.mubr.msk.f32.mxu1 %vm16571_vm1, %v22562_v63 }
 0x6fe   :  { %14703 = vmatmul.mubr.msk.f32.gmra.mrb[48].mxu1 %vm2463_vm3, %v20598_v12 }
 0x6ff   :  { %v21719_v7 = vpop.f32.mrb[198].mxu0  ;;  %14705 = vmatprep.mubr.msk.f32.mxu1 %vm16571_vm1, %v22562_v63 }
 0x700   :  { %v13328_v27 = vpop.f32.mrb[199].mxu0 }
 0x702   :  { %14706 = vmatmul.mubr.msk.f32.gmra.mrb[50].mxu1 %vm2463_vm3, %v20614_v36 }
 0x703   :  { %v21725_v15 = vpop.f32.mrb[200].mxu0  ;;  %14708 = vmatprep.mubr.msk.f32.mxu1 %vm16571_vm1, %v22562_v63 }
 0x704   :  { %v13331_v55 = vpop.f32.mrb[201].mxu0 }
 0x706   :  { %14709 = vmatmul.mubr.msk.f32.gmra.mrb[52].mxu1 %vm2463_vm3, %v21567_v58 }
 0x707   :  { %v21731_v28 = vpop.f32.mrb[202].mxu0  ;;  %14711 = vmatprep.mubr.msk.f32.mxu1 %vm16571_vm1, %v22562_v63 }
 0x708   :  { %v13334_v12 = vpop.f32.mrb[203].mxu0 }
 0x70a   :  { %14712 = vmatmul.mubr.msk.f32.gmra.mrb[54].mxu1 %vm2463_vm3, %v20635_v6 }
 0x70b   :  { %v21737_v52 = vpop.f32.mrb[204].mxu0  ;;  %14714 = vmatprep.mubr.msk.f32.mxu1 %vm16571_vm1, %v22562_v63 }
 0x70c   :  { %v13337_v36 = vpop.f32.mrb[205].mxu0 }
 0x70e   :  { %14715 = vmatmul.mubr.msk.f32.gmra.mrb[56].mxu1 %vm2463_vm3, %v20647_v1 }
 0x70f   :  { %v21743_v48 = vpop.f32.mrb[206].mxu0  ;;  %14717 = vmatprep.mubr.msk.f32.mxu1 %vm16571_vm1, %v22562_v63 }
 0x710   :  { %v13340_v54 = vpop.f32.mrb[207].mxu0 }
 0x712   :  { %14718 = vmatmul.mubr.msk.f32.gmra.mrb[58].mxu1 %vm2463_vm3, %v22867_v31 }
 0x713   :  { %v21749_v40 = vpop.f32.mrb[208].mxu0  ;;  %14720 = vmatprep.mubr.msk.f32.mxu1 %vm16571_vm1, %v22562_v63 }
 0x714   :  { %v13343_v6 = vpop.f32.mrb[209].mxu0 }
 0x716   :  { %14721 = vmatmul.mubr.msk.f32.gmra.mrb[60].mxu1 %vm2463_vm3, %v22868_v19 }
 0x717   :  { %v21755_v23 = vpop.f32.mrb[210].mxu0  ;;  %14723 = vmatprep.mubr.msk.f32.mxu1 %vm16571_vm1, %v22562_v63 }
 0x718   :  { %v13346_v1 = vpop.f32.mrb[211].mxu0 }
 0x71a   :  { %14724 = vmatmul.mubr.msk.f32.gmra.mrb[62].mxu1 %vm2463_vm3, %v22870_v11 }
 0x71b   :  { %v21761_v59 = vpop.f32.mrb[212].mxu0  ;;  %14726 = vmatprep.mubr.msk.f32.mxu1 %vm16571_vm1, %v22562_v63 }
 0x71c   :  { %v13349_v53 = vpop.f32.mrb[213].mxu0 }
 0x71e   :  { %14727 = vmatmul.mubr.msk.f32.gmra.mrb[64].mxu1 %vm2463_vm3, %v22871_v37 }
 0x71f   :  { %v21767_v0 = vpop.f32.mrb[214].mxu0  ;;  %14729 = vmatprep.mubr.msk.f32.mxu1 %vm16571_vm1, %v22562_v63 }
 0x720   :  { %v13352_v58 = vpop.f32.mrb[215].mxu0 }
 0x722   :  { %14730 = vmatmul.mubr.msk.f32.gmra.mrb[66].mxu1 %vm2463_vm3, %v21627_v45 }
 0x723   :  { %v21773_v31 = vpop.f32.mrb[216].mxu0  ;;  %14732 = vmatprep.mubr.msk.f32.mxu1 %vm16571_vm1, %v22562_v63 }
 0x724   :  { %v13355_v19 = vpop.f32.mrb[217].mxu0 }
 0x726   :  { %14733 = vmatmul.mubr.msk.f32.gmra.mrb[68].mxu1 %vm2463_vm3, %v22872_v4 }
 0x727   :  { %v21779_v35 = vpop.f32.mrb[218].mxu0  ;;  %14735 = vmatprep.mubr.msk.f32.mxu1 %vm16571_vm1, %v22562_v63 }
 0x728   :  { %v13358_v46 = vpop.f32.mrb[219].mxu0 }
 0x72a   :  { %14736 = vmatmul.mubr.msk.f32.gmra.mrb[70].mxu1 %vm2463_vm3, %v22873_v9 }
 0x72b   :  { %v21785_v11 = vpop.f32.mrb[220].mxu0  ;;  %14738 = vmatprep.mubr.msk.f32.mxu1 %vm16571_vm1, %v22562_v63 }
 0x72c   :  { %v13361_v47 = vpop.f32.mrb[221].mxu0 }
 0x72e   :  { %14739 = vmatmul.mubr.msk.f32.gmra.mrb[72].mxu1 %vm2463_vm3, %v22874_v60 }
 0x72f   :  { %v21791_v37 = vpop.f32.mrb[222].mxu0  ;;  %14741 = vmatprep.mubr.msk.f32.mxu1 %vm16571_vm1, %v22562_v63 }
 0x730   :  { %v13364_v45 = vpop.f32.mrb[223].mxu0 }
 0x732   :  { %14742 = vmatmul.mubr.msk.f32.gmra.mrb[74].mxu1 %vm2463_vm3, %v22875_v44 }
 0x733   :  { %v21797_v4 = vpop.f32.mrb[224].mxu0  ;;  %14744 = vmatprep.mubr.msk.f32.mxu1 %vm16571_vm1, %v22562_v63 }
 0x734   :  { %v13367_v9 = vpop.f32.mrb[225].mxu0 }
 0x735   :  { %v22880_v9 = vld [vmem:[#allocation16_spill] sm:$0xff] }
 0x736   :  { %14745 = vmatmul.mubr.msk.f32.gmra.mrb[76].mxu1 %vm2463_vm3, %v22877_v22 }
 0x737   :  { %v21803_v3 = vpop.f32.mrb[226].mxu0  ;;  %14747 = vmatprep.mubr.msk.f32.mxu1 %vm16571_vm1, %v22562_v63 }
 0x738   :  { %v13370_v60 = vpop.f32.mrb[227].mxu0 }
 0x73a   :  { %14748 = vmatmul.mubr.msk.f32.gmra.mrb[78].mxu1 %vm2463_vm3, %v22878_v10 }
 0x73b   :  { %v21809_v14 = vpop.f32.mrb[228].mxu0  ;;  %14750 = vmatprep.mubr.msk.f32.mxu1 %vm16571_vm1, %v22562_v63 }
 0x73c   :  { %v13373_v44 = vpop.f32.mrb[229].mxu0 }
 0x73e   :  { %14751 = vmatmul.mubr.msk.f32.gmra.mrb[80].mxu1 %vm2463_vm3, %v21687_v57 }
 0x73f   :  { %v21815_v50 = vpop.f32.mrb[230].mxu0  ;;  %14753 = vmatprep.mubr.msk.f32.mxu1 %vm16571_vm1, %v22562_v63 }
 0x740   :  { %v13376_v22 = vpop.f32.mrb[231].mxu0 }
 0x741   :  { %v22881_v22 = vld [vmem:[#allocation18_spill] sm:$0xff] }
 0x742   :  { %14754 = vmatmul.mubr.f32.gmra.mrb[82].mxu1 %v22562_v63 }
 0x743   :  { %v21820_v29 = vpop.f32.mrb[232].mxu0  ;;  %14756 = vmatprep.mubr.msk.f32.mxu1 %vm16571_vm1, %v22562_v63 }
 0x744   :  { %v13379_v10 = vpop.f32.mrb[233].mxu0 }
 0x746   :  { %14757 = vmatmul.mubr.f32.gmra.mrb[84].mxu1 %v22562_v63 }
 0x747   :  { %v21825_v27 = vpop.f32.mrb[234].mxu0  ;;  %14759 = vmatprep.mubr.msk.f32.mxu1 %vm16571_vm1, %v22562_v63 }
 0x748   :  { %v13382_v57 = vpop.f32.mrb[235].mxu0 }
 0x749   :  { %v22882_v57 = vld [vmem:[#allocation19_spill] sm:$0xff] }
 0x74a   :  { %14760 = vmatmul.mubr.f32.gmra.mrb[86].mxu1 %v22562_v63 }
 0x74b   :  { %v21830_v55 = vpop.f32.mrb[236].mxu0  ;;  %14762 = vmatprep.mubr.msk.f32.mxu1 %vm16571_vm1, %v22562_v63 }
 0x74c   :  { %v13385_v12 = vpop.f32.mrb[237].mxu0 }
 0x74e   :  { %14763 = vmatmul.mubr.f32.gmra.mrb[88].mxu1 %v22562_v63 }
 0x74f   :  { %v21835_v36 = vpop.f32.mrb[238].mxu0  ;;  %14765 = vmatprep.mubr.msk.f32.mxu1 %vm16571_vm1, %v22562_v63 }
 0x750   :  { %v13388_v54 = vpop.f32.mrb[239].mxu0 }
 0x752   :  { %14766 = vmatmul.mubr.f32.gmra.mrb[90].mxu1 %v22562_v63 }
 0x753   :  { %v21840_v6 = vpop.f32.mrb[240].mxu0  ;;  %14768 = vmatprep.mubr.msk.f32.mxu1 %vm16571_vm1, %v22562_v63 }
 0x754   :  { %v13391_v1 = vpop.f32.mrb[241].mxu0 }
 0x756   :  { %14769 = vmatmul.mubr.f32.gmra.mrb[92].mxu1 %v22562_v63 }
 0x757   :  { %v21845_v53 = vpop.f32.mrb[242].mxu0  ;;  %14771 = vmatprep.mubr.msk.f32.mxu1 %vm16571_vm1, %v22562_v63 }
 0x758   :  { %v13394_v58 = vpop.f32.mrb[243].mxu0 }
 0x75a   :  { %14772 = vmatmul.mubr.f32.gmra.mrb[94].mxu1 %v22562_v63 }
 0x75b   :  { %v21850_v19 = vpop.f32.mrb[244].mxu0  ;;  %14790 = vmatprep.mubr.msk.f32.mxu1 %vm16571_vm1, %v22562_v63 }
 0x75c   :  { %v13397_v46 = vpop.f32.mrb[245].mxu0 }
 0x75e   :  { %14791 = vmatmul.mubr.msk.f32.vlgmr.msra.gmra.mrb[96].mxu1 %vm2463_vm3, %v22817_v20 }
 0x75f   :  { %v21856_v47 = vpop.f32.mrb[246].mxu0  ;;  %14793 = vmatprep.mubr.msk.f32.mxu1 %vm16571_vm1, %v22562_v63 }
 0x760   :  { %v13400_v45 = vpop.f32.mrb[247].mxu0 }
 0x762   :  { %14794 = vmatmul.mubr.msk.f32.gmra.mrb[0].mxu1 %vm2463_vm3, %v22880_v9 }
 0x763   :  { %v21862_v60 = vpop.f32.mrb[248].mxu0  ;;  %14796 = vmatprep.mubr.msk.f32.mxu1 %vm16571_vm1, %v22562_v63 }
 0x764   :  { %v13403_v44 = vpop.f32.mrb[249].mxu0 }
 0x765   :  { %v22883_v44 = vld [vmem:[#allocation23_spill] sm:$0xff] }
 0x766   :  { %14797 = vmatmul.mubr.msk.f32.gmra.mrb[2].mxu1 %vm2463_vm3, %v22881_v22 }
 0x767   :  { %v21868_v10 = vpop.f32.mrb[250].mxu0  ;;  %14799 = vmatprep.mubr.msk.f32.mxu1 %vm16571_vm1, %v22562_v63 }
 0x768   :  { %v13406_v20 = vpop.f32.mrb[251].mxu0 }
 0x769   :  { %v22884_v20 = vld [vmem:[#allocation24_spill] sm:$0xff] }
 0x76a   :  { %14800 = vmatmul.mubr.msk.f32.gmra.mrb[4].mxu1 %vm2463_vm3, %v22882_v57 }
 0x76b   :  { %v21874_v12 = vpop.f32.mrb[252].mxu0  ;;  %14802 = vmatprep.mubr.msk.f32.mxu1 %vm16571_vm1, %v22562_v63 }
 0x76c   :  { %v13409_v54 = vpop.f32.mrb[253].mxu0 }
 0x76e   :  { %14803 = vmatmul.mubr.msk.f32.gmra.mrb[6].mxu1 %vm2463_vm3, %v22822_v38 }
 0x76f   :  { %v21880_v1 = vpop.f32.mrb[254].mxu0  ;;  %14805 = vmatprep.mubr.msk.f32.mxu1 %vm16571_vm1, %v22562_v63 }
 0x770   :  { %v13412_v58 = vpop.f32.mrb[255].mxu0 }
 0x771   :  { %v22885_v58 = vld [vmem:[#allocation26_spill] sm:$0xff] }
 0x772   :  { %14806 = vmatmul.mubr.msk.f32.gmra.mrb[8].mxu1 %vm2463_vm3, %v22823_v49 }
 0x773   :  { %v21886_v46 = vpop.f32.mrb[0].mxu0  ;;  %14808 = vmatprep.mubr.msk.f32.mxu1 %vm16571_vm1, %v22562_v63 }
 0x774   :  { %v13415_v45 = vpop.f32.mrb[1].mxu0 }
 0x776   :  { %14809 = vmatmul.mubr.f32.gmra.mrb[10].mxu1 %v22562_v63 }
 0x777   :  { %v21891_v9 = vpop.f32.mrb[2].mxu0  ;;  %14811 = vmatprep.mubr.msk.f32.mxu1 %vm16571_vm1, %v22562_v63 }
 0x778   :  { %v13418_v38 = vpop.f32.mrb[3].mxu0 }
 0x77a   :  { %14812 = vmatmul.mubr.msk.f32.gmra.mrb[12].mxu1 %vm2463_vm3, %v22883_v44  ;;  %v22886_v44 = vld [vmem:[#allocation27_spill] sm:$0xff] }
 0x77b   :  { %v21897_v22 = vpop.f32.mrb[4].mxu0  ;;  %14814 = vmatprep.mubr.msk.f32.mxu1 %vm16571_vm1, %v22562_v63 }
 0x77c   :  { %v13421_v49 = vpop.f32.mrb[5].mxu0 }
 0x77e   :  { %14815 = vmatmul.mubr.msk.f32.gmra.mrb[14].mxu1 %vm2463_vm3, %v22884_v20 }
 0x77f   :  { %v21903_v57 = vpop.f32.mrb[6].mxu0  ;;  %14817 = vmatprep.mubr.msk.f32.mxu1 %vm16571_vm1, %v22562_v63 }
 0x780   :  { %v13424_v54 = vpop.f32.mrb[7].mxu0 }
 0x782   :  { %14818 = vmatmul.mubr.msk.f32.gmra.mrb[16].mxu1 %vm2463_vm3, %v22885_v58 }
 0x783   :  { %v21909_v45 = vpop.f32.mrb[8].mxu0  ;;  %14820 = vmatprep.mubr.msk.f32.mxu1 %vm16571_vm1, %v22562_v63 }
 0x784   :  { %v13427_v38 = vpop.f32.mrb[9].mxu0 }
 0x786   :  { %14821 = vmatmul.mubr.msk.f32.gmra.mrb[18].mxu1 %vm2463_vm3, %v22886_v44 }
 0x787   :  { %v21915_v49 = vpop.f32.mrb[10].mxu0  ;;  %14823 = vmatprep.mubr.msk.f32.mxu1 %vm16571_vm1, %v22562_v63 }
 0x788   :  { %v13430_v20 = vpop.f32.mrb[11].mxu0 }
 0x78a   :  { %14824 = vmatmul.mubr.msk.f32.gmra.mrb[20].mxu1 %vm2463_vm3, %v22829_v16 }
 0x78b   :  { %v21921_v54 = vpop.f32.mrb[12].mxu0  ;;  %14826 = vmatprep.mubr.msk.f32.mxu1 %vm16571_vm1, %v22562_v63 }
 0x78c   :  { %22887 = vst [vmem:[#allocation133_spill] sm:$0xff] %v21921_v54  ;;  %v13433_v58 = vpop.f32.mrb[13].mxu0  ;;  %v22892_v54 = vld [vmem:[#allocation34_spill] sm:$0xff] }
 0x78e   :  { %14827 = vmatmul.mubr.msk.f32.gmra.mrb[22].mxu1 %vm2463_vm3, %v22830_v17 }
 0x78f   :  { %v21927_v38 = vpop.f32.mrb[14].mxu0  ;;  %14829 = vmatprep.mubr.msk.f32.mxu1 %vm16571_vm1, %v22562_v63 }
 0x790   :  { %22888 = vst [vmem:[#allocation120_spill] sm:$0xff] %v21927_v38  ;;  %v13436_v44 = vpop.f32.mrb[15].mxu0  ;;  %v22890_v38 = vld [vmem:[#allocation32_spill] sm:$0xff] }
 0x792   :  { %14830 = vmatmul.mubr.f32.gmra.mrb[24].mxu1 %v22562_v63 }
 0x793   :  { %v21932_v20 = vpop.f32.mrb[16].mxu0  ;;  %14832 = vmatprep.mubr.msk.f32.mxu1 %vm16571_vm1, %v22562_v63 }
 0x794   :  { %22889 = vst [vmem:[#allocation138_spill] sm:$0xff] %v21932_v20  ;;  %v13439_v16 = vpop.f32.mrb[17].mxu0 }
 0x796   :  { %14833 = vmatmul.mubr.msk.f32.gmra.mrb[26].mxu1 %vm2463_vm3, %v22831_v2 }
 0x797   :  { %v21938_v58 = vpop.f32.mrb[18].mxu0  ;;  %14835 = vmatprep.mubr.msk.f32.mxu1 %vm16571_vm1, %v22562_v63 }
 0x798   :  { %v13442_v17 = vpop.f32.mrb[19].mxu0 }
 0x79a   :  { %14836 = vmatmul.mubr.msk.f32.gmra.mrb[28].mxu1 %vm2463_vm3, %v22890_v38 }
 0x79b   :  { %v21944_v44 = vpop.f32.mrb[20].mxu0  ;;  %14838 = vmatprep.mubr.msk.f32.mxu1 %vm16571_vm1, %v22562_v63 }
 0x79c   :  { %22891 = vst [vmem:[#allocation142_spill] sm:$0xff] %v21944_v44  ;;  %v13445_v20 = vpop.f32.mrb[21].mxu0  ;;  %v22893_v44 = vld [vmem:[#allocation40_spill] sm:$0xff] }
 0x79e   :  { %14839 = vmatmul.mubr.msk.f32.gmra.mrb[30].mxu1 %vm2463_vm3, %v22892_v54 }
 0x79f   :  { %v21950_v16 = vpop.f32.mrb[22].mxu0  ;;  %14841 = vmatprep.mubr.msk.f32.mxu1 %vm16571_vm1, %v22562_v63 }
 0x7a0   :  { %v13448_v2 = vpop.f32.mrb[23].mxu0 }
 0x7a2   :  { %14842 = vmatmul.mubr.msk.f32.gmra.mrb[32].mxu1 %vm2463_vm3, %v22834_v5 }
 0x7a3   :  { %v21956_v17 = vpop.f32.mrb[24].mxu0  ;;  %14844 = vmatprep.mubr.msk.f32.mxu1 %vm16571_vm1, %v22562_v63 }
 0x7a4   :  { %v13451_v38 = vpop.f32.mrb[25].mxu0 }
 0x7a6   :  { %14845 = vmatmul.mubr.msk.f32.gmra.mrb[34].mxu1 %vm2463_vm3, %v22893_v44 }
 0x7a7   :  { %v21962_v20 = vpop.f32.mrb[26].mxu0  ;;  %14847 = vmatprep.mubr.msk.f32.mxu1 %vm16571_vm1, %v22562_v63 }
 0x7a8   :  { %v13454_v54 = vpop.f32.mrb[27].mxu0 }
 0x7aa   :  { %14848 = vmatmul.mubr.msk.f32.gmra.mrb[36].mxu1 %vm2463_vm3, %v22837_v43 }
 0x7ab   :  { %v21968_v2 = vpop.f32.mrb[28].mxu0  ;;  %14850 = vmatprep.mubr.msk.f32.mxu1 %vm16571_vm1, %v22562_v63 }
 0x7ac   :  { %v13457_v5 = vpop.f32.mrb[29].mxu0 }
 0x7ae   :  { %14851 = vmatmul.mubr.f32.gmra.mrb[38].mxu1 %v22562_v63 }
 0x7af   :  { %v21973_v38 = vpop.f32.mrb[30].mxu0  ;;  %14853 = vmatprep.mubr.msk.f32.mxu1 %vm16571_vm1, %v22562_v63 }
 0x7b0   :  { %22894 = vst [vmem:[#allocation146_spill] sm:$0xff] %v21973_v38  ;;  %v13460_v44 = vpop.f32.mrb[31].mxu0 }
 0x7b2   :  { %14854 = vmatmul.mubr.msk.f32.gmra.mrb[40].mxu1 %vm2463_vm3, %v22838_v42 }
 0x7b3   :  { %v21979_v54 = vpop.f32.mrb[32].mxu0  ;;  %14856 = vmatprep.mubr.msk.f32.mxu1 %vm16571_vm1, %v22562_v63 }
 0x7b4   :  { %v13463_v43 = vpop.f32.mrb[33].mxu0 }
 0x7b6   :  { %14857 = vmatmul.mubr.msk.f32.gmra.mrb[42].mxu1 %vm2463_vm3, %v22839_v21 }
 0x7b7   :  { %v21985_v5 = vpop.f32.mrb[34].mxu0  ;;  %14859 = vmatprep.mubr.msk.f32.mxu1 %vm16571_vm1, %v22562_v63 }
 0x7b8   :  { %v13466_v38 = vpop.f32.mrb[35].mxu0 }
 0x7ba   :  { %14860 = vmatmul.mubr.msk.f32.gmra.mrb[44].mxu1 %vm2463_vm3, %v22840_v13 }
 0x7bb   :  { %v21991_v44 = vpop.f32.mrb[36].mxu0  ;;  %14862 = vmatprep.mubr.msk.f32.mxu1 %vm16571_vm1, %v22562_v63 }
 0x7bc   :  { %v13469_v42 = vpop.f32.mrb[37].mxu0 }
 0x7be   :  { %14863 = vmatmul.mubr.msk.f32.gmra.mrb[46].mxu1 %vm2463_vm3, %v22841_v51 }
 0x7bf   :  { %v5548_v43 = vpop.f32.mrb[196].mxu0  ;;  %14865 = vmatprep.mubr.msk.f32.mxu1 %vm16571_vm1, %v22562_v63 }
 0x7c0   :  { %v13488_v21 = vpop.f32.mrb[197].mxu0 }
 0x7c2   :  { %14866 = vmatmul.mubr.msk.f32.gmra.mrb[48].mxu1 %vm2463_vm3, %v22843_v8 }
 0x7c3   :  { %14868 = vmatprep.mubr.msk.f32.mxu1 %vm16571_vm1, %v22562_v63 }
 0x7c6   :  { %14869 = vmatmul.mubr.msk.f32.gmra.mrb[50].mxu1 %vm2463_vm3, %v22844_v56  ;;  %v8827_v56 = vlaneseq }
 0x7c7   :  { %14871 = vmatprep.mubr.msk.f32.mxu1 %vm16571_vm1, %v22562_v63 }
 0x7ca   :  { %14872 = vmatmul.mubr.f32.gmra.mrb[52].mxu1 %v22562_v63 }
 0x7cb   :  { %14874 = vmatprep.mubr.msk.f32.mxu1 %vm16571_vm1, %v22562_v63 }
 0x7ce   :  { %14875 = vmatmul.mubr.msk.f32.gmra.mrb[54].mxu1 %vm2463_vm3, %v22845_v24 }
 0x7cf   :  { %14877 = vmatprep.mubr.msk.f32.mxu1 %vm16571_vm1, %v22562_v63 }
 0x7d2   :  { %14878 = vmatmul.mubr.msk.f32.gmra.mrb[56].mxu1 %vm2463_vm3, %v22846_v34 }
 0x7d3   :  { %14880 = vmatprep.mubr.msk.f32.mxu1 %vm16571_vm1, %v22562_v63 }
 0x7d6   :  { %14881 = vmatmul.mubr.msk.f32.gmra.mrb[58].mxu1 %vm2463_vm3, %v22847_v30 }
 0x7d7   :  { %14883 = vmatprep.mubr.msk.f32.mxu1 %vm16571_vm1, %v22562_v63 }
 0x7da   :  { %14884 = vmatmul.mubr.msk.f32.gmra.mrb[60].mxu1 %vm2463_vm3, %v22848_v62 }
 0x7db   :  { %14886 = vmatprep.mubr.msk.f32.mxu1 %vm16571_vm1, %v22562_v63 }
 0x7de   :  { %14887 = vmatmul.mubr.msk.f32.gmra.mrb[62].mxu1 %vm2463_vm3, %v22850_v25  ;;  %v22083_v25 = vshrl.u32 %v8827_v56, 7 }
 0x7df   :  { %14889 = vmatprep.mubr.msk.f32.mxu1 %vm16571_vm1, %v22562_v63 }
 0x7e0   :  { %v8831_v30 = vadd.s32 24, %v22083_v25 }
 0x7e2   :  { %14890 = vmatmul.mubr.msk.f32.gmra.mrb[64].mxu1 %vm2463_vm3, %v22851_v61  ;;  %v8829_v61 = vadd.s32 8, %v22083_v25  ;;  %v8902_v56 = vand.u32 7, %v8831_v30 }
 0x7e3   :  { %14892 = vmatprep.mubr.msk.f32.mxu1 %vm16571_vm1, %v22562_v63 }
 0x7e4   :  { %v8888_v51 = vand.u32 7, %v8829_v61  ;;  %vm9519_vm6 = vcmp.lt.s32.totalorder %v8902_v56, 2 }
 0x7e6   :  { %14893 = vmatmul.mubr.f32.gmra.mrb[66].mxu1 %v22562_v63 }
 0x7e7   :  { %14895 = vmatprep.mubr.msk.f32.mxu1 %vm16571_vm1, %v22562_v63 }
 0x7ea   :  { %14896 = vmatmul.mubr.msk.f32.gmra.mrb[68].mxu1 %vm2463_vm3, %v22852_v18 }
 0x7eb   :  { %14898 = vmatprep.mubr.msk.f32.mxu1 %vm16571_vm1, %v22562_v63 }
 0x7ee   :  { %14899 = vmatmul.mubr.msk.f32.gmra.mrb[70].mxu1 %vm2463_vm3, %v22853_v26 }
 0x7ef   :  { %14901 = vmatprep.mubr.msk.f32.mxu1 %vm16571_vm1, %v22562_v63 }
 0x7f2   :  { %14902 = vmatmul.mubr.msk.f32.gmra.mrb[72].mxu1 %vm2463_vm3, %v22854_v39 }
 0x7f3   :  { %14904 = vmatprep.mubr.msk.f32.mxu1 %vm16571_vm1, %v22562_v63 }
 0x7f6   :  { %14905 = vmatmul.mubr.msk.f32.gmra.mrb[74].mxu1 %vm2463_vm3, %v22855_v32  ;;  %v8832_v32 = vadd.s32 32, %v22083_v25 }
 0x7f7   :  { %14907 = vmatprep.mubr.msk.f32.mxu1 %vm16571_vm1, %v22562_v63 }
 0x7fa   :  { %14908 = vmatmul.mubr.msk.f32.gmra.mrb[76].mxu1 %vm2463_vm3, %v22856_v33  ;;  %v8881_v33 = vand.u32 7, %v22083_v25 }
 0x7fb   :  { %14910 = vmatprep.mubr.msk.f32.mxu1 %vm16571_vm1, %v22562_v63 }
 0x7fe   :  { %14911 = vmatmul.mubr.msk.f32.gmra.mrb[78].mxu1 %vm2463_vm3, %v22857_v41  ;;  %v8830_v41 = vadd.s32 16, %v22083_v25  ;;  %vm9516_vm3 = vcmp.lt.s32.totalorder %v8881_v33, 2 }
 0x7ff   :  { %14913 = vmatprep.mubr.msk.f32.mxu1 %vm16571_vm1, %v22562_v63 }
 0x800   :  { %v8895_v34 = vand.u32 7, %v8830_v41 }
 0x802   :  { %14914 = vmatmul.mubr.f32.gmra.mrb[80].mxu1 %v22562_v63  ;;  %vm9518_vm5 = vcmp.lt.s32.totalorder %v8895_v34, 2  ;;  %v8833_v34 = vadd.s32 40, %v22083_v25 }
 0x803   :  { %14916 = vmatprep.mubr.msk.f32.mxu1 %vm16571_vm1, %v22562_v63 }
 0x806   :  { %14917 = vmatmul.mubr.f32.gmra.mrb[82].mxu1 %v22562_v63 }
 0x807   :  { %14919 = vmatprep.mubr.msk.f32.mxu1 %vm16571_vm1, %v22562_v63 }
 0x80a   :  { %14920 = vmatmul.mubr.f32.gmra.mrb[84].mxu1 %v22562_v63 }
 0x80b   :  { %14922 = vmatprep.mubr.msk.f32.mxu1 %vm16571_vm1, %v22562_v63 }
 0x80e   :  { %14923 = vmatmul.mubr.f32.gmra.mrb[86].mxu1 %v22562_v63 }
 0x80f   :  { %14925 = vmatprep.mubr.msk.f32.mxu1 %vm16571_vm1, %v22562_v63 }
 0x812   :  { %14926 = vmatmul.mubr.f32.gmra.mrb[88].mxu1 %v22562_v63 }
 0x813   :  { %14928 = vmatprep.mubr.msk.f32.mxu1 %vm16571_vm1, %v22562_v63 }
 0x816   :  { %14929 = vmatmul.mubr.f32.gmra.mrb[90].mxu1 %v22562_v63 }
 0x817   :  { %14931 = vmatprep.mubr.msk.f32.mxu1 %vm16571_vm1, %v22562_v63 }
 0x81a   :  { %14932 = vmatmul.mubr.f32.gmra.mrb[92].mxu1 %v22562_v63 }
 0x81b   :  { %14934 = vmatprep.mubr.msk.f32.mxu1 %vm16571_vm1, %v22562_v63  ;;  %vm9517_vm1 = vcmp.lt.s32.totalorder %v8888_v51, 2 }
 0x81e   :  { %14935 = vmatmul.mubr.f32.gmra.mrb[94].mxu1 %v22562_v63 }
 0x831   :  { %v8534_v13 = vpop.f32.mrb[96].mxu1 }
 0x832   :  { %v15141_v8 = vadd.f32 %v8534_v13, %v5548_v43  ;;  %v14792_v24 = vpop.f32.mrb[97].mxu1 }
 0x834   :  { %9871 = vst [vmem:[%s22339_s4] sm:$0xff] %v15141_v8  ;;  %v9663_v62 = vsel %vm9516_vm3, %v15141_v8, 0.0 }
 0x835   :  { %v8539_v63 = vpop.f32.mrb[0].mxu1  ;;  %v9767_v38 = vmul.f32 %v9663_v62, %v9663_v62 }
 0x836   :  { %v15142_v18 = vadd.f32 %v8539_v63, %v21719_v7  ;;  %v14795_v26 = vpop.f32.mrb[1].mxu1  ;;  %v8909_v7 = vand.u32 7, %v8832_v32  ;;  %v8916_v32 = vand.u32 7, %v8833_v34 }
 0x838   :  { %v9664_v39 = vsel %vm9517_vm1, %v15142_v18, 0.0  ;;  %9872 = vst [vmem:[%s22339_s4 + $0x8] sm:$0xff] %v15142_v18  ;;  %vm9520_vm7 = vcmp.lt.s32.totalorder %v8909_v7, 2  ;;  %vm9521_vm8 = vcmp.lt.s32.totalorder %v8916_v32, 2 }
 0x839   :  { %v9712_v42 = vadd.f32 %v9664_v39, %v9663_v62  ;;  %v9768_v43 = vmul.f32 %v9664_v39, %v9664_v39  ;;  %v8544_v21 = vpop.f32.mrb[2].mxu1 }
 0x83a   :  { %v15143_v61 = vadd.f32 %v8544_v21, %v21725_v15  ;;  %v14798_v33 = vpop.f32.mrb[3].mxu1 }
 0x83b   :  { %v9816_v41 = vadd.f32 %v9768_v43, %v9767_v38  ;;  %v8834_v38 = vadd.s32 48, %v22083_v25 }
 0x83c   :  { %v9665_v13 = vsel %vm9518_vm5, %v15143_v61, 0.0  ;;  %9873 = vst [vmem:[%s22339_s4 + $0x10] sm:$0xff] %v15143_v61 }
 0x83d   :  { %v9713_v51 = vadd.f32 %v9712_v42, %v9665_v13  ;;  %v9769_v8 = vmul.f32 %v9665_v13, %v9665_v13  ;;  %v8549_v24 = vpop.f32.mrb[4].mxu1  ;;  %v8923_v13 = vand.u32 7, %v8834_v38 }
 0x83e   :  { %v15144_v63 = vadd.f32 %v8549_v24, %v21731_v28  ;;  %v14801_v62 = vpop.f32.mrb[5].mxu1  ;;  %v8835_v28 = vadd.s32 56, %v22083_v25 }
 0x83f   :  { %v9817_v30 = vadd.f32 %v9816_v41, %v9769_v8  ;;  %vm9522_vm9 = vcmp.lt.s32.totalorder %v8923_v13, 2 }
 0x840   :  { %v9666_v18 = vsel %vm9519_vm6, %v15144_v63, 0.0  ;;  %9874 = vst [vmem:[%s22339_s4 + $0x18] sm:$0xff] %v15144_v63 }
 0x841   :  { %v9714_v15 = vadd.f32 %v9713_v51, %v9666_v18  ;;  %v9770_v26 = vmul.f32 %v9666_v18, %v9666_v18  ;;  %v8554_v39 = vpop.f32.mrb[6].mxu1 }
 0x842   :  { %v15145_v42 = vadd.f32 %v8554_v39, %v21737_v52  ;;  %v14804_v43 = vpop.f32.mrb[7].mxu1  ;;  %v8930_v52 = vand.u32 7, %v8835_v28 }
 0x843   :  { %v9818_v21 = vadd.f32 %v9817_v30, %v9770_v26  ;;  %v8836_v30 = vadd.s32 64, %v22083_v25  ;;  %v8837_v43 = vadd.s32 72, %v22083_v25 }
 0x844   :  { %v9667_v56 = vsel %vm9520_vm7, %v15145_v42, 0.0  ;;  %9875 = vst [vmem:[%s22339_s4 + $0x20] sm:$0xff] %v15145_v42  ;;  %vm9523_vm10 = vcmp.lt.s32.totalorder %v8930_v52, 2 }
 0x845   :  { %v9715_v61 = vadd.f32 %v9714_v15, %v9667_v56  ;;  %v9771_v33 = vmul.f32 %v9667_v56, %v9667_v56  ;;  %v8559_v41 = vpop.f32.mrb[8].mxu1  ;;  %v8937_v42 = vand.u32 7, %v8836_v30  ;;  %v8839_v30 = vadd.s32 88, %v22083_v25 }
 0x846   :  { %v15146_v7 = vadd.f32 %v8559_v41, %v21743_v48  ;;  %v14807_v51 = vpop.f32.mrb[9].mxu1 }
 0x847   :  { %v9819_v8 = vadd.f32 %v9818_v21, %v9771_v33  ;;  %vm9524_vm11 = vcmp.lt.s32.totalorder %v8937_v42, 2  ;;  %v8840_v42 = vadd.s32 96, %v22083_v25 }
 0x848   :  { %v9668_v24 = vsel %vm9521_vm8, %v15146_v7, 0.0  ;;  %9876 = vst [vmem:[%s22339_s4 + $0x28] sm:$0xff] %v15146_v7  ;;  %v8944_v7 = vand.u32 7, %v8837_v43 }
 0x849   :  { %v9716_v34 = vadd.f32 %v9715_v61, %v9668_v24  ;;  %v9772_v63 = vmul.f32 %v9668_v24, %v9668_v24  ;;  %v8564_v62 = vpop.f32.mrb[10].mxu1 }
 0x84a   :  { %v15147_v18 = vadd.f32 %v8564_v62, %v21749_v40  ;;  %v14810_v15 = vpop.f32.mrb[11].mxu1  ;;  %v8838_v40 = vadd.s32 80, %v22083_v25  ;;  %vm9525_vm12 = vcmp.lt.s32.totalorder %v8944_v7, 2 }
 0x84b   :  { %v9820_v26 = vadd.f32 %v9819_v8, %v9772_v63 }
 0x84c   :  { %v9669_v39 = vsel %vm9522_vm9, %v15147_v18, 0.0  ;;  %9877 = vst [vmem:[%s22339_s4 + $0x30] sm:$0xff] %v15147_v18 }
 0x84d   :  { %v9717_v48 = vadd.f32 %v9716_v34, %v9669_v39  ;;  %v9773_v32 = vmul.f32 %v9669_v39, %v9669_v39  ;;  %v8569_v38 = vpop.f32.mrb[12].mxu1 }
 0x84e   :  { %v15148_v21 = vadd.f32 %v8569_v38, %v21755_v23  ;;  %v14813_v56 = vpop.f32.mrb[13].mxu1  ;;  %v8951_v23 = vand.u32 7, %v8838_v40  ;;  %v8958_v38 = vand.u32 7, %v8839_v30 }
 0x84f   :  { %v9821_v28 = vadd.f32 %v9820_v26, %v9773_v32 }
 0x850   :  { %v9670_v61 = vsel %vm9523_vm10, %v15148_v21, 0.0  ;;  %9878 = vst [vmem:[%s22339_s4 + $0x38] sm:$0xff] %v15148_v21  ;;  %vm9526_vm13 = vcmp.lt.s32.totalorder %v8951_v23, 2  ;;  %vm9527_vm14 = vcmp.lt.s32.totalorder %v8958_v38, 2 }
 0x851   :  { %v9718_v33 = vadd.f32 %v9717_v48, %v9670_v61  ;;  %v9774_v41 = vmul.f32 %v9670_v61, %v9670_v61  ;;  %v8574_v13 = vpop.f32.mrb[14].mxu1 }
 0x852   :  { %v15149_v51 = vadd.f32 %v8574_v13, %v21761_v59  ;;  %v14816_v8 = vpop.f32.mrb[15].mxu1 }
 0x853   :  { %v9822_v24 = vadd.f32 %v9821_v28, %v9774_v41  ;;  %v8965_v41 = vand.u32 7, %v8840_v42 }
 0x854   :  { %v9671_v52 = vsel %vm9524_vm11, %v15149_v51, 0.0  ;;  %9879 = vst [vmem:[%s22339_s4 + $0x40] sm:$0xff] %v15149_v51 }
 0x855   :  { %v9719_v34 = vadd.f32 %v9718_v33, %v9671_v52  ;;  %v9775_v63 = vmul.f32 %v9671_v52, %v9671_v52  ;;  %v8579_v62 = vpop.f32.mrb[16].mxu1  ;;  %vm9528_vm0 = vcmp.lt.s32.totalorder %v8965_v41, 2 }
 0x856   :  { %v15150_v18 = vadd.f32 %v8579_v62, %v21767_v0  ;;  %v14819_v15 = vpop.f32.mrb[17].mxu1  ;;  %v8841_v0 = vadd.s32 104, %v22083_v25 }
 0x857   :  { %v9823_v26 = vadd.f32 %v9822_v24, %v9775_v63 }
 0x858   :  { %v9672_v39 = vsel %vm9525_vm12, %v15150_v18, 0.0  ;;  %9880 = vst [vmem:[%s22339_s4 + $0x48] sm:$0xff] %v15150_v18 }
 0x859   :  { %v9720_v59 = vadd.f32 %v9719_v34, %v9672_v39  ;;  %v9776_v48 = vmul.f32 %v9672_v39, %v9672_v39  ;;  %v8584_v32 = vpop.f32.mrb[18].mxu1  ;;  %v8842_v34 = vadd.s32 112, %v22083_v25 }
 0x85a   :  { %v15151_v43 = vadd.f32 %v8584_v32, %v21773_v31  ;;  %v14822_v21 = vpop.f32.mrb[19].mxu1  ;;  %v8972_v31 = vand.u32 7, %v8841_v0 }
 0x85b   :  { %v9824_v56 = vadd.f32 %v9823_v26, %v9776_v48  ;;  %v8979_v39 = vand.u32 7, %v8842_v34 }
 0x85c   :  { %v9673_v28 = vsel %vm9526_vm13, %v15151_v43, 0.0  ;;  %9881 = vst [vmem:[%s22339_s4 + $0x50] sm:$0xff] %v15151_v43  ;;  %vm9529_vm15 = vcmp.lt.s32.totalorder %v8972_v31, 2 }
 0x85d   :  { %v9721_v61 = vadd.f32 %v9720_v59, %v9673_v28  ;;  %v9777_v40 = vmul.f32 %v9673_v28, %v9673_v28  ;;  %v8589_v33 = vpop.f32.mrb[20].mxu1  ;;  %v8843_v59 = vadd.s32 120, %v22083_v25  ;;  %vm9530_vm2 = vcmp.lt.s32.totalorder %v8979_v39, 2 }
 0x85e   :  { %v15152_v13 = vadd.f32 %v8589_v33, %v21779_v35  ;;  %v14825_v7 = vpop.f32.mrb[21].mxu1 }
 0x85f   :  { %v9825_v51 = vadd.f32 %v9824_v56, %v9777_v40  ;;  %v8986_v28 = vand.u32 7, %v8843_v59 }
 0x860   :  { %v9674_v8 = vsel %vm9527_vm14, %v15152_v13, 0.0  ;;  %9882 = vst [vmem:[%s22339_s4 + $0x58] sm:$0xff] %v15152_v13 }
 0x861   :  { %v9722_v24 = vadd.f32 %v9721_v61, %v9674_v8  ;;  %v9778_v52 = vmul.f32 %v9674_v8, %v9674_v8  ;;  %v8594_v23 = vpop.f32.mrb[22].mxu1  ;;  %vm9531_vm4 = vcmp.lt.s32.totalorder %v8986_v28, 2  ;;  %v8848_v28 = vadd.s32 160, %v22083_v25 }
 0x862   :  { %v15153_v63 = vadd.f32 %v8594_v23, %v21785_v11  ;;  %v14828_v62 = vpop.f32.mrb[23].mxu1  ;;  %v8844_v11 = vadd.s32 128, %v22083_v25 }
 0x863   :  { %v9826_v30 = vadd.f32 %v9825_v51, %v9778_v52  ;;  %v8845_v51 = vadd.s32 136, %v22083_v25  ;;  %v8846_v62 = vadd.s32 144, %v22083_v25 }
 0x864   :  { %v9675_v18 = vsel %vm9528_vm0, %v15153_v63, 0.0  ;;  %9883 = vst [vmem:[%s22339_s4 + $0x60] sm:$0xff] %v15153_v63 }
 0x865   :  { %v9723_v35 = vadd.f32 %v9722_v24, %v9675_v18  ;;  %v9779_v15 = vmul.f32 %v9675_v18, %v9675_v18  ;;  %v8599_v26 = vpop.f32.mrb[24].mxu1  ;;  %v9000_v63 = vand.u32 7, %v8845_v51 }
 0x866   :  { %v15154_v48 = vadd.f32 %v8599_v26, %v21791_v37  ;;  %v14831_v32 = vpop.f32.mrb[25].mxu1  ;;  %v8993_v37 = vand.u32 7, %v8844_v11 }
 0x867   :  { %v9827_v38 = vadd.f32 %v9826_v30, %v9779_v15  ;;  %vm9533_vm1 = vcmp.lt.s32.totalorder %v9000_v63, 2 }
 0x868   :  { %v9676_v42 = vsel %vm9529_vm15, %v15154_v48, 0.0  ;;  %9884 = vst [vmem:[%s22339_s4 + $0x68] sm:$0xff] %v15154_v48  ;;  %vm9532_vm3 = vcmp.lt.s32.totalorder %v8993_v37, 2  ;;  %v9007_v48 = vand.u32 7, %v8846_v62 }
 0x869   :  { %v9724_v43 = vadd.f32 %v9723_v35, %v9676_v42  ;;  %v9780_v21 = vmul.f32 %v9676_v42, %v9676_v42  ;;  %v8604_v56 = vpop.f32.mrb[26].mxu1 }
 0x86a   :  { %v15155_v0 = vadd.f32 %v8604_v56, %v21797_v4  ;;  %v14834_v61 = vpop.f32.mrb[27].mxu1  ;;  %vm9534_vm5 = vcmp.lt.s32.totalorder %v9007_v48, 2 }
 0x86b   :  { %v9828_v40 = vadd.f32 %v9827_v38, %v9780_v21 }
 0x86c   :  { %v9677_v33 = vsel %vm9530_vm2, %v15155_v0, 0.0  ;;  %9885 = vst [vmem:[%s22339_s4 + $0x70] sm:$0xff] %v15155_v0 }
 0x86d   :  { %v9725_v41 = vadd.f32 %v9724_v43, %v9677_v33  ;;  %v9781_v13 = vmul.f32 %v9677_v33, %v9677_v33  ;;  %v8609_v7 = vpop.f32.mrb[28].mxu1 }
 0x86e   :  { %v15156_v8 = vadd.f32 %v8609_v7, %v21803_v3  ;;  %v14837_v31 = vpop.f32.mrb[29].mxu1  ;;  %v8847_v3 = vadd.s32 152, %v22083_v25  ;;  %v8849_v7 = vadd.s32 168, %v22083_v25 }
 0x86f   :  { %v9829_v24 = vadd.f32 %v9828_v40, %v9781_v13  ;;  %v9021_v13 = vand.u32 7, %v8848_v28 }
 0x870   :  { %v9678_v52 = vsel %vm9531_vm4, %v15156_v8, 0.0  ;;  %9886 = vst [vmem:[%s22339_s4 + $0x78] sm:$0xff] %v15156_v8 }
 0x871   :  { %v9726_v4 = vadd.f32 %v9725_v41, %v9678_v52  ;;  %v9782_v23 = vmul.f32 %v9678_v52, %v9678_v52  ;;  %v8614_v34 = vpop.f32.mrb[30].mxu1  ;;  %vm9536_vm7 = vcmp.lt.s32.totalorder %v9021_v13, 2 }
 0x872   :  { %v15157_v30 = vadd.f32 %v8614_v34, %v21809_v14  ;;  %v14840_v18 = vpop.f32.mrb[31].mxu1  ;;  %v9014_v14 = vand.u32 7, %v8847_v3  ;;  %v9028_v34 = vand.u32 7, %v8849_v7 }
 0x873   :  { %v9830_v35 = vadd.f32 %v9829_v24, %v9782_v23 }
 0x874   :  { %v9679_v15 = vsel %vm9532_vm3, %v15157_v30, 0.0  ;;  %9887 = vst [vmem:[%s22339_s4 + $0x80] sm:$0xff] %v15157_v30  ;;  %vm9535_vm6 = vcmp.lt.s32.totalorder %v9014_v14, 2  ;;  %vm9537_vm8 = vcmp.lt.s32.totalorder %v9028_v34, 2  ;;  %v8852_v14 = vadd.s32 192, %v22083_v25 }
 0x875   :  { %v9727_v26 = vadd.f32 %v9726_v4, %v9679_v15  ;;  %v9783_v39 = vmul.f32 %v9679_v15, %v9679_v15  ;;  %v8619_v59 = vpop.f32.mrb[32].mxu1 }
 0x876   :  { %v15158_v32 = vadd.f32 %v8619_v59, %v21815_v50  ;;  %v14843_v38 = vpop.f32.mrb[33].mxu1 }
 0x877   :  { %v9831_v42 = vadd.f32 %v9830_v35, %v9783_v39 }
 0x878   :  { %v9680_v11 = vsel %vm9533_vm1, %v15158_v32, 0.0  ;;  %9888 = vst [vmem:[%s22339_s4 + $0x88] sm:$0xff] %v15158_v32 }
 0x879   :  { %v9728_v43 = vadd.f32 %v9727_v26, %v9680_v11  ;;  %v9784_v21 = vmul.f32 %v9680_v11, %v9680_v11  ;;  %v8624_v56 = vpop.f32.mrb[34].mxu1  ;;  %v8851_v26 = vadd.s32 184, %v22083_v25 }
 0x87a   :  { %v15159_v0 = vadd.f32 %v8624_v56, %v21820_v29  ;;  %v14846_v61 = vpop.f32.mrb[35].mxu1  ;;  %v8850_v29 = vadd.s32 176, %v22083_v25 }
 0x87b   :  { %v9832_v40 = vadd.f32 %v9831_v42, %v9784_v21  ;;  %v9042_v11 = vand.u32 7, %v8851_v26 }
 0x87c   :  { %v9681_v33 = vsel %vm9534_vm5, %v15159_v0, 0.0  ;;  %9889 = vst [vmem:[%s22339_s4 + $0x90] sm:$0xff] %v15159_v0 }
 0x87d   :  { %v9729_v50 = vadd.f32 %v9728_v43, %v9681_v33  ;;  %v9785_v37 = vmul.f32 %v9681_v33, %v9681_v33  ;;  %v8629_v41 = vpop.f32.mrb[36].mxu1  ;;  %vm9539_vm10 = vcmp.lt.s32.totalorder %v9042_v11, 2  ;;  %v9049_v33 = vand.u32 7, %v8852_v14 }
 0x87e   :  { %v15160_v51 = vadd.f32 %v8629_v41, %v21825_v27  ;;  %v14849_v8 = vpop.f32.mrb[37].mxu1  ;;  %v9035_v27 = vand.u32 7, %v8850_v29  ;;  %v8857_v14 = vadd.s32 232, %v22083_v25 }
 0x87f   :  { %v9833_v31 = vadd.f32 %v9832_v40, %v9785_v37  ;;  %vm9540_vm11 = vcmp.lt.s32.totalorder %v9049_v33, 2 }
 0x880   :  { %v9682_v24 = vsel %vm9535_vm6, %v15160_v51, 0.0  ;;  %9890 = vst [vmem:[%s22339_s4 + $0x98] sm:$0xff] %v15160_v51  ;;  %vm9538_vm9 = vcmp.lt.s32.totalorder %v9035_v27, 2 }
 0x881   :  { %v9730_v52 = vadd.f32 %v9729_v50, %v9682_v24  ;;  %v9786_v4 = vmul.f32 %v9682_v24, %v9682_v24  ;;  %v8634_v23 = vpop.f32.mrb[38].mxu1 }
 0x882   :  { %v15161_v63 = vadd.f32 %v8634_v23, %v21830_v55  ;;  %v14852_v62 = vpop.f32.mrb[39].mxu1 }
 0x883   :  { %v9834_v30 = vadd.f32 %v9833_v31, %v9786_v4  ;;  %v8854_v31 = vadd.s32 208, %v22083_v25  ;;  %v8855_v62 = vadd.s32 216, %v22083_v25 }
 0x884   :  { %v9683_v18 = vsel %vm9536_vm7, %v15161_v63, 0.0  ;;  %9891 = vst [vmem:[%s22339_s4 + $0xa0] sm:$0xff] %v15161_v63 }
 0x885   :  { %v9731_v35 = vadd.f32 %v9730_v52, %v9683_v18  ;;  %v9787_v15 = vmul.f32 %v9683_v18, %v9683_v18  ;;  %v8639_v3 = vpop.f32.mrb[40].mxu1  ;;  %v9063_v63 = vand.u32 7, %v8854_v31 }
 0x886   :  { %v15162_v39 = vadd.f32 %v8639_v3, %v21835_v36  ;;  %v14855_v59 = vpop.f32.mrb[41].mxu1  ;;  %v8853_v36 = vadd.s32 200, %v22083_v25 }
 0x887   :  { %v9835_v48 = vadd.f32 %v9834_v30, %v9787_v15  ;;  %vm9542_vm13 = vcmp.lt.s32.totalorder %v9063_v63, 2 }
 0x888   :  { %v9684_v32 = vsel %vm9537_vm8, %v15162_v39, 0.0  ;;  %9892 = vst [vmem:[%s22339_s4 + $0xa8] sm:$0xff] %v15162_v39  ;;  %v9070_v39 = vand.u32 7, %v8855_v62 }
 0x889   :  { %v9732_v55 = vadd.f32 %v9731_v35, %v9684_v32  ;;  %v9788_v38 = vmul.f32 %v9684_v32, %v9684_v32  ;;  %v8644_v42 = vpop.f32.mrb[42].mxu1 }
 0x88a   :  { %v15163_v43 = vadd.f32 %v8644_v42, %v21840_v6  ;;  %v14858_v21 = vpop.f32.mrb[43].mxu1  ;;  %v9056_v6 = vand.u32 7, %v8853_v36  ;;  %vm9543_vm14 = vcmp.lt.s32.totalorder %v9070_v39, 2 }
 0x88b   :  { %v9836_v56 = vadd.f32 %v9835_v48, %v9788_v38 }
 0x88c   :  { %v9685_v28 = vsel %vm9538_vm9, %v15163_v43, 0.0  ;;  %9893 = vst [vmem:[%s22339_s4 + $0xb0] sm:$0xff] %v15163_v43  ;;  %vm9541_vm12 = vcmp.lt.s32.totalorder %v9056_v6, 2 }
 0x88d   :  { %v9733_v0 = vadd.f32 %v9732_v55, %v9685_v28  ;;  %v9789_v61 = vmul.f32 %v9685_v28, %v9685_v28  ;;  %v8649_v40 = vpop.f32.mrb[44].mxu1 }
 0x88e   :  { %v15164_v50 = vadd.f32 %v8649_v40, %v21845_v53  ;;  %v14861_v37 = vpop.f32.mrb[45].mxu1  ;;  %v8858_v40 = vadd.s32 240, %v22083_v25 }
 0x88f   :  { %v9837_v41 = vadd.f32 %v9836_v56, %v9789_v61  ;;  %v9084_v61 = vand.u32 7, %v8857_v14 }
 0x890   :  { %v9686_v13 = vsel %vm9539_vm10, %v15164_v50, 0.0  ;;  %9894 = vst [vmem:[%s22339_s4 + $0xb8] sm:$0xff] %v15164_v50 }
 0x891   :  { %v9734_v7 = vadd.f32 %v9733_v0, %v9686_v13  ;;  %v9790_v51 = vmul.f32 %v9686_v13, %v9686_v13  ;;  %v8654_v8 = vpop.f32.mrb[46].mxu1  ;;  %vm9545_vm15 = vcmp.lt.s32.totalorder %v9084_v61, 2 }
 0x892   :  { %v15165_v24 = vadd.f32 %v8654_v8, %v21850_v19  ;;  %v14864_v29 = vpop.f32.mrb[47].mxu1  ;;  %v8856_v19 = vadd.s32 224, %v22083_v25 }
 0x893   :  { %v9838_v52 = vadd.f32 %v9837_v41, %v9790_v51  ;;  %v9091_v51 = vand.u32 7, %v8858_v40 }
 0x894   :  { %v9687_v4 = vsel %vm9540_vm11, %v15165_v24, 0.0  ;;  %9895 = vst [vmem:[%s22339_s4 + $0xc0] sm:$0xff] %v15165_v24 }
 0x895   :  { %v9735_v53 = vadd.f32 %v9734_v7, %v9687_v4  ;;  %v9791_v23 = vmul.f32 %v9687_v4, %v9687_v4  ;;  %v8659_v34 = vpop.f32.mrb[48].mxu1  ;;  %vm9546_vm2 = vcmp.lt.s32.totalorder %v9091_v51, 2 }
 0x896   :  { %v15166_v30 = vadd.f32 %v8659_v34, %v21856_v47  ;;  %v14867_v18 = vpop.f32.mrb[49].mxu1  ;;  %v9077_v47 = vand.u32 7, %v8856_v19  ;;  %v8861_v19 = vadd.s32 264, %v22083_v25 }
 0x897   :  { %v9839_v27 = vadd.f32 %v9838_v52, %v9791_v23  ;;  %v8860_v23 = vadd.s32 256, %v22083_v25 }
 0x898   :  { %v9688_v35 = vsel %vm9541_vm12, %v15166_v30, 0.0  ;;  %9896 = vst [vmem:[%s22339_s4 + $0xc8] sm:$0xff] %v15166_v30  ;;  %vm9544_vm0 = vcmp.lt.s32.totalorder %v9077_v47, 2 }
 0x899   :  { %v9736_v15 = vadd.f32 %v9735_v53, %v9688_v35  ;;  %v9792_v3 = vmul.f32 %v9688_v35, %v9688_v35  ;;  %v8664_v26 = vpop.f32.mrb[50].mxu1  ;;  %v9105_v35 = vand.u32 7, %v8860_v23  ;;  %v8866_v23 = vadd.s32 304, %v22083_v25 }
 0x89a   :  { %v15167_v59 = vadd.f32 %v8664_v26, %v21862_v60  ;;  %v14870_v48 = vpop.f32.mrb[51].mxu1 }
 0x89b   :  { %v9840_v32 = vadd.f32 %v9839_v27, %v9792_v3  ;;  %vm9548_vm3 = vcmp.lt.s32.totalorder %v9105_v35, 2  ;;  %v9147_v35 = vand.u32 7, %v8866_v23 }
 0x89c   :  { %v9689_v55 = vsel %vm9542_vm13, %v15167_v59, 0.0  ;;  %9897 = vst [vmem:[%s22339_s4 + $0xd0] sm:$0xff] %v15167_v59 }
 0x89d   :  { %v9737_v38 = vadd.f32 %v9736_v15, %v9689_v55  ;;  %v9793_v42 = vmul.f32 %v9689_v55, %v9689_v55  ;;  %v8669_v11 = vpop.f32.mrb[52].mxu1  ;;  %v9112_v55 = vand.u32 7, %v8861_v19  ;;  %v8867_v19 = vadd.s32 312, %v22083_v25 }
 0x89e   :  { %v15168_v43 = vadd.f32 %v8669_v11, %v21868_v10  ;;  %v14873_v21 = vpop.f32.mrb[53].mxu1  ;;  %v8859_v10 = vadd.s32 248, %v22083_v25  ;;  %vm9554_vm9 = vcmp.lt.s32.totalorder %v9147_v35, 2 }
 0x89f   :  { %v9841_v56 = vadd.f32 %v9840_v32, %v9793_v42  ;;  %vm9549_vm1 = vcmp.lt.s32.totalorder %v9112_v55, 2 }
 0x8a0   :  { %v9690_v28 = vsel %vm9543_vm14, %v15168_v43, 0.0  ;;  %9898 = vst [vmem:[%s22339_s4 + $0xd8] sm:$0xff] %v15168_v43 }
 0x8a1   :  { %v9738_v60 = vadd.f32 %v9737_v38, %v9690_v28  ;;  %v9794_v36 = vmul.f32 %v9690_v28, %v9690_v28  ;;  %v8674_v0 = vpop.f32.mrb[54].mxu1 }
 0x8a2   :  { %v15169_v33 = vadd.f32 %v8674_v0, %v21874_v12  ;;  %v14876_v50 = vpop.f32.mrb[55].mxu1  ;;  %v9098_v12 = vand.u32 7, %v8859_v10 }
 0x8a3   :  { %v9842_v37 = vadd.f32 %v9841_v56, %v9794_v36  ;;  %v8863_v56 = vadd.s32 280, %v22083_v25  ;;  %v8864_v50 = vadd.s32 288, %v22083_v25 }
 0x8a4   :  { %v9691_v41 = vsel %vm9544_vm0, %v15169_v33, 0.0  ;;  %9899 = vst [vmem:[%s22339_s4 + $0xe0] sm:$0xff] %v15169_v33  ;;  %vm9547_vm4 = vcmp.lt.s32.totalorder %v9098_v12, 2 }
 0x8a5   :  { %v9739_v13 = vadd.f32 %v9738_v60, %v9691_v41  ;;  %v9795_v6 = vmul.f32 %v9691_v41, %v9691_v41  ;;  %v8679_v7 = vpop.f32.mrb[56].mxu1  ;;  %v9126_v33 = vand.u32 7, %v8863_v56 }
 0x8a6   :  { %v15170_v8 = vadd.f32 %v8679_v7, %v21880_v1  ;;  %v14879_v31 = vpop.f32.mrb[57].mxu1 }
 0x8a7   :  { %v9843_v24 = vadd.f32 %v9842_v37, %v9795_v6  ;;  %vm9551_vm6 = vcmp.lt.s32.totalorder %v9126_v33, 2 }
 0x8a8   :  { %v9692_v29 = vsel %vm9545_vm15, %v15170_v8, 0.0  ;;  %9900 = vst [vmem:[%s22339_s4 + $0xe8] sm:$0xff] %v15170_v8  ;;  %v9133_v8 = vand.u32 7, %v8864_v50 }
 0x8a9   :  { %v9740_v52 = vadd.f32 %v9739_v13, %v9692_v29  ;;  %v9796_v4 = vmul.f32 %v9692_v29, %v9692_v29  ;;  %v8684_v53 = vpop.f32.mrb[58].mxu1 }
 0x8aa   :  { %v15171_v34 = vadd.f32 %v8684_v53, %v21886_v46  ;;  %v14882_v63 = vpop.f32.mrb[59].mxu1  ;;  %v8862_v46 = vadd.s32 272, %v22083_v25  ;;  %vm9552_vm7 = vcmp.lt.s32.totalorder %v9133_v8, 2 }
 0x8ab   :  { %v9844_v62 = vadd.f32 %v9843_v24, %v9796_v4 }
 0x8ac   :  { %v9693_v30 = vsel %vm9546_vm2, %v15171_v34, 0.0  ;;  %9901 = vst [vmem:[%s22339_s4 + $0xf0] sm:$0xff] %v15171_v34  ;;  %v22895_v34 = vld [vmem:[#allocation133_spill] sm:$0xff] }
 0x8ad   :  { %v9741_v1 = vadd.f32 %v9740_v52, %v9693_v30  ;;  %v9797_v18 = vmul.f32 %v9693_v30, %v9693_v30  ;;  %v8689_v27 = vpop.f32.mrb[60].mxu1 }
 0x8ae   :  { %v15172_v15 = vadd.f32 %v8689_v27, %v21891_v9  ;;  %v14885_v3 = vpop.f32.mrb[61].mxu1  ;;  %v9119_v9 = vand.u32 7, %v8862_v46 }
 0x8af   :  { %v9845_v26 = vadd.f32 %v9844_v62, %v9797_v18 }
 0x8b0   :  { %v9694_v39 = vsel %vm9547_vm4, %v15172_v15, 0.0  ;;  %9902 = vst [vmem:[%s22339_s4 + $0xf8] sm:$0xff] %v15172_v15  ;;  %vm9550_vm5 = vcmp.lt.s32.totalorder %v9119_v9, 2  ;;  %v22896_v15 = vld [vmem:[#allocation120_spill] sm:$0xff] }
 0x8b1   :  { %v9742_v59 = vadd.f32 %v9741_v1, %v9694_v39  ;;  %v9798_v48 = vmul.f32 %v9694_v39, %v9694_v39  ;;  %v8694_v32 = vpop.f32.mrb[62].mxu1 }
 0x8b2   :  { %v15173_v47 = vadd.f32 %v8694_v32, %v21897_v22  ;;  %v14888_v38 = vpop.f32.mrb[63].mxu1 }
 0x8b3   :  { %v9846_v42 = vadd.f32 %v9845_v26, %v9798_v48  ;;  %v22897_v38 = vld [vmem:[#allocation138_spill] sm:$0xff] }
 0x8b4   :  { %v9695_v11 = vsel %vm9548_vm3, %v15173_v47, 0.0  ;;  %9903 = vst [vmem:[%s22339_s4 + $0x100] sm:$0xff] %v15173_v47  ;;  %v9154_v47 = vand.u32 7, %v8867_v19  ;;  %v8873_v19 = vadd.s32 360, %v22083_v25 }
 0x8b5   :  { %v9743_v14 = vadd.f32 %v9742_v59, %v9695_v11  ;;  %v9799_v43 = vmul.f32 %v9695_v11, %v9695_v11  ;;  %v8699_v21 = vpop.f32.mrb[64].mxu1  ;;  %v8868_v59 = vadd.s32 320, %v22083_v25 }
 0x8b6   :  { %v15174_v28 = vadd.f32 %v8699_v21, %v21903_v57  ;;  %v14891_v60 = vpop.f32.mrb[65].mxu1  ;;  %v8865_v57 = vadd.s32 296, %v22083_v25  ;;  %vm9555_vm10 = vcmp.lt.s32.totalorder %v9154_v47, 2 }
 0x8b7   :  { %v9847_v36 = vadd.f32 %v9846_v42, %v9799_v43  ;;  %v9161_v43 = vand.u32 7, %v8868_v59  ;;  %v8869_v60 = vadd.s32 328, %v22083_v25 }
 0x8b8   :  { %v9696_v0 = vsel %vm9549_vm1, %v15174_v28, 0.0  ;;  %9904 = vst [vmem:[%s22339_s4 + $0x108] sm:$0xff] %v15174_v28 }
 0x8b9   :  { %v9744_v22 = vadd.f32 %v9743_v14, %v9696_v0  ;;  %v9800_v61 = vmul.f32 %v9696_v0, %v9696_v0  ;;  %v8704_v40 = vpop.f32.mrb[66].mxu1  ;;  %vm9556_vm11 = vcmp.lt.s32.totalorder %v9161_v43, 2  ;;  %v8875_v43 = vadd.s32 376, %v22083_v25 }
 0x8ba   :  { %v15175_v37 = vadd.f32 %v8704_v40, %v21909_v45  ;;  %v14894_v41 = vpop.f32.mrb[67].mxu1  ;;  %v9140_v45 = vand.u32 7, %v8865_v57 }
 0x8bb   :  { %v9848_v10 = vadd.f32 %v9847_v36, %v9800_v61  ;;  %v8870_v41 = vadd.s32 336, %v22083_v25 }
 0x8bc   :  { %v9697_v13 = vsel %vm9550_vm5, %v15175_v37, 0.0  ;;  %9905 = vst [vmem:[%s22339_s4 + $0x110] sm:$0xff] %v15175_v37  ;;  %vm9553_vm8 = vcmp.lt.s32.totalorder %v9140_v45, 2  ;;  %v9168_v37 = vand.u32 7, %v8869_v60 }
 0x8bd   :  { %v9745_v6 = vadd.f32 %v9744_v22, %v9697_v13  ;;  %v9801_v7 = vmul.f32 %v9697_v13, %v9697_v13  ;;  %v8709_v51 = vpop.f32.mrb[68].mxu1 }
 0x8be   :  { %v15176_v31 = vadd.f32 %v8709_v51, %v21915_v49  ;;  %v14897_v24 = vpop.f32.mrb[69].mxu1  ;;  %vm9557_vm12 = vcmp.lt.s32.totalorder %v9168_v37, 2 }
 0x8bf   :  { %v9849_v29 = vadd.f32 %v9848_v10, %v9801_v7  ;;  %v22898_v10 = vld [vmem:[#allocation142_spill] sm:$0xff]  ;;  %v9175_v24 = vand.u32 7, %v8870_v41 }
 0x8c0   :  { %v9698_v12 = vsel %vm9551_vm6, %v15176_v31, 0.0  ;;  %9906 = vst [vmem:[%s22339_s4 + $0x118] sm:$0xff] %v15176_v31 }
 0x8c1   :  { %v9746_v52 = vadd.f32 %v9745_v6, %v9698_v12  ;;  %v9802_v4 = vmul.f32 %v9698_v12, %v9698_v12  ;;  %v8714_v53 = vpop.f32.mrb[70].mxu1  ;;  %vm9558_vm13 = vcmp.lt.s32.totalorder %v9175_v24, 2 }
 0x8c2   :  { %v15177_v63 = vadd.f32 %v8714_v53, %v22895_v34  ;;  %v14900_v62 = vpop.f32.mrb[71].mxu1 }
 0x8c3   :  { %v9850_v30 = vadd.f32 %v9849_v29, %v9802_v4 }
 0x8c4   :  { %v9699_v1 = vsel %vm9552_vm7, %v15177_v63, 0.0  ;;  %9907 = vst [vmem:[%s22339_s4 + $0x120] sm:$0xff] %v15177_v63  ;;  %v8872_v63 = vadd.s32 352, %v22083_v25 }
 0x8c5   :  { %v9747_v49 = vadd.f32 %v9746_v52, %v9699_v1  ;;  %v9803_v18 = vmul.f32 %v9699_v1, %v9699_v1  ;;  %v8719_v27 = vpop.f32.mrb[72].mxu1 }
 0x8c6   :  { %v15178_v3 = vadd.f32 %v8719_v27, %v22896_v15  ;;  %v14903_v26 = vpop.f32.mrb[73].mxu1  ;;  %v9189_v35 = vand.u32 7, %v8872_v63 }
 0x8c7   :  { %v9851_v39 = vadd.f32 %v9850_v30, %v9803_v18 }
 0x8c8   :  { %v9700_v46 = vsel %vm9553_vm8, %v15178_v3, 0.0  ;;  %9908 = vst [vmem:[%s22339_s4 + $0x128] sm:$0xff] %v15178_v3  ;;  %vm9560_vm0 = vcmp.lt.s32.totalorder %v9189_v35, 2 }
 0x8c9   :  { %v9748_v48 = vadd.f32 %v9747_v49, %v9700_v46  ;;  %v9804_v32 = vmul.f32 %v9700_v46, %v9700_v46  ;;  %v8724_v55 = vpop.f32.mrb[74].mxu1 }
 0x8ca   :  { %v15179_v42 = vadd.f32 %v8724_v55, %v22897_v38  ;;  %v14906_v11 = vpop.f32.mrb[75].mxu1 }
 0x8cb   :  { %v9852_v9 = vadd.f32 %v9851_v39, %v9804_v32  ;;  %v9196_v32 = vand.u32 7, %v8873_v19 }
 0x8cc   :  { %v9701_v14 = vsel %vm9554_vm9, %v15179_v42, 0.0  ;;  %9909 = vst [vmem:[%s22339_s4 + $0x130] sm:$0xff] %v15179_v42 }
 0x8cd   :  { %v9749_v21 = vadd.f32 %v9748_v48, %v9701_v14  ;;  %v9805_v56 = vmul.f32 %v9701_v14, %v9701_v14  ;;  %v8729_v28 = vpop.f32.mrb[76].mxu1  ;;  %vm9561_vm15 = vcmp.lt.s32.totalorder %v9196_v32, 2 }
 0x8ce   :  { %v15180_v36 = vadd.f32 %v8729_v28, %v21938_v58  ;;  %v14909_v0 = vpop.f32.mrb[77].mxu1  ;;  %v8871_v58 = vadd.s32 344, %v22083_v25 }
 0x8cf   :  { %v9853_v22 = vadd.f32 %v9852_v9, %v9805_v56 }
 0x8d0   :  { %v9702_v61 = vsel %vm9555_vm10, %v15180_v36, 0.0  ;;  %9910 = vst [vmem:[%s22339_s4 + $0x138] sm:$0xff] %v15180_v36  ;;  %v9182_v4 = vand.u32 7, %v8871_v58 }
 0x8d1   :  { %v9750_v40 = vadd.f32 %v9749_v21, %v9702_v61  ;;  %v9806_v33 = vmul.f32 %v9702_v61, %v9702_v61  ;;  %v8734_v50 = vpop.f32.mrb[78].mxu1  ;;  %v22899_v21 = vld [vmem:[#allocation146_spill] sm:$0xff]  ;;  %v9210_v61 = vand.u32 7, %v8875_v43 }
 0x8d2   :  { %v15181_v13 = vadd.f32 %v8734_v50, %v22898_v10  ;;  %v14912_v57 = vpop.f32.mrb[79].mxu1  ;;  %vm9559_vm14 = vcmp.lt.s32.totalorder %v9182_v4, 2 }
 0x8d3   :  { %v9854_v6 = vadd.f32 %v9853_v22, %v9806_v33  ;;  %vm9563_vm4 = vcmp.lt.s32.totalorder %v9210_v61, 2 }
 0x8d4   :  { %v9703_v7 = vsel %vm9556_vm11, %v15181_v13, 0.0  ;;  %9911 = vst [vmem:[%s22339_s4 + $0x140] sm:$0xff] %v15181_v13 }
 0x8d5   :  { %v9751_v51 = vadd.f32 %v9750_v40, %v9703_v7  ;;  %v9807_v8 = vmul.f32 %v9703_v7, %v9703_v7  ;;  %v8739_v31 = vpop.f32.mrb[80].mxu1  ;;  %v8876_v40 = vadd.s32 384, %v22083_v25 }
 0x8d6   :  { %v15182_v29 = vadd.f32 %v8739_v31, %v21950_v16  ;;  %v14915_v12 = vpop.f32.mrb[81].mxu1 }
 0x8d7   :  { %v9855_v45 = vadd.f32 %v9854_v6, %v9807_v8  ;;  %v9217_v6 = vand.u32 7, %v8876_v40 }
 0x8d8   :  { %v9704_v52 = vsel %vm9557_vm12, %v15182_v29, 0.0  ;;  %9912 = vst [vmem:[%s22339_s4 + $0x148] sm:$0xff] %v15182_v29 }
 0x8d9   :  { %v9752_v53 = vadd.f32 %v9751_v51, %v9704_v52  ;;  %v9808_v23 = vmul.f32 %v9704_v52, %v9704_v52  ;;  %v8744_v34 = vpop.f32.mrb[82].mxu1  ;;  %vm9564_vm3 = vcmp.lt.s32.totalorder %v9217_v6, 2 }
 0x8da   :  { %v15183_v62 = vadd.f32 %v8744_v34, %v21956_v17  ;;  %v14918_v30 = vpop.f32.mrb[83].mxu1  ;;  %v8874_v17 = vadd.s32 368, %v22083_v25 }
 0x8db   :  { %v9856_v1 = vadd.f32 %v9855_v45, %v9808_v23 }
 0x8dc   :  { %v9705_v49 = vsel %vm9558_vm13, %v15183_v62, 0.0  ;;  %9913 = vst [vmem:[%s22339_s4 + $0x150] sm:$0xff] %v15183_v62 }
 0x8dd   :  { %v9753_v16 = vadd.f32 %v9752_v53, %v9705_v49  ;;  %v9809_v18 = vmul.f32 %v9705_v49, %v9705_v49  ;;  %v8749_v27 = vpop.f32.mrb[84].mxu1 }
 0x8de   :  { %v15184_v15 = vadd.f32 %v8749_v27, %v21962_v20  ;;  %v14921_v3 = vpop.f32.mrb[85].mxu1  ;;  %v9203_v20 = vand.u32 7, %v8874_v17 }
 0x8df   :  { %v9857_v26 = vadd.f32 %v9856_v1, %v9809_v18 }
 0x8e0   :  { %v9706_v39 = vsel %vm9559_vm14, %v15184_v15, 0.0  ;;  %9914 = vst [vmem:[%s22339_s4 + $0x158] sm:$0xff] %v15184_v15  ;;  %vm9562_vm2 = vcmp.lt.s32.totalorder %v9203_v20, 2 }
 0x8e1   :  { %v9754_v46 = vadd.f32 %v9753_v16, %v9706_v39  ;;  %v9810_v59 = vmul.f32 %v9706_v39, %v9706_v39  ;;  %v8754_v48 = vpop.f32.mrb[86].mxu1 }
 0x8e2   :  { %v15185_v55 = vadd.f32 %v8754_v48, %v21968_v2  ;;  %v14924_v47 = vpop.f32.mrb[87].mxu1 }
 0x8e3   :  { %v9858_v38 = vadd.f32 %v9857_v26, %v9810_v59 }
 0x8e4   :  { %v9707_v42 = vsel %vm9560_vm0, %v15185_v55, 0.0  ;;  %9915 = vst [vmem:[%s22339_s4 + $0x160] sm:$0xff] %v15185_v55 }
 0x8e5   :  { %v9755_v11 = vadd.f32 %v9754_v46, %v9707_v42  ;;  %v9811_v9 = vmul.f32 %v9707_v42, %v9707_v42  ;;  %v8759_v14 = vpop.f32.mrb[88].mxu1 }
 0x8e6   :  { %v15186_v56 = vadd.f32 %v8759_v14, %v22899_v21  ;;  %v14927_v28 = vpop.f32.mrb[89].mxu1 }
 0x8e7   :  { %v9859_v60 = vadd.f32 %v9858_v38, %v9811_v9 }
 0x8e8   :  { %v9708_v36 = vsel %vm9561_vm15, %v15186_v56, 0.0  ;;  %9916 = vst [vmem:[%s22339_s4 + $0x168] sm:$0xff] %v15186_v56 }
 0x8e9   :  { %v9756_v2 = vadd.f32 %v9755_v11, %v9708_v36  ;;  %v9812_v0 = vmul.f32 %v9708_v36, %v9708_v36  ;;  %v8764_v22 = vpop.f32.mrb[90].mxu1 }
 0x8ea   :  { %v15187_v33 = vadd.f32 %v8764_v22, %v21979_v54  ;;  %v14930_v50 = vpop.f32.mrb[91].mxu1 }
 0x8eb   :  { %v9860_v37 = vadd.f32 %v9859_v60, %v9812_v0 }
 0x8ec   :  { %v9709_v41 = vsel %vm9562_vm2, %v15187_v33, 0.0  ;;  %9917 = vst [vmem:[%s22339_s4 + $0x170] sm:$0xff] %v15187_v33 }
 0x8ed   :  { %v9757_v10 = vadd.f32 %v9756_v2, %v9709_v41  ;;  %v9813_v13 = vmul.f32 %v9709_v41, %v9709_v41  ;;  %v8769_v57 = vpop.f32.mrb[92].mxu1 }
 0x8ee   :  { %v15188_v7 = vadd.f32 %v8769_v57, %v21985_v5  ;;  %v14933_v58 = vpop.f32.mrb[93].mxu1 }
 0x8ef   :  { %v9861_v51 = vadd.f32 %v9860_v37, %v9813_v13 }
 0x8f0   :  { %v9710_v8 = vsel %vm9563_vm4, %v15188_v7, 0.0  ;;  %9918 = vst [vmem:[%s22339_s4 + $0x178] sm:$0xff] %v15188_v7 }
 0x8f1   :  { %v9758_v54 = vadd.f32 %v9757_v10, %v9710_v8  ;;  %v9814_v25 = vmul.f32 %v9710_v8, %v9710_v8  ;;  %v8774_v31 = vpop.f32.mrb[94].mxu1 }
 0x8f2   :  { %v15189_v24 = vadd.f32 %v8774_v31, %v21991_v44  ;;  %v14936_v29 = vpop.f32.mrb[95].mxu1 }
 0x8f3   :  { %v9862_v12 = vadd.f32 %v9861_v51, %v9814_v25 }
 0x8f4   :  { %v9711_v45 = vsel %vm9564_vm3, %v15189_v24, 0.0  ;;  %9919 = vst [vmem:[%s22339_s4 + $0x180] sm:$0xff] %v15189_v24 }
 0x8f5   :  { %v9759_v5 = vadd.f32 %v9758_v54, %v9711_v45  ;;  %v9815_v52 = vmul.f32 %v9711_v45, %v9711_v45 }
 0x8f7   :  { %v9760_v4 = vrot.slane %v9759_v5, 4  ;;  %v9863_v53 = vadd.f32 %v9862_v12, %v9815_v52 }
 0x8f9   :  { %v9761_v23 = vadd.f32 %v9760_v4, %v9759_v5  ;;  %v9864_v34 = vrot.slane %v9863_v53, 4 }
 0x8fb   :  { %v9762_v63 = vrot.slane %v9761_v23, 2  ;;  %v9865_v62 = vadd.f32 %v9864_v34, %v9863_v53 }
 0x8fd   :  { %v9763_v30 = vadd.f32 %v9762_v63, %v9761_v23  ;;  %v9866_v1 = vrot.slane %v9865_v62, 2 }
 0x8ff   :  { %v9764_v49 = vrot.slane %v9763_v30, 1  ;;  %v9867_v16 = vadd.f32 %v9866_v1, %v9865_v62 }
 0x901   :  { %v9765_v44 = vadd.f32 %v9764_v49, %v9763_v30  ;;  %v9868_v18 = vrot.slane %v9867_v16, 1 }
 0x903   :  { %9766 = vst [vmem:[%s22340_s5] sm:$0x1] %v9765_v44  ;;  %v9869_v27 = vadd.f32 %v9868_v18, %v9867_v16 }
 0x905   :  { %9870 = vst [vmem:[%s22340_s5 + $0x1] sm:$0x1] %v9869_v27 }

</bundles_post_ra>
